<compile_context>
chip_gen: v7x
topology: tpu7x:2x2x1
jax: 0.10.0
libtpu: 0.0.40
codegen_flags: <defaults>
</compile_context>

<pallas_src>
import functools

import jax
import jax.numpy as jnp
from jax.experimental import pallas as pl
from jax.experimental.pallas import tpu as pltpu

EPS = 1e-5
LANE = 128


# ---------------------------------------------------------------------------
# Pallas kernels
# ---------------------------------------------------------------------------
def _conv1_im2col_pool_kernel(p_ref, w_ref, b_ref, o_ref, y_ref, *, h, w, nb):
    """Fused conv-as-matmul + folded-BN shift + ReLU + 2x2/stride-2 max-pool.

    p_ref : (nb*h*w, k)             bf16  im2col patches for `nb` whole images
    w_ref : (k, cout)               bf16  conv weights, BN scale pre-folded
    b_ref : (1, cout)               f32   BN shift (includes conv bias)
    o_ref : (nb*(h//2), w//2, cout) bf16  pooled output rows
    y_ref : (nb*h*w, cout)          f32   VMEM scratch (pre-pool activation)
    """
    y = jnp.dot(p_ref[...], w_ref[...], preferred_element_type=jnp.float32)
    y_ref[...] = jnp.maximum(y + b_ref[...], 0.0)

    wo = w // 2
    # One iteration per (image, pooled row): 2x2 max over a 2-row band of y.
    # All reads are stride-2 sublane slices of the VMEM scratch (no HBM).
    for p in range(nb * (h // 2)):
        base = p * 2 * w
        te = y_ref[pl.ds(base, wo, 2), :]
        to = y_ref[pl.ds(base + 1, wo, 2), :]
        be = y_ref[pl.ds(base + w, wo, 2), :]
        bo = y_ref[pl.ds(base + w + 1, wo, 2), :]
        o_ref[p, :, :] = jnp.maximum(jnp.maximum(te, to),
                                     jnp.maximum(be, bo)).astype(o_ref.dtype)


def _conv2_tap_pool_kernel(x_ref, w_ref, b_ref, o_ref, y_ref, *, h, w, cin, nb):
    """Fully in-kernel 3x3 conv (stride 1, pad 1) + BN shift + ReLU + 2x2/2 pool.

    The input is the zero-padded image flattened row-major to (pixels, cin),
    with (h+4)*(w+2) rows per image (1 top / 3 bottom / 1 left / 1 right pad;
    the two extra bottom rows only feed discarded columns and keep every tap
    slice in-bounds).  Tap (dh, dw) of the conv is then ONE contiguous sublane
    slice of length h*(w+2), so the conv is 9 accumulating matmuls -- no HBM
    im2col.  Columns w..w+1 of the activation are garbage and never pooled.

    x_ref : (nb*(h+4)*(w+2), cin)     bf16
    w_ref : (9*cin, cout)             bf16  (tap-major, BN scale pre-folded)
    b_ref : (1, cout)                 f32
    o_ref : (nb*(h//2), w//2, cout)   bf16  pooled output rows
    y_ref : (h*(w+2), cout)           f32   VMEM scratch (one image, pre-pool)
    """
    wp = w + 2
    rows_in = (h + 4) * wp
    rows_y = h * wp
    ho, wo = h // 2, w // 2

    for b in range(nb):
        base = b * rows_in
        acc = None
        for t in range(9):
            dh, dw = t // 3, t % 3
            xs = x_ref[pl.ds(base + dh * wp + dw, rows_y), :]
            wt = w_ref[pl.ds(t * cin, cin), :]
            c = jnp.dot(xs, wt, preferred_element_type=jnp.float32)
            acc = c if acc is None else acc + c
        y_ref[...] = jnp.maximum(acc + b_ref[...], 0.0)

        for po in range(ho):
            r0 = 2 * po * wp
            te = y_ref[pl.ds(r0, wo, 2), :]
            to = y_ref[pl.ds(r0 + 1, wo, 2), :]
            be = y_ref[pl.ds(r0 + wp, wo, 2), :]
            bo = y_ref[pl.ds(r0 + wp + 1, wo, 2), :]
            o_ref[b * ho + po, :, :] = jnp.maximum(
                jnp.maximum(te, to), jnp.maximum(be, bo)).astype(o_ref.dtype)


def _fc_bn_relu_fc_kernel(x_ref, w1_ref, b1_ref, w2_ref, b2_ref, o_ref):
    """o = (relu((x @ w1) + b1) @ w2) + b2, all accumulation in f32."""
    hid = jnp.dot(x_ref[...], w1_ref[...], preferred_element_type=jnp.float32)
    hid = jnp.maximum(hid + b1_ref[...], 0.0)
    out = jnp.dot(hid.astype(w2_ref.dtype), w2_ref[...],
                  preferred_element_type=jnp.float32)
    o_ref[...] = (out + b2_ref[...]).astype(o_ref.dtype)


# ---------------------------------------------------------------------------
# Tiling heuristics
# ---------------------------------------------------------------------------
def _pick_batch_tile(n, cap=8):
    """Images per conv grid step: largest divisor of n that is <= cap.

    Per-image pixel counts (784 / 288) are multiples of 8, so any nb keeps the
    block's second-minor dim 8-aligned; cap=8 keeps VMEM well under the v5e
    scoped limit while minimizing grid steps (batch=2 -> a single step)."""
    for nb in range(min(cap, n), 0, -1):
        if n % nb == 0:
            return nb
    return 1


def _pick_fc_row_tile(n, cap=256):
    """Row tile for the FC kernel: multiple of 8 dividing n (single block if n<8)."""
    if n % 8 != 0:
        return n                       # single full block; always legal
    best = 8
    for t in range(8, min(cap, max(8, n)) + 1, 8):
        if n % t == 0:
            best = t
    return best


# ---------------------------------------------------------------------------
# Pallas-call wrappers
# ---------------------------------------------------------------------------
def conv1_block(patches, wk, shift, *, n, h, w, cout):
    """patches: (n*h*w, k) bf16 -> pooled NHWC activation (n, h/2, w/2, cout)."""
    k = patches.shape[1]
    nb = _pick_batch_tile(n)
    ho, wo = h // 2, w // 2
    out = pl.pallas_call(
        functools.partial(_conv1_im2col_pool_kernel, h=h, w=w, nb=nb),
        out_shape=jax.ShapeDtypeStruct((n * ho, wo, cout), jnp.bfloat16),
        grid=(n // nb,),
        in_specs=[
            pl.BlockSpec((nb * h * w, k), lambda i: (i, 0)),
            pl.BlockSpec((k, cout), lambda i: (0, 0)),
            pl.BlockSpec((1, cout), lambda i: (0, 0)),
        ],
        out_specs=pl.BlockSpec((nb * ho, wo, cout), lambda i: (i, 0, 0)),
        scratch_shapes=[pltpu.VMEM((nb * h * w, cout), jnp.float32)],
        compiler_params=pltpu.CompilerParams(dimension_semantics=("parallel",)),
    )(patches, wk, shift)
    return out.reshape(n, ho, wo, cout)


def conv2_block(x_flat, wk, shift, *, n, h, w, cin, cout):
    """x_flat: (n*(h+4)*(w+2), cin) bf16 padded flat images -> (n, h/2, w/2, cout)."""
    wp = w + 2
    rows_in = (h + 4) * wp
    ho, wo = h // 2, w // 2
    nb = _pick_batch_tile(n)
    out = pl.pallas_call(
        functools.partial(_conv2_tap_pool_kernel, h=h, w=w, cin=cin, nb=nb),
        out_shape=jax.ShapeDtypeStruct((n * ho, wo, cout), jnp.bfloat16),
        grid=(n // nb,),
        in_specs=[
            pl.BlockSpec((nb * rows_in, cin), lambda i: (i, 0)),
            pl.BlockSpec((9 * cin, cout), lambda i: (0, 0)),
            pl.BlockSpec((1, cout), lambda i: (0, 0)),
        ],
        out_specs=pl.BlockSpec((nb * ho, wo, cout), lambda i: (i, 0, 0)),
        scratch_shapes=[pltpu.VMEM((h * wp, cout), jnp.float32)],
        compiler_params=pltpu.CompilerParams(dimension_semantics=("parallel",)),
    )(x_flat, wk, shift)
    return out.reshape(n, ho, wo, cout)


def fc_block(x, w1, b1, w2p, b2p):
    """x: (n, 3136) bf16 -> (n, 128) f32 padded logits (slice [:, :10] outside)."""
    n, kin = x.shape
    tm = _pick_fc_row_tile(n)
    return pl.pallas_call(
        _fc_bn_relu_fc_kernel,
        out_shape=jax.ShapeDtypeStruct((n, w2p.shape[1]), jnp.float32),
        grid=(n // tm,),
        in_specs=[
            pl.BlockSpec((tm, kin), lambda i: (i, 0)),
            pl.BlockSpec(w1.shape, lambda i: (0, 0)),
            pl.BlockSpec((1, b1.shape[1]), lambda i: (0, 0)),
            pl.BlockSpec(w2p.shape, lambda i: (0, 0)),
            pl.BlockSpec((1, b2p.shape[1]), lambda i: (0, 0)),
        ],
        out_specs=pl.BlockSpec((tm, w2p.shape[1]), lambda i: (i, 0)),
        compiler_params=pltpu.CompilerParams(dimension_semantics=("parallel",)),
    )(x, w1, b1, w2p, b2p)


# ---------------------------------------------------------------------------
# Glue (im2col for conv1, BN folding, parameter init)
# ---------------------------------------------------------------------------
def _im2col3x3(xpad):
    """xpad: (N, H+2, W+2, C) -> (N*H*W, 9*C); K ordering is (kh, kw, ci)."""
    n, hp, wp, c = xpad.shape
    h, w = hp - 2, wp - 2
    cols = [xpad[:, dh:dh + h, dw:dw + w, :] for dh in range(3) for dw in range(3)]
    return jnp.concatenate(cols, axis=-1).reshape(n * h * w, 9 * c)


def _fold_bn(gamma, beta, mean, var, bias):
    """Fold eval-mode BN applied to (z + bias) into scale/shift on z."""
    scale = gamma * jax.lax.rsqrt(var + EPS)
    shift = beta + (bias - mean) * scale
    return scale, shift


def init_params(key):
    ks = jax.random.split(key, 15)
    kk = jax.random.split(ks[14], 6)
    return {
        "w1": jax.random.normal(ks[0], (3, 3, 1, 32), jnp.float32) * 0.3,
        "b1": jax.random.normal(ks[1], (32,), jnp.float32) * 0.1,
        "g1": 1.0 + 0.1 * jax.random.normal(ks[2], (32,), jnp.float32),
        "be1": 0.1 * jax.random.normal(ks[3], (32,), jnp.float32),
        "m1": 0.1 * jax.random.normal(ks[4], (32,), jnp.float32),
        "v1": jax.random.uniform(ks[5], (32,), jnp.float32, 0.5, 1.5),
        "w2": jax.random.normal(ks[6], (3, 3, 32, 64), jnp.float32) * 0.1,
        "b2": jax.random.normal(ks[7], (64,), jnp.float32) * 0.1,
        "g2": 1.0 + 0.1 * jax.random.normal(ks[8], (64,), jnp.float32),
        "be2": 0.1 * jax.random.normal(ks[9], (64,), jnp.float32),
        "m2": 0.1 * jax.random.normal(ks[10], (64,), jnp.float32),
        "v2": jax.random.uniform(ks[11], (64,), jnp.float32, 0.5, 1.5),
        "wf1": jax.random.normal(ks[12], (3136, 128), jnp.float32) * 0.02,
        "bf1": jax.random.normal(ks[13], (128,), jnp.float32) * 0.1,
        "g3": 1.0 + 0.1 * jax.random.normal(kk[0], (128,), jnp.float32),
        "be3": 0.1 * jax.random.normal(kk[1], (128,), jnp.float32),
        "m3": 0.1 * jax.random.normal(kk[2], (128,), jnp.float32),
        "v3": jax.random.uniform(kk[3], (128,), jnp.float32, 0.5, 1.5),
        "wf2": jax.random.normal(kk[4], (128, 10), jnp.float32) * 0.1,
        "bf2": jax.random.normal(kk[5], (10,), jnp.float32) * 0.1,
    }


# ---------------------------------------------------------------------------
# Forward pass (mirrors Dnet.forward)
# ---------------------------------------------------------------------------
@jax.jit
def dnet_forward(x, params):
    # x: (N, 1, 28, 28) NCHW float32, as PyTorch.
    n = x.shape[0]

    # Fold eval-mode BN into bf16 weights (scale) and f32 shifts.
    s1, t1 = _fold_bn(params["g1"], params["be1"], params["m1"], params["v1"], params["b1"])
    w1 = (params["w1"] * s1).reshape(9, 32).astype(jnp.bfloat16)
    t1 = t1.reshape(1, 32).astype(jnp.float32)

    s2, t2 = _fold_bn(params["g2"], params["be2"], params["m2"], params["v2"], params["b2"])
    w2 = (params["w2"] * s2).reshape(9 * 32, 64).astype(jnp.bfloat16)   # tap-major rows
    t2 = t2.reshape(1, 64).astype(jnp.float32)

    s3, t3 = _fold_bn(params["g3"], params["be3"], params["m3"], params["v3"], params["bf1"])
    wf1 = (params["wf1"] * s3).astype(jnp.bfloat16)                     # (3136, 128)
    t3 = t3.reshape(1, 128).astype(jnp.float32)

    # fc2 zero-padded to 128 output lanes -> lane-dense stores; sliced below.
    w2p = jnp.zeros((128, LANE), jnp.bfloat16).at[:, :10].set(params["wf2"].astype(jnp.bfloat16))
    b2p = jnp.zeros((1, LANE), jnp.float32).at[:, :10].set(params["bf2"].reshape(1, 10))

    # conv1 + bn1 + relu + pool1 (one fused kernel).  NCHW->NHWC is a pure
    # reshape for cin=1; im2col (K=9) stays in XLA (tiny for a 1-channel input).
    xh = x.reshape(n, 28, 28, 1).astype(jnp.bfloat16)                   # NHWC (N,28,28,1)
    p1 = _im2col3x3(jnp.pad(xh, ((0, 0), (1, 1), (1, 1), (0, 0))))      # (N*784, 9) bf16
    q1 = conv1_block(p1, w1, t1, n=n, h=28, w=28, cout=32)              # (N,14,14,32) bf16

    # conv2 + bn2 + relu + pool2: fully in-kernel 9-tap conv over the padded
    # flat image (no HBM im2col).  Pad 1 top / 3 bottom / 1 left / 1 right;
    # the 2 extra zero rows keep the in-kernel tap slices in-bounds.
    q1p = jnp.pad(q1, ((0, 0), (1, 3), (1, 1), (0, 0)))                 # (N,18,16,32)
    x2 = q1p.reshape(n * 18 * 16, 32)                                   # (N*288, 32) bf16
    q2 = conv2_block(x2, w2, t2, n=n, h=14, w=14, cin=32, cout=64)      # (N,7,7,64) bf16

    # flatten in torch's NCHW order, then fc1 + bn3 + relu + fc2 (one fused kernel).
    flat = jnp.transpose(q2, (0, 3, 1, 2)).reshape(n, 64 * 7 * 7)       # (N, 3136) bf16
    logits = fc_block(flat, wf1, t3, w2p, b2p)                          # (N, 128) f32
    return logits[:, :10]


if __name__ == "__main__":
    key = jax.random.PRNGKey(0)
    pkey, xkey = jax.random.split(key)
    params = init_params(pkey)
    # Grayscale 28x28 images (what the module's transform / fc1=3136 implies), batch=2.
    x = jax.random.uniform(xkey, (2, 1, 28, 28), jnp.float32)
    out = jax.block_until_ready(dnet_forward(x, params))
    assert out.shape == (2, 10) and out.dtype == jnp.float32
    print("KERNEL_OK")
</pallas_src>

<mosaic_0001>
module attributes {stable_mosaic.version = 11 : i64} {
  func.func @_conv1_im2col_pool_kernel(%arg0: i32, %arg1: memref<1568x9xbf16, #tpu.memory_space<vmem>>, %arg2: memref<9x32xbf16, #tpu.memory_space<vmem>>, %arg3: memref<1x32xf32, #tpu.memory_space<vmem>>, %arg4: memref<28x14x32xbf16, #tpu.memory_space<vmem>>, %arg5: memref<1568x32xf32, #tpu.memory_space<vmem>>) attributes {dimension_semantics = [#tpu.dimension_semantics<parallel>], iteration_bounds = array<i64: 1>, scalar_prefetch = 0 : i64, scratch_operands = 1 : i64, tpu.core_type = #tpu.core_type<tc>, window_params = [{transform_indices = @transform_0, window_bounds = array<i64: 1568, 9>}, {pipeline_mode = #tpu.pipeline_mode<synchronous>, transform_indices = @transform_1, window_bounds = array<i64: 9, 32>}, {pipeline_mode = #tpu.pipeline_mode<synchronous>, transform_indices = @transform_2, window_bounds = array<i64: 1, 32>}, {transform_indices = @transform_3, window_bounds = array<i64: 28, 14, 32>}]} {
    %c0 = arith.constant 0 : index
    %c0_0 = arith.constant 0 : index
    %0 = vector.load %arg1[%c0, %c0_0] : memref<1568x9xbf16, #tpu.memory_space<vmem>>, vector<1568x9xbf16>
    %c0_1 = arith.constant 0 : index
    %c0_2 = arith.constant 0 : index
    %1 = vector.load %arg2[%c0_1, %c0_2] : memref<9x32xbf16, #tpu.memory_space<vmem>>, vector<9x32xbf16>
    %cst = arith.constant dense<0.000000e+00> : vector<1568x32xf32>
    %2 = tpu.matmul %0, %1, %cst {dimension_numbers = #tpu.dot_dimension_numbers<[1], [0], [0], [1], [0, 0, 1, 1], [], []>} : vector<1568x9xbf16>, vector<9x32xbf16>, vector<1568x32xf32> -> vector<1568x32xf32>
    %c0_3 = arith.constant 0 : index
    %c0_4 = arith.constant 0 : index
    %3 = vector.load %arg3[%c0_3, %c0_4] : memref<1x32xf32, #tpu.memory_space<vmem>>, vector<1x32xf32>
    %4 = vector.broadcast %3 : vector<1x32xf32> to vector<1568x32xf32>
    %5 = arith.addf %2, %4 : vector<1568x32xf32>
    %cst_5 = arith.constant 0.000000e+00 : f32
    %6 = vector.broadcast %cst_5 : f32 to vector<1568x32xf32>
    %7 = arith.maximumf %5, %6 : vector<1568x32xf32>
    %c0_6 = arith.constant 0 : index
    %c0_7 = arith.constant 0 : index
    %8 = vector.load %arg5[%c0_6, %c0_7] : memref<1568x32xf32, #tpu.memory_space<vmem>>, vector<1568x32xf32>
    tpu.vector_store %arg5[%c0_6, %c0_7], %7 {strides = array<i32>} : memref<1568x32xf32, #tpu.memory_space<vmem>>, vector<1568x32xf32>,
    %c0_8 = arith.constant 0 : index
    %c0_9 = arith.constant 0 : index
    %9 = tpu.strided_load %arg5[%c0_8, %c0_9] {strides = array<i32: 2, 1>} : memref<1568x32xf32, #tpu.memory_space<vmem>>, vector<14x32xf32>
    %c1 = arith.constant 1 : index
    %c0_10 = arith.constant 0 : index
    %10 = tpu.strided_load %arg5[%c1, %c0_10] {strides = array<i32: 2, 1>} : memref<1568x32xf32, #tpu.memory_space<vmem>>, vector<14x32xf32>
    %c28 = arith.constant 28 : index
    %c0_11 = arith.constant 0 : index
    %11 = tpu.strided_load %arg5[%c28, %c0_11] {strides = array<i32: 2, 1>} : memref<1568x32xf32, #tpu.memory_space<vmem>>, vector<14x32xf32>
    %c29 = arith.constant 29 : index
    %c0_12 = arith.constant 0 : index
    %12 = tpu.strided_load %arg5[%c29, %c0_12] {strides = array<i32: 2, 1>} : memref<1568x32xf32, #tpu.memory_space<vmem>>, vector<14x32xf32>
    %13 = arith.maximumf %9, %10 : vector<14x32xf32>
    %14 = arith.maximumf %11, %12 : vector<14x32xf32>
    %15 = arith.maximumf %13, %14 : vector<14x32xf32>
    %16 = arith.truncf %15 : vector<14x32xf32> to vector<14x32xbf16>
    %c0_13 = arith.constant 0 : index
    %c0_14 = arith.constant 0 : index
    %c0_15 = arith.constant 0 : index
    %17 = vector.load %arg4[%c0_13, %c0_14, %c0_15] : memref<28x14x32xbf16, #tpu.memory_space<vmem>>, vector<1x14x32xbf16>
    %18 = vector.shape_cast %17 : vector<1x14x32xbf16> to vector<14x32xbf16>
    %19 = vector.shape_cast %16 : vector<14x32xbf16> to vector<1x14x32xbf16>
    tpu.vector_store %arg4[%c0_13, %c0_14, %c0_15], %19 {strides = array<i32>} : memref<28x14x32xbf16, #tpu.memory_space<vmem>>, vector<1x14x32xbf16>,
    %c56 = arith.constant 56 : index
    %c0_16 = arith.constant 0 : index
    %20 = tpu.strided_load %arg5[%c56, %c0_16] {strides = array<i32: 2, 1>} : memref<1568x32xf32, #tpu.memory_space<vmem>>, vector<14x32xf32>
    %c57 = arith.constant 57 : index
    %c0_17 = arith.constant 0 : index
    %21 = tpu.strided_load %arg5[%c57, %c0_17] {strides = array<i32: 2, 1>} : memref<1568x32xf32, #tpu.memory_space<vmem>>, vector<14x32xf32>
    %c84 = arith.constant 84 : index
    %c0_18 = arith.constant 0 : index
    %22 = tpu.strided_load %arg5[%c84, %c0_18] {strides = array<i32: 2, 1>} : memref<1568x32xf32, #tpu.memory_space<vmem>>, vector<14x32xf32>
    %c85 = arith.constant 85 : index
    %c0_19 = arith.constant 0 : index
    %23 = tpu.strided_load %arg5[%c85, %c0_19] {strides = array<i32: 2, 1>} : memref<1568x32xf32, #tpu.memory_space<vmem>>, vector<14x32xf32>
    %24 = arith.maximumf %20, %21 : vector<14x32xf32>
    %25 = arith.maximumf %22, %23 : vector<14x32xf32>
    %26 = arith.maximumf %24, %25 : vector<14x32xf32>
    %27 = arith.truncf %26 : vector<14x32xf32> to vector<14x32xbf16>
    %c1_20 = arith.constant 1 : index
    %c0_21 = arith.constant 0 : index
    %c0_22 = arith.constant 0 : index
    %28 = vector.load %arg4[%c1_20, %c0_21, %c0_22] : memref<28x14x32xbf16, #tpu.memory_space<vmem>>, vector<1x14x32xbf16>
    %29 = vector.shape_cast %28 : vector<1x14x32xbf16> to vector<14x32xbf16>
    %30 = vector.shape_cast %27 : vector<14x32xbf16> to vector<1x14x32xbf16>
    tpu.vector_store %arg4[%c1_20, %c0_21, %c0_22], %30 {strides = array<i32>} : memref<28x14x32xbf16, #tpu.memory_space<vmem>>, vector<1x14x32xbf16>,
    %c112 = arith.constant 112 : index
    %c0_23 = arith.constant 0 : index
    %31 = tpu.strided_load %arg5[%c112, %c0_23] {strides = array<i32: 2, 1>} : memref<1568x32xf32, #tpu.memory_space<vmem>>, vector<14x32xf32>
    %c113 = arith.constant 113 : index
    %c0_24 = arith.constant 0 : index
    %32 = tpu.strided_load %arg5[%c113, %c0_24] {strides = array<i32: 2, 1>} : memref<1568x32xf32, #tpu.memory_space<vmem>>, vector<14x32xf32>
    %c140 = arith.constant 140 : index
    %c0_25 = arith.constant 0 : index
    %33 = tpu.strided_load %arg5[%c140, %c0_25] {strides = array<i32: 2, 1>} : memref<1568x32xf32, #tpu.memory_space<vmem>>, vector<14x32xf32>
    %c141 = arith.constant 141 : index
    %c0_26 = arith.constant 0 : index
    %34 = tpu.strided_load %arg5[%c141, %c0_26] {strides = array<i32: 2, 1>} : memref<1568x32xf32, #tpu.memory_space<vmem>>, vector<14x32xf32>
    %35 = arith.maximumf %31, %32 : vector<14x32xf32>
    %36 = arith.maximumf %33, %34 : vector<14x32xf32>
    %37 = arith.maximumf %35, %36 : vector<14x32xf32>
    %38 = arith.truncf %37 : vector<14x32xf32> to vector<14x32xbf16>
    %c2 = arith.constant 2 : index
    %c0_27 = arith.constant 0 : index
    %c0_28 = arith.constant 0 : index
    %39 = vector.load %arg4[%c2, %c0_27, %c0_28] : memref<28x14x32xbf16, #tpu.memory_space<vmem>>, vector<1x14x32xbf16>
    %40 = vector.shape_cast %39 : vector<1x14x32xbf16> to vector<14x32xbf16>
    %41 = vector.shape_cast %38 : vector<14x32xbf16> to vector<1x14x32xbf16>
    tpu.vector_store %arg4[%c2, %c0_27, %c0_28], %41 {strides = array<i32>} : memref<28x14x32xbf16, #tpu.memory_space<vmem>>, vector<1x14x32xbf16>,
    %c168 = arith.constant 168 : index
    %c0_29 = arith.constant 0 : index
    %42 = tpu.strided_load %arg5[%c168, %c0_29] {strides = array<i32: 2, 1>} : memref<1568x32xf32, #tpu.memory_space<vmem>>, vector<14x32xf32>
    %c169 = arith.constant 169 : index
    %c0_30 = arith.constant 0 : index
    %43 = tpu.strided_load %arg5[%c169, %c0_30] {strides = array<i32: 2, 1>} : memref<1568x32xf32, #tpu.memory_space<vmem>>, vector<14x32xf32>
    %c196 = arith.constant 196 : index
    %c0_31 = arith.constant 0 : index
    %44 = tpu.strided_load %arg5[%c196, %c0_31] {strides = array<i32: 2, 1>} : memref<1568x32xf32, #tpu.memory_space<vmem>>, vector<14x32xf32>
    %c197 = arith.constant 197 : index
    %c0_32 = arith.constant 0 : index
    %45 = tpu.strided_load %arg5[%c197, %c0_32] {strides = array<i32: 2, 1>} : memref<1568x32xf32, #tpu.memory_space<vmem>>, vector<14x32xf32>
    %46 = arith.maximumf %42, %43 : vector<14x32xf32>
    %47 = arith.maximumf %44, %45 : vector<14x32xf32>
    %48 = arith.maximumf %46, %47 : vector<14x32xf32>
    %49 = arith.truncf %48 : vector<14x32xf32> to vector<14x32xbf16>
    %c3 = arith.constant 3 : index
    %c0_33 = arith.constant 0 : index
    %c0_34 = arith.constant 0 : index
    %50 = vector.load %arg4[%c3, %c0_33, %c0_34] : memref<28x14x32xbf16, #tpu.memory_space<vmem>>, vector<1x14x32xbf16>
    %51 = vector.shape_cast %50 : vector<1x14x32xbf16> to vector<14x32xbf16>
    %52 = vector.shape_cast %49 : vector<14x32xbf16> to vector<1x14x32xbf16>
    tpu.vector_store %arg4[%c3, %c0_33, %c0_34], %52 {strides = array<i32>} : memref<28x14x32xbf16, #tpu.memory_space<vmem>>, vector<1x14x32xbf16>,
    %c224 = arith.constant 224 : index
    %c0_35 = arith.constant 0 : index
    %53 = tpu.strided_load %arg5[%c224, %c0_35] {strides = array<i32: 2, 1>} : memref<1568x32xf32, #tpu.memory_space<vmem>>, vector<14x32xf32>
    %c225 = arith.constant 225 : index
    %c0_36 = arith.constant 0 : index
    %54 = tpu.strided_load %arg5[%c225, %c0_36] {strides = array<i32: 2, 1>} : memref<1568x32xf32, #tpu.memory_space<vmem>>, vector<14x32xf32>
    %c252 = arith.constant 252 : index
    %c0_37 = arith.constant 0 : index
    %55 = tpu.strided_load %arg5[%c252, %c0_37] {strides = array<i32: 2, 1>} : memref<1568x32xf32, #tpu.memory_space<vmem>>, vector<14x32xf32>
    %c253 = arith.constant 253 : index
    %c0_38 = arith.constant 0 : index
    %56 = tpu.strided_load %arg5[%c253, %c0_38] {strides = array<i32: 2, 1>} : memref<1568x32xf32, #tpu.memory_space<vmem>>, vector<14x32xf32>
    %57 = arith.maximumf %53, %54 : vector<14x32xf32>
    %58 = arith.maximumf %55, %56 : vector<14x32xf32>
    %59 = arith.maximumf %57, %58 : vector<14x32xf32>
    %60 = arith.truncf %59 : vector<14x32xf32> to vector<14x32xbf16>
    %c4 = arith.constant 4 : index
    %c0_39 = arith.constant 0 : index
    %c0_40 = arith.constant 0 : index
    %61 = vector.load %arg4[%c4, %c0_39, %c0_40] : memref<28x14x32xbf16, #tpu.memory_space<vmem>>, vector<1x14x32xbf16>
    %62 = vector.shape_cast %61 : vector<1x14x32xbf16> to vector<14x32xbf16>
    %63 = vector.shape_cast %60 : vector<14x32xbf16> to vector<1x14x32xbf16>
    tpu.vector_store %arg4[%c4, %c0_39, %c0_40], %63 {strides = array<i32>} : memref<28x14x32xbf16, #tpu.memory_space<vmem>>, vector<1x14x32xbf16>,
    %c280 = arith.constant 280 : index
    %c0_41 = arith.constant 0 : index
    %64 = tpu.strided_load %arg5[%c280, %c0_41] {strides = array<i32: 2, 1>} : memref<1568x32xf32, #tpu.memory_space<vmem>>, vector<14x32xf32>
    %c281 = arith.constant 281 : index
    %c0_42 = arith.constant 0 : index
    %65 = tpu.strided_load %arg5[%c281, %c0_42] {strides = array<i32: 2, 1>} : memref<1568x32xf32, #tpu.memory_space<vmem>>, vector<14x32xf32>
    %c308 = arith.constant 308 : index
    %c0_43 = arith.constant 0 : index
    %66 = tpu.strided_load %arg5[%c308, %c0_43] {strides = array<i32: 2, 1>} : memref<1568x32xf32, #tpu.memory_space<vmem>>, vector<14x32xf32>
    %c309 = arith.constant 309 : index
    %c0_44 = arith.constant 0 : index
    %67 = tpu.strided_load %arg5[%c309, %c0_44] {strides = array<i32: 2, 1>} : memref<1568x32xf32, #tpu.memory_space<vmem>>, vector<14x32xf32>
    %68 = arith.maximumf %64, %65 : vector<14x32xf32>
    %69 = arith.maximumf %66, %67 : vector<14x32xf32>
    %70 = arith.maximumf %68, %69 : vector<14x32xf32>
    %71 = arith.truncf %70 : vector<14x32xf32> to vector<14x32xbf16>
    %c5 = arith.constant 5 : index
    %c0_45 = arith.constant 0 : index
    %c0_46 = arith.constant 0 : index
    %72 = vector.load %arg4[%c5, %c0_45, %c0_46] : memref<28x14x32xbf16, #tpu.memory_space<vmem>>, vector<1x14x32xbf16>
    %73 = vector.shape_cast %72 : vector<1x14x32xbf16> to vector<14x32xbf16>
    %74 = vector.shape_cast %71 : vector<14x32xbf16> to vector<1x14x32xbf16>
    tpu.vector_store %arg4[%c5, %c0_45, %c0_46], %74 {strides = array<i32>} : memref<28x14x32xbf16, #tpu.memory_space<vmem>>, vector<1x14x32xbf16>,
    %c336 = arith.constant 336 : index
    %c0_47 = arith.constant 0 : index
    %75 = tpu.strided_load %arg5[%c336, %c0_47] {strides = array<i32: 2, 1>} : memref<1568x32xf32, #tpu.memory_space<vmem>>, vector<14x32xf32>
    %c337 = arith.constant 337 : index
    %c0_48 = arith.constant 0 : index
    %76 = tpu.strided_load %arg5[%c337, %c0_48] {strides = array<i32: 2, 1>} : memref<1568x32xf32, #tpu.memory_space<vmem>>, vector<14x32xf32>
    %c364 = arith.constant 364 : index
    %c0_49 = arith.constant 0 : index
    %77 = tpu.strided_load %arg5[%c364, %c0_49] {strides = array<i32: 2, 1>} : memref<1568x32xf32, #tpu.memory_space<vmem>>, vector<14x32xf32>
    %c365 = arith.constant 365 : index
    %c0_50 = arith.constant 0 : index
    %78 = tpu.strided_load %arg5[%c365, %c0_50] {strides = array<i32: 2, 1>} : memref<1568x32xf32, #tpu.memory_space<vmem>>, vector<14x32xf32>
    %79 = arith.maximumf %75, %76 : vector<14x32xf32>
    %80 = arith.maximumf %77, %78 : vector<14x32xf32>
    %81 = arith.maximumf %79, %80 : vector<14x32xf32>
    %82 = arith.truncf %81 : vector<14x32xf32> to vector<14x32xbf16>
    %c6 = arith.constant 6 : index
    %c0_51 = arith.constant 0 : index
    %c0_52 = arith.constant 0 : index
    %83 = vector.load %arg4[%c6, %c0_51, %c0_52] : memref<28x14x32xbf16, #tpu.memory_space<vmem>>, vector<1x14x32xbf16>
    %84 = vector.shape_cast %83 : vector<1x14x32xbf16> to vector<14x32xbf16>
    %85 = vector.shape_cast %82 : vector<14x32xbf16> to vector<1x14x32xbf16>
    tpu.vector_store %arg4[%c6, %c0_51, %c0_52], %85 {strides = array<i32>} : memref<28x14x32xbf16, #tpu.memory_space<vmem>>, vector<1x14x32xbf16>,
    %c392 = arith.constant 392 : index
    %c0_53 = arith.constant 0 : index
    %86 = tpu.strided_load %arg5[%c392, %c0_53] {strides = array<i32: 2, 1>} : memref<1568x32xf32, #tpu.memory_space<vmem>>, vector<14x32xf32>
    %c393 = arith.constant 393 : index
    %c0_54 = arith.constant 0 : index
    %87 = tpu.strided_load %arg5[%c393, %c0_54] {strides = array<i32: 2, 1>} : memref<1568x32xf32, #tpu.memory_space<vmem>>, vector<14x32xf32>
    %c420 = arith.constant 420 : index
    %c0_55 = arith.constant 0 : index
    %88 = tpu.strided_load %arg5[%c420, %c0_55] {strides = array<i32: 2, 1>} : memref<1568x32xf32, #tpu.memory_space<vmem>>, vector<14x32xf32>
    %c421 = arith.constant 421 : index
    %c0_56 = arith.constant 0 : index
    %89 = tpu.strided_load %arg5[%c421, %c0_56] {strides = array<i32: 2, 1>} : memref<1568x32xf32, #tpu.memory_space<vmem>>, vector<14x32xf32>
    %90 = arith.maximumf %86, %87 : vector<14x32xf32>
    %91 = arith.maximumf %88, %89 : vector<14x32xf32>
    %92 = arith.maximumf %90, %91 : vector<14x32xf32>
    %93 = arith.truncf %92 : vector<14x32xf32> to vector<14x32xbf16>
    %c7 = arith.constant 7 : index
    %c0_57 = arith.constant 0 : index
    %c0_58 = arith.constant 0 : index
    %94 = vector.load %arg4[%c7, %c0_57, %c0_58] : memref<28x14x32xbf16, #tpu.memory_space<vmem>>, vector<1x14x32xbf16>
    %95 = vector.shape_cast %94 : vector<1x14x32xbf16> to vector<14x32xbf16>
    %96 = vector.shape_cast %93 : vector<14x32xbf16> to vector<1x14x32xbf16>
    tpu.vector_store %arg4[%c7, %c0_57, %c0_58], %96 {strides = array<i32>} : memref<28x14x32xbf16, #tpu.memory_space<vmem>>, vector<1x14x32xbf16>,
    %c448 = arith.constant 448 : index
    %c0_59 = arith.constant 0 : index
    %97 = tpu.strided_load %arg5[%c448, %c0_59] {strides = array<i32: 2, 1>} : memref<1568x32xf32, #tpu.memory_space<vmem>>, vector<14x32xf32>
    %c449 = arith.constant 449 : index
    %c0_60 = arith.constant 0 : index
    %98 = tpu.strided_load %arg5[%c449, %c0_60] {strides = array<i32: 2, 1>} : memref<1568x32xf32, #tpu.memory_space<vmem>>, vector<14x32xf32>
    %c476 = arith.constant 476 : index
    %c0_61 = arith.constant 0 : index
    %99 = tpu.strided_load %arg5[%c476, %c0_61] {strides = array<i32: 2, 1>} : memref<1568x32xf32, #tpu.memory_space<vmem>>, vector<14x32xf32>
    %c477 = arith.constant 477 : index
    %c0_62 = arith.constant 0 : index
    %100 = tpu.strided_load %arg5[%c477, %c0_62] {strides = array<i32: 2, 1>} : memref<1568x32xf32, #tpu.memory_space<vmem>>, vector<14x32xf32>
    %101 = arith.maximumf %97, %98 : vector<14x32xf32>
    %102 = arith.maximumf %99, %100 : vector<14x32xf32>
    %103 = arith.maximumf %101, %102 : vector<14x32xf32>
    %104 = arith.truncf %103 : vector<14x32xf32> to vector<14x32xbf16>
    %c8 = arith.constant 8 : index
    %c0_63 = arith.constant 0 : index
    %c0_64 = arith.constant 0 : index
    %105 = vector.load %arg4[%c8, %c0_63, %c0_64] : memref<28x14x32xbf16, #tpu.memory_space<vmem>>, vector<1x14x32xbf16>
    %106 = vector.shape_cast %105 : vector<1x14x32xbf16> to vector<14x32xbf16>
    %107 = vector.shape_cast %104 : vector<14x32xbf16> to vector<1x14x32xbf16>
    tpu.vector_store %arg4[%c8, %c0_63, %c0_64], %107 {strides = array<i32>} : memref<28x14x32xbf16, #tpu.memory_space<vmem>>, vector<1x14x32xbf16>,
    %c504 = arith.constant 504 : index
    %c0_65 = arith.constant 0 : index
    %108 = tpu.strided_load %arg5[%c504, %c0_65] {strides = array<i32: 2, 1>} : memref<1568x32xf32, #tpu.memory_space<vmem>>, vector<14x32xf32>
    %c505 = arith.constant 505 : index
    %c0_66 = arith.constant 0 : index
    %109 = tpu.strided_load %arg5[%c505, %c0_66] {strides = array<i32: 2, 1>} : memref<1568x32xf32, #tpu.memory_space<vmem>>, vector<14x32xf32>
    %c532 = arith.constant 532 : index
    %c0_67 = arith.constant 0 : index
    %110 = tpu.strided_load %arg5[%c532, %c0_67] {strides = array<i32: 2, 1>} : memref<1568x32xf32, #tpu.memory_space<vmem>>, vector<14x32xf32>
    %c533 = arith.constant 533 : index
    %c0_68 = arith.constant 0 : index
    %111 = tpu.strided_load %arg5[%c533, %c0_68] {strides = array<i32: 2, 1>} : memref<1568x32xf32, #tpu.memory_space<vmem>>, vector<14x32xf32>
    %112 = arith.maximumf %108, %109 : vector<14x32xf32>
    %113 = arith.maximumf %110, %111 : vector<14x32xf32>
    %114 = arith.maximumf %112, %113 : vector<14x32xf32>
    %115 = arith.truncf %114 : vector<14x32xf32> to vector<14x32xbf16>
    %c9 = arith.constant 9 : index
    %c0_69 = arith.constant 0 : index
    %c0_70 = arith.constant 0 : index
    %116 = vector.load %arg4[%c9, %c0_69, %c0_70] : memref<28x14x32xbf16, #tpu.memory_space<vmem>>, vector<1x14x32xbf16>
    %117 = vector.shape_cast %116 : vector<1x14x32xbf16> to vector<14x32xbf16>
    %118 = vector.shape_cast %115 : vector<14x32xbf16> to vector<1x14x32xbf16>
    tpu.vector_store %arg4[%c9, %c0_69, %c0_70], %118 {strides = array<i32>} : memref<28x14x32xbf16, #tpu.memory_space<vmem>>, vector<1x14x32xbf16>,
    %c560 = arith.constant 560 : index
    %c0_71 = arith.constant 0 : index
    %119 = tpu.strided_load %arg5[%c560, %c0_71] {strides = array<i32: 2, 1>} : memref<1568x32xf32, #tpu.memory_space<vmem>>, vector<14x32xf32>
    %c561 = arith.constant 561 : index
    %c0_72 = arith.constant 0 : index
    %120 = tpu.strided_load %arg5[%c561, %c0_72] {strides = array<i32: 2, 1>} : memref<1568x32xf32, #tpu.memory_space<vmem>>, vector<14x32xf32>
    %c588 = arith.constant 588 : index
    %c0_73 = arith.constant 0 : index
    %121 = tpu.strided_load %arg5[%c588, %c0_73] {strides = array<i32: 2, 1>} : memref<1568x32xf32, #tpu.memory_space<vmem>>, vector<14x32xf32>
    %c589 = arith.constant 589 : index
    %c0_74 = arith.constant 0 : index
    %122 = tpu.strided_load %arg5[%c589, %c0_74] {strides = array<i32: 2, 1>} : memref<1568x32xf32, #tpu.memory_space<vmem>>, vector<14x32xf32>
    %123 = arith.maximumf %119, %120 : vector<14x32xf32>
    %124 = arith.maximumf %121, %122 : vector<14x32xf32>
    %125 = arith.maximumf %123, %124 : vector<14x32xf32>
    %126 = arith.truncf %125 : vector<14x32xf32> to vector<14x32xbf16>
    %c10 = arith.constant 10 : index
    %c0_75 = arith.constant 0 : index
    %c0_76 = arith.constant 0 : index
    %127 = vector.load %arg4[%c10, %c0_75, %c0_76] : memref<28x14x32xbf16, #tpu.memory_space<vmem>>, vector<1x14x32xbf16>
    %128 = vector.shape_cast %127 : vector<1x14x32xbf16> to vector<14x32xbf16>
    %129 = vector.shape_cast %126 : vector<14x32xbf16> to vector<1x14x32xbf16>
    tpu.vector_store %arg4[%c10, %c0_75, %c0_76], %129 {strides = array<i32>} : memref<28x14x32xbf16, #tpu.memory_space<vmem>>, vector<1x14x32xbf16>,
    %c616 = arith.constant 616 : index
    %c0_77 = arith.constant 0 : index
    %130 = tpu.strided_load %arg5[%c616, %c0_77] {strides = array<i32: 2, 1>} : memref<1568x32xf32, #tpu.memory_space<vmem>>, vector<14x32xf32>
    %c617 = arith.constant 617 : index
    %c0_78 = arith.constant 0 : index
    %131 = tpu.strided_load %arg5[%c617, %c0_78] {strides = array<i32: 2, 1>} : memref<1568x32xf32, #tpu.memory_space<vmem>>, vector<14x32xf32>
    %c644 = arith.constant 644 : index
    %c0_79 = arith.constant 0 : index
    %132 = tpu.strided_load %arg5[%c644, %c0_79] {strides = array<i32: 2, 1>} : memref<1568x32xf32, #tpu.memory_space<vmem>>, vector<14x32xf32>
    %c645 = arith.constant 645 : index
    %c0_80 = arith.constant 0 : index
    %133 = tpu.strided_load %arg5[%c645, %c0_80] {strides = array<i32: 2, 1>} : memref<1568x32xf32, #tpu.memory_space<vmem>>, vector<14x32xf32>
    %134 = arith.maximumf %130, %131 : vector<14x32xf32>
    %135 = arith.maximumf %132, %133 : vector<14x32xf32>
    %136 = arith.maximumf %134, %135 : vector<14x32xf32>
    %137 = arith.truncf %136 : vector<14x32xf32> to vector<14x32xbf16>
    %c11 = arith.constant 11 : index
    %c0_81 = arith.constant 0 : index
    %c0_82 = arith.constant 0 : index
    %138 = vector.load %arg4[%c11, %c0_81, %c0_82] : memref<28x14x32xbf16, #tpu.memory_space<vmem>>, vector<1x14x32xbf16>
    %139 = vector.shape_cast %138 : vector<1x14x32xbf16> to vector<14x32xbf16>
    %140 = vector.shape_cast %137 : vector<14x32xbf16> to vector<1x14x32xbf16>
    tpu.vector_store %arg4[%c11, %c0_81, %c0_82], %140 {strides = array<i32>} : memref<28x14x32xbf16, #tpu.memory_space<vmem>>, vector<1x14x32xbf16>,
    %c672 = arith.constant 672 : index
    %c0_83 = arith.constant 0 : index
    %141 = tpu.strided_load %arg5[%c672, %c0_83] {strides = array<i32: 2, 1>} : memref<1568x32xf32, #tpu.memory_space<vmem>>, vector<14x32xf32>
    %c673 = arith.constant 673 : index
    %c0_84 = arith.constant 0 : index
    %142 = tpu.strided_load %arg5[%c673, %c0_84] {strides = array<i32: 2, 1>} : memref<1568x32xf32, #tpu.memory_space<vmem>>, vector<14x32xf32>
    %c700 = arith.constant 700 : index
    %c0_85 = arith.constant 0 : index
    %143 = tpu.strided_load %arg5[%c700, %c0_85] {strides = array<i32: 2, 1>} : memref<1568x32xf32, #tpu.memory_space<vmem>>, vector<14x32xf32>
    %c701 = arith.constant 701 : index
    %c0_86 = arith.constant 0 : index
    %144 = tpu.strided_load %arg5[%c701, %c0_86] {strides = array<i32: 2, 1>} : memref<1568x32xf32, #tpu.memory_space<vmem>>, vector<14x32xf32>
    %145 = arith.maximumf %141, %142 : vector<14x32xf32>
    %146 = arith.maximumf %143, %144 : vector<14x32xf32>
    %147 = arith.maximumf %145, %146 : vector<14x32xf32>
    %148 = arith.truncf %147 : vector<14x32xf32> to vector<14x32xbf16>
    %c12 = arith.constant 12 : index
    %c0_87 = arith.constant 0 : index
    %c0_88 = arith.constant 0 : index
    %149 = vector.load %arg4[%c12, %c0_87, %c0_88] : memref<28x14x32xbf16, #tpu.memory_space<vmem>>, vector<1x14x32xbf16>
    %150 = vector.shape_cast %149 : vector<1x14x32xbf16> to vector<14x32xbf16>
    %151 = vector.shape_cast %148 : vector<14x32xbf16> to vector<1x14x32xbf16>
    tpu.vector_store %arg4[%c12, %c0_87, %c0_88], %151 {strides = array<i32>} : memref<28x14x32xbf16, #tpu.memory_space<vmem>>, vector<1x14x32xbf16>,
    %c728 = arith.constant 728 : index
    %c0_89 = arith.constant 0 : index
    %152 = tpu.strided_load %arg5[%c728, %c0_89] {strides = array<i32: 2, 1>} : memref<1568x32xf32, #tpu.memory_space<vmem>>, vector<14x32xf32>
    %c729 = arith.constant 729 : index
    %c0_90 = arith.constant 0 : index
    %153 = tpu.strided_load %arg5[%c729, %c0_90] {strides = array<i32: 2, 1>} : memref<1568x32xf32, #tpu.memory_space<vmem>>, vector<14x32xf32>
    %c756 = arith.constant 756 : index
    %c0_91 = arith.constant 0 : index
    %154 = tpu.strided_load %arg5[%c756, %c0_91] {strides = array<i32: 2, 1>} : memref<1568x32xf32, #tpu.memory_space<vmem>>, vector<14x32xf32>
    %c757 = arith.constant 757 : index
    %c0_92 = arith.constant 0 : index
    %155 = tpu.strided_load %arg5[%c757, %c0_92] {strides = array<i32: 2, 1>} : memref<1568x32xf32, #tpu.memory_space<vmem>>, vector<14x32xf32>
    %156 = arith.maximumf %152, %153 : vector<14x32xf32>
    %157 = arith.maximumf %154, %155 : vector<14x32xf32>
    %158 = arith.maximumf %156, %157 : vector<14x32xf32>
    %159 = arith.truncf %158 : vector<14x32xf32> to vector<14x32xbf16>
    %c13 = arith.constant 13 : index
    %c0_93 = arith.constant 0 : index
    %c0_94 = arith.constant 0 : index
    %160 = vector.load %arg4[%c13, %c0_93, %c0_94] : memref<28x14x32xbf16, #tpu.memory_space<vmem>>, vector<1x14x32xbf16>
    %161 = vector.shape_cast %160 : vector<1x14x32xbf16> to vector<14x32xbf16>
    %162 = vector.shape_cast %159 : vector<14x32xbf16> to vector<1x14x32xbf16>
    tpu.vector_store %arg4[%c13, %c0_93, %c0_94], %162 {strides = array<i32>} : memref<28x14x32xbf16, #tpu.memory_space<vmem>>, vector<1x14x32xbf16>,
    %c784 = arith.constant 784 : index
    %c0_95 = arith.constant 0 : index
    %163 = tpu.strided_load %arg5[%c784, %c0_95] {strides = array<i32: 2, 1>} : memref<1568x32xf32, #tpu.memory_space<vmem>>, vector<14x32xf32>
    %c785 = arith.constant 785 : index
    %c0_96 = arith.constant 0 : index
    %164 = tpu.strided_load %arg5[%c785, %c0_96] {strides = array<i32: 2, 1>} : memref<1568x32xf32, #tpu.memory_space<vmem>>, vector<14x32xf32>
    %c812 = arith.constant 812 : index
    %c0_97 = arith.constant 0 : index
    %165 = tpu.strided_load %arg5[%c812, %c0_97] {strides = array<i32: 2, 1>} : memref<1568x32xf32, #tpu.memory_space<vmem>>, vector<14x32xf32>
    %c813 = arith.constant 813 : index
    %c0_98 = arith.constant 0 : index
    %166 = tpu.strided_load %arg5[%c813, %c0_98] {strides = array<i32: 2, 1>} : memref<1568x32xf32, #tpu.memory_space<vmem>>, vector<14x32xf32>
    %167 = arith.maximumf %163, %164 : vector<14x32xf32>
    %168 = arith.maximumf %165, %166 : vector<14x32xf32>
    %169 = arith.maximumf %167, %168 : vector<14x32xf32>
    %170 = arith.truncf %169 : vector<14x32xf32> to vector<14x32xbf16>
    %c14 = arith.constant 14 : index
    %c0_99 = arith.constant 0 : index
    %c0_100 = arith.constant 0 : index
    %171 = vector.load %arg4[%c14, %c0_99, %c0_100] : memref<28x14x32xbf16, #tpu.memory_space<vmem>>, vector<1x14x32xbf16>
    %172 = vector.shape_cast %171 : vector<1x14x32xbf16> to vector<14x32xbf16>
    %173 = vector.shape_cast %170 : vector<14x32xbf16> to vector<1x14x32xbf16>
    tpu.vector_store %arg4[%c14, %c0_99, %c0_100], %173 {strides = array<i32>} : memref<28x14x32xbf16, #tpu.memory_space<vmem>>, vector<1x14x32xbf16>,
    %c840 = arith.constant 840 : index
    %c0_101 = arith.constant 0 : index
    %174 = tpu.strided_load %arg5[%c840, %c0_101] {strides = array<i32: 2, 1>} : memref<1568x32xf32, #tpu.memory_space<vmem>>, vector<14x32xf32>
    %c841 = arith.constant 841 : index
    %c0_102 = arith.constant 0 : index
    %175 = tpu.strided_load %arg5[%c841, %c0_102] {strides = array<i32: 2, 1>} : memref<1568x32xf32, #tpu.memory_space<vmem>>, vector<14x32xf32>
    %c868 = arith.constant 868 : index
    %c0_103 = arith.constant 0 : index
    %176 = tpu.strided_load %arg5[%c868, %c0_103] {strides = array<i32: 2, 1>} : memref<1568x32xf32, #tpu.memory_space<vmem>>, vector<14x32xf32>
    %c869 = arith.constant 869 : index
    %c0_104 = arith.constant 0 : index
    %177 = tpu.strided_load %arg5[%c869, %c0_104] {strides = array<i32: 2, 1>} : memref<1568x32xf32, #tpu.memory_space<vmem>>, vector<14x32xf32>
    %178 = arith.maximumf %174, %175 : vector<14x32xf32>
    %179 = arith.maximumf %176, %177 : vector<14x32xf32>
    %180 = arith.maximumf %178, %179 : vector<14x32xf32>
    %181 = arith.truncf %180 : vector<14x32xf32> to vector<14x32xbf16>
    %c15 = arith.constant 15 : index
    %c0_105 = arith.constant 0 : index
    %c0_106 = arith.constant 0 : index
    %182 = vector.load %arg4[%c15, %c0_105, %c0_106] : memref<28x14x32xbf16, #tpu.memory_space<vmem>>, vector<1x14x32xbf16>
    %183 = vector.shape_cast %182 : vector<1x14x32xbf16> to vector<14x32xbf16>
    %184 = vector.shape_cast %181 : vector<14x32xbf16> to vector<1x14x32xbf16>
    tpu.vector_store %arg4[%c15, %c0_105, %c0_106], %184 {strides = array<i32>} : memref<28x14x32xbf16, #tpu.memory_space<vmem>>, vector<1x14x32xbf16>,
    %c896 = arith.constant 896 : index
    %c0_107 = arith.constant 0 : index
    %185 = tpu.strided_load %arg5[%c896, %c0_107] {strides = array<i32: 2, 1>} : memref<1568x32xf32, #tpu.memory_space<vmem>>, vector<14x32xf32>
    %c897 = arith.constant 897 : index
    %c0_108 = arith.constant 0 : index
    %186 = tpu.strided_load %arg5[%c897, %c0_108] {strides = array<i32: 2, 1>} : memref<1568x32xf32, #tpu.memory_space<vmem>>, vector<14x32xf32>
    %c924 = arith.constant 924 : index
    %c0_109 = arith.constant 0 : index
    %187 = tpu.strided_load %arg5[%c924, %c0_109] {strides = array<i32: 2, 1>} : memref<1568x32xf32, #tpu.memory_space<vmem>>, vector<14x32xf32>
    %c925 = arith.constant 925 : index
    %c0_110 = arith.constant 0 : index
    %188 = tpu.strided_load %arg5[%c925, %c0_110] {strides = array<i32: 2, 1>} : memref<1568x32xf32, #tpu.memory_space<vmem>>, vector<14x32xf32>
    %189 = arith.maximumf %185, %186 : vector<14x32xf32>
    %190 = arith.maximumf %187, %188 : vector<14x32xf32>
    %191 = arith.maximumf %189, %190 : vector<14x32xf32>
    %192 = arith.truncf %191 : vector<14x32xf32> to vector<14x32xbf16>
    %c16 = arith.constant 16 : index
    %c0_111 = arith.constant 0 : index
    %c0_112 = arith.constant 0 : index
    %193 = vector.load %arg4[%c16, %c0_111, %c0_112] : memref<28x14x32xbf16, #tpu.memory_space<vmem>>, vector<1x14x32xbf16>
    %194 = vector.shape_cast %193 : vector<1x14x32xbf16> to vector<14x32xbf16>
    %195 = vector.shape_cast %192 : vector<14x32xbf16> to vector<1x14x32xbf16>
    tpu.vector_store %arg4[%c16, %c0_111, %c0_112], %195 {strides = array<i32>} : memref<28x14x32xbf16, #tpu.memory_space<vmem>>, vector<1x14x32xbf16>,
    %c952 = arith.constant 952 : index
    %c0_113 = arith.constant 0 : index
    %196 = tpu.strided_load %arg5[%c952, %c0_113] {strides = array<i32: 2, 1>} : memref<1568x32xf32, #tpu.memory_space<vmem>>, vector<14x32xf32>
    %c953 = arith.constant 953 : index
    %c0_114 = arith.constant 0 : index
    %197 = tpu.strided_load %arg5[%c953, %c0_114] {strides = array<i32: 2, 1>} : memref<1568x32xf32, #tpu.memory_space<vmem>>, vector<14x32xf32>
    %c980 = arith.constant 980 : index
    %c0_115 = arith.constant 0 : index
    %198 = tpu.strided_load %arg5[%c980, %c0_115] {strides = array<i32: 2, 1>} : memref<1568x32xf32, #tpu.memory_space<vmem>>, vector<14x32xf32>
    %c981 = arith.constant 981 : index
    %c0_116 = arith.constant 0 : index
    %199 = tpu.strided_load %arg5[%c981, %c0_116] {strides = array<i32: 2, 1>} : memref<1568x32xf32, #tpu.memory_space<vmem>>, vector<14x32xf32>
    %200 = arith.maximumf %196, %197 : vector<14x32xf32>
    %201 = arith.maximumf %198, %199 : vector<14x32xf32>
    %202 = arith.maximumf %200, %201 : vector<14x32xf32>
    %203 = arith.truncf %202 : vector<14x32xf32> to vector<14x32xbf16>
    %c17 = arith.constant 17 : index
    %c0_117 = arith.constant 0 : index
    %c0_118 = arith.constant 0 : index
    %204 = vector.load %arg4[%c17, %c0_117, %c0_118] : memref<28x14x32xbf16, #tpu.memory_space<vmem>>, vector<1x14x32xbf16>
    %205 = vector.shape_cast %204 : vector<1x14x32xbf16> to vector<14x32xbf16>
    %206 = vector.shape_cast %203 : vector<14x32xbf16> to vector<1x14x32xbf16>
    tpu.vector_store %arg4[%c17, %c0_117, %c0_118], %206 {strides = array<i32>} : memref<28x14x32xbf16, #tpu.memory_space<vmem>>, vector<1x14x32xbf16>,
    %c1008 = arith.constant 1008 : index
    %c0_119 = arith.constant 0 : index
    %207 = tpu.strided_load %arg5[%c1008, %c0_119] {strides = array<i32: 2, 1>} : memref<1568x32xf32, #tpu.memory_space<vmem>>, vector<14x32xf32>
    %c1009 = arith.constant 1009 : index
    %c0_120 = arith.constant 0 : index
    %208 = tpu.strided_load %arg5[%c1009, %c0_120] {strides = array<i32: 2, 1>} : memref<1568x32xf32, #tpu.memory_space<vmem>>, vector<14x32xf32>
    %c1036 = arith.constant 1036 : index
    %c0_121 = arith.constant 0 : index
    %209 = tpu.strided_load %arg5[%c1036, %c0_121] {strides = array<i32: 2, 1>} : memref<1568x32xf32, #tpu.memory_space<vmem>>, vector<14x32xf32>
    %c1037 = arith.constant 1037 : index
    %c0_122 = arith.constant 0 : index
    %210 = tpu.strided_load %arg5[%c1037, %c0_122] {strides = array<i32: 2, 1>} : memref<1568x32xf32, #tpu.memory_space<vmem>>, vector<14x32xf32>
    %211 = arith.maximumf %207, %208 : vector<14x32xf32>
    %212 = arith.maximumf %209, %210 : vector<14x32xf32>
    %213 = arith.maximumf %211, %212 : vector<14x32xf32>
    %214 = arith.truncf %213 : vector<14x32xf32> to vector<14x32xbf16>
    %c18 = arith.constant 18 : index
    %c0_123 = arith.constant 0 : index
    %c0_124 = arith.constant 0 : index
    %215 = vector.load %arg4[%c18, %c0_123, %c0_124] : memref<28x14x32xbf16, #tpu.memory_space<vmem>>, vector<1x14x32xbf16>
    %216 = vector.shape_cast %215 : vector<1x14x32xbf16> to vector<14x32xbf16>
    %217 = vector.shape_cast %214 : vector<14x32xbf16> to vector<1x14x32xbf16>
    tpu.vector_store %arg4[%c18, %c0_123, %c0_124], %217 {strides = array<i32>} : memref<28x14x32xbf16, #tpu.memory_space<vmem>>, vector<1x14x32xbf16>,
    %c1064 = arith.constant 1064 : index
    %c0_125 = arith.constant 0 : index
    %218 = tpu.strided_load %arg5[%c1064, %c0_125] {strides = array<i32: 2, 1>} : memref<1568x32xf32, #tpu.memory_space<vmem>>, vector<14x32xf32>
    %c1065 = arith.constant 1065 : index
    %c0_126 = arith.constant 0 : index
    %219 = tpu.strided_load %arg5[%c1065, %c0_126] {strides = array<i32: 2, 1>} : memref<1568x32xf32, #tpu.memory_space<vmem>>, vector<14x32xf32>
    %c1092 = arith.constant 1092 : index
    %c0_127 = arith.constant 0 : index
    %220 = tpu.strided_load %arg5[%c1092, %c0_127] {strides = array<i32: 2, 1>} : memref<1568x32xf32, #tpu.memory_space<vmem>>, vector<14x32xf32>
    %c1093 = arith.constant 1093 : index
    %c0_128 = arith.constant 0 : index
    %221 = tpu.strided_load %arg5[%c1093, %c0_128] {strides = array<i32: 2, 1>} : memref<1568x32xf32, #tpu.memory_space<vmem>>, vector<14x32xf32>
    %222 = arith.maximumf %218, %219 : vector<14x32xf32>
    %223 = arith.maximumf %220, %221 : vector<14x32xf32>
    %224 = arith.maximumf %222, %223 : vector<14x32xf32>
    %225 = arith.truncf %224 : vector<14x32xf32> to vector<14x32xbf16>
    %c19 = arith.constant 19 : index
    %c0_129 = arith.constant 0 : index
    %c0_130 = arith.constant 0 : index
    %226 = vector.load %arg4[%c19, %c0_129, %c0_130] : memref<28x14x32xbf16, #tpu.memory_space<vmem>>, vector<1x14x32xbf16>
    %227 = vector.shape_cast %226 : vector<1x14x32xbf16> to vector<14x32xbf16>
    %228 = vector.shape_cast %225 : vector<14x32xbf16> to vector<1x14x32xbf16>
    tpu.vector_store %arg4[%c19, %c0_129, %c0_130], %228 {strides = array<i32>} : memref<28x14x32xbf16, #tpu.memory_space<vmem>>, vector<1x14x32xbf16>,
    %c1120 = arith.constant 1120 : index
    %c0_131 = arith.constant 0 : index
    %229 = tpu.strided_load %arg5[%c1120, %c0_131] {strides = array<i32: 2, 1>} : memref<1568x32xf32, #tpu.memory_space<vmem>>, vector<14x32xf32>
    %c1121 = arith.constant 1121 : index
    %c0_132 = arith.constant 0 : index
    %230 = tpu.strided_load %arg5[%c1121, %c0_132] {strides = array<i32: 2, 1>} : memref<1568x32xf32, #tpu.memory_space<vmem>>, vector<14x32xf32>
    %c1148 = arith.constant 1148 : index
    %c0_133 = arith.constant 0 : index
    %231 = tpu.strided_load %arg5[%c1148, %c0_133] {strides = array<i32: 2, 1>} : memref<1568x32xf32, #tpu.memory_space<vmem>>, vector<14x32xf32>
    %c1149 = arith.constant 1149 : index
    %c0_134 = arith.constant 0 : index
    %232 = tpu.strided_load %arg5[%c1149, %c0_134] {strides = array<i32: 2, 1>} : memref<1568x32xf32, #tpu.memory_space<vmem>>, vector<14x32xf32>
    %233 = arith.maximumf %229, %230 : vector<14x32xf32>
    %234 = arith.maximumf %231, %232 : vector<14x32xf32>
    %235 = arith.maximumf %233, %234 : vector<14x32xf32>
    %236 = arith.truncf %235 : vector<14x32xf32> to vector<14x32xbf16>
    %c20 = arith.constant 20 : index
    %c0_135 = arith.constant 0 : index
    %c0_136 = arith.constant 0 : index
    %237 = vector.load %arg4[%c20, %c0_135, %c0_136] : memref<28x14x32xbf16, #tpu.memory_space<vmem>>, vector<1x14x32xbf16>
    %238 = vector.shape_cast %237 : vector<1x14x32xbf16> to vector<14x32xbf16>
    %239 = vector.shape_cast %236 : vector<14x32xbf16> to vector<1x14x32xbf16>
    tpu.vector_store %arg4[%c20, %c0_135, %c0_136], %239 {strides = array<i32>} : memref<28x14x32xbf16, #tpu.memory_space<vmem>>, vector<1x14x32xbf16>,
    %c1176 = arith.constant 1176 : index
    %c0_137 = arith.constant 0 : index
    %240 = tpu.strided_load %arg5[%c1176, %c0_137] {strides = array<i32: 2, 1>} : memref<1568x32xf32, #tpu.memory_space<vmem>>, vector<14x32xf32>
    %c1177 = arith.constant 1177 : index
    %c0_138 = arith.constant 0 : index
    %241 = tpu.strided_load %arg5[%c1177, %c0_138] {strides = array<i32: 2, 1>} : memref<1568x32xf32, #tpu.memory_space<vmem>>, vector<14x32xf32>
    %c1204 = arith.constant 1204 : index
    %c0_139 = arith.constant 0 : index
    %242 = tpu.strided_load %arg5[%c1204, %c0_139] {strides = array<i32: 2, 1>} : memref<1568x32xf32, #tpu.memory_space<vmem>>, vector<14x32xf32>
    %c1205 = arith.constant 1205 : index
    %c0_140 = arith.constant 0 : index
    %243 = tpu.strided_load %arg5[%c1205, %c0_140] {strides = array<i32: 2, 1>} : memref<1568x32xf32, #tpu.memory_space<vmem>>, vector<14x32xf32>
    %244 = arith.maximumf %240, %241 : vector<14x32xf32>
    %245 = arith.maximumf %242, %243 : vector<14x32xf32>
    %246 = arith.maximumf %244, %245 : vector<14x32xf32>
    %247 = arith.truncf %246 : vector<14x32xf32> to vector<14x32xbf16>
    %c21 = arith.constant 21 : index
    %c0_141 = arith.constant 0 : index
    %c0_142 = arith.constant 0 : index
    %248 = vector.load %arg4[%c21, %c0_141, %c0_142] : memref<28x14x32xbf16, #tpu.memory_space<vmem>>, vector<1x14x32xbf16>
    %249 = vector.shape_cast %248 : vector<1x14x32xbf16> to vector<14x32xbf16>
    %250 = vector.shape_cast %247 : vector<14x32xbf16> to vector<1x14x32xbf16>
    tpu.vector_store %arg4[%c21, %c0_141, %c0_142], %250 {strides = array<i32>} : memref<28x14x32xbf16, #tpu.memory_space<vmem>>, vector<1x14x32xbf16>,
    %c1232 = arith.constant 1232 : index
    %c0_143 = arith.constant 0 : index
    %251 = tpu.strided_load %arg5[%c1232, %c0_143] {strides = array<i32: 2, 1>} : memref<1568x32xf32, #tpu.memory_space<vmem>>, vector<14x32xf32>
    %c1233 = arith.constant 1233 : index
    %c0_144 = arith.constant 0 : index
    %252 = tpu.strided_load %arg5[%c1233, %c0_144] {strides = array<i32: 2, 1>} : memref<1568x32xf32, #tpu.memory_space<vmem>>, vector<14x32xf32>
    %c1260 = arith.constant 1260 : index
    %c0_145 = arith.constant 0 : index
    %253 = tpu.strided_load %arg5[%c1260, %c0_145] {strides = array<i32: 2, 1>} : memref<1568x32xf32, #tpu.memory_space<vmem>>, vector<14x32xf32>
    %c1261 = arith.constant 1261 : index
    %c0_146 = arith.constant 0 : index
    %254 = tpu.strided_load %arg5[%c1261, %c0_146] {strides = array<i32: 2, 1>} : memref<1568x32xf32, #tpu.memory_space<vmem>>, vector<14x32xf32>
    %255 = arith.maximumf %251, %252 : vector<14x32xf32>
    %256 = arith.maximumf %253, %254 : vector<14x32xf32>
    %257 = arith.maximumf %255, %256 : vector<14x32xf32>
    %258 = arith.truncf %257 : vector<14x32xf32> to vector<14x32xbf16>
    %c22 = arith.constant 22 : index
    %c0_147 = arith.constant 0 : index
    %c0_148 = arith.constant 0 : index
    %259 = vector.load %arg4[%c22, %c0_147, %c0_148] : memref<28x14x32xbf16, #tpu.memory_space<vmem>>, vector<1x14x32xbf16>
    %260 = vector.shape_cast %259 : vector<1x14x32xbf16> to vector<14x32xbf16>
    %261 = vector.shape_cast %258 : vector<14x32xbf16> to vector<1x14x32xbf16>
    tpu.vector_store %arg4[%c22, %c0_147, %c0_148], %261 {strides = array<i32>} : memref<28x14x32xbf16, #tpu.memory_space<vmem>>, vector<1x14x32xbf16>,
    %c1288 = arith.constant 1288 : index
    %c0_149 = arith.constant 0 : index
    %262 = tpu.strided_load %arg5[%c1288, %c0_149] {strides = array<i32: 2, 1>} : memref<1568x32xf32, #tpu.memory_space<vmem>>, vector<14x32xf32>
    %c1289 = arith.constant 1289 : index
    %c0_150 = arith.constant 0 : index
    %263 = tpu.strided_load %arg5[%c1289, %c0_150] {strides = array<i32: 2, 1>} : memref<1568x32xf32, #tpu.memory_space<vmem>>, vector<14x32xf32>
    %c1316 = arith.constant 1316 : index
    %c0_151 = arith.constant 0 : index
    %264 = tpu.strided_load %arg5[%c1316, %c0_151] {strides = array<i32: 2, 1>} : memref<1568x32xf32, #tpu.memory_space<vmem>>, vector<14x32xf32>
    %c1317 = arith.constant 1317 : index
    %c0_152 = arith.constant 0 : index
    %265 = tpu.strided_load %arg5[%c1317, %c0_152] {strides = array<i32: 2, 1>} : memref<1568x32xf32, #tpu.memory_space<vmem>>, vector<14x32xf32>
    %266 = arith.maximumf %262, %263 : vector<14x32xf32>
    %267 = arith.maximumf %264, %265 : vector<14x32xf32>
    %268 = arith.maximumf %266, %267 : vector<14x32xf32>
    %269 = arith.truncf %268 : vector<14x32xf32> to vector<14x32xbf16>
    %c23 = arith.constant 23 : index
    %c0_153 = arith.constant 0 : index
    %c0_154 = arith.constant 0 : index
    %270 = vector.load %arg4[%c23, %c0_153, %c0_154] : memref<28x14x32xbf16, #tpu.memory_space<vmem>>, vector<1x14x32xbf16>
    %271 = vector.shape_cast %270 : vector<1x14x32xbf16> to vector<14x32xbf16>
    %272 = vector.shape_cast %269 : vector<14x32xbf16> to vector<1x14x32xbf16>
    tpu.vector_store %arg4[%c23, %c0_153, %c0_154], %272 {strides = array<i32>} : memref<28x14x32xbf16, #tpu.memory_space<vmem>>, vector<1x14x32xbf16>,
    %c1344 = arith.constant 1344 : index
    %c0_155 = arith.constant 0 : index
    %273 = tpu.strided_load %arg5[%c1344, %c0_155] {strides = array<i32: 2, 1>} : memref<1568x32xf32, #tpu.memory_space<vmem>>, vector<14x32xf32>
    %c1345 = arith.constant 1345 : index
    %c0_156 = arith.constant 0 : index
    %274 = tpu.strided_load %arg5[%c1345, %c0_156] {strides = array<i32: 2, 1>} : memref<1568x32xf32, #tpu.memory_space<vmem>>, vector<14x32xf32>
    %c1372 = arith.constant 1372 : index
    %c0_157 = arith.constant 0 : index
    %275 = tpu.strided_load %arg5[%c1372, %c0_157] {strides = array<i32: 2, 1>} : memref<1568x32xf32, #tpu.memory_space<vmem>>, vector<14x32xf32>
    %c1373 = arith.constant 1373 : index
    %c0_158 = arith.constant 0 : index
    %276 = tpu.strided_load %arg5[%c1373, %c0_158] {strides = array<i32: 2, 1>} : memref<1568x32xf32, #tpu.memory_space<vmem>>, vector<14x32xf32>
    %277 = arith.maximumf %273, %274 : vector<14x32xf32>
    %278 = arith.maximumf %275, %276 : vector<14x32xf32>
    %279 = arith.maximumf %277, %278 : vector<14x32xf32>
    %280 = arith.truncf %279 : vector<14x32xf32> to vector<14x32xbf16>
    %c24 = arith.constant 24 : index
    %c0_159 = arith.constant 0 : index
    %c0_160 = arith.constant 0 : index
    %281 = vector.load %arg4[%c24, %c0_159, %c0_160] : memref<28x14x32xbf16, #tpu.memory_space<vmem>>, vector<1x14x32xbf16>
    %282 = vector.shape_cast %281 : vector<1x14x32xbf16> to vector<14x32xbf16>
    %283 = vector.shape_cast %280 : vector<14x32xbf16> to vector<1x14x32xbf16>
    tpu.vector_store %arg4[%c24, %c0_159, %c0_160], %283 {strides = array<i32>} : memref<28x14x32xbf16, #tpu.memory_space<vmem>>, vector<1x14x32xbf16>,
    %c1400 = arith.constant 1400 : index
    %c0_161 = arith.constant 0 : index
    %284 = tpu.strided_load %arg5[%c1400, %c0_161] {strides = array<i32: 2, 1>} : memref<1568x32xf32, #tpu.memory_space<vmem>>, vector<14x32xf32>
    %c1401 = arith.constant 1401 : index
    %c0_162 = arith.constant 0 : index
    %285 = tpu.strided_load %arg5[%c1401, %c0_162] {strides = array<i32: 2, 1>} : memref<1568x32xf32, #tpu.memory_space<vmem>>, vector<14x32xf32>
    %c1428 = arith.constant 1428 : index
    %c0_163 = arith.constant 0 : index
    %286 = tpu.strided_load %arg5[%c1428, %c0_163] {strides = array<i32: 2, 1>} : memref<1568x32xf32, #tpu.memory_space<vmem>>, vector<14x32xf32>
    %c1429 = arith.constant 1429 : index
    %c0_164 = arith.constant 0 : index
    %287 = tpu.strided_load %arg5[%c1429, %c0_164] {strides = array<i32: 2, 1>} : memref<1568x32xf32, #tpu.memory_space<vmem>>, vector<14x32xf32>
    %288 = arith.maximumf %284, %285 : vector<14x32xf32>
    %289 = arith.maximumf %286, %287 : vector<14x32xf32>
    %290 = arith.maximumf %288, %289 : vector<14x32xf32>
    %291 = arith.truncf %290 : vector<14x32xf32> to vector<14x32xbf16>
    %c25 = arith.constant 25 : index
    %c0_165 = arith.constant 0 : index
    %c0_166 = arith.constant 0 : index
    %292 = vector.load %arg4[%c25, %c0_165, %c0_166] : memref<28x14x32xbf16, #tpu.memory_space<vmem>>, vector<1x14x32xbf16>
    %293 = vector.shape_cast %292 : vector<1x14x32xbf16> to vector<14x32xbf16>
    %294 = vector.shape_cast %291 : vector<14x32xbf16> to vector<1x14x32xbf16>
    tpu.vector_store %arg4[%c25, %c0_165, %c0_166], %294 {strides = array<i32>} : memref<28x14x32xbf16, #tpu.memory_space<vmem>>, vector<1x14x32xbf16>,
    %c1456 = arith.constant 1456 : index
    %c0_167 = arith.constant 0 : index
    %295 = tpu.strided_load %arg5[%c1456, %c0_167] {strides = array<i32: 2, 1>} : memref<1568x32xf32, #tpu.memory_space<vmem>>, vector<14x32xf32>
    %c1457 = arith.constant 1457 : index
    %c0_168 = arith.constant 0 : index
    %296 = tpu.strided_load %arg5[%c1457, %c0_168] {strides = array<i32: 2, 1>} : memref<1568x32xf32, #tpu.memory_space<vmem>>, vector<14x32xf32>
    %c1484 = arith.constant 1484 : index
    %c0_169 = arith.constant 0 : index
    %297 = tpu.strided_load %arg5[%c1484, %c0_169] {strides = array<i32: 2, 1>} : memref<1568x32xf32, #tpu.memory_space<vmem>>, vector<14x32xf32>
    %c1485 = arith.constant 1485 : index
    %c0_170 = arith.constant 0 : index
    %298 = tpu.strided_load %arg5[%c1485, %c0_170] {strides = array<i32: 2, 1>} : memref<1568x32xf32, #tpu.memory_space<vmem>>, vector<14x32xf32>
    %299 = arith.maximumf %295, %296 : vector<14x32xf32>
    %300 = arith.maximumf %297, %298 : vector<14x32xf32>
    %301 = arith.maximumf %299, %300 : vector<14x32xf32>
    %302 = arith.truncf %301 : vector<14x32xf32> to vector<14x32xbf16>
    %c26 = arith.constant 26 : index
    %c0_171 = arith.constant 0 : index
    %c0_172 = arith.constant 0 : index
    %303 = vector.load %arg4[%c26, %c0_171, %c0_172] : memref<28x14x32xbf16, #tpu.memory_space<vmem>>, vector<1x14x32xbf16>
    %304 = vector.shape_cast %303 : vector<1x14x32xbf16> to vector<14x32xbf16>
    %305 = vector.shape_cast %302 : vector<14x32xbf16> to vector<1x14x32xbf16>
    tpu.vector_store %arg4[%c26, %c0_171, %c0_172], %305 {strides = array<i32>} : memref<28x14x32xbf16, #tpu.memory_space<vmem>>, vector<1x14x32xbf16>,
    %c1512 = arith.constant 1512 : index
    %c0_173 = arith.constant 0 : index
    %306 = tpu.strided_load %arg5[%c1512, %c0_173] {strides = array<i32: 2, 1>} : memref<1568x32xf32, #tpu.memory_space<vmem>>, vector<14x32xf32>
    %c1513 = arith.constant 1513 : index
    %c0_174 = arith.constant 0 : index
    %307 = tpu.strided_load %arg5[%c1513, %c0_174] {strides = array<i32: 2, 1>} : memref<1568x32xf32, #tpu.memory_space<vmem>>, vector<14x32xf32>
    %c1540 = arith.constant 1540 : index
    %c0_175 = arith.constant 0 : index
    %308 = tpu.strided_load %arg5[%c1540, %c0_175] {strides = array<i32: 2, 1>} : memref<1568x32xf32, #tpu.memory_space<vmem>>, vector<14x32xf32>
    %c1541 = arith.constant 1541 : index
    %c0_176 = arith.constant 0 : index
    %309 = tpu.strided_load %arg5[%c1541, %c0_176] {strides = array<i32: 2, 1>} : memref<1568x32xf32, #tpu.memory_space<vmem>>, vector<14x32xf32>
    %310 = arith.maximumf %306, %307 : vector<14x32xf32>
    %311 = arith.maximumf %308, %309 : vector<14x32xf32>
    %312 = arith.maximumf %310, %311 : vector<14x32xf32>
    %313 = arith.truncf %312 : vector<14x32xf32> to vector<14x32xbf16>
    %c27 = arith.constant 27 : index
    %c0_177 = arith.constant 0 : index
    %c0_178 = arith.constant 0 : index
    %314 = vector.load %arg4[%c27, %c0_177, %c0_178] : memref<28x14x32xbf16, #tpu.memory_space<vmem>>, vector<1x14x32xbf16>
    %315 = vector.shape_cast %314 : vector<1x14x32xbf16> to vector<14x32xbf16>
    %316 = vector.shape_cast %313 : vector<14x32xbf16> to vector<1x14x32xbf16>
    tpu.vector_store %arg4[%c27, %c0_177, %c0_178], %316 {strides = array<i32>} : memref<28x14x32xbf16, #tpu.memory_space<vmem>>, vector<1x14x32xbf16>,
    return
  }
  func.func @transform_0(%arg0: i32) -> (i32, i32) {
    %c0_i32 = arith.constant 0 : i32
    %c0_i32_0 = arith.constant 0 : i32
    return %arg0, %c0_i32 : i32, i32
  }
  func.func @transform_1(%arg0: i32) -> (i32, i32) {
    %c0_i32 = arith.constant 0 : i32
    %c0_i32_0 = arith.constant 0 : i32
    %c0_i32_1 = arith.constant 0 : i32
    return %c0_i32, %c0_i32_0 : i32, i32
  }
  func.func @transform_2(%arg0: i32) -> (i32, i32) {
    %c0_i32 = arith.constant 0 : i32
    %c0_i32_0 = arith.constant 0 : i32
    %c0_i32_1 = arith.constant 0 : i32
    return %c0_i32, %c0_i32_0 : i32, i32
  }
  func.func @transform_3(%arg0: i32) -> (i32, i32, i32) {
    %c0_i32 = arith.constant 0 : i32
    %c0_i32_0 = arith.constant 0 : i32
    %c0_i32_1 = arith.constant 0 : i32
    return %arg0, %c0_i32, %c0_i32_0 : i32, i32, i32
  }
}

module attributes {stable_mosaic.version = 11 : i64} {
  func.func @_conv2_tap_pool_kernel(%arg0: i32, %arg1: memref<576x32xbf16, #tpu.memory_space<vmem>>, %arg2: memref<288x64xbf16, #tpu.memory_space<vmem>>, %arg3: memref<1x64xf32, #tpu.memory_space<vmem>>, %arg4: memref<14x7x64xbf16, #tpu.memory_space<vmem>>, %arg5: memref<224x64xf32, #tpu.memory_space<vmem>>) attributes {dimension_semantics = [#tpu.dimension_semantics<parallel>], iteration_bounds = array<i64: 1>, scalar_prefetch = 0 : i64, scratch_operands = 1 : i64, tpu.core_type = #tpu.core_type<tc>, window_params = [{transform_indices = @transform_0, window_bounds = array<i64: 576, 32>}, {pipeline_mode = #tpu.pipeline_mode<synchronous>, transform_indices = @transform_1, window_bounds = array<i64: 288, 64>}, {pipeline_mode = #tpu.pipeline_mode<synchronous>, transform_indices = @transform_2, window_bounds = array<i64: 1, 64>}, {transform_indices = @transform_3, window_bounds = array<i64: 14, 7, 64>}]} {
    %c0 = arith.constant 0 : index
    %c0_0 = arith.constant 0 : index
    %0 = vector.load %arg1[%c0, %c0_0] : memref<576x32xbf16, #tpu.memory_space<vmem>>, vector<224x32xbf16>
    %c0_1 = arith.constant 0 : index
    %c0_2 = arith.constant 0 : index
    %1 = vector.load %arg2[%c0_1, %c0_2] : memref<288x64xbf16, #tpu.memory_space<vmem>>, vector<32x64xbf16>
    %cst = arith.constant dense<0.000000e+00> : vector<224x64xf32>
    %2 = tpu.matmul %0, %1, %cst {dimension_numbers = #tpu.dot_dimension_numbers<[1], [0], [0], [1], [0, 0, 1, 1], [], []>} : vector<224x32xbf16>, vector<32x64xbf16>, vector<224x64xf32> -> vector<224x64xf32>
    %c1 = arith.constant 1 : index
    %c0_3 = arith.constant 0 : index
    %3 = vector.load %arg1[%c1, %c0_3] : memref<576x32xbf16, #tpu.memory_space<vmem>>, vector<224x32xbf16>
    %c32 = arith.constant 32 : index
    %c0_4 = arith.constant 0 : index
    %4 = vector.load %arg2[%c32, %c0_4] : memref<288x64xbf16, #tpu.memory_space<vmem>>, vector<32x64xbf16>
    %cst_5 = arith.constant dense<0.000000e+00> : vector<224x64xf32>
    %5 = tpu.matmul %3, %4, %cst_5 {dimension_numbers = #tpu.dot_dimension_numbers<[1], [0], [0], [1], [0, 0, 1, 1], [], []>} : vector<224x32xbf16>, vector<32x64xbf16>, vector<224x64xf32> -> vector<224x64xf32>
    %6 = arith.addf %2, %5 : vector<224x64xf32>
    %c2 = arith.constant 2 : index
    %c0_6 = arith.constant 0 : index
    %7 = vector.load %arg1[%c2, %c0_6] : memref<576x32xbf16, #tpu.memory_space<vmem>>, vector<224x32xbf16>
    %c64 = arith.constant 64 : index
    %c0_7 = arith.constant 0 : index
    %8 = vector.load %arg2[%c64, %c0_7] : memref<288x64xbf16, #tpu.memory_space<vmem>>, vector<32x64xbf16>
    %cst_8 = arith.constant dense<0.000000e+00> : vector<224x64xf32>
    %9 = tpu.matmul %7, %8, %cst_8 {dimension_numbers = #tpu.dot_dimension_numbers<[1], [0], [0], [1], [0, 0, 1, 1], [], []>} : vector<224x32xbf16>, vector<32x64xbf16>, vector<224x64xf32> -> vector<224x64xf32>
    %10 = arith.addf %6, %9 : vector<224x64xf32>
    %c16 = arith.constant 16 : index
    %c0_9 = arith.constant 0 : index
    %11 = vector.load %arg1[%c16, %c0_9] : memref<576x32xbf16, #tpu.memory_space<vmem>>, vector<224x32xbf16>
    %c96 = arith.constant 96 : index
    %c0_10 = arith.constant 0 : index
    %12 = vector.load %arg2[%c96, %c0_10] : memref<288x64xbf16, #tpu.memory_space<vmem>>, vector<32x64xbf16>
    %cst_11 = arith.constant dense<0.000000e+00> : vector<224x64xf32>
    %13 = tpu.matmul %11, %12, %cst_11 {dimension_numbers = #tpu.dot_dimension_numbers<[1], [0], [0], [1], [0, 0, 1, 1], [], []>} : vector<224x32xbf16>, vector<32x64xbf16>, vector<224x64xf32> -> vector<224x64xf32>
    %14 = arith.addf %10, %13 : vector<224x64xf32>
    %c17 = arith.constant 17 : index
    %c0_12 = arith.constant 0 : index
    %15 = vector.load %arg1[%c17, %c0_12] : memref<576x32xbf16, #tpu.memory_space<vmem>>, vector<224x32xbf16>
    %c128 = arith.constant 128 : index
    %c0_13 = arith.constant 0 : index
    %16 = vector.load %arg2[%c128, %c0_13] : memref<288x64xbf16, #tpu.memory_space<vmem>>, vector<32x64xbf16>
    %cst_14 = arith.constant dense<0.000000e+00> : vector<224x64xf32>
    %17 = tpu.matmul %15, %16, %cst_14 {dimension_numbers = #tpu.dot_dimension_numbers<[1], [0], [0], [1], [0, 0, 1, 1], [], []>} : vector<224x32xbf16>, vector<32x64xbf16>, vector<224x64xf32> -> vector<224x64xf32>
    %18 = arith.addf %14, %17 : vector<224x64xf32>
    %c18 = arith.constant 18 : index
    %c0_15 = arith.constant 0 : index
    %19 = vector.load %arg1[%c18, %c0_15] : memref<576x32xbf16, #tpu.memory_space<vmem>>, vector<224x32xbf16>
    %c160 = arith.constant 160 : index
    %c0_16 = arith.constant 0 : index
    %20 = vector.load %arg2[%c160, %c0_16] : memref<288x64xbf16, #tpu.memory_space<vmem>>, vector<32x64xbf16>
    %cst_17 = arith.constant dense<0.000000e+00> : vector<224x64xf32>
    %21 = tpu.matmul %19, %20, %cst_17 {dimension_numbers = #tpu.dot_dimension_numbers<[1], [0], [0], [1], [0, 0, 1, 1], [], []>} : vector<224x32xbf16>, vector<32x64xbf16>, vector<224x64xf32> -> vector<224x64xf32>
    %22 = arith.addf %18, %21 : vector<224x64xf32>
    %c32_18 = arith.constant 32 : index
    %c0_19 = arith.constant 0 : index
    %23 = vector.load %arg1[%c32_18, %c0_19] : memref<576x32xbf16, #tpu.memory_space<vmem>>, vector<224x32xbf16>
    %c192 = arith.constant 192 : index
    %c0_20 = arith.constant 0 : index
    %24 = vector.load %arg2[%c192, %c0_20] : memref<288x64xbf16, #tpu.memory_space<vmem>>, vector<32x64xbf16>
    %cst_21 = arith.constant dense<0.000000e+00> : vector<224x64xf32>
    %25 = tpu.matmul %23, %24, %cst_21 {dimension_numbers = #tpu.dot_dimension_numbers<[1], [0], [0], [1], [0, 0, 1, 1], [], []>} : vector<224x32xbf16>, vector<32x64xbf16>, vector<224x64xf32> -> vector<224x64xf32>
    %26 = arith.addf %22, %25 : vector<224x64xf32>
    %c33 = arith.constant 33 : index
    %c0_22 = arith.constant 0 : index
    %27 = vector.load %arg1[%c33, %c0_22] : memref<576x32xbf16, #tpu.memory_space<vmem>>, vector<224x32xbf16>
    %c224 = arith.constant 224 : index
    %c0_23 = arith.constant 0 : index
    %28 = vector.load %arg2[%c224, %c0_23] : memref<288x64xbf16, #tpu.memory_space<vmem>>, vector<32x64xbf16>
    %cst_24 = arith.constant dense<0.000000e+00> : vector<224x64xf32>
    %29 = tpu.matmul %27, %28, %cst_24 {dimension_numbers = #tpu.dot_dimension_numbers<[1], [0], [0], [1], [0, 0, 1, 1], [], []>} : vector<224x32xbf16>, vector<32x64xbf16>, vector<224x64xf32> -> vector<224x64xf32>
    %30 = arith.addf %26, %29 : vector<224x64xf32>
    %c34 = arith.constant 34 : index
    %c0_25 = arith.constant 0 : index
    %31 = vector.load %arg1[%c34, %c0_25] : memref<576x32xbf16, #tpu.memory_space<vmem>>, vector<224x32xbf16>
    %c256 = arith.constant 256 : index
    %c0_26 = arith.constant 0 : index
    %32 = vector.load %arg2[%c256, %c0_26] : memref<288x64xbf16, #tpu.memory_space<vmem>>, vector<32x64xbf16>
    %cst_27 = arith.constant dense<0.000000e+00> : vector<224x64xf32>
    %33 = tpu.matmul %31, %32, %cst_27 {dimension_numbers = #tpu.dot_dimension_numbers<[1], [0], [0], [1], [0, 0, 1, 1], [], []>} : vector<224x32xbf16>, vector<32x64xbf16>, vector<224x64xf32> -> vector<224x64xf32>
    %34 = arith.addf %30, %33 : vector<224x64xf32>
    %c0_28 = arith.constant 0 : index
    %c0_29 = arith.constant 0 : index
    %35 = vector.load %arg3[%c0_28, %c0_29] : memref<1x64xf32, #tpu.memory_space<vmem>>, vector<1x64xf32>
    %36 = vector.broadcast %35 : vector<1x64xf32> to vector<224x64xf32>
    %37 = arith.addf %34, %36 : vector<224x64xf32>
    %cst_30 = arith.constant 0.000000e+00 : f32
    %38 = vector.broadcast %cst_30 : f32 to vector<224x64xf32>
    %39 = arith.maximumf %37, %38 : vector<224x64xf32>
    %c0_31 = arith.constant 0 : index
    %c0_32 = arith.constant 0 : index
    %40 = vector.load %arg5[%c0_31, %c0_32] : memref<224x64xf32, #tpu.memory_space<vmem>>, vector<224x64xf32>
    tpu.vector_store %arg5[%c0_31, %c0_32], %39 {strides = array<i32>} : memref<224x64xf32, #tpu.memory_space<vmem>>, vector<224x64xf32>,
    %c0_33 = arith.constant 0 : index
    %c0_34 = arith.constant 0 : index
    %41 = tpu.strided_load %arg5[%c0_33, %c0_34] {strides = array<i32: 2, 1>} : memref<224x64xf32, #tpu.memory_space<vmem>>, vector<7x64xf32>
    %c1_35 = arith.constant 1 : index
    %c0_36 = arith.constant 0 : index
    %42 = tpu.strided_load %arg5[%c1_35, %c0_36] {strides = array<i32: 2, 1>} : memref<224x64xf32, #tpu.memory_space<vmem>>, vector<7x64xf32>
    %c16_37 = arith.constant 16 : index
    %c0_38 = arith.constant 0 : index
    %43 = tpu.strided_load %arg5[%c16_37, %c0_38] {strides = array<i32: 2, 1>} : memref<224x64xf32, #tpu.memory_space<vmem>>, vector<7x64xf32>
    %c17_39 = arith.constant 17 : index
    %c0_40 = arith.constant 0 : index
    %44 = tpu.strided_load %arg5[%c17_39, %c0_40] {strides = array<i32: 2, 1>} : memref<224x64xf32, #tpu.memory_space<vmem>>, vector<7x64xf32>
    %45 = arith.maximumf %41, %42 : vector<7x64xf32>
    %46 = arith.maximumf %43, %44 : vector<7x64xf32>
    %47 = arith.maximumf %45, %46 : vector<7x64xf32>
    %48 = arith.truncf %47 : vector<7x64xf32> to vector<7x64xbf16>
    %c0_41 = arith.constant 0 : index
    %c0_42 = arith.constant 0 : index
    %c0_43 = arith.constant 0 : index
    %49 = vector.load %arg4[%c0_41, %c0_42, %c0_43] : memref<14x7x64xbf16, #tpu.memory_space<vmem>>, vector<1x7x64xbf16>
    %50 = vector.shape_cast %49 : vector<1x7x64xbf16> to vector<7x64xbf16>
    %51 = vector.shape_cast %48 : vector<7x64xbf16> to vector<1x7x64xbf16>
    tpu.vector_store %arg4[%c0_41, %c0_42, %c0_43], %51 {strides = array<i32>} : memref<14x7x64xbf16, #tpu.memory_space<vmem>>, vector<1x7x64xbf16>,
    %c32_44 = arith.constant 32 : index
    %c0_45 = arith.constant 0 : index
    %52 = tpu.strided_load %arg5[%c32_44, %c0_45] {strides = array<i32: 2, 1>} : memref<224x64xf32, #tpu.memory_space<vmem>>, vector<7x64xf32>
    %c33_46 = arith.constant 33 : index
    %c0_47 = arith.constant 0 : index
    %53 = tpu.strided_load %arg5[%c33_46, %c0_47] {strides = array<i32: 2, 1>} : memref<224x64xf32, #tpu.memory_space<vmem>>, vector<7x64xf32>
    %c48 = arith.constant 48 : index
    %c0_48 = arith.constant 0 : index
    %54 = tpu.strided_load %arg5[%c48, %c0_48] {strides = array<i32: 2, 1>} : memref<224x64xf32, #tpu.memory_space<vmem>>, vector<7x64xf32>
    %c49 = arith.constant 49 : index
    %c0_49 = arith.constant 0 : index
    %55 = tpu.strided_load %arg5[%c49, %c0_49] {strides = array<i32: 2, 1>} : memref<224x64xf32, #tpu.memory_space<vmem>>, vector<7x64xf32>
    %56 = arith.maximumf %52, %53 : vector<7x64xf32>
    %57 = arith.maximumf %54, %55 : vector<7x64xf32>
    %58 = arith.maximumf %56, %57 : vector<7x64xf32>
    %59 = arith.truncf %58 : vector<7x64xf32> to vector<7x64xbf16>
    %c1_50 = arith.constant 1 : index
    %c0_51 = arith.constant 0 : index
    %c0_52 = arith.constant 0 : index
    %60 = vector.load %arg4[%c1_50, %c0_51, %c0_52] : memref<14x7x64xbf16, #tpu.memory_space<vmem>>, vector<1x7x64xbf16>
    %61 = vector.shape_cast %60 : vector<1x7x64xbf16> to vector<7x64xbf16>
    %62 = vector.shape_cast %59 : vector<7x64xbf16> to vector<1x7x64xbf16>
    tpu.vector_store %arg4[%c1_50, %c0_51, %c0_52], %62 {strides = array<i32>} : memref<14x7x64xbf16, #tpu.memory_space<vmem>>, vector<1x7x64xbf16>,
    %c64_53 = arith.constant 64 : index
    %c0_54 = arith.constant 0 : index
    %63 = tpu.strided_load %arg5[%c64_53, %c0_54] {strides = array<i32: 2, 1>} : memref<224x64xf32, #tpu.memory_space<vmem>>, vector<7x64xf32>
    %c65 = arith.constant 65 : index
    %c0_55 = arith.constant 0 : index
    %64 = tpu.strided_load %arg5[%c65, %c0_55] {strides = array<i32: 2, 1>} : memref<224x64xf32, #tpu.memory_space<vmem>>, vector<7x64xf32>
    %c80 = arith.constant 80 : index
    %c0_56 = arith.constant 0 : index
    %65 = tpu.strided_load %arg5[%c80, %c0_56] {strides = array<i32: 2, 1>} : memref<224x64xf32, #tpu.memory_space<vmem>>, vector<7x64xf32>
    %c81 = arith.constant 81 : index
    %c0_57 = arith.constant 0 : index
    %66 = tpu.strided_load %arg5[%c81, %c0_57] {strides = array<i32: 2, 1>} : memref<224x64xf32, #tpu.memory_space<vmem>>, vector<7x64xf32>
    %67 = arith.maximumf %63, %64 : vector<7x64xf32>
    %68 = arith.maximumf %65, %66 : vector<7x64xf32>
    %69 = arith.maximumf %67, %68 : vector<7x64xf32>
    %70 = arith.truncf %69 : vector<7x64xf32> to vector<7x64xbf16>
    %c2_58 = arith.constant 2 : index
    %c0_59 = arith.constant 0 : index
    %c0_60 = arith.constant 0 : index
    %71 = vector.load %arg4[%c2_58, %c0_59, %c0_60] : memref<14x7x64xbf16, #tpu.memory_space<vmem>>, vector<1x7x64xbf16>
    %72 = vector.shape_cast %71 : vector<1x7x64xbf16> to vector<7x64xbf16>
    %73 = vector.shape_cast %70 : vector<7x64xbf16> to vector<1x7x64xbf16>
    tpu.vector_store %arg4[%c2_58, %c0_59, %c0_60], %73 {strides = array<i32>} : memref<14x7x64xbf16, #tpu.memory_space<vmem>>, vector<1x7x64xbf16>,
    %c96_61 = arith.constant 96 : index
    %c0_62 = arith.constant 0 : index
    %74 = tpu.strided_load %arg5[%c96_61, %c0_62] {strides = array<i32: 2, 1>} : memref<224x64xf32, #tpu.memory_space<vmem>>, vector<7x64xf32>
    %c97 = arith.constant 97 : index
    %c0_63 = arith.constant 0 : index
    %75 = tpu.strided_load %arg5[%c97, %c0_63] {strides = array<i32: 2, 1>} : memref<224x64xf32, #tpu.memory_space<vmem>>, vector<7x64xf32>
    %c112 = arith.constant 112 : index
    %c0_64 = arith.constant 0 : index
    %76 = tpu.strided_load %arg5[%c112, %c0_64] {strides = array<i32: 2, 1>} : memref<224x64xf32, #tpu.memory_space<vmem>>, vector<7x64xf32>
    %c113 = arith.constant 113 : index
    %c0_65 = arith.constant 0 : index
    %77 = tpu.strided_load %arg5[%c113, %c0_65] {strides = array<i32: 2, 1>} : memref<224x64xf32, #tpu.memory_space<vmem>>, vector<7x64xf32>
    %78 = arith.maximumf %74, %75 : vector<7x64xf32>
    %79 = arith.maximumf %76, %77 : vector<7x64xf32>
    %80 = arith.maximumf %78, %79 : vector<7x64xf32>
    %81 = arith.truncf %80 : vector<7x64xf32> to vector<7x64xbf16>
    %c3 = arith.constant 3 : index
    %c0_66 = arith.constant 0 : index
    %c0_67 = arith.constant 0 : index
    %82 = vector.load %arg4[%c3, %c0_66, %c0_67] : memref<14x7x64xbf16, #tpu.memory_space<vmem>>, vector<1x7x64xbf16>
    %83 = vector.shape_cast %82 : vector<1x7x64xbf16> to vector<7x64xbf16>
    %84 = vector.shape_cast %81 : vector<7x64xbf16> to vector<1x7x64xbf16>
    tpu.vector_store %arg4[%c3, %c0_66, %c0_67], %84 {strides = array<i32>} : memref<14x7x64xbf16, #tpu.memory_space<vmem>>, vector<1x7x64xbf16>,
    %c128_68 = arith.constant 128 : index
    %c0_69 = arith.constant 0 : index
    %85 = tpu.strided_load %arg5[%c128_68, %c0_69] {strides = array<i32: 2, 1>} : memref<224x64xf32, #tpu.memory_space<vmem>>, vector<7x64xf32>
    %c129 = arith.constant 129 : index
    %c0_70 = arith.constant 0 : index
    %86 = tpu.strided_load %arg5[%c129, %c0_70] {strides = array<i32: 2, 1>} : memref<224x64xf32, #tpu.memory_space<vmem>>, vector<7x64xf32>
    %c144 = arith.constant 144 : index
    %c0_71 = arith.constant 0 : index
    %87 = tpu.strided_load %arg5[%c144, %c0_71] {strides = array<i32: 2, 1>} : memref<224x64xf32, #tpu.memory_space<vmem>>, vector<7x64xf32>
    %c145 = arith.constant 145 : index
    %c0_72 = arith.constant 0 : index
    %88 = tpu.strided_load %arg5[%c145, %c0_72] {strides = array<i32: 2, 1>} : memref<224x64xf32, #tpu.memory_space<vmem>>, vector<7x64xf32>
    %89 = arith.maximumf %85, %86 : vector<7x64xf32>
    %90 = arith.maximumf %87, %88 : vector<7x64xf32>
    %91 = arith.maximumf %89, %90 : vector<7x64xf32>
    %92 = arith.truncf %91 : vector<7x64xf32> to vector<7x64xbf16>
    %c4 = arith.constant 4 : index
    %c0_73 = arith.constant 0 : index
    %c0_74 = arith.constant 0 : index
    %93 = vector.load %arg4[%c4, %c0_73, %c0_74] : memref<14x7x64xbf16, #tpu.memory_space<vmem>>, vector<1x7x64xbf16>
    %94 = vector.shape_cast %93 : vector<1x7x64xbf16> to vector<7x64xbf16>
    %95 = vector.shape_cast %92 : vector<7x64xbf16> to vector<1x7x64xbf16>
    tpu.vector_store %arg4[%c4, %c0_73, %c0_74], %95 {strides = array<i32>} : memref<14x7x64xbf16, #tpu.memory_space<vmem>>, vector<1x7x64xbf16>,
    %c160_75 = arith.constant 160 : index
    %c0_76 = arith.constant 0 : index
    %96 = tpu.strided_load %arg5[%c160_75, %c0_76] {strides = array<i32: 2, 1>} : memref<224x64xf32, #tpu.memory_space<vmem>>, vector<7x64xf32>
    %c161 = arith.constant 161 : index
    %c0_77 = arith.constant 0 : index
    %97 = tpu.strided_load %arg5[%c161, %c0_77] {strides = array<i32: 2, 1>} : memref<224x64xf32, #tpu.memory_space<vmem>>, vector<7x64xf32>
    %c176 = arith.constant 176 : index
    %c0_78 = arith.constant 0 : index
    %98 = tpu.strided_load %arg5[%c176, %c0_78] {strides = array<i32: 2, 1>} : memref<224x64xf32, #tpu.memory_space<vmem>>, vector<7x64xf32>
    %c177 = arith.constant 177 : index
    %c0_79 = arith.constant 0 : index
    %99 = tpu.strided_load %arg5[%c177, %c0_79] {strides = array<i32: 2, 1>} : memref<224x64xf32, #tpu.memory_space<vmem>>, vector<7x64xf32>
    %100 = arith.maximumf %96, %97 : vector<7x64xf32>
    %101 = arith.maximumf %98, %99 : vector<7x64xf32>
    %102 = arith.maximumf %100, %101 : vector<7x64xf32>
    %103 = arith.truncf %102 : vector<7x64xf32> to vector<7x64xbf16>
    %c5 = arith.constant 5 : index
    %c0_80 = arith.constant 0 : index
    %c0_81 = arith.constant 0 : index
    %104 = vector.load %arg4[%c5, %c0_80, %c0_81] : memref<14x7x64xbf16, #tpu.memory_space<vmem>>, vector<1x7x64xbf16>
    %105 = vector.shape_cast %104 : vector<1x7x64xbf16> to vector<7x64xbf16>
    %106 = vector.shape_cast %103 : vector<7x64xbf16> to vector<1x7x64xbf16>
    tpu.vector_store %arg4[%c5, %c0_80, %c0_81], %106 {strides = array<i32>} : memref<14x7x64xbf16, #tpu.memory_space<vmem>>, vector<1x7x64xbf16>,
    %c192_82 = arith.constant 192 : index
    %c0_83 = arith.constant 0 : index
    %107 = tpu.strided_load %arg5[%c192_82, %c0_83] {strides = array<i32: 2, 1>} : memref<224x64xf32, #tpu.memory_space<vmem>>, vector<7x64xf32>
    %c193 = arith.constant 193 : index
    %c0_84 = arith.constant 0 : index
    %108 = tpu.strided_load %arg5[%c193, %c0_84] {strides = array<i32: 2, 1>} : memref<224x64xf32, #tpu.memory_space<vmem>>, vector<7x64xf32>
    %c208 = arith.constant 208 : index
    %c0_85 = arith.constant 0 : index
    %109 = tpu.strided_load %arg5[%c208, %c0_85] {strides = array<i32: 2, 1>} : memref<224x64xf32, #tpu.memory_space<vmem>>, vector<7x64xf32>
    %c209 = arith.constant 209 : index
    %c0_86 = arith.constant 0 : index
    %110 = tpu.strided_load %arg5[%c209, %c0_86] {strides = array<i32: 2, 1>} : memref<224x64xf32, #tpu.memory_space<vmem>>, vector<7x64xf32>
    %111 = arith.maximumf %107, %108 : vector<7x64xf32>
    %112 = arith.maximumf %109, %110 : vector<7x64xf32>
    %113 = arith.maximumf %111, %112 : vector<7x64xf32>
    %114 = arith.truncf %113 : vector<7x64xf32> to vector<7x64xbf16>
    %c6 = arith.constant 6 : index
    %c0_87 = arith.constant 0 : index
    %c0_88 = arith.constant 0 : index
    %115 = vector.load %arg4[%c6, %c0_87, %c0_88] : memref<14x7x64xbf16, #tpu.memory_space<vmem>>, vector<1x7x64xbf16>
    %116 = vector.shape_cast %115 : vector<1x7x64xbf16> to vector<7x64xbf16>
    %117 = vector.shape_cast %114 : vector<7x64xbf16> to vector<1x7x64xbf16>
    tpu.vector_store %arg4[%c6, %c0_87, %c0_88], %117 {strides = array<i32>} : memref<14x7x64xbf16, #tpu.memory_space<vmem>>, vector<1x7x64xbf16>,
    %c288 = arith.constant 288 : index
    %c0_89 = arith.constant 0 : index
    %118 = vector.load %arg1[%c288, %c0_89] : memref<576x32xbf16, #tpu.memory_space<vmem>>, vector<224x32xbf16>
    %c0_90 = arith.constant 0 : index
    %c0_91 = arith.constant 0 : index
    %119 = vector.load %arg2[%c0_90, %c0_91] : memref<288x64xbf16, #tpu.memory_space<vmem>>, vector<32x64xbf16>
    %cst_92 = arith.constant dense<0.000000e+00> : vector<224x64xf32>
    %120 = tpu.matmul %118, %119, %cst_92 {dimension_numbers = #tpu.dot_dimension_numbers<[1], [0], [0], [1], [0, 0, 1, 1], [], []>} : vector<224x32xbf16>, vector<32x64xbf16>, vector<224x64xf32> -> vector<224x64xf32>
    %c289 = arith.constant 289 : index
    %c0_93 = arith.constant 0 : index
    %121 = vector.load %arg1[%c289, %c0_93] : memref<576x32xbf16, #tpu.memory_space<vmem>>, vector<224x32xbf16>
    %c32_94 = arith.constant 32 : index
    %c0_95 = arith.constant 0 : index
    %122 = vector.load %arg2[%c32_94, %c0_95] : memref<288x64xbf16, #tpu.memory_space<vmem>>, vector<32x64xbf16>
    %cst_96 = arith.constant dense<0.000000e+00> : vector<224x64xf32>
    %123 = tpu.matmul %121, %122, %cst_96 {dimension_numbers = #tpu.dot_dimension_numbers<[1], [0], [0], [1], [0, 0, 1, 1], [], []>} : vector<224x32xbf16>, vector<32x64xbf16>, vector<224x64xf32> -> vector<224x64xf32>
    %124 = arith.addf %120, %123 : vector<224x64xf32>
    %c290 = arith.constant 290 : index
    %c0_97 = arith.constant 0 : index
    %125 = vector.load %arg1[%c290, %c0_97] : memref<576x32xbf16, #tpu.memory_space<vmem>>, vector<224x32xbf16>
    %c64_98 = arith.constant 64 : index
    %c0_99 = arith.constant 0 : index
    %126 = vector.load %arg2[%c64_98, %c0_99] : memref<288x64xbf16, #tpu.memory_space<vmem>>, vector<32x64xbf16>
    %cst_100 = arith.constant dense<0.000000e+00> : vector<224x64xf32>
    %127 = tpu.matmul %125, %126, %cst_100 {dimension_numbers = #tpu.dot_dimension_numbers<[1], [0], [0], [1], [0, 0, 1, 1], [], []>} : vector<224x32xbf16>, vector<32x64xbf16>, vector<224x64xf32> -> vector<224x64xf32>
    %128 = arith.addf %124, %127 : vector<224x64xf32>
    %c304 = arith.constant 304 : index
    %c0_101 = arith.constant 0 : index
    %129 = vector.load %arg1[%c304, %c0_101] : memref<576x32xbf16, #tpu.memory_space<vmem>>, vector<224x32xbf16>
    %c96_102 = arith.constant 96 : index
    %c0_103 = arith.constant 0 : index
    %130 = vector.load %arg2[%c96_102, %c0_103] : memref<288x64xbf16, #tpu.memory_space<vmem>>, vector<32x64xbf16>
    %cst_104 = arith.constant dense<0.000000e+00> : vector<224x64xf32>
    %131 = tpu.matmul %129, %130, %cst_104 {dimension_numbers = #tpu.dot_dimension_numbers<[1], [0], [0], [1], [0, 0, 1, 1], [], []>} : vector<224x32xbf16>, vector<32x64xbf16>, vector<224x64xf32> -> vector<224x64xf32>
    %132 = arith.addf %128, %131 : vector<224x64xf32>
    %c305 = arith.constant 305 : index
    %c0_105 = arith.constant 0 : index
    %133 = vector.load %arg1[%c305, %c0_105] : memref<576x32xbf16, #tpu.memory_space<vmem>>, vector<224x32xbf16>
    %c128_106 = arith.constant 128 : index
    %c0_107 = arith.constant 0 : index
    %134 = vector.load %arg2[%c128_106, %c0_107] : memref<288x64xbf16, #tpu.memory_space<vmem>>, vector<32x64xbf16>
    %cst_108 = arith.constant dense<0.000000e+00> : vector<224x64xf32>
    %135 = tpu.matmul %133, %134, %cst_108 {dimension_numbers = #tpu.dot_dimension_numbers<[1], [0], [0], [1], [0, 0, 1, 1], [], []>} : vector<224x32xbf16>, vector<32x64xbf16>, vector<224x64xf32> -> vector<224x64xf32>
    %136 = arith.addf %132, %135 : vector<224x64xf32>
    %c306 = arith.constant 306 : index
    %c0_109 = arith.constant 0 : index
    %137 = vector.load %arg1[%c306, %c0_109] : memref<576x32xbf16, #tpu.memory_space<vmem>>, vector<224x32xbf16>
    %c160_110 = arith.constant 160 : index
    %c0_111 = arith.constant 0 : index
    %138 = vector.load %arg2[%c160_110, %c0_111] : memref<288x64xbf16, #tpu.memory_space<vmem>>, vector<32x64xbf16>
    %cst_112 = arith.constant dense<0.000000e+00> : vector<224x64xf32>
    %139 = tpu.matmul %137, %138, %cst_112 {dimension_numbers = #tpu.dot_dimension_numbers<[1], [0], [0], [1], [0, 0, 1, 1], [], []>} : vector<224x32xbf16>, vector<32x64xbf16>, vector<224x64xf32> -> vector<224x64xf32>
    %140 = arith.addf %136, %139 : vector<224x64xf32>
    %c320 = arith.constant 320 : index
    %c0_113 = arith.constant 0 : index
    %141 = vector.load %arg1[%c320, %c0_113] : memref<576x32xbf16, #tpu.memory_space<vmem>>, vector<224x32xbf16>
    %c192_114 = arith.constant 192 : index
    %c0_115 = arith.constant 0 : index
    %142 = vector.load %arg2[%c192_114, %c0_115] : memref<288x64xbf16, #tpu.memory_space<vmem>>, vector<32x64xbf16>
    %cst_116 = arith.constant dense<0.000000e+00> : vector<224x64xf32>
    %143 = tpu.matmul %141, %142, %cst_116 {dimension_numbers = #tpu.dot_dimension_numbers<[1], [0], [0], [1], [0, 0, 1, 1], [], []>} : vector<224x32xbf16>, vector<32x64xbf16>, vector<224x64xf32> -> vector<224x64xf32>
    %144 = arith.addf %140, %143 : vector<224x64xf32>
    %c321 = arith.constant 321 : index
    %c0_117 = arith.constant 0 : index
    %145 = vector.load %arg1[%c321, %c0_117] : memref<576x32xbf16, #tpu.memory_space<vmem>>, vector<224x32xbf16>
    %c224_118 = arith.constant 224 : index
    %c0_119 = arith.constant 0 : index
    %146 = vector.load %arg2[%c224_118, %c0_119] : memref<288x64xbf16, #tpu.memory_space<vmem>>, vector<32x64xbf16>
    %cst_120 = arith.constant dense<0.000000e+00> : vector<224x64xf32>
    %147 = tpu.matmul %145, %146, %cst_120 {dimension_numbers = #tpu.dot_dimension_numbers<[1], [0], [0], [1], [0, 0, 1, 1], [], []>} : vector<224x32xbf16>, vector<32x64xbf16>, vector<224x64xf32> -> vector<224x64xf32>
    %148 = arith.addf %144, %147 : vector<224x64xf32>
    %c322 = arith.constant 322 : index
    %c0_121 = arith.constant 0 : index
    %149 = vector.load %arg1[%c322, %c0_121] : memref<576x32xbf16, #tpu.memory_space<vmem>>, vector<224x32xbf16>
    %c256_122 = arith.constant 256 : index
    %c0_123 = arith.constant 0 : index
    %150 = vector.load %arg2[%c256_122, %c0_123] : memref<288x64xbf16, #tpu.memory_space<vmem>>, vector<32x64xbf16>
    %cst_124 = arith.constant dense<0.000000e+00> : vector<224x64xf32>
    %151 = tpu.matmul %149, %150, %cst_124 {dimension_numbers = #tpu.dot_dimension_numbers<[1], [0], [0], [1], [0, 0, 1, 1], [], []>} : vector<224x32xbf16>, vector<32x64xbf16>, vector<224x64xf32> -> vector<224x64xf32>
    %152 = arith.addf %148, %151 : vector<224x64xf32>
    %c0_125 = arith.constant 0 : index
    %c0_126 = arith.constant 0 : index
    %153 = vector.load %arg3[%c0_125, %c0_126] : memref<1x64xf32, #tpu.memory_space<vmem>>, vector<1x64xf32>
    %154 = vector.broadcast %153 : vector<1x64xf32> to vector<224x64xf32>
    %155 = arith.addf %152, %154 : vector<224x64xf32>
    %cst_127 = arith.constant 0.000000e+00 : f32
    %156 = vector.broadcast %cst_127 : f32 to vector<224x64xf32>
    %157 = arith.maximumf %155, %156 : vector<224x64xf32>
    %c0_128 = arith.constant 0 : index
    %c0_129 = arith.constant 0 : index
    %158 = vector.load %arg5[%c0_128, %c0_129] : memref<224x64xf32, #tpu.memory_space<vmem>>, vector<224x64xf32>
    tpu.vector_store %arg5[%c0_128, %c0_129], %157 {strides = array<i32>} : memref<224x64xf32, #tpu.memory_space<vmem>>, vector<224x64xf32>,
    %c0_130 = arith.constant 0 : index
    %c0_131 = arith.constant 0 : index
    %159 = tpu.strided_load %arg5[%c0_130, %c0_131] {strides = array<i32: 2, 1>} : memref<224x64xf32, #tpu.memory_space<vmem>>, vector<7x64xf32>
    %c1_132 = arith.constant 1 : index
    %c0_133 = arith.constant 0 : index
    %160 = tpu.strided_load %arg5[%c1_132, %c0_133] {strides = array<i32: 2, 1>} : memref<224x64xf32, #tpu.memory_space<vmem>>, vector<7x64xf32>
    %c16_134 = arith.constant 16 : index
    %c0_135 = arith.constant 0 : index
    %161 = tpu.strided_load %arg5[%c16_134, %c0_135] {strides = array<i32: 2, 1>} : memref<224x64xf32, #tpu.memory_space<vmem>>, vector<7x64xf32>
    %c17_136 = arith.constant 17 : index
    %c0_137 = arith.constant 0 : index
    %162 = tpu.strided_load %arg5[%c17_136, %c0_137] {strides = array<i32: 2, 1>} : memref<224x64xf32, #tpu.memory_space<vmem>>, vector<7x64xf32>
    %163 = arith.maximumf %159, %160 : vector<7x64xf32>
    %164 = arith.maximumf %161, %162 : vector<7x64xf32>
    %165 = arith.maximumf %163, %164 : vector<7x64xf32>
    %166 = arith.truncf %165 : vector<7x64xf32> to vector<7x64xbf16>
    %c7 = arith.constant 7 : index
    %c0_138 = arith.constant 0 : index
    %c0_139 = arith.constant 0 : index
    %167 = vector.load %arg4[%c7, %c0_138, %c0_139] : memref<14x7x64xbf16, #tpu.memory_space<vmem>>, vector<1x7x64xbf16>
    %168 = vector.shape_cast %167 : vector<1x7x64xbf16> to vector<7x64xbf16>
    %169 = vector.shape_cast %166 : vector<7x64xbf16> to vector<1x7x64xbf16>
    tpu.vector_store %arg4[%c7, %c0_138, %c0_139], %169 {strides = array<i32>} : memref<14x7x64xbf16, #tpu.memory_space<vmem>>, vector<1x7x64xbf16>,
    %c32_140 = arith.constant 32 : index
    %c0_141 = arith.constant 0 : index
    %170 = tpu.strided_load %arg5[%c32_140, %c0_141] {strides = array<i32: 2, 1>} : memref<224x64xf32, #tpu.memory_space<vmem>>, vector<7x64xf32>
    %c33_142 = arith.constant 33 : index
    %c0_143 = arith.constant 0 : index
    %171 = tpu.strided_load %arg5[%c33_142, %c0_143] {strides = array<i32: 2, 1>} : memref<224x64xf32, #tpu.memory_space<vmem>>, vector<7x64xf32>
    %c48_144 = arith.constant 48 : index
    %c0_145 = arith.constant 0 : index
    %172 = tpu.strided_load %arg5[%c48_144, %c0_145] {strides = array<i32: 2, 1>} : memref<224x64xf32, #tpu.memory_space<vmem>>, vector<7x64xf32>
    %c49_146 = arith.constant 49 : index
    %c0_147 = arith.constant 0 : index
    %173 = tpu.strided_load %arg5[%c49_146, %c0_147] {strides = array<i32: 2, 1>} : memref<224x64xf32, #tpu.memory_space<vmem>>, vector<7x64xf32>
    %174 = arith.maximumf %170, %171 : vector<7x64xf32>
    %175 = arith.maximumf %172, %173 : vector<7x64xf32>
    %176 = arith.maximumf %174, %175 : vector<7x64xf32>
    %177 = arith.truncf %176 : vector<7x64xf32> to vector<7x64xbf16>
    %c8 = arith.constant 8 : index
    %c0_148 = arith.constant 0 : index
    %c0_149 = arith.constant 0 : index
    %178 = vector.load %arg4[%c8, %c0_148, %c0_149] : memref<14x7x64xbf16, #tpu.memory_space<vmem>>, vector<1x7x64xbf16>
    %179 = vector.shape_cast %178 : vector<1x7x64xbf16> to vector<7x64xbf16>
    %180 = vector.shape_cast %177 : vector<7x64xbf16> to vector<1x7x64xbf16>
    tpu.vector_store %arg4[%c8, %c0_148, %c0_149], %180 {strides = array<i32>} : memref<14x7x64xbf16, #tpu.memory_space<vmem>>, vector<1x7x64xbf16>,
    %c64_150 = arith.constant 64 : index
    %c0_151 = arith.constant 0 : index
    %181 = tpu.strided_load %arg5[%c64_150, %c0_151] {strides = array<i32: 2, 1>} : memref<224x64xf32, #tpu.memory_space<vmem>>, vector<7x64xf32>
    %c65_152 = arith.constant 65 : index
    %c0_153 = arith.constant 0 : index
    %182 = tpu.strided_load %arg5[%c65_152, %c0_153] {strides = array<i32: 2, 1>} : memref<224x64xf32, #tpu.memory_space<vmem>>, vector<7x64xf32>
    %c80_154 = arith.constant 80 : index
    %c0_155 = arith.constant 0 : index
    %183 = tpu.strided_load %arg5[%c80_154, %c0_155] {strides = array<i32: 2, 1>} : memref<224x64xf32, #tpu.memory_space<vmem>>, vector<7x64xf32>
    %c81_156 = arith.constant 81 : index
    %c0_157 = arith.constant 0 : index
    %184 = tpu.strided_load %arg5[%c81_156, %c0_157] {strides = array<i32: 2, 1>} : memref<224x64xf32, #tpu.memory_space<vmem>>, vector<7x64xf32>
    %185 = arith.maximumf %181, %182 : vector<7x64xf32>
    %186 = arith.maximumf %183, %184 : vector<7x64xf32>
    %187 = arith.maximumf %185, %186 : vector<7x64xf32>
    %188 = arith.truncf %187 : vector<7x64xf32> to vector<7x64xbf16>
    %c9 = arith.constant 9 : index
    %c0_158 = arith.constant 0 : index
    %c0_159 = arith.constant 0 : index
    %189 = vector.load %arg4[%c9, %c0_158, %c0_159] : memref<14x7x64xbf16, #tpu.memory_space<vmem>>, vector<1x7x64xbf16>
    %190 = vector.shape_cast %189 : vector<1x7x64xbf16> to vector<7x64xbf16>
    %191 = vector.shape_cast %188 : vector<7x64xbf16> to vector<1x7x64xbf16>
    tpu.vector_store %arg4[%c9, %c0_158, %c0_159], %191 {strides = array<i32>} : memref<14x7x64xbf16, #tpu.memory_space<vmem>>, vector<1x7x64xbf16>,
    %c96_160 = arith.constant 96 : index
    %c0_161 = arith.constant 0 : index
    %192 = tpu.strided_load %arg5[%c96_160, %c0_161] {strides = array<i32: 2, 1>} : memref<224x64xf32, #tpu.memory_space<vmem>>, vector<7x64xf32>
    %c97_162 = arith.constant 97 : index
    %c0_163 = arith.constant 0 : index
    %193 = tpu.strided_load %arg5[%c97_162, %c0_163] {strides = array<i32: 2, 1>} : memref<224x64xf32, #tpu.memory_space<vmem>>, vector<7x64xf32>
    %c112_164 = arith.constant 112 : index
    %c0_165 = arith.constant 0 : index
    %194 = tpu.strided_load %arg5[%c112_164, %c0_165] {strides = array<i32: 2, 1>} : memref<224x64xf32, #tpu.memory_space<vmem>>, vector<7x64xf32>
    %c113_166 = arith.constant 113 : index
    %c0_167 = arith.constant 0 : index
    %195 = tpu.strided_load %arg5[%c113_166, %c0_167] {strides = array<i32: 2, 1>} : memref<224x64xf32, #tpu.memory_space<vmem>>, vector<7x64xf32>
    %196 = arith.maximumf %192, %193 : vector<7x64xf32>
    %197 = arith.maximumf %194, %195 : vector<7x64xf32>
    %198 = arith.maximumf %196, %197 : vector<7x64xf32>
    %199 = arith.truncf %198 : vector<7x64xf32> to vector<7x64xbf16>
    %c10 = arith.constant 10 : index
    %c0_168 = arith.constant 0 : index
    %c0_169 = arith.constant 0 : index
    %200 = vector.load %arg4[%c10, %c0_168, %c0_169] : memref<14x7x64xbf16, #tpu.memory_space<vmem>>, vector<1x7x64xbf16>
    %201 = vector.shape_cast %200 : vector<1x7x64xbf16> to vector<7x64xbf16>
    %202 = vector.shape_cast %199 : vector<7x64xbf16> to vector<1x7x64xbf16>
    tpu.vector_store %arg4[%c10, %c0_168, %c0_169], %202 {strides = array<i32>} : memref<14x7x64xbf16, #tpu.memory_space<vmem>>, vector<1x7x64xbf16>,
    %c128_170 = arith.constant 128 : index
    %c0_171 = arith.constant 0 : index
    %203 = tpu.strided_load %arg5[%c128_170, %c0_171] {strides = array<i32: 2, 1>} : memref<224x64xf32, #tpu.memory_space<vmem>>, vector<7x64xf32>
    %c129_172 = arith.constant 129 : index
    %c0_173 = arith.constant 0 : index
    %204 = tpu.strided_load %arg5[%c129_172, %c0_173] {strides = array<i32: 2, 1>} : memref<224x64xf32, #tpu.memory_space<vmem>>, vector<7x64xf32>
    %c144_174 = arith.constant 144 : index
    %c0_175 = arith.constant 0 : index
    %205 = tpu.strided_load %arg5[%c144_174, %c0_175] {strides = array<i32: 2, 1>} : memref<224x64xf32, #tpu.memory_space<vmem>>, vector<7x64xf32>
    %c145_176 = arith.constant 145 : index
    %c0_177 = arith.constant 0 : index
    %206 = tpu.strided_load %arg5[%c145_176, %c0_177] {strides = array<i32: 2, 1>} : memref<224x64xf32, #tpu.memory_space<vmem>>, vector<7x64xf32>
    %207 = arith.maximumf %203, %204 : vector<7x64xf32>
    %208 = arith.maximumf %205, %206 : vector<7x64xf32>
    %209 = arith.maximumf %207, %208 : vector<7x64xf32>
    %210 = arith.truncf %209 : vector<7x64xf32> to vector<7x64xbf16>
    %c11 = arith.constant 11 : index
    %c0_178 = arith.constant 0 : index
    %c0_179 = arith.constant 0 : index
    %211 = vector.load %arg4[%c11, %c0_178, %c0_179] : memref<14x7x64xbf16, #tpu.memory_space<vmem>>, vector<1x7x64xbf16>
    %212 = vector.shape_cast %211 : vector<1x7x64xbf16> to vector<7x64xbf16>
    %213 = vector.shape_cast %210 : vector<7x64xbf16> to vector<1x7x64xbf16>
    tpu.vector_store %arg4[%c11, %c0_178, %c0_179], %213 {strides = array<i32>} : memref<14x7x64xbf16, #tpu.memory_space<vmem>>, vector<1x7x64xbf16>,
    %c160_180 = arith.constant 160 : index
    %c0_181 = arith.constant 0 : index
    %214 = tpu.strided_load %arg5[%c160_180, %c0_181] {strides = array<i32: 2, 1>} : memref<224x64xf32, #tpu.memory_space<vmem>>, vector<7x64xf32>
    %c161_182 = arith.constant 161 : index
    %c0_183 = arith.constant 0 : index
    %215 = tpu.strided_load %arg5[%c161_182, %c0_183] {strides = array<i32: 2, 1>} : memref<224x64xf32, #tpu.memory_space<vmem>>, vector<7x64xf32>
    %c176_184 = arith.constant 176 : index
    %c0_185 = arith.constant 0 : index
    %216 = tpu.strided_load %arg5[%c176_184, %c0_185] {strides = array<i32: 2, 1>} : memref<224x64xf32, #tpu.memory_space<vmem>>, vector<7x64xf32>
    %c177_186 = arith.constant 177 : index
    %c0_187 = arith.constant 0 : index
    %217 = tpu.strided_load %arg5[%c177_186, %c0_187] {strides = array<i32: 2, 1>} : memref<224x64xf32, #tpu.memory_space<vmem>>, vector<7x64xf32>
    %218 = arith.maximumf %214, %215 : vector<7x64xf32>
    %219 = arith.maximumf %216, %217 : vector<7x64xf32>
    %220 = arith.maximumf %218, %219 : vector<7x64xf32>
    %221 = arith.truncf %220 : vector<7x64xf32> to vector<7x64xbf16>
    %c12 = arith.constant 12 : index
    %c0_188 = arith.constant 0 : index
    %c0_189 = arith.constant 0 : index
    %222 = vector.load %arg4[%c12, %c0_188, %c0_189] : memref<14x7x64xbf16, #tpu.memory_space<vmem>>, vector<1x7x64xbf16>
    %223 = vector.shape_cast %222 : vector<1x7x64xbf16> to vector<7x64xbf16>
    %224 = vector.shape_cast %221 : vector<7x64xbf16> to vector<1x7x64xbf16>
    tpu.vector_store %arg4[%c12, %c0_188, %c0_189], %224 {strides = array<i32>} : memref<14x7x64xbf16, #tpu.memory_space<vmem>>, vector<1x7x64xbf16>,
    %c192_190 = arith.constant 192 : index
    %c0_191 = arith.constant 0 : index
    %225 = tpu.strided_load %arg5[%c192_190, %c0_191] {strides = array<i32: 2, 1>} : memref<224x64xf32, #tpu.memory_space<vmem>>, vector<7x64xf32>
    %c193_192 = arith.constant 193 : index
    %c0_193 = arith.constant 0 : index
    %226 = tpu.strided_load %arg5[%c193_192, %c0_193] {strides = array<i32: 2, 1>} : memref<224x64xf32, #tpu.memory_space<vmem>>, vector<7x64xf32>
    %c208_194 = arith.constant 208 : index
    %c0_195 = arith.constant 0 : index
    %227 = tpu.strided_load %arg5[%c208_194, %c0_195] {strides = array<i32: 2, 1>} : memref<224x64xf32, #tpu.memory_space<vmem>>, vector<7x64xf32>
    %c209_196 = arith.constant 209 : index
    %c0_197 = arith.constant 0 : index
    %228 = tpu.strided_load %arg5[%c209_196, %c0_197] {strides = array<i32: 2, 1>} : memref<224x64xf32, #tpu.memory_space<vmem>>, vector<7x64xf32>
    %229 = arith.maximumf %225, %226 : vector<7x64xf32>
    %230 = arith.maximumf %227, %228 : vector<7x64xf32>
    %231 = arith.maximumf %229, %230 : vector<7x64xf32>
    %232 = arith.truncf %231 : vector<7x64xf32> to vector<7x64xbf16>
    %c13 = arith.constant 13 : index
    %c0_198 = arith.constant 0 : index
    %c0_199 = arith.constant 0 : index
    %233 = vector.load %arg4[%c13, %c0_198, %c0_199] : memref<14x7x64xbf16, #tpu.memory_space<vmem>>, vector<1x7x64xbf16>
    %234 = vector.shape_cast %233 : vector<1x7x64xbf16> to vector<7x64xbf16>
    %235 = vector.shape_cast %232 : vector<7x64xbf16> to vector<1x7x64xbf16>
    tpu.vector_store %arg4[%c13, %c0_198, %c0_199], %235 {strides = array<i32>} : memref<14x7x64xbf16, #tpu.memory_space<vmem>>, vector<1x7x64xbf16>,
    return
  }
  func.func @transform_0(%arg0: i32) -> (i32, i32) {
    %c0_i32 = arith.constant 0 : i32
    %c0_i32_0 = arith.constant 0 : i32
    return %arg0, %c0_i32 : i32, i32
  }
  func.func @transform_1(%arg0: i32) -> (i32, i32) {
    %c0_i32 = arith.constant 0 : i32
    %c0_i32_0 = arith.constant 0 : i32
    %c0_i32_1 = arith.constant 0 : i32
    return %c0_i32, %c0_i32_0 : i32, i32
  }
  func.func @transform_2(%arg0: i32) -> (i32, i32) {
    %c0_i32 = arith.constant 0 : i32
    %c0_i32_0 = arith.constant 0 : i32
    %c0_i32_1 = arith.constant 0 : i32
    return %c0_i32, %c0_i32_0 : i32, i32
  }
  func.func @transform_3(%arg0: i32) -> (i32, i32, i32) {
    %c0_i32 = arith.constant 0 : i32
    %c0_i32_0 = arith.constant 0 : i32
    %c0_i32_1 = arith.constant 0 : i32
    return %arg0, %c0_i32, %c0_i32_0 : i32, i32, i32
  }
}

module attributes {stable_mosaic.version = 11 : i64} {
  func.func @_fc_bn_relu_fc_kernel(%arg0: i32, %arg1: memref<2x3136xbf16, #tpu.memory_space<vmem>>, %arg2: memref<3136x128xbf16, #tpu.memory_space<vmem>>, %arg3: memref<1x128xf32, #tpu.memory_space<vmem>>, %arg4: memref<128x128xbf16, #tpu.memory_space<vmem>>, %arg5: memref<1x128xf32, #tpu.memory_space<vmem>>, %arg6: memref<2x128xf32, #tpu.memory_space<vmem>>) attributes {dimension_semantics = [#tpu.dimension_semantics<parallel>], iteration_bounds = array<i64: 1>, scalar_prefetch = 0 : i64, scratch_operands = 0 : i64, tpu.core_type = #tpu.core_type<tc>, window_params = [{transform_indices = @transform_0, window_bounds = array<i64: 2, 3136>}, {pipeline_mode = #tpu.pipeline_mode<synchronous>, transform_indices = @transform_1, window_bounds = array<i64: 3136, 128>}, {pipeline_mode = #tpu.pipeline_mode<synchronous>, transform_indices = @transform_2, window_bounds = array<i64: 1, 128>}, {pipeline_mode = #tpu.pipeline_mode<synchronous>, transform_indices = @transform_3, window_bounds = array<i64: 128, 128>}, {pipeline_mode = #tpu.pipeline_mode<synchronous>, transform_indices = @transform_4, window_bounds = array<i64: 1, 128>}, {transform_indices = @transform_5, window_bounds = array<i64: 2, 128>}]} {
    %c0 = arith.constant 0 : index
    %c0_0 = arith.constant 0 : index
    %0 = vector.load %arg1[%c0, %c0_0] : memref<2x3136xbf16, #tpu.memory_space<vmem>>, vector<2x3136xbf16>
    %c0_1 = arith.constant 0 : index
    %c0_2 = arith.constant 0 : index
    %1 = vector.load %arg2[%c0_1, %c0_2] : memref<3136x128xbf16, #tpu.memory_space<vmem>>, vector<3136x128xbf16>
    %cst = arith.constant dense<0.000000e+00> : vector<2x128xf32>
    %2 = tpu.matmul %0, %1, %cst {dimension_numbers = #tpu.dot_dimension_numbers<[1], [0], [0], [1], [0, 0, 1, 1], [], []>} : vector<2x3136xbf16>, vector<3136x128xbf16>, vector<2x128xf32> -> vector<2x128xf32>
    %c0_3 = arith.constant 0 : index
    %c0_4 = arith.constant 0 : index
    %3 = vector.load %arg3[%c0_3, %c0_4] : memref<1x128xf32, #tpu.memory_space<vmem>>, vector<1x128xf32>
    %4 = vector.broadcast %3 : vector<1x128xf32> to vector<2x128xf32>
    %5 = arith.addf %2, %4 : vector<2x128xf32>
    %cst_5 = arith.constant 0.000000e+00 : f32
    %6 = vector.broadcast %cst_5 : f32 to vector<2x128xf32>
    %7 = arith.maximumf %5, %6 : vector<2x128xf32>
    %8 = arith.truncf %7 : vector<2x128xf32> to vector<2x128xbf16>
    %c0_6 = arith.constant 0 : index
    %c0_7 = arith.constant 0 : index
    %9 = vector.load %arg4[%c0_6, %c0_7] : memref<128x128xbf16, #tpu.memory_space<vmem>>, vector<128x128xbf16>
    %cst_8 = arith.constant dense<0.000000e+00> : vector<2x128xf32>
    %10 = tpu.matmul %8, %9, %cst_8 {dimension_numbers = #tpu.dot_dimension_numbers<[1], [0], [0], [1], [0, 0, 1, 1], [], []>} : vector<2x128xbf16>, vector<128x128xbf16>, vector<2x128xf32> -> vector<2x128xf32>
    %c0_9 = arith.constant 0 : index
    %c0_10 = arith.constant 0 : index
    %11 = vector.load %arg5[%c0_9, %c0_10] : memref<1x128xf32, #tpu.memory_space<vmem>>, vector<1x128xf32>
    %12 = vector.broadcast %11 : vector<1x128xf32> to vector<2x128xf32>
    %13 = arith.addf %10, %12 : vector<2x128xf32>
    %c0_11 = arith.constant 0 : index
    %c0_12 = arith.constant 0 : index
    %14 = vector.load %arg6[%c0_11, %c0_12] : memref<2x128xf32, #tpu.memory_space<vmem>>, vector<2x128xf32>
    tpu.vector_store %arg6[%c0_11, %c0_12], %13 {strides = array<i32>} : memref<2x128xf32, #tpu.memory_space<vmem>>, vector<2x128xf32>,
    return
  }
  func.func @transform_0(%arg0: i32) -> (i32, i32) {
    %c0_i32 = arith.constant 0 : i32
    %c0_i32_0 = arith.constant 0 : i32
    return %arg0, %c0_i32 : i32, i32
  }
  func.func @transform_1(%arg0: i32) -> (i32, i32) {
    %c0_i32 = arith.constant 0 : i32
    %c0_i32_0 = arith.constant 0 : i32
    %c0_i32_1 = arith.constant 0 : i32
    return %c0_i32, %c0_i32_0 : i32, i32
  }
  func.func @transform_2(%arg0: i32) -> (i32, i32) {
    %c0_i32 = arith.constant 0 : i32
    %c0_i32_0 = arith.constant 0 : i32
    %c0_i32_1 = arith.constant 0 : i32
    return %c0_i32, %c0_i32_0 : i32, i32
  }
  func.func @transform_3(%arg0: i32) -> (i32, i32) {
    %c0_i32 = arith.constant 0 : i32
    %c0_i32_0 = arith.constant 0 : i32
    %c0_i32_1 = arith.constant 0 : i32
    return %c0_i32, %c0_i32_0 : i32, i32
  }
  func.func @transform_4(%arg0: i32) -> (i32, i32) {
    %c0_i32 = arith.constant 0 : i32
    %c0_i32_0 = arith.constant 0 : i32
    %c0_i32_1 = arith.constant 0 : i32
    return %c0_i32, %c0_i32_0 : i32, i32
  }
  func.func @transform_5(%arg0: i32) -> (i32, i32) {
    %c0_i32 = arith.constant 0 : i32
    %c0_i32_0 = arith.constant 0 : i32
    return %arg0, %c0_i32 : i32, i32
  }
}

</mosaic_0001>

<bundles_post_ra>
// kernel: dnet_forward.3
= control target key start
LH: loop header
LB: loop body
LE: loop exit
PB: predicated region body
PF: predicated region fallthrough
CT: control target
= control target key end

     0   :  { %vm1010_vm0 = vcmask 1043456   ;;  %vm1011_vm1 = vcmask 1044480   ;;  %vm715_vm2 = vcmask 72704   ;;  %v3920_v1 = vmov 65535   ;;  %s4967_s1 = inlined_call_operand.vmem [shape: bf16[9,32], index: 1, kind: input, shape index: {}]   ;;  %s4968_s0 = inlined_call_operand.vmem [shape: bf16[1568,9], index: 0, kind: input, shape index: {}]   ;;  %s4969_s2 = inlined_call_operand.vmem [shape: f32[1,32], index: 2, kind: input, shape index: {}]   ;;  %s4970_s3 = inlined_call_operand.vmem [shape: bf16[28,14,32], index: 3, kind: output, shape index: {}]  }
   0x1   :  { %v3819_v0 = vld [vmem:[%s4967_s1] sm:$0x1f]   ;;  %v1012_v2 = vsel %vm1010_vm0, 4294967295, %v3920_v1  ;;  %v3821_v5 = vld [vmem:[%s4968_s0 + $0x190] sm:$0xff]   ;;  %v3822_v7 = vld [vmem:[%s4968_s0 + $0x8] sm:$0xff]   ;;  %vm2030_vm3 = vcmask 261120  }
   0x2   :  { %v3820_v3 = vld [vmem:[%s4968_s0] sm:$0xff]   ;;  %v1013_v4 = vsel %vm1011_vm1, %v1012_v2, 0  ;;  %3720 = vmatprep.mubr.msk.bf16.mxu1 %vm715_vm2, %v3821_v5  ;;  %v3823_v8 = vld [vmem:[%s4968_s0 + $0x198] sm:$0xff]   ;;  %v3824_v9 = vld [vmem:[%s4968_s0 + $0x10] sm:$0xff]   ;;  %vm2258_vm4 = vcmask 256000   ;;  %vm2256_vm5 = vcmask 257024  }
   0x3   :  { %v1015_v6 = vand.u32 %v3819_v0, %v1013_v4  ;;  %3620 = vmatprep.mubr.msk.bf16.mxu0 %vm715_vm2, %v3820_v3  ;;  %v3825_v10 = vld [vmem:[%s4968_s0 + $0x1a0] sm:$0xff]   ;;  %v3826_v11 = vld [vmem:[%s4968_s0 + $0x18] sm:$0xff]   ;;  %v3827_v12 = vld [vmem:[%s4968_s0 + $0x1a8] sm:$0xff]  }
   0x4   :  { %v3828_v13 = vld [vmem:[%s4968_s0 + $0x20] sm:$0xff]   ;;  %v3829_v14 = vld [vmem:[%s4968_s0 + $0x1b0] sm:$0xff]   ;;  %v3830_v15 = vld [vmem:[%s4968_s0 + $0x28] sm:$0xff]  }
   0x5   :  { %3618 = vmatprep.subr.bf16.mxu0 %v1015_v6  ;;  %3816 = vmatprep.subr.bf16.mxu1 %v1015_v6  ;;  %v3831_v16 = vld [vmem:[%s4968_s0 + $0x1b8] sm:$0xff]   ;;  %v3832_v17 = vld [vmem:[%s4968_s0 + $0x30] sm:$0xff]   ;;  %v3833_v18 = vld [vmem:[%s4968_s0 + $0x1c0] sm:$0xff]  }
   0x6   :  { %3619 = vmatpush3.bf16.msra.mxu0 %v1015_v6  ;;  %3817 = vmatpush3.bf16.msra.mxu1 %v1015_v6  ;;  %v3834_v19 = vld [vmem:[%s4968_s0 + $0x38] sm:$0xff]   ;;  %v3835_v20 = vld [vmem:[%s4968_s0 + $0x1c8] sm:$0xff]   ;;  %v3836_v21 = vld [vmem:[%s4968_s0 + $0x40] sm:$0xff]  }
   0x7   :  { %v3837_v22 = vld [vmem:[%s4968_s0 + $0x1d0] sm:$0xff]   ;;  %v3838_v23 = vld [vmem:[%s4968_s0 + $0x48] sm:$0xff]   ;;  %v3839_v24 = vld [vmem:[%s4968_s0 + $0x1d8] sm:$0xff]  }
   0x8   :  { %v3840_v25 = vld [vmem:[%s4968_s0 + $0x50] sm:$0xff]   ;;  %v3841_v26 = vld [vmem:[%s4968_s0 + $0x1e0] sm:$0xff]   ;;  %v3842_v27 = vld [vmem:[%s4968_s0 + $0x58] sm:$0xff]  }
   0x9   :  { %3621 = vmatmul.mubr.msk.bf16.vlgmr.msra.gmra.mrb[0].mxu0 %vm715_vm2, %v3822_v7  ;;  %3721 = vmatmul.mubr.msk.bf16.vlgmr.msra.gmra.mrb[0].mxu1 %vm715_vm2, %v3823_v8  ;;  %v3843_v28 = vld [vmem:[%s4968_s0 + $0x1e8] sm:$0xff]   ;;  %v3844_v29 = vld [vmem:[%s4968_s0 + $0x60] sm:$0xff]   ;;  %v3845_v30 = vld [vmem:[%s4968_s0 + $0x1f0] sm:$0xff]  }
   0xa   :  { %3624 = vmatprep.mubr.msk.bf16.mxu0 %vm715_vm2, %v3824_v9  ;;  %3724 = vmatprep.mubr.msk.bf16.mxu1 %vm715_vm2, %v3825_v10  ;;  %v3846_v31 = vld [vmem:[%s4968_s0 + $0x68] sm:$0xff]   ;;  %v3847_v32 = vld [vmem:[%s4968_s0 + $0x1f8] sm:$0xff]   ;;  %v3848_v33 = vld [vmem:[%s4968_s0 + $0x70] sm:$0xff]  }
   0xb   :  { %v3849_v34 = vld [vmem:[%s4968_s0 + $0x200] sm:$0xff]   ;;  %v3850_v35 = vld [vmem:[%s4968_s0 + $0x78] sm:$0xff]   ;;  %v3851_v36 = vld [vmem:[%s4968_s0 + $0x208] sm:$0xff]  }
   0xc   :  { %v3852_v37 = vld [vmem:[%s4968_s0 + $0x80] sm:$0xff]   ;;  %v3853_v38 = vld [vmem:[%s4968_s0 + $0x210] sm:$0xff]   ;;  %v3854_v39 = vld [vmem:[%s4968_s0 + $0x88] sm:$0xff]  }
   0xd   :  { %v3855_v40 = vld [vmem:[%s4968_s0 + $0x218] sm:$0xff]   ;;  %v3856_v41 = vld [vmem:[%s4968_s0 + $0x90] sm:$0xff]   ;;  %v3857_v42 = vld [vmem:[%s4968_s0 + $0x220] sm:$0xff]  }
   0xe   :  { %v3858_v43 = vld [vmem:[%s4968_s0 + $0x98] sm:$0xff]   ;;  %v3859_v44 = vld [vmem:[%s4968_s0 + $0x228] sm:$0xff]   ;;  %v3860_v45 = vld [vmem:[%s4968_s0 + $0xa0] sm:$0xff]  }
   0xf   :  { %v3861_v46 = vld [vmem:[%s4968_s0 + $0x230] sm:$0xff]   ;;  %v3862_v47 = vld [vmem:[%s4968_s0 + $0xa8] sm:$0xff]   ;;  %v3863_v48 = vld [vmem:[%s4968_s0 + $0x238] sm:$0xff]  }
  0x10   :  { %v3864_v49 = vld [vmem:[%s4968_s0 + $0xb0] sm:$0xff]   ;;  %v3865_v50 = vld [vmem:[%s4968_s0 + $0x240] sm:$0xff]   ;;  %v3866_v51 = vld [vmem:[%s4968_s0 + $0xb8] sm:$0xff]  }
  0x11   :  { %3625 = vmatmul.mubr.msk.bf16.gmra.mrb[4].mxu0 %vm715_vm2, %v3826_v11  ;;  %3725 = vmatmul.mubr.msk.bf16.gmra.mrb[4].mxu1 %vm715_vm2, %v3827_v12  ;;  %v3867_v52 = vld [vmem:[%s4968_s0 + $0x248] sm:$0xff]   ;;  %v3868_v53 = vld [vmem:[%s4968_s0 + $0xc0] sm:$0xff]   ;;  %v3869_v54 = vld [vmem:[%s4968_s0 + $0x250] sm:$0xff]  }
  0x12   :  { %3628 = vmatprep.mubr.msk.bf16.mxu0 %vm715_vm2, %v3828_v13  ;;  %3728 = vmatprep.mubr.msk.bf16.mxu1 %vm715_vm2, %v3829_v14  ;;  %v3870_v55 = vld [vmem:[%s4968_s0 + $0xc8] sm:$0xff]   ;;  %v3871_v56 = vld [vmem:[%s4968_s0 + $0x258] sm:$0xff]   ;;  %v3872_v57 = vld [vmem:[%s4968_s0 + $0xd0] sm:$0xff]  }
  0x13   :  { %v3873_v58 = vld [vmem:[%s4968_s0 + $0x260] sm:$0xff]   ;;  %v3874_v59 = vld [vmem:[%s4968_s0 + $0xd8] sm:$0xff]   ;;  %v3875_v60 = vld [vmem:[%s4968_s0 + $0x268] sm:$0xff]  }
  0x14   :  { %v3876_v61 = vld [vmem:[%s4968_s0 + $0xe0] sm:$0xff]   ;;  %v3877_v62 = vld [vmem:[%s4968_s0 + $0x270] sm:$0xff]   ;;  %v3878_v63 = vld [vmem:[%s4968_s0 + $0xe8] sm:$0xff]  }
  0x15   :  { %v3879_v0 = vld [vmem:[%s4968_s0 + $0x278] sm:$0xff]   ;;  %v3880_v1 = vld [vmem:[%s4968_s0 + $0xf0] sm:$0xff]   ;;  %v3881_v2 = vld [vmem:[%s4968_s0 + $0x280] sm:$0xff]  }
  0x16   :  { %v3882_v3 = vld [vmem:[%s4968_s0 + $0xf8] sm:$0xff]   ;;  %v3883_v4 = vld [vmem:[%s4968_s0 + $0x288] sm:$0xff]   ;;  %v3884_v5 = vld [vmem:[%s4968_s0 + $0x100] sm:$0xff]  }
  0x17   :  { %v3885_v6 = vld [vmem:[%s4968_s0 + $0x290] sm:$0xff]   ;;  %v3886_v7 = vld [vmem:[%s4968_s0 + $0x108] sm:$0xff]   ;;  %v3887_v8 = vld [vmem:[%s4968_s0 + $0x298] sm:$0xff]  }
  0x18   :  { %v3888_v9 = vld [vmem:[%s4968_s0 + $0x110] sm:$0xff]   ;;  %v3889_v10 = vld [vmem:[%s4968_s0 + $0x2a0] sm:$0xff]   ;;  %v3890_v11 = vld [vmem:[%s4968_s0 + $0x118] sm:$0xff]  }
  0x19   :  { %3629 = vmatmul.mubr.msk.bf16.gmra.mrb[8].mxu0 %vm715_vm2, %v3830_v15  ;;  %3729 = vmatmul.mubr.msk.bf16.gmra.mrb[8].mxu1 %vm715_vm2, %v3831_v16  ;;  %v3891_v12 = vld [vmem:[%s4968_s0 + $0x2a8] sm:$0xff]   ;;  %v3892_v13 = vld [vmem:[%s4968_s0 + $0x120] sm:$0xff]   ;;  %v3893_v14 = vld [vmem:[%s4968_s0 + $0x2b0] sm:$0xff]  }
  0x1a   :  { %3632 = vmatprep.mubr.msk.bf16.mxu0 %vm715_vm2, %v3832_v17  ;;  %3732 = vmatprep.mubr.msk.bf16.mxu1 %vm715_vm2, %v3833_v18  ;;  %v3894_v15 = vld [vmem:[%s4968_s0 + $0x128] sm:$0xff]   ;;  %v3895_v16 = vld [vmem:[%s4968_s0 + $0x2b8] sm:$0xff]   ;;  %v3896_v17 = vld [vmem:[%s4968_s0 + $0x130] sm:$0xff]  }
  0x1b   :  { %v3897_v18 = vld [vmem:[%s4968_s0 + $0x2c0] sm:$0xff]  }
  0x21   :  { %3633 = vmatmul.mubr.msk.bf16.gmra.mrb[12].mxu0 %vm715_vm2, %v3834_v19  ;;  %3733 = vmatmul.mubr.msk.bf16.gmra.mrb[12].mxu1 %vm715_vm2, %v3835_v20  ;;  %v3898_v19 = vld [vmem:[%s4968_s0 + $0x138] sm:$0xff]   ;;  %v3899_v20 = vld [vmem:[%s4968_s0 + $0x2c8] sm:$0xff]  }
  0x22   :  { %3636 = vmatprep.mubr.msk.bf16.mxu0 %vm715_vm2, %v3836_v21  ;;  %3736 = vmatprep.mubr.msk.bf16.mxu1 %vm715_vm2, %v3837_v22  ;;  %v3900_v21 = vld [vmem:[%s4968_s0 + $0x140] sm:$0xff]   ;;  %v3901_v22 = vld [vmem:[%s4968_s0 + $0x2d0] sm:$0xff]  }
  0x29   :  { %3637 = vmatmul.mubr.msk.bf16.gmra.mrb[16].mxu0 %vm715_vm2, %v3838_v23  ;;  %3737 = vmatmul.mubr.msk.bf16.gmra.mrb[16].mxu1 %vm715_vm2, %v3839_v24  ;;  %v3902_v23 = vld [vmem:[%s4968_s0 + $0x148] sm:$0xff]   ;;  %v3903_v24 = vld [vmem:[%s4968_s0 + $0x2d8] sm:$0xff]  }
  0x2a   :  { %3640 = vmatprep.mubr.msk.bf16.mxu0 %vm715_vm2, %v3840_v25  ;;  %3740 = vmatprep.mubr.msk.bf16.mxu1 %vm715_vm2, %v3841_v26  ;;  %v3904_v25 = vld [vmem:[%s4968_s0 + $0x150] sm:$0xff]   ;;  %v3905_v26 = vld [vmem:[%s4968_s0 + $0x2e0] sm:$0xff]  }
  0x31   :  { %3641 = vmatmul.mubr.msk.bf16.gmra.mrb[20].mxu0 %vm715_vm2, %v3842_v27  ;;  %3741 = vmatmul.mubr.msk.bf16.gmra.mrb[20].mxu1 %vm715_vm2, %v3843_v28  ;;  %v3906_v27 = vld [vmem:[%s4968_s0 + $0x158] sm:$0xff]   ;;  %v3907_v28 = vld [vmem:[%s4968_s0 + $0x2e8] sm:$0xff]  }
  0x32   :  { %3644 = vmatprep.mubr.msk.bf16.mxu0 %vm715_vm2, %v3844_v29  ;;  %3744 = vmatprep.mubr.msk.bf16.mxu1 %vm715_vm2, %v3845_v30  ;;  %v3908_v29 = vld [vmem:[%s4968_s0 + $0x160] sm:$0xff]   ;;  %v3909_v30 = vld [vmem:[%s4968_s0 + $0x2f0] sm:$0xff]  }
  0x39   :  { %3645 = vmatmul.mubr.msk.bf16.gmra.mrb[24].mxu0 %vm715_vm2, %v3846_v31  ;;  %3745 = vmatmul.mubr.msk.bf16.gmra.mrb[24].mxu1 %vm715_vm2, %v3847_v32  ;;  %v3910_v31 = vld [vmem:[%s4968_s0 + $0x168] sm:$0xff]   ;;  %v3911_v32 = vld [vmem:[%s4968_s0 + $0x2f8] sm:$0xff]  }
  0x3a   :  { %3648 = vmatprep.mubr.msk.bf16.mxu0 %vm715_vm2, %v3848_v33  ;;  %3748 = vmatprep.mubr.msk.bf16.mxu1 %vm715_vm2, %v3849_v34  ;;  %v3912_v33 = vld [vmem:[%s4968_s0 + $0x170] sm:$0xff]   ;;  %v3913_v34 = vld [vmem:[%s4968_s0 + $0x300] sm:$0xff]  }
  0x41   :  { %3649 = vmatmul.mubr.msk.bf16.gmra.mrb[28].mxu0 %vm715_vm2, %v3850_v35  ;;  %3749 = vmatmul.mubr.msk.bf16.gmra.mrb[28].mxu1 %vm715_vm2, %v3851_v36  ;;  %v3914_v35 = vld [vmem:[%s4968_s0 + $0x178] sm:$0xff]   ;;  %v3915_v36 = vld [vmem:[%s4968_s0 + $0x308] sm:$0xff]  }
  0x42   :  { %3652 = vmatprep.mubr.msk.bf16.mxu0 %vm715_vm2, %v3852_v37  ;;  %3752 = vmatprep.mubr.msk.bf16.mxu1 %vm715_vm2, %v3853_v38  ;;  %v3916_v37 = vld [vmem:[%s4968_s0 + $0x180] sm:$0xff]   ;;  %v3917_v38 = vld [vmem:[%s4968_s0 + $0x188] sm:$0xff]  }
  0x49   :  { %3653 = vmatmul.mubr.msk.bf16.gmra.mrb[32].mxu0 %vm715_vm2, %v3854_v39  ;;  %3753 = vmatmul.mubr.msk.bf16.gmra.mrb[32].mxu1 %vm715_vm2, %v3855_v40  ;;  %v4339_v39 = vld [vmem:[%s4969_s2] ss:$0 sm:$0xff] }
  0x4a   :  { %3656 = vmatprep.mubr.msk.bf16.mxu0 %vm715_vm2, %v3856_v41  ;;  %3756 = vmatprep.mubr.msk.bf16.mxu1 %vm715_vm2, %v3857_v42 }
  0x51   :  { %3657 = vmatmul.mubr.msk.bf16.gmra.mrb[36].mxu0 %vm715_vm2, %v3858_v43  ;;  %3757 = vmatmul.mubr.msk.bf16.gmra.mrb[36].mxu1 %vm715_vm2, %v3859_v44 }
  0x52   :  { %3660 = vmatprep.mubr.msk.bf16.mxu0 %vm715_vm2, %v3860_v45  ;;  %3760 = vmatprep.mubr.msk.bf16.mxu1 %vm715_vm2, %v3861_v46 }
  0x59   :  { %3661 = vmatmul.mubr.msk.bf16.gmra.mrb[40].mxu0 %vm715_vm2, %v3862_v47  ;;  %3761 = vmatmul.mubr.msk.bf16.gmra.mrb[40].mxu1 %vm715_vm2, %v3863_v48 }
  0x5a   :  { %3664 = vmatprep.mubr.msk.bf16.mxu0 %vm715_vm2, %v3864_v49  ;;  %3764 = vmatprep.mubr.msk.bf16.mxu1 %vm715_vm2, %v3865_v50 }
  0x61   :  { %3665 = vmatmul.mubr.msk.bf16.gmra.mrb[44].mxu0 %vm715_vm2, %v3866_v51  ;;  %3765 = vmatmul.mubr.msk.bf16.gmra.mrb[44].mxu1 %vm715_vm2, %v3867_v52 }
  0x62   :  { %3668 = vmatprep.mubr.msk.bf16.mxu0 %vm715_vm2, %v3868_v53  ;;  %3768 = vmatprep.mubr.msk.bf16.mxu1 %vm715_vm2, %v3869_v54 }
  0x69   :  { %3669 = vmatmul.mubr.msk.bf16.gmra.mrb[48].mxu0 %vm715_vm2, %v3870_v55  ;;  %3769 = vmatmul.mubr.msk.bf16.gmra.mrb[48].mxu1 %vm715_vm2, %v3871_v56 }
  0x6a   :  { %3672 = vmatprep.mubr.msk.bf16.mxu0 %vm715_vm2, %v3872_v57  ;;  %3772 = vmatprep.mubr.msk.bf16.mxu1 %vm715_vm2, %v3873_v58 }
  0x71   :  { %3673 = vmatmul.mubr.msk.bf16.gmra.mrb[52].mxu0 %vm715_vm2, %v3874_v59  ;;  %3773 = vmatmul.mubr.msk.bf16.gmra.mrb[52].mxu1 %vm715_vm2, %v3875_v60 }
  0x72   :  { %3676 = vmatprep.mubr.msk.bf16.mxu0 %vm715_vm2, %v3876_v61  ;;  %3776 = vmatprep.mubr.msk.bf16.mxu1 %vm715_vm2, %v3877_v62 }
  0x79   :  { %3677 = vmatmul.mubr.msk.bf16.gmra.mrb[56].mxu0 %vm715_vm2, %v3878_v63  ;;  %3777 = vmatmul.mubr.msk.bf16.gmra.mrb[56].mxu1 %vm715_vm2, %v3879_v0 }
  0x7a   :  { %3680 = vmatprep.mubr.msk.bf16.mxu0 %vm715_vm2, %v3880_v1  ;;  %3780 = vmatprep.mubr.msk.bf16.mxu1 %vm715_vm2, %v3881_v2 }
  0x81   :  { %3681 = vmatmul.mubr.msk.bf16.gmra.mrb[60].mxu0 %vm715_vm2, %v3882_v3  ;;  %3781 = vmatmul.mubr.msk.bf16.gmra.mrb[60].mxu1 %vm715_vm2, %v3883_v4 }
  0x82   :  { %3684 = vmatprep.mubr.msk.bf16.mxu0 %vm715_vm2, %v3884_v5  ;;  %3784 = vmatprep.mubr.msk.bf16.mxu1 %vm715_vm2, %v3885_v6 }
  0x89   :  { %3685 = vmatmul.mubr.msk.bf16.gmra.mrb[64].mxu0 %vm715_vm2, %v3886_v7  ;;  %3785 = vmatmul.mubr.msk.bf16.gmra.mrb[64].mxu1 %vm715_vm2, %v3887_v8 }
  0x8a   :  { %3688 = vmatprep.mubr.msk.bf16.mxu0 %vm715_vm2, %v3888_v9  ;;  %3788 = vmatprep.mubr.msk.bf16.mxu1 %vm715_vm2, %v3889_v10 }
  0x91   :  { %3689 = vmatmul.mubr.msk.bf16.gmra.mrb[68].mxu0 %vm715_vm2, %v3890_v11  ;;  %3789 = vmatmul.mubr.msk.bf16.gmra.mrb[68].mxu1 %vm715_vm2, %v3891_v12 }
  0x92   :  { %3692 = vmatprep.mubr.msk.bf16.mxu0 %vm715_vm2, %v3892_v13  ;;  %3792 = vmatprep.mubr.msk.bf16.mxu1 %vm715_vm2, %v3893_v14 }
  0x99   :  { %3693 = vmatmul.mubr.msk.bf16.gmra.mrb[72].mxu0 %vm715_vm2, %v3894_v15  ;;  %3793 = vmatmul.mubr.msk.bf16.gmra.mrb[72].mxu1 %vm715_vm2, %v3895_v16 }
  0x9a   :  { %3696 = vmatprep.mubr.msk.bf16.mxu0 %vm715_vm2, %v3896_v17  ;;  %3796 = vmatprep.mubr.msk.bf16.mxu1 %vm715_vm2, %v3897_v18 }
  0xa1   :  { %3697 = vmatmul.mubr.msk.bf16.gmra.mrb[76].mxu0 %vm715_vm2, %v3898_v19  ;;  %3797 = vmatmul.mubr.msk.bf16.gmra.mrb[76].mxu1 %vm715_vm2, %v3899_v20 }
  0xa2   :  { %3700 = vmatprep.mubr.msk.bf16.mxu0 %vm715_vm2, %v3900_v21  ;;  %3800 = vmatprep.mubr.msk.bf16.mxu1 %vm715_vm2, %v3901_v22 }
  0xa9   :  { %3701 = vmatmul.mubr.msk.bf16.gmra.mrb[80].mxu0 %vm715_vm2, %v3902_v23  ;;  %3801 = vmatmul.mubr.msk.bf16.gmra.mrb[80].mxu1 %vm715_vm2, %v3903_v24 }
  0xaa   :  { %3704 = vmatprep.mubr.msk.bf16.mxu0 %vm715_vm2, %v3904_v25  ;;  %3804 = vmatprep.mubr.msk.bf16.mxu1 %vm715_vm2, %v3905_v26 }
  0xb1   :  { %3705 = vmatmul.mubr.msk.bf16.gmra.mrb[84].mxu0 %vm715_vm2, %v3906_v27  ;;  %3805 = vmatmul.mubr.msk.bf16.gmra.mrb[84].mxu1 %vm715_vm2, %v3907_v28 }
  0xb2   :  { %3708 = vmatprep.mubr.msk.bf16.mxu0 %vm715_vm2, %v3908_v29  ;;  %3808 = vmatprep.mubr.msk.bf16.mxu1 %vm715_vm2, %v3909_v30 }
  0xb9   :  { %3709 = vmatmul.mubr.msk.bf16.gmra.mrb[88].mxu0 %vm715_vm2, %v3910_v31  ;;  %3809 = vmatmul.mubr.msk.bf16.gmra.mrb[88].mxu1 %vm715_vm2, %v3911_v32 }
  0xba   :  { %3712 = vmatprep.mubr.msk.bf16.mxu0 %vm715_vm2, %v3912_v33  ;;  %3812 = vmatprep.mubr.msk.bf16.mxu1 %vm715_vm2, %v3913_v34 }
  0xc1   :  { %3713 = vmatmul.mubr.msk.bf16.gmra.mrb[92].mxu0 %vm715_vm2, %v3914_v35  ;;  %3813 = vmatmul.mubr.msk.bf16.gmra.mrb[92].mxu1 %vm715_vm2, %v3915_v36 }
  0xc2   :  { %3716 = vmatprep.mubr.msk.bf16.mxu0 %vm715_vm2, %v3916_v37 }
  0xc9   :  { %3717 = vmatmul.mubr.msk.bf16.gmra.mrb[96].mxu0 %vm715_vm2, %v3917_v38 }
  0xdc   :  { %v3622_v40 = vpop.f32.mrb[0].mxu0  ;;  %v3722_v41 = vpop.f32.mrb[0].mxu1 }
  0xdd   :  { %v1060_v42 = vadd.f32 %v3622_v40, %v4339_v39  ;;  %v1051_v43 = vpop.f32.mrb[1].mxu0  ;;  %v1460_v44 = vadd.f32 %v3722_v41, %v4339_v39  ;;  %v1451_v45 = vpop.f32.mrb[1].mxu1 }
  0xde   :  { %v1052_v46 = vadd.f32 %v4339_v39, %v1051_v43  ;;  %v3623_v47 = vpop.f32.mrb[2].mxu0  ;;  %v1452_v48 = vadd.f32 %v4339_v39, %v1451_v45  ;;  %v3723_v49 = vpop.f32.mrb[2].mxu1 }
  0xdf   :  { %v1836_v50 = vmax.f32 %v1060_v42, 0.0  ;;  %v1063_v51 = vadd.f32 %v3623_v47, %v4339_v39  ;;  %v1054_v52 = vpop.f32.mrb[3].mxu0  ;;  %v1936_v53 = vmax.f32 %v1460_v44, 0.0  ;;  %v1463_v54 = vadd.f32 %v3723_v49, %v4339_v39  ;;  %v1454_v55 = vpop.f32.mrb[3].mxu1 }
  0xe0   :  { %v1834_v56 = vmax.f32 %v1052_v46, 0.0  ;;  %v1055_v57 = vadd.f32 %v4339_v39, %v1054_v52  ;;  %v1934_v58 = vmax.f32 %v1452_v48, 0.0  ;;  %v1455_v59 = vadd.f32 %v4339_v39, %v1454_v55 }
  0xe1   :  { %2033 = vst.msk [vmem:[#allocation2 + $0x10] sm:$0xff] %vm2030_vm3, %v1836_v50  ;;  %v1837_v60 = vmax.f32 %v1063_v51, 0.0  ;;  %2133 = vst.msk [vmem:[#allocation2 + $0x330] sm:$0xff] %vm2030_vm3, %v1936_v53  ;;  %v1937_v61 = vmax.f32 %v1463_v54, 0.0 }
  0xe2   :  { %2031 = vst.msk [vmem:[#allocation2] sm:$0xff] %vm2030_vm3, %v1834_v56  ;;  %v1835_v62 = vmax.f32 %v1055_v57, 0.0  ;;  %2131 = vst.msk [vmem:[#allocation2 + $0x320] sm:$0xff] %vm2030_vm3, %v1934_v58  ;;  %v1935_v63 = vmax.f32 %v1455_v59, 0.0 }
  0xe3   :  { %2034 = vst.msk [vmem:[#allocation2 + $0x18] sm:$0xff] %vm2030_vm3, %v1837_v60  ;;  %2134 = vst.msk [vmem:[#allocation2 + $0x338] sm:$0xff] %vm2030_vm3, %v1937_v61 }
  0xe4   :  { %2032 = vst.msk [vmem:[#allocation2 + $0x8] sm:$0xff] %vm2030_vm3, %v1835_v62  ;;  %2132 = vst.msk [vmem:[#allocation2 + $0x328] sm:$0xff] %vm2030_vm3, %v1935_v63  ;;  %v3626_v0 = vpop.f32.mrb[4].mxu0  ;;  %v3726_v1 = vpop.f32.mrb[4].mxu1 }
  0xe5   :  { %v1076_v2 = vadd.f32 %v3626_v0, %v4339_v39  ;;  %v1476_v3 = vadd.f32 %v3726_v1, %v4339_v39  ;;  %v1067_v4 = vpop.f32.mrb[5].mxu0  ;;  %v1467_v5 = vpop.f32.mrb[5].mxu1 }
  0xe6   :  { %v1068_v6 = vadd.f32 %v4339_v39, %v1067_v4  ;;  %v1468_v7 = vadd.f32 %v4339_v39, %v1467_v5  ;;  %v3627_v8 = vpop.f32.mrb[6].mxu0  ;;  %v3727_v9 = vpop.f32.mrb[6].mxu1 }
  0xe7   :  { %v1840_v10 = vmax.f32 %v1076_v2, 0.0  ;;  %v1940_v11 = vmax.f32 %v1476_v3, 0.0  ;;  %v1079_v12 = vadd.f32 %v3627_v8, %v4339_v39  ;;  %v1070_v13 = vpop.f32.mrb[7].mxu0  ;;  %v1479_v14 = vadd.f32 %v3727_v9, %v4339_v39  ;;  %v1470_v15 = vpop.f32.mrb[7].mxu1 }
  0xe8   :  { %v1838_v16 = vmax.f32 %v1068_v6, 0.0  ;;  %v1938_v17 = vmax.f32 %v1468_v7, 0.0  ;;  %v1071_v19 = vadd.f32 %v4339_v39, %v1070_v13  ;;  %v1471_v21 = vadd.f32 %v4339_v39, %v1470_v15 }
  0xe9   :  { %2037 = vst.msk [vmem:[#allocation2 + $0x30] sm:$0xff] %vm2030_vm3, %v1840_v10  ;;  %2137 = vst.msk [vmem:[#allocation2 + $0x350] sm:$0xff] %vm2030_vm3, %v1940_v11  ;;  %v1841_v18 = vmax.f32 %v1079_v12, 0.0  ;;  %v1941_v20 = vmax.f32 %v1479_v14, 0.0 }
  0xea   :  { %2035 = vst.msk [vmem:[#allocation2 + $0x20] sm:$0xff] %vm2030_vm3, %v1838_v16  ;;  %2135 = vst.msk [vmem:[#allocation2 + $0x340] sm:$0xff] %vm2030_vm3, %v1938_v17  ;;  %v1839_v24 = vmax.f32 %v1071_v19, 0.0  ;;  %v1939_v25 = vmax.f32 %v1471_v21, 0.0 }
  0xeb   :  { %2038 = vst.msk [vmem:[#allocation2 + $0x38] sm:$0xff] %vm2030_vm3, %v1841_v18  ;;  %2138 = vst.msk [vmem:[#allocation2 + $0x358] sm:$0xff] %vm2030_vm3, %v1941_v20  ;;  %v2692_v22 = vld [vmem:[#allocation2 + $0x320] ss:$2 sm:$0x3f] }
  0xec   :  { %v2696_v23 = vld [vmem:[#allocation2 + $0x321] ss:$2 sm:$0x3f]  ;;  %v3630_v26 = vpop.f32.mrb[8].mxu0  ;;  %v3730_v27 = vpop.f32.mrb[8].mxu1  ;;  %2036 = vst.msk [vmem:[#allocation2 + $0x28] sm:$0xff] %vm2030_vm3, %v1839_v24 }
  0xed   :  { %v1092_v28 = vadd.f32 %v3630_v26, %v4339_v39  ;;  %v1492_v29 = vadd.f32 %v3730_v27, %v4339_v39  ;;  %v1083_v30 = vpop.f32.mrb[9].mxu0  ;;  %v1483_v31 = vpop.f32.mrb[9].mxu1  ;;  %v2706_v32 = vmax.f32 %v2692_v22, %v2696_v23  ;;  %2136 = vst.msk [vmem:[#allocation2 + $0x348] sm:$0xff] %vm2030_vm3, %v1939_v25  ;;  %v2229_v52 = vld [vmem:[#allocation2 + $0x10] ss:$2 sm:$0x3f] }
  0xee   :  { %v1084_v33 = vadd.f32 %v4339_v39, %v1083_v30  ;;  %v1484_v34 = vadd.f32 %v4339_v39, %v1483_v31  ;;  %v3631_v35 = vpop.f32.mrb[10].mxu0  ;;  %v3731_v36 = vpop.f32.mrb[10].mxu1  ;;  %v2233_v56 = vld [vmem:[#allocation2 + $0x11] ss:$2 sm:$0x3f] }
  0xef   :  { %v1844_v37 = vmax.f32 %v1092_v28, 0.0  ;;  %v1944_v38 = vmax.f32 %v1492_v29, 0.0  ;;  %v1095_v40 = vadd.f32 %v3631_v35, %v4339_v39  ;;  %v1495_v41 = vadd.f32 %v3731_v36, %v4339_v39  ;;  %v1086_v42 = vpop.f32.mrb[11].mxu0  ;;  %v1486_v43 = vpop.f32.mrb[11].mxu1  ;;  %v2227_v60 = vld [vmem:[#allocation2] ss:$2 sm:$0xff] }
  0xf0   :  { %v1087_v46 = vadd.f32 %v4339_v39, %v1086_v42  ;;  %v1487_v47 = vadd.f32 %v4339_v39, %v1486_v43  ;;  %v1842_v49 = vmax.f32 %v1084_v33, 0.0  ;;  %v1942_v50 = vmax.f32 %v1484_v34, 0.0  ;;  %v2231_v61 = vld [vmem:[#allocation2 + $0x1] ss:$2 sm:$0xff] }
  0xf1   :  { %v2700_v44 = vld [vmem:[#allocation2 + $0x33c] ss:$2 sm:$0x3f]  ;;  %v2704_v45 = vld [vmem:[#allocation2 + $0x33d] ss:$2 sm:$0x3f]  ;;  %v2243_v8 = vmax.f32 %v2229_v52, %v2233_v56  ;;  %v2242_v13 = vmax.f32 %v2227_v60, %v2231_v61 }
  0xf2   :  { %v2708_v48 = vmax.f32 %v2700_v44, %v2704_v45  ;;  %2041 = vst.msk [vmem:[#allocation2 + $0x50] sm:$0xff] %vm2030_vm3, %v1844_v37  ;;  %2141 = vst.msk [vmem:[#allocation2 + $0x370] sm:$0xff] %vm2030_vm3, %v1944_v38  ;;  %v1845_v51 = vmax.f32 %v1095_v40, 0.0  ;;  %v1945_v53 = vmax.f32 %v1495_v41, 0.0  ;;  %v1843_v54 = vmax.f32 %v1087_v46, 0.0 }
  0xf3   :  { %v1943_v55 = vmax.f32 %v1487_v47, 0.0  ;;  %2039 = vst.msk [vmem:[#allocation2 + $0x40] sm:$0xff] %vm2030_vm3, %v1842_v49  ;;  %2139 = vst.msk [vmem:[#allocation2 + $0x360] sm:$0xff] %vm2030_vm3, %v1942_v50  ;;  %v2235_v3 = vld [vmem:[#allocation2 + $0x1c] ss:$2 sm:$0xff] }
  0xf4   :  { %v2710_v57 = vmax.f32 %v2706_v32, %v2708_v48  ;;  %2042 = vst.msk [vmem:[#allocation2 + $0x58] sm:$0xff] %vm2030_vm3, %v1845_v51  ;;  %v3634_v58 = vpop.f32.mrb[12].mxu0  ;;  %v3734_v59 = vpop.f32.mrb[12].mxu1  ;;  %2142 = vst.msk [vmem:[#allocation2 + $0x378] sm:$0xff] %vm2030_vm3, %v1945_v53  ;;  %v2239_v9 = vld [vmem:[#allocation2 + $0x1d] ss:$2 sm:$0xff] }
  0xf5   :  { %2040 = vst.msk [vmem:[#allocation2 + $0x48] sm:$0xff] %vm2030_vm3, %v1843_v54  ;;  %2140 = vst.msk [vmem:[#allocation2 + $0x368] sm:$0xff] %vm2030_vm3, %v1943_v55  ;;  %v1108_v62 = vadd.f32 %v3634_v58, %v4339_v39  ;;  %v1099_v63 = vpop.f32.mrb[13].mxu0  ;;  %v1508_v0 = vadd.f32 %v3734_v59, %v4339_v39  ;;  %v1499_v1 = vpop.f32.mrb[13].mxu1  ;;  %v2244_v14 = vmax.f32 %v2235_v3, %v2239_v9  ;;  %v2723_v26 = vld [vmem:[#allocation2 + $0x348] ss:$2 sm:$0xff] }
  0xf6   :  { %v3492_v2 = vpack.c.bf16 %v2710_v57, %v2710_v57  ;;  %v2237_v4 = vld [vmem:[#allocation2 + $0x2c] ss:$2 sm:$0x3f]  ;;  %v1100_v5 = vadd.f32 %v4339_v39, %v1099_v63  ;;  %v3635_v6 = vpop.f32.mrb[14].mxu0  ;;  %v1500_v7 = vadd.f32 %v4339_v39, %v1499_v1  ;;  %v3735_v21 = vpop.f32.mrb[14].mxu1 }
  0xf7   :  { %v2241_v10 = vld [vmem:[#allocation2 + $0x2d] ss:$2 sm:$0x3f]  ;;  %v1848_v11 = vmax.f32 %v1108_v62, 0.0  ;;  %v1111_v12 = vadd.f32 %v3635_v6, %v4339_v39  ;;  %v1102_v17 = vpop.f32.mrb[15].mxu0  ;;  %v1948_v20 = vmax.f32 %v1508_v0, 0.0  ;;  %v2246_v22 = vmax.f32 %v2242_v13, %v2244_v14 }
  0xf8   :  { %3410 = vst.msk [vmem:[%s4970_s3 + $0x74] sm:$0x7] %vm2258_vm4, %v3492_v2  ;;  %v2245_v15 = vmax.f32 %v2237_v4, %v2241_v10  ;;  %v1846_v16 = vmax.f32 %v1100_v5, 0.0  ;;  %v1103_v19 = vadd.f32 %v4339_v39, %v1102_v17  ;;  %v1946_v24 = vmax.f32 %v1500_v7, 0.0  ;;  %v1502_v25 = vpop.f32.mrb[15].mxu1 }
  0xf9   :  { %2045 = vst.msk [vmem:[#allocation2 + $0x70] sm:$0xff] %vm2030_vm3, %v1848_v11  ;;  %v1849_v18 = vmax.f32 %v1111_v12, 0.0  ;;  %v2727_v27 = vld [vmem:[#allocation2 + $0x349] ss:$2 sm:$0xff]  ;;  %2145 = vst.msk [vmem:[#allocation2 + $0x390] sm:$0xff] %vm2030_vm3, %v1948_v20  ;;  %v1511_v29 = vadd.f32 %v3735_v21, %v4339_v39  ;;  %v1503_v30 = vadd.f32 %v4339_v39, %v1502_v25  ;;  %v3463_v31 = vpack.c.bf16 %v2246_v22, %v2246_v22 }
  0xfa   :  { %v2247_v23 = vmax.f32 %v2243_v8, %v2245_v15  ;;  %2043 = vst.msk [vmem:[#allocation2 + $0x60] sm:$0xff] %vm2030_vm3, %v1846_v16  ;;  %v1847_v28 = vmax.f32 %v1103_v19, 0.0  ;;  %v2261_v33 = vld [vmem:[#allocation2 + $0x38] ss:$2 sm:$0xff]  ;;  %2143 = vst.msk [vmem:[#allocation2 + $0x380] sm:$0xff] %vm2030_vm3, %v1946_v24  ;;  %v2738_v47 = vmax.f32 %v2723_v26, %v2727_v27 }
  0xfb   :  { %2046 = vst.msk [vmem:[#allocation2 + $0x78] sm:$0xff] %vm2030_vm3, %v1849_v18  ;;  %v2725_v34 = vld [vmem:[#allocation2 + $0x358] ss:$2 sm:$0x3f]  ;;  %v2265_v40 = vld [vmem:[#allocation2 + $0x39] ss:$2 sm:$0xff] }
  0xfc   :  { %v3464_v32 = vpack.c.bf16 %v2247_v23, %v2247_v23  ;;  %v2729_v35 = vld [vmem:[#allocation2 + $0x359] ss:$2 sm:$0x3f]  ;;  %v2733_v37 = vld [vmem:[#allocation2 + $0x374] ss:$2 sm:$0x3f]  ;;  %v2276_v53 = vmax.f32 %v2261_v33, %v2265_v40 }
  0xfd   :  { %v2739_v36 = vmax.f32 %v2725_v34, %v2729_v35  ;;  %v2737_v38 = vld [vmem:[#allocation2 + $0x375] ss:$2 sm:$0x3f]  ;;  %2044 = vst.msk [vmem:[#allocation2 + $0x68] sm:$0xff] %vm2030_vm3, %v1847_v28  ;;  %v2731_v43 = vld [vmem:[#allocation2 + $0x364] ss:$2 sm:$0xff] }
  0xfe   :  { %2257 = vst.msk [vmem:[%s4970_s3] sm:$0xf] %vm2256_vm5, %v3463_v31  ;;  %v2741_v41 = vmax.f32 %v2733_v37, %v2737_v38  ;;  %v2263_v42 = vld [vmem:[#allocation2 + $0x48] ss:$2 sm:$0x3f]  ;;  %v1949_v45 = vmax.f32 %v1511_v29, 0.0 }
  0xff   :  { %2259 = vst.msk [vmem:[%s4970_s3 + $0x4] sm:$0x7] %vm2258_vm4, %v3464_v32  ;;  %v2735_v44 = vld [vmem:[#allocation2 + $0x365] ss:$2 sm:$0xff]  ;;  %v1947_v46 = vmax.f32 %v1503_v30, 0.0  ;;  %v3638_v51 = vpop.f32.mrb[16].mxu0 }
 0x100   :  { %v2743_v48 = vmax.f32 %v2739_v36, %v2741_v41  ;;  %v2267_v49 = vld [vmem:[#allocation2 + $0x49] ss:$2 sm:$0x3f]  ;;  %v2740_v50 = vmax.f32 %v2731_v43, %v2735_v44  ;;  %v3738_v52 = vpop.f32.mrb[16].mxu1  ;;  %2146 = vst.msk [vmem:[#allocation2 + $0x398] sm:$0xff] %vm2030_vm3, %v1949_v45  ;;  %v1124_v56 = vadd.f32 %v3638_v51, %v4339_v39  ;;  %v1115_v58 = vpop.f32.mrb[17].mxu0 }
 0x101   :  { %v2269_v54 = vld [vmem:[#allocation2 + $0x54] ss:$2 sm:$0xff]  ;;  %v2273_v55 = vld [vmem:[#allocation2 + $0x55] ss:$2 sm:$0xff]  ;;  %2144 = vst.msk [vmem:[#allocation2 + $0x388] sm:$0xff] %vm2030_vm3, %v1947_v46  ;;  %v1524_v57 = vadd.f32 %v3738_v52, %v4339_v39  ;;  %v1515_v59 = vpop.f32.mrb[17].mxu1  ;;  %v1116_v63 = vadd.f32 %v4339_v39, %v1115_v58  ;;  %v2277_v2 = vmax.f32 %v2263_v42, %v2267_v49 }
 0x102   :  { %v3494_v60 = vpack.c.bf16 %v2743_v48, %v2743_v48  ;;  %v2742_v61 = vmax.f32 %v2738_v47, %v2740_v50  ;;  %v2278_v62 = vmax.f32 %v2269_v54, %v2273_v55  ;;  %v3639_v0 = vpop.f32.mrb[18].mxu0  ;;  %v3739_v1 = vpop.f32.mrb[18].mxu1  ;;  %v1852_v3 = vmax.f32 %v1124_v56, 0.0  ;;  %v2294_v51 = vld [vmem:[#allocation2 + $0x70] ss:$2 sm:$0xff] }
 0x103   :  { %v1952_v4 = vmax.f32 %v1524_v57, 0.0  ;;  %v1516_v5 = vadd.f32 %v4339_v39, %v1515_v59  ;;  %v1118_v6 = vpop.f32.mrb[19].mxu0  ;;  %v1518_v7 = vpop.f32.mrb[19].mxu1  ;;  %v1127_v12 = vadd.f32 %v3639_v0, %v4339_v39  ;;  %v1527_v13 = vadd.f32 %v3739_v1, %v4339_v39  ;;  %v2298_v52 = vld [vmem:[#allocation2 + $0x71] ss:$2 sm:$0xff] }
 0x104   :  { %3414 = vst.msk [vmem:[%s4970_s3 + $0x7c] sm:$0x7] %vm2258_vm4, %v3494_v60  ;;  %v3493_v8 = vpack.c.bf16 %v2742_v61, %v2742_v61  ;;  %v2280_v9 = vmax.f32 %v2276_v53, %v2278_v62  ;;  %v2271_v10 = vld [vmem:[#allocation2 + $0x64] ss:$2 sm:$0x3f]  ;;  %v1850_v15 = vmax.f32 %v1116_v63, 0.0  ;;  %v1119_v17 = vadd.f32 %v4339_v39, %v1118_v6 }
 0x105   :  { %v2275_v11 = vld [vmem:[#allocation2 + $0x65] ss:$2 sm:$0x3f]  ;;  %2049 = vst.msk [vmem:[#allocation2 + $0x90] sm:$0xff] %vm2030_vm3, %v1852_v3  ;;  %2149 = vst.msk [vmem:[#allocation2 + $0x3b0] sm:$0xff] %vm2030_vm3, %v1952_v4  ;;  %v1950_v16 = vmax.f32 %v1516_v5, 0.0  ;;  %v1519_v23 = vadd.f32 %v4339_v39, %v1518_v7 }
 0x106   :  { %v2279_v14 = vmax.f32 %v2271_v10, %v2275_v11  ;;  %v3642_v18 = vpop.f32.mrb[20].mxu0  ;;  %v3742_v19 = vpop.f32.mrb[20].mxu1  ;;  %3413 = vst.msk [vmem:[%s4970_s3 + $0x78] sm:$0xf] %vm2256_vm5, %v3493_v8  ;;  %v3465_v20 = vpack.c.bf16 %v2280_v9, %v2280_v9  ;;  %v1853_v21 = vmax.f32 %v1127_v12, 0.0  ;;  %v1953_v22 = vmax.f32 %v1527_v13, 0.0 }
 0x107   :  { %v1131_v24 = vpop.f32.mrb[21].mxu0  ;;  %v1531_v25 = vpop.f32.mrb[21].mxu1  ;;  %2047 = vst.msk [vmem:[#allocation2 + $0x80] sm:$0xff] %vm2030_vm3, %v1850_v15  ;;  %2147 = vst.msk [vmem:[#allocation2 + $0x3a0] sm:$0xff] %vm2030_vm3, %v1950_v16  ;;  %v1851_v27 = vmax.f32 %v1119_v17, 0.0  ;;  %v1140_v28 = vadd.f32 %v3642_v18, %v4339_v39  ;;  %v1540_v29 = vadd.f32 %v3742_v19, %v4339_v39  ;;  %v1951_v37 = vmax.f32 %v1519_v23, 0.0 }
 0x108   :  { %v2281_v26 = vmax.f32 %v2277_v2, %v2279_v14  ;;  %v3643_v30 = vpop.f32.mrb[22].mxu0  ;;  %v3743_v31 = vpop.f32.mrb[22].mxu1  ;;  %3357 = vst.msk [vmem:[%s4970_s3 + $0x8] sm:$0xf] %vm2256_vm5, %v3465_v20  ;;  %v1132_v32 = vadd.f32 %v4339_v39, %v1131_v24  ;;  %v1532_v33 = vadd.f32 %v4339_v39, %v1531_v25  ;;  %v2756_v1 = vld [vmem:[#allocation2 + $0x380] ss:$2 sm:$0xff]  ;;  %v2309_v17 = vmax.f32 %v2294_v51, %v2298_v52 }
 0x109   :  { %2050 = vst.msk [vmem:[#allocation2 + $0x98] sm:$0xff] %vm2030_vm3, %v1853_v21  ;;  %2150 = vst.msk [vmem:[#allocation2 + $0x3b8] sm:$0xff] %vm2030_vm3, %v1953_v22  ;;  %v1143_v34 = vadd.f32 %v3643_v30, %v4339_v39  ;;  %v1543_v35 = vadd.f32 %v3743_v31, %v4339_v39  ;;  %v1856_v38 = vmax.f32 %v1140_v28, 0.0  ;;  %v1956_v40 = vmax.f32 %v1540_v29, 0.0  ;;  %v1134_v43 = vpop.f32.mrb[23].mxu0  ;;  %v1534_v44 = vpop.f32.mrb[23].mxu1 }
 0x10a   :  { %v3466_v36 = vpack.c.bf16 %v2281_v26, %v2281_v26  ;;  %2048 = vst.msk [vmem:[#allocation2 + $0x88] sm:$0xff] %vm2030_vm3, %v1851_v27  ;;  %v1854_v41 = vmax.f32 %v1132_v32, 0.0  ;;  %v1954_v42 = vmax.f32 %v1532_v33, 0.0  ;;  %2148 = vst.msk [vmem:[#allocation2 + $0x3a8] sm:$0xff] %vm2030_vm3, %v1951_v37  ;;  %v1135_v46 = vadd.f32 %v4339_v39, %v1134_v43  ;;  %v2760_v2 = vld [vmem:[#allocation2 + $0x381] ss:$2 sm:$0xff] }
 0x10b   :  { %2053 = vst.msk [vmem:[#allocation2 + $0xb0] sm:$0xff] %vm2030_vm3, %v1856_v38  ;;  %v1857_v45 = vmax.f32 %v1143_v34, 0.0  ;;  %v1957_v47 = vmax.f32 %v1543_v35, 0.0  ;;  %v1535_v48 = vadd.f32 %v4339_v39, %v1534_v44  ;;  %2153 = vst.msk [vmem:[#allocation2 + $0x3d0] sm:$0xff] %vm2030_vm3, %v1956_v40  ;;  %v2771_v26 = vmax.f32 %v2756_v1, %v2760_v2 }
 0x10c   :  { %3358 = vst.msk [vmem:[%s4970_s3 + $0xc] sm:$0x7] %vm2258_vm4, %v3466_v36  ;;  %v3646_v49 = vpop.f32.mrb[24].mxu0  ;;  %v3746_v50 = vpop.f32.mrb[24].mxu1  ;;  %v1855_v53 = vmax.f32 %v1135_v46, 0.0 }
 0x10d   :  { %2051 = vst.msk [vmem:[#allocation2 + $0xa0] sm:$0xff] %vm2030_vm3, %v1854_v41  ;;  %2151 = vst.msk [vmem:[#allocation2 + $0x3c0] sm:$0xff] %vm2030_vm3, %v1954_v42  ;;  %v1955_v54 = vmax.f32 %v1535_v48, 0.0  ;;  %v1156_v55 = vadd.f32 %v3646_v49, %v4339_v39  ;;  %v1556_v56 = vadd.f32 %v3746_v50, %v4339_v39  ;;  %v1147_v57 = vpop.f32.mrb[25].mxu0  ;;  %v1547_v58 = vpop.f32.mrb[25].mxu1 }
 0x10e   :  { %2054 = vst.msk [vmem:[#allocation2 + $0xb8] sm:$0xff] %vm2030_vm3, %v1857_v45  ;;  %2154 = vst.msk [vmem:[#allocation2 + $0x3d8] sm:$0xff] %vm2030_vm3, %v1957_v47  ;;  %v2758_v59 = vld [vmem:[#allocation2 + $0x390] ss:$2 sm:$0x3f]  ;;  %v1148_v61 = vadd.f32 %v4339_v39, %v1147_v57  ;;  %v1548_v62 = vadd.f32 %v4339_v39, %v1547_v58  ;;  %v3647_v63 = vpop.f32.mrb[26].mxu0 }
 0x10f   :  { %v2762_v60 = vld [vmem:[#allocation2 + $0x391] ss:$2 sm:$0x3f]  ;;  %v3747_v0 = vpop.f32.mrb[26].mxu1  ;;  %2052 = vst.msk [vmem:[#allocation2 + $0xa8] sm:$0xff] %vm2030_vm3, %v1855_v53  ;;  %2152 = vst.msk [vmem:[#allocation2 + $0x3c8] sm:$0xff] %vm2030_vm3, %v1955_v54  ;;  %v1159_v5 = vadd.f32 %v3647_v63, %v4339_v39 }
 0x110   :  { %v1860_v3 = vmax.f32 %v1156_v55, 0.0  ;;  %v1960_v4 = vmax.f32 %v1556_v56, 0.0  ;;  %v1559_v6 = vadd.f32 %v3747_v0, %v4339_v39  ;;  %v1150_v7 = vpop.f32.mrb[27].mxu0  ;;  %v1550_v8 = vpop.f32.mrb[27].mxu1  ;;  %v1858_v13 = vmax.f32 %v1148_v61, 0.0 }
 0x111   :  { %v2296_v9 = vld [vmem:[#allocation2 + $0x80] ss:$2 sm:$0x3f]  ;;  %v2300_v10 = vld [vmem:[#allocation2 + $0x81] ss:$2 sm:$0x3f]  ;;  %v1151_v15 = vadd.f32 %v4339_v39, %v1150_v7  ;;  %v1551_v16 = vadd.f32 %v4339_v39, %v1550_v8  ;;  %v2772_v22 = vmax.f32 %v2758_v59, %v2762_v60 }
 0x112   :  { %v2302_v11 = vld [vmem:[#allocation2 + $0x8c] ss:$2 sm:$0xff]  ;;  %v2306_v12 = vld [vmem:[#allocation2 + $0x8d] ss:$2 sm:$0xff]  ;;  %2057 = vst.msk [vmem:[#allocation2 + $0xd0] sm:$0xff] %vm2030_vm3, %v1860_v3  ;;  %2157 = vst.msk [vmem:[#allocation2 + $0x3f0] sm:$0xff] %vm2030_vm3, %v1960_v4  ;;  %v2310_v32 = vmax.f32 %v2296_v9, %v2300_v10 }
 0x113   :  { %v1958_v14 = vmax.f32 %v1548_v62, 0.0  ;;  %v2311_v18 = vmax.f32 %v2302_v11, %v2306_v12  ;;  %v2764_v19 = vld [vmem:[#allocation2 + $0x39c] ss:$2 sm:$0xff]  ;;  %v2766_v20 = vld [vmem:[#allocation2 + $0x3ac] ss:$2 sm:$0x3f] }
 0x114   :  { %v1861_v21 = vmax.f32 %v1159_v5, 0.0  ;;  %v2768_v23 = vld [vmem:[#allocation2 + $0x39d] ss:$2 sm:$0xff]  ;;  %v2770_v24 = vld [vmem:[#allocation2 + $0x3ad] ss:$2 sm:$0x3f] }
 0x115   :  { %2055 = vst.msk [vmem:[#allocation2 + $0xc0] sm:$0xff] %vm2030_vm3, %v1858_v13  ;;  %2155 = vst.msk [vmem:[#allocation2 + $0x3e0] sm:$0xff] %vm2030_vm3, %v1958_v14  ;;  %v1961_v25 = vmax.f32 %v1559_v6, 0.0  ;;  %v2313_v27 = vmax.f32 %v2309_v17, %v2311_v18  ;;  %v2773_v28 = vmax.f32 %v2764_v19, %v2768_v23  ;;  %v2774_v29 = vmax.f32 %v2766_v20, %v2770_v24  ;;  %v2304_v30 = vld [vmem:[#allocation2 + $0x9c] ss:$2 sm:$0x3f] }
 0x116   :  { %v2308_v31 = vld [vmem:[#allocation2 + $0x9d] ss:$2 sm:$0x3f]  ;;  %2058 = vst.msk [vmem:[#allocation2 + $0xd8] sm:$0xff] %vm2030_vm3, %v1861_v21  ;;  %v1859_v34 = vmax.f32 %v1151_v15, 0.0  ;;  %v1959_v35 = vmax.f32 %v1551_v16, 0.0 }
 0x117   :  { %v2312_v33 = vmax.f32 %v2304_v30, %v2308_v31  ;;  %2158 = vst.msk [vmem:[#allocation2 + $0x3f8] sm:$0xff] %vm2030_vm3, %v1961_v25  ;;  %v3467_v36 = vpack.c.bf16 %v2313_v27, %v2313_v27  ;;  %v2775_v37 = vmax.f32 %v2771_v26, %v2773_v28  ;;  %v2776_v38 = vmax.f32 %v2772_v22, %v2774_v29  ;;  %v3650_v40 = vpop.f32.mrb[28].mxu0  ;;  %v3750_v41 = vpop.f32.mrb[28].mxu1  ;;  %v2789_v47 = vld [vmem:[#allocation2 + $0x3b8] ss:$2 sm:$0xff] }
 0x118   :  { %2056 = vst.msk [vmem:[#allocation2 + $0xc8] sm:$0xff] %vm2030_vm3, %v1859_v34  ;;  %2156 = vst.msk [vmem:[#allocation2 + $0x3e8] sm:$0xff] %vm2030_vm3, %v1959_v35  ;;  %v1172_v43 = vadd.f32 %v3650_v40, %v4339_v39  ;;  %v1572_v44 = vadd.f32 %v3750_v41, %v4339_v39  ;;  %v1163_v48 = vpop.f32.mrb[29].mxu0  ;;  %v1563_v49 = vpop.f32.mrb[29].mxu1  ;;  %v2793_v51 = vld [vmem:[#allocation2 + $0x3b9] ss:$2 sm:$0xff] }
 0x119   :  { %v2314_v42 = vmax.f32 %v2310_v32, %v2312_v33  ;;  %3361 = vst.msk [vmem:[%s4970_s3 + $0x10] sm:$0xf] %vm2256_vm5, %v3467_v36  ;;  %v3495_v45 = vpack.c.bf16 %v2775_v37, %v2775_v37  ;;  %v3496_v46 = vpack.c.bf16 %v2776_v38, %v2776_v38  ;;  %v1164_v54 = vadd.f32 %v4339_v39, %v1163_v48  ;;  %v3651_v55 = vpop.f32.mrb[30].mxu0  ;;  %v3751_v56 = vpop.f32.mrb[30].mxu1  ;;  %v2327_v57 = vld [vmem:[#allocation2 + $0xa8] ss:$2 sm:$0xff] }
 0x11a   :  { %v1864_v52 = vmax.f32 %v1172_v43, 0.0  ;;  %v1964_v53 = vmax.f32 %v1572_v44, 0.0  ;;  %v2331_v58 = vld [vmem:[#allocation2 + $0xa9] ss:$2 sm:$0xff]  ;;  %v1564_v61 = vadd.f32 %v4339_v39, %v1563_v49  ;;  %v1175_v62 = vadd.f32 %v3651_v55, %v4339_v39  ;;  %v1166_v5 = vpop.f32.mrb[31].mxu0  ;;  %v1566_v28 = vpop.f32.mrb[31].mxu1 }
 0x11b   :  { %v3468_v50 = vpack.c.bf16 %v2314_v42, %v2314_v42  ;;  %3417 = vst.msk [vmem:[%s4970_s3 + $0x80] sm:$0xf] %vm2256_vm5, %v3495_v45  ;;  %v1575_v63 = vadd.f32 %v3751_v56, %v4339_v39  ;;  %v2791_v0 = vld [vmem:[#allocation2 + $0x3c8] ss:$2 sm:$0x3f]  ;;  %v1862_v4 = vmax.f32 %v1164_v54, 0.0  ;;  %v2804_v6 = vmax.f32 %v2789_v47, %v2793_v51 }
 0x11c   :  { %3418 = vst.msk [vmem:[%s4970_s3 + $0x84] sm:$0x7] %vm2258_vm4, %v3496_v46  ;;  %v2329_v59 = vld [vmem:[#allocation2 + $0xb8] ss:$2 sm:$0x3f]  ;;  %v1167_v10 = vadd.f32 %v4339_v39, %v1166_v5  ;;  %v1962_v13 = vmax.f32 %v1564_v61, 0.0  ;;  %v2342_v20 = vmax.f32 %v2327_v57, %v2331_v58  ;;  %v1567_v32 = vadd.f32 %v4339_v39, %v1566_v28 }
 0x11d   :  { %v2333_v60 = vld [vmem:[#allocation2 + $0xb9] ss:$2 sm:$0x3f]  ;;  %3362 = vst.msk [vmem:[%s4970_s3 + $0x14] sm:$0x7] %vm2258_vm4, %v3468_v50  ;;  %v1865_v14 = vmax.f32 %v1175_v62, 0.0 }
 0x11e   :  { %v2343_v1 = vmax.f32 %v2329_v59, %v2333_v60  ;;  %v2797_v2 = vld [vmem:[#allocation2 + $0x3d4] ss:$2 sm:$0xff]  ;;  %v2801_v3 = vld [vmem:[#allocation2 + $0x3d5] ss:$2 sm:$0xff]  ;;  %2061 = vst.msk [vmem:[#allocation2 + $0xf0] sm:$0xff] %vm2030_vm3, %v1864_v52  ;;  %2161 = vst.msk [vmem:[#allocation2 + $0x410] sm:$0xff] %vm2030_vm3, %v1964_v53 }
 0x11f   :  { %v2806_v7 = vmax.f32 %v2797_v2, %v2801_v3  ;;  %v2337_v8 = vld [vmem:[#allocation2 + $0xd4] ss:$2 sm:$0x3f]  ;;  %v2341_v9 = vld [vmem:[#allocation2 + $0xd5] ss:$2 sm:$0x3f] }
 0x120   :  { %v2795_v11 = vld [vmem:[#allocation2 + $0x3c9] ss:$2 sm:$0x3f]  ;;  %v2345_v12 = vmax.f32 %v2337_v8, %v2341_v9  ;;  %2059 = vst.msk [vmem:[#allocation2 + $0xe0] sm:$0xff] %vm2030_vm3, %v1862_v4  ;;  %v2335_v16 = vld [vmem:[#allocation2 + $0xc4] ss:$2 sm:$0xff] }
 0x121   :  { %v2808_v15 = vmax.f32 %v2804_v6, %v2806_v7  ;;  %v2339_v17 = vld [vmem:[#allocation2 + $0xc5] ss:$2 sm:$0xff]  ;;  %v1965_v18 = vmax.f32 %v1575_v63, 0.0  ;;  %v1863_v19 = vmax.f32 %v1167_v10, 0.0  ;;  %2159 = vst.msk [vmem:[#allocation2 + $0x400] sm:$0xff] %vm2030_vm3, %v1962_v13  ;;  %2062 = vst.msk [vmem:[#allocation2 + $0xf8] sm:$0xff] %vm2030_vm3, %v1865_v14  ;;  %v2805_v25 = vmax.f32 %v2791_v0, %v2795_v11 }
 0x122   :  { %v2347_v21 = vmax.f32 %v2343_v1, %v2345_v12  ;;  %v2344_v22 = vmax.f32 %v2335_v16, %v2339_v17  ;;  %v2799_v23 = vld [vmem:[#allocation2 + $0x3e4] ss:$2 sm:$0x3f]  ;;  %v2803_v24 = vld [vmem:[#allocation2 + $0x3e5] ss:$2 sm:$0x3f] }
 0x123   :  { %v3497_v26 = vpack.c.bf16 %v2808_v15, %v2808_v15  ;;  %v2807_v27 = vmax.f32 %v2799_v23, %v2803_v24  ;;  %2162 = vst.msk [vmem:[#allocation2 + $0x418] sm:$0xff] %vm2030_vm3, %v1965_v18  ;;  %2060 = vst.msk [vmem:[#allocation2 + $0xe8] sm:$0xff] %vm2030_vm3, %v1863_v19  ;;  %v3654_v29 = vpop.f32.mrb[32].mxu0  ;;  %v3754_v34 = vpop.f32.mrb[32].mxu1  ;;  %v1963_v43 = vmax.f32 %v1567_v32, 0.0 }
 0x124   :  { %v3470_v30 = vpack.c.bf16 %v2347_v21, %v2347_v21  ;;  %v2346_v31 = vmax.f32 %v2342_v20, %v2344_v22  ;;  %v1188_v33 = vadd.f32 %v3654_v29, %v4339_v39  ;;  %v1179_v35 = vpop.f32.mrb[33].mxu0  ;;  %v1588_v37 = vadd.f32 %v3754_v34, %v4339_v39  ;;  %v1579_v40 = vpop.f32.mrb[33].mxu1  ;;  %v2822_v12 = vld [vmem:[#allocation2 + $0x3f0] ss:$2 sm:$0xff]  ;;  %v2826_v13 = vld [vmem:[#allocation2 + $0x3f1] ss:$2 sm:$0xff] }
 0x125   :  { %3421 = vst.msk [vmem:[%s4970_s3 + $0x88] sm:$0xf] %vm2256_vm5, %v3497_v26  ;;  %v2809_v36 = vmax.f32 %v2805_v25, %v2807_v27  ;;  %v1180_v38 = vadd.f32 %v4339_v39, %v1179_v35  ;;  %v3655_v41 = vpop.f32.mrb[34].mxu0  ;;  %v1580_v45 = vadd.f32 %v4339_v39, %v1579_v40  ;;  %v3755_v47 = vpop.f32.mrb[34].mxu1 }
 0x126   :  { %3366 = vst.msk [vmem:[%s4970_s3 + $0x1c] sm:$0x7] %vm2258_vm4, %v3470_v30  ;;  %v3469_v42 = vpack.c.bf16 %v2346_v31, %v2346_v31  ;;  %v1868_v44 = vmax.f32 %v1188_v33, 0.0  ;;  %v1182_v46 = vpop.f32.mrb[35].mxu0  ;;  %v1968_v49 = vmax.f32 %v1588_v37, 0.0  ;;  %v1191_v51 = vadd.f32 %v3655_v41, %v4339_v39  ;;  %v1582_v52 = vpop.f32.mrb[35].mxu1 }
 0x127   :  { %v3498_v48 = vpack.c.bf16 %v2809_v36, %v2809_v36  ;;  %v1866_v50 = vmax.f32 %v1180_v38, 0.0  ;;  %v3658_v53 = vpop.f32.mrb[36].mxu0  ;;  %2160 = vst.msk [vmem:[#allocation2 + $0x408] sm:$0xff] %vm2030_vm3, %v1963_v43  ;;  %v1966_v54 = vmax.f32 %v1580_v45, 0.0  ;;  %v1183_v55 = vadd.f32 %v4339_v39, %v1182_v46  ;;  %v3758_v58 = vpop.f32.mrb[36].mxu1 }
 0x128   :  { %3365 = vst.msk [vmem:[%s4970_s3 + $0x18] sm:$0xf] %vm2256_vm5, %v3469_v42  ;;  %v1591_v56 = vadd.f32 %v3755_v47, %v4339_v39  ;;  %v1583_v57 = vadd.f32 %v4339_v39, %v1582_v52  ;;  %v1195_v59 = vpop.f32.mrb[37].mxu0  ;;  %v1204_v60 = vadd.f32 %v3658_v53, %v4339_v39  ;;  %v1604_v61 = vadd.f32 %v3758_v58, %v4339_v39  ;;  %v1595_v4 = vpop.f32.mrb[37].mxu1 }
 0x129   :  { %2065 = vst.msk [vmem:[#allocation2 + $0x110] sm:$0xff] %vm2030_vm3, %v1868_v44  ;;  %2165 = vst.msk [vmem:[#allocation2 + $0x430] sm:$0xff] %vm2030_vm3, %v1968_v49  ;;  %v1196_v62 = vadd.f32 %v4339_v39, %v1195_v59  ;;  %v1869_v63 = vmax.f32 %v1191_v51, 0.0  ;;  %v1867_v0 = vmax.f32 %v1183_v55, 0.0  ;;  %v3659_v5 = vpop.f32.mrb[38].mxu0  ;;  %v1596_v8 = vadd.f32 %v4339_v39, %v1595_v4  ;;  %v3759_v10 = vpop.f32.mrb[38].mxu1 }
 0x12a   :  { %3422 = vst.msk [vmem:[%s4970_s3 + $0x8c] sm:$0x7] %vm2258_vm4, %v3498_v48  ;;  %v1969_v1 = vmax.f32 %v1591_v56, 0.0  ;;  %v1967_v2 = vmax.f32 %v1583_v57, 0.0  ;;  %v1872_v3 = vmax.f32 %v1204_v60, 0.0  ;;  %v1972_v6 = vmax.f32 %v1604_v61, 0.0 }
 0x12b   :  { %2063 = vst.msk [vmem:[#allocation2 + $0x100] sm:$0xff] %vm2030_vm3, %v1866_v50  ;;  %2163 = vst.msk [vmem:[#allocation2 + $0x420] sm:$0xff] %vm2030_vm3, %v1966_v54  ;;  %v1870_v7 = vmax.f32 %v1196_v62, 0.0  ;;  %v1207_v9 = vadd.f32 %v3659_v5, %v4339_v39  ;;  %v1198_v11 = vpop.f32.mrb[39].mxu0  ;;  %v1607_v14 = vadd.f32 %v3759_v10, %v4339_v39  ;;  %v1598_v16 = vpop.f32.mrb[39].mxu1  ;;  %v1970_v19 = vmax.f32 %v1596_v8, 0.0 }
 0x12c   :  { %2066 = vst.msk [vmem:[#allocation2 + $0x118] sm:$0xff] %vm2030_vm3, %v1869_v63  ;;  %2064 = vst.msk [vmem:[#allocation2 + $0x108] sm:$0xff] %vm2030_vm3, %v1867_v0  ;;  %v1199_v15 = vadd.f32 %v4339_v39, %v1198_v11  ;;  %v2362_v17 = vld [vmem:[#allocation2 + $0xf0] ss:$2 sm:$0x3f]  ;;  %v1599_v21 = vadd.f32 %v4339_v39, %v1598_v16  ;;  %v2837_v31 = vmax.f32 %v2822_v12, %v2826_v13  ;;  %v3662_v37 = vpop.f32.mrb[40].mxu0 }
 0x12d   :  { %2166 = vst.msk [vmem:[#allocation2 + $0x438] sm:$0xff] %vm2030_vm3, %v1969_v1  ;;  %2164 = vst.msk [vmem:[#allocation2 + $0x428] sm:$0xff] %vm2030_vm3, %v1967_v2  ;;  %v2366_v18 = vld [vmem:[#allocation2 + $0xf1] ss:$2 sm:$0x3f]  ;;  %v1873_v20 = vmax.f32 %v1207_v9, 0.0  ;;  %v1220_v44 = vadd.f32 %v3662_v37, %v4339_v39 }
 0x12e   :  { %2069 = vst.msk [vmem:[#allocation2 + $0x130] sm:$0xff] %vm2030_vm3, %v1872_v3  ;;  %2169 = vst.msk [vmem:[#allocation2 + $0x450] sm:$0xff] %vm2030_vm3, %v1972_v6  ;;  %v2360_v22 = vld [vmem:[#allocation2 + $0xe0] ss:$2 sm:$0xff]  ;;  %v2364_v23 = vld [vmem:[#allocation2 + $0xe1] ss:$2 sm:$0xff]  ;;  %v2376_v40 = vmax.f32 %v2362_v17, %v2366_v18 }
 0x12f   :  { %2067 = vst.msk [vmem:[#allocation2 + $0x120] sm:$0xff] %vm2030_vm3, %v1870_v7  ;;  %v2824_v24 = vld [vmem:[#allocation2 + $0x400] ss:$2 sm:$0x3f]  ;;  %v2830_v26 = vld [vmem:[#allocation2 + $0x40c] ss:$2 sm:$0xff]  ;;  %v2375_v46 = vmax.f32 %v2360_v22, %v2364_v23 }
 0x130   :  { %v2828_v25 = vld [vmem:[#allocation2 + $0x401] ss:$2 sm:$0x3f]  ;;  %v2834_v27 = vld [vmem:[#allocation2 + $0x40d] ss:$2 sm:$0xff]  ;;  %2167 = vst.msk [vmem:[#allocation2 + $0x440] sm:$0xff] %vm2030_vm3, %v1970_v19 }
 0x131   :  { %v2838_v28 = vmax.f32 %v2824_v24, %v2828_v25  ;;  %2070 = vst.msk [vmem:[#allocation2 + $0x138] sm:$0xff] %vm2030_vm3, %v1873_v20  ;;  %v1973_v29 = vmax.f32 %v1607_v14, 0.0  ;;  %v1871_v30 = vmax.f32 %v1199_v15, 0.0  ;;  %v2839_v32 = vmax.f32 %v2830_v26, %v2834_v27  ;;  %v3762_v38 = vpop.f32.mrb[40].mxu1  ;;  %v1211_v45 = vpop.f32.mrb[41].mxu0 }
 0x132   :  { %v2832_v33 = vld [vmem:[#allocation2 + $0x41c] ss:$2 sm:$0x3f]  ;;  %v2836_v34 = vld [vmem:[#allocation2 + $0x41d] ss:$2 sm:$0x3f]  ;;  %v1212_v50 = vadd.f32 %v4339_v39, %v1211_v45  ;;  %v1620_v52 = vadd.f32 %v3762_v38, %v4339_v39 }
 0x133   :  { %v2840_v35 = vmax.f32 %v2832_v33, %v2836_v34  ;;  %2170 = vst.msk [vmem:[#allocation2 + $0x458] sm:$0xff] %vm2030_vm3, %v1973_v29  ;;  %2068 = vst.msk [vmem:[#allocation2 + $0x128] sm:$0xff] %vm2030_vm3, %v1871_v30  ;;  %v1971_v36 = vmax.f32 %v1599_v21, 0.0  ;;  %v2841_v41 = vmax.f32 %v2837_v31, %v2839_v32  ;;  %v2368_v42 = vld [vmem:[#allocation2 + $0xfc] ss:$2 sm:$0xff]  ;;  %v3663_v51 = vpop.f32.mrb[42].mxu0 }
 0x134   :  { %v2370_v43 = vld [vmem:[#allocation2 + $0x10c] ss:$2 sm:$0x3f]  ;;  %v2372_v48 = vld [vmem:[#allocation2 + $0xfd] ss:$2 sm:$0xff]  ;;  %v1223_v56 = vadd.f32 %v3663_v51, %v4339_v39  ;;  %v1876_v59 = vmax.f32 %v1220_v44, 0.0 }
 0x135   :  { %v2842_v47 = vmax.f32 %v2838_v28, %v2840_v35  ;;  %v2374_v49 = vld [vmem:[#allocation2 + $0x10d] ss:$2 sm:$0x3f]  ;;  %2168 = vst.msk [vmem:[#allocation2 + $0x448] sm:$0xff] %vm2030_vm3, %v1971_v36  ;;  %v3499_v53 = vpack.c.bf16 %v2841_v41, %v2841_v41  ;;  %v2377_v54 = vmax.f32 %v2368_v42, %v2372_v48  ;;  %v2855_v58 = vld [vmem:[#allocation2 + $0x428] ss:$2 sm:$0xff] }
 0x136   :  { %v2378_v55 = vmax.f32 %v2370_v43, %v2374_v49  ;;  %v1874_v60 = vmax.f32 %v1212_v50, 0.0  ;;  %v1214_v61 = vpop.f32.mrb[43].mxu0  ;;  %v1611_v62 = vpop.f32.mrb[41].mxu1  ;;  %v2859_v4 = vld [vmem:[#allocation2 + $0x429] ss:$2 sm:$0xff]  ;;  %2073 = vst.msk [vmem:[#allocation2 + $0x150] sm:$0xff] %vm2030_vm3, %v1876_v59 }
 0x137   :  { %v3500_v57 = vpack.c.bf16 %v2842_v47, %v2842_v47  ;;  %3425 = vst.msk [vmem:[%s4970_s3 + $0x90] sm:$0xf] %vm2256_vm5, %v3499_v53  ;;  %v2379_v63 = vmax.f32 %v2375_v46, %v2377_v54  ;;  %v2857_v1 = vld [vmem:[#allocation2 + $0x438] ss:$2 sm:$0x3f]  ;;  %v1215_v3 = vadd.f32 %v4339_v39, %v1214_v61  ;;  %v1877_v6 = vmax.f32 %v1223_v56, 0.0 }
 0x138   :  { %v2380_v0 = vmax.f32 %v2376_v40, %v2378_v55  ;;  %v2861_v2 = vld [vmem:[#allocation2 + $0x439] ss:$2 sm:$0x3f]  ;;  %2071 = vst.msk [vmem:[#allocation2 + $0x140] sm:$0xff] %vm2030_vm3, %v1874_v60  ;;  %v1976_v7 = vmax.f32 %v1620_v52, 0.0  ;;  %v3763_v9 = vpop.f32.mrb[42].mxu1  ;;  %v2870_v20 = vmax.f32 %v2855_v58, %v2859_v4 }
 0x139   :  { %3426 = vst.msk [vmem:[%s4970_s3 + $0x94] sm:$0x7] %vm2258_vm4, %v3500_v57  ;;  %v2871_v5 = vmax.f32 %v2857_v1, %v2861_v2  ;;  %v4579_v8 = vld [vmem:[%s4969_s2] ss:$0 sm:$0xff]  ;;  %v3666_v10 = vpop.f32.mrb[44].mxu0  ;;  %v3471_v11 = vpack.c.bf16 %v2379_v63, %v2379_v63  ;;  %v1875_v23 = vmax.f32 %v1215_v3, 0.0 }
 0x13a   :  { %v1612_v39 = vadd.f32 %v4579_v8, %v1611_v62  ;;  %v3472_v12 = vpack.c.bf16 %v2380_v0, %v2380_v0  ;;  %v2865_v13 = vld [vmem:[#allocation2 + $0x454] ss:$2 sm:$0x3f]  ;;  %v2869_v14 = vld [vmem:[#allocation2 + $0x455] ss:$2 sm:$0x3f]  ;;  %v1623_v15 = vadd.f32 %v4579_v8, %v3763_v9  ;;  %v1236_v16 = vadd.f32 %v4579_v8, %v3666_v10 }
 0x13b   :  { %v2393_v17 = vld [vmem:[#allocation2 + $0x118] ss:$2 sm:$0xff]  ;;  %v2397_v18 = vld [vmem:[#allocation2 + $0x119] ss:$2 sm:$0xff]  ;;  %v2873_v19 = vmax.f32 %v2865_v13, %v2869_v14  ;;  %2074 = vst.msk [vmem:[#allocation2 + $0x158] sm:$0xff] %vm2030_vm3, %v1877_v6  ;;  %2173 = vst.msk [vmem:[#allocation2 + $0x470] sm:$0xff] %vm2030_vm3, %v1976_v7 }
 0x13c   :  { %3369 = vst.msk [vmem:[%s4970_s3 + $0x20] sm:$0xf] %vm2256_vm5, %v3471_v11  ;;  %v2863_v21 = vld [vmem:[#allocation2 + $0x444] ss:$2 sm:$0xff]  ;;  %v2867_v22 = vld [vmem:[#allocation2 + $0x445] ss:$2 sm:$0xff]  ;;  %v2408_v31 = vmax.f32 %v2393_v17, %v2397_v18 }
 0x13d   :  { %3370 = vst.msk [vmem:[%s4970_s3 + $0x24] sm:$0x7] %vm2258_vm4, %v3472_v12  ;;  %v1974_v24 = vmax.f32 %v1612_v39, 0.0  ;;  %v2875_v25 = vmax.f32 %v2871_v5, %v2873_v19  ;;  %v2872_v26 = vmax.f32 %v2863_v21, %v2867_v22  ;;  %v1977_v27 = vmax.f32 %v1623_v15, 0.0  ;;  %v1614_v28 = vpop.f32.mrb[43].mxu1  ;;  %v1227_v30 = vpop.f32.mrb[45].mxu0 }
 0x13e   :  { %v1880_v29 = vmax.f32 %v1236_v16, 0.0  ;;  %2072 = vst.msk [vmem:[#allocation2 + $0x148] sm:$0xff] %vm2030_vm3, %v1875_v23  ;;  %v1615_v32 = vadd.f32 %v4579_v8, %v1614_v28  ;;  %v3766_v33 = vpop.f32.mrb[44].mxu1  ;;  %v1228_v34 = vadd.f32 %v4579_v8, %v1227_v30  ;;  %v3667_v35 = vpop.f32.mrb[46].mxu0 }
 0x13f   :  { %2171 = vst.msk [vmem:[#allocation2 + $0x460] sm:$0xff] %vm2030_vm3, %v1974_v24  ;;  %v3502_v36 = vpack.c.bf16 %v2875_v25, %v2875_v25  ;;  %v2874_v37 = vmax.f32 %v2870_v20, %v2872_v26  ;;  %2174 = vst.msk [vmem:[#allocation2 + $0x478] sm:$0xff] %vm2030_vm3, %v1977_v27  ;;  %v1636_v38 = vadd.f32 %v4579_v8, %v3766_v33  ;;  %v1627_v40 = vpop.f32.mrb[45].mxu1  ;;  %v1230_v42 = vpop.f32.mrb[47].mxu0  ;;  %v2401_v43 = vld [vmem:[#allocation2 + $0x134] ss:$2 sm:$0xff] }
 0x140   :  { %2077 = vst.msk [vmem:[#allocation2 + $0x170] sm:$0xff] %vm2030_vm3, %v1880_v29  ;;  %v1239_v41 = vadd.f32 %v4579_v8, %v3667_v35  ;;  %v2405_v44 = vld [vmem:[#allocation2 + $0x135] ss:$2 sm:$0xff]  ;;  %v1975_v45 = vmax.f32 %v1615_v32, 0.0  ;;  %v1878_v46 = vmax.f32 %v1228_v34, 0.0  ;;  %v1628_v47 = vadd.f32 %v4579_v8, %v1627_v40  ;;  %v3767_v53 = vpop.f32.mrb[46].mxu1 }
 0x141   :  { %v1231_v48 = vadd.f32 %v4579_v8, %v1230_v42  ;;  %3430 = vst.msk [vmem:[%s4970_s3 + $0x9c] sm:$0x7] %vm2258_vm4, %v3502_v36  ;;  %v3501_v49 = vpack.c.bf16 %v2874_v37, %v2874_v37  ;;  %v2410_v50 = vmax.f32 %v2401_v43, %v2405_v44  ;;  %v1980_v51 = vmax.f32 %v1636_v38, 0.0  ;;  %v3670_v54 = vpop.f32.mrb[48].mxu0  ;;  %v1630_v62 = vpop.f32.mrb[47].mxu1 }
 0x142   :  { %v1881_v52 = vmax.f32 %v1239_v41, 0.0  ;;  %v2395_v55 = vld [vmem:[#allocation2 + $0x128] ss:$2 sm:$0x3f]  ;;  %2172 = vst.msk [vmem:[#allocation2 + $0x468] sm:$0xff] %vm2030_vm3, %v1975_v45  ;;  %2075 = vst.msk [vmem:[#allocation2 + $0x160] sm:$0xff] %vm2030_vm3, %v1878_v46  ;;  %v1639_v57 = vadd.f32 %v4579_v8, %v3767_v53  ;;  %v1252_v59 = vadd.f32 %v4579_v8, %v3670_v54  ;;  %v1631_v1 = vadd.f32 %v4579_v8, %v1630_v62 }
 0x143   :  { %v1978_v56 = vmax.f32 %v1628_v47, 0.0  ;;  %v1879_v58 = vmax.f32 %v1231_v48, 0.0  ;;  %v2399_v60 = vld [vmem:[#allocation2 + $0x129] ss:$2 sm:$0x3f]  ;;  %v2412_v61 = vmax.f32 %v2408_v31, %v2410_v50  ;;  %2177 = vst.msk [vmem:[#allocation2 + $0x490] sm:$0xff] %vm2030_vm3, %v1980_v51 }
 0x144   :  { %3429 = vst.msk [vmem:[%s4970_s3 + $0x98] sm:$0xf] %vm2256_vm5, %v3501_v49  ;;  %v1243_v63 = vpop.f32.mrb[49].mxu0  ;;  %v1981_v0 = vmax.f32 %v1639_v57, 0.0  ;;  %v1884_v2 = vmax.f32 %v1252_v59, 0.0  ;;  %v3770_v3 = vpop.f32.mrb[48].mxu1  ;;  %v2409_v11 = vmax.f32 %v2395_v55, %v2399_v60 }
 0x145   :  { %2078 = vst.msk [vmem:[#allocation2 + $0x178] sm:$0xff] %vm2030_vm3, %v1881_v52  ;;  %2175 = vst.msk [vmem:[#allocation2 + $0x480] sm:$0xff] %vm2030_vm3, %v1978_v56  ;;  %v1244_v4 = vadd.f32 %v4579_v8, %v1243_v63  ;;  %v3671_v5 = vpop.f32.mrb[50].mxu0  ;;  %v3473_v6 = vpack.c.bf16 %v2412_v61, %v2412_v61  ;;  %v2403_v7 = vld [vmem:[#allocation2 + $0x144] ss:$2 sm:$0x3f]  ;;  %v1652_v9 = vadd.f32 %v4579_v8, %v3770_v3 }
 0x146   :  { %2076 = vst.msk [vmem:[#allocation2 + $0x168] sm:$0xff] %vm2030_vm3, %v1879_v58  ;;  %v2407_v39 = vld [vmem:[#allocation2 + $0x145] ss:$2 sm:$0x3f]  ;;  %v1255_v10 = vadd.f32 %v4579_v8, %v3671_v5  ;;  %2178 = vst.msk [vmem:[#allocation2 + $0x498] sm:$0xff] %vm2030_vm3, %v1981_v0  ;;  %v1979_v13 = vmax.f32 %v1631_v1, 0.0 }
 0x147   :  { %v2411_v12 = vmax.f32 %v2403_v7, %v2407_v39  ;;  %2081 = vst.msk [vmem:[#allocation2 + $0x190] sm:$0xff] %vm2030_vm3, %v1884_v2  ;;  %v1984_v14 = vmax.f32 %v1652_v9, 0.0  ;;  %v1882_v15 = vmax.f32 %v1244_v4, 0.0  ;;  %v1643_v16 = vpop.f32.mrb[49].mxu1  ;;  %v1246_v17 = vpop.f32.mrb[51].mxu0 }
 0x148   :  { %3373 = vst.msk [vmem:[%s4970_s3 + $0x28] sm:$0xf] %vm2256_vm5, %v3473_v6  ;;  %v1644_v19 = vadd.f32 %v4579_v8, %v1643_v16  ;;  %v1885_v20 = vmax.f32 %v1255_v10, 0.0  ;;  %v1247_v21 = vadd.f32 %v4579_v8, %v1246_v17  ;;  %v3771_v22 = vpop.f32.mrb[50].mxu1  ;;  %v3674_v23 = vpop.f32.mrb[52].mxu0 }
 0x149   :  { %v2413_v18 = vmax.f32 %v2409_v11, %v2411_v12  ;;  %v2426_v24 = vld [vmem:[#allocation2 + $0x150] ss:$2 sm:$0xff]  ;;  %v2430_v25 = vld [vmem:[#allocation2 + $0x151] ss:$2 sm:$0xff]  ;;  %2176 = vst.msk [vmem:[#allocation2 + $0x488] sm:$0xff] %vm2030_vm3, %v1979_v13  ;;  %2181 = vst.msk [vmem:[#allocation2 + $0x4b0] sm:$0xff] %vm2030_vm3, %v1984_v14  ;;  %v1655_v26 = vadd.f32 %v4579_v8, %v3771_v22  ;;  %v1268_v28 = vadd.f32 %v4579_v8, %v3674_v23 }
 0x14a   :  { %2079 = vst.msk [vmem:[#allocation2 + $0x180] sm:$0xff] %vm2030_vm3, %v1882_v15  ;;  %v1646_v27 = vpop.f32.mrb[51].mxu1  ;;  %v1259_v29 = vpop.f32.mrb[53].mxu0  ;;  %v1982_v31 = vmax.f32 %v1644_v19, 0.0  ;;  %2082 = vst.msk [vmem:[#allocation2 + $0x198] sm:$0xff] %vm2030_vm3, %v1885_v20  ;;  %v1883_v32 = vmax.f32 %v1247_v21, 0.0  ;;  %v2441_v40 = vmax.f32 %v2426_v24, %v2430_v25 }
 0x14b   :  { %v3474_v30 = vpack.c.bf16 %v2413_v18, %v2413_v18  ;;  %v3774_v33 = vpop.f32.mrb[52].mxu1  ;;  %v3675_v34 = vpop.f32.mrb[54].mxu0  ;;  %v1647_v35 = vadd.f32 %v4579_v8, %v1646_v27  ;;  %v1260_v37 = vadd.f32 %v4579_v8, %v1259_v29  ;;  %v1985_v43 = vmax.f32 %v1655_v26, 0.0  ;;  %v2890_v45 = vld [vmem:[#allocation2 + $0x470] ss:$2 sm:$0x3f] }
 0x14c   :  { %v1668_v36 = vadd.f32 %v4579_v8, %v3774_v33  ;;  %v1271_v38 = vadd.f32 %v4579_v8, %v3675_v34  ;;  %2179 = vst.msk [vmem:[#allocation2 + $0x4a0] sm:$0xff] %vm2030_vm3, %v1982_v31  ;;  %2080 = vst.msk [vmem:[#allocation2 + $0x188] sm:$0xff] %vm2030_vm3, %v1883_v32  ;;  %v1888_v44 = vmax.f32 %v1268_v28, 0.0  ;;  %v2894_v46 = vld [vmem:[#allocation2 + $0x471] ss:$2 sm:$0x3f] }
 0x14d   :  { %3374 = vst.msk [vmem:[%s4970_s3 + $0x2c] sm:$0x7] %vm2258_vm4, %v3474_v30  ;;  %v2434_v41 = vld [vmem:[#allocation2 + $0x16c] ss:$2 sm:$0xff]  ;;  %v2438_v42 = vld [vmem:[#allocation2 + $0x16d] ss:$2 sm:$0xff]  ;;  %v2904_v39 = vmax.f32 %v2890_v45, %v2894_v46 }
 0x14e   :  { %v2888_v47 = vld [vmem:[#allocation2 + $0x460] ss:$2 sm:$0xff]  ;;  %v2443_v48 = vmax.f32 %v2434_v41, %v2438_v42  ;;  %v1983_v49 = vmax.f32 %v1647_v35, 0.0  ;;  %v1988_v50 = vmax.f32 %v1668_v36, 0.0  ;;  %v1886_v51 = vmax.f32 %v1260_v37, 0.0  ;;  %v1659_v52 = vpop.f32.mrb[53].mxu1 }
 0x14f   :  { %v1262_v53 = vpop.f32.mrb[55].mxu0  ;;  %v2428_v54 = vld [vmem:[#allocation2 + $0x160] ss:$2 sm:$0x3f]  ;;  %2182 = vst.msk [vmem:[#allocation2 + $0x4b8] sm:$0xff] %vm2030_vm3, %v1985_v43  ;;  %2085 = vst.msk [vmem:[#allocation2 + $0x1b0] sm:$0xff] %vm2030_vm3, %v1888_v44  ;;  %v1660_v55 = vadd.f32 %v4579_v8, %v1659_v52 }
 0x150   :  { %v1889_v56 = vmax.f32 %v1271_v38, 0.0  ;;  %v3775_v57 = vpop.f32.mrb[54].mxu1  ;;  %v2892_v58 = vld [vmem:[#allocation2 + $0x461] ss:$2 sm:$0xff]  ;;  %v2445_v60 = vmax.f32 %v2441_v40, %v2443_v48  ;;  %2180 = vst.msk [vmem:[#allocation2 + $0x4a8] sm:$0xff] %vm2030_vm3, %v1983_v49  ;;  %2185 = vst.msk [vmem:[#allocation2 + $0x4d0] sm:$0xff] %vm2030_vm3, %v1988_v50  ;;  %v1263_v2 = vadd.f32 %v4579_v8, %v1262_v53 }
 0x151   :  { %v2432_v59 = vld [vmem:[#allocation2 + $0x161] ss:$2 sm:$0x3f]  ;;  %2083 = vst.msk [vmem:[#allocation2 + $0x1a0] sm:$0xff] %vm2030_vm3, %v1886_v51  ;;  %v1671_v61 = vadd.f32 %v4579_v8, %v3775_v57  ;;  %v1662_v62 = vpop.f32.mrb[55].mxu1  ;;  %v1986_v1 = vmax.f32 %v1660_v55, 0.0  ;;  %v2903_v9 = vmax.f32 %v2888_v47, %v2892_v58 }
 0x152   :  { %v2896_v63 = vld [vmem:[#allocation2 + $0x47c] ss:$2 sm:$0xff]  ;;  %v2898_v0 = vld [vmem:[#allocation2 + $0x48c] ss:$2 sm:$0x3f]  ;;  %2086 = vst.msk [vmem:[#allocation2 + $0x1b8] sm:$0xff] %vm2030_vm3, %v1889_v56  ;;  %v3475_v3 = vpack.c.bf16 %v2445_v60, %v2445_v60  ;;  %v1663_v7 = vadd.f32 %v4579_v8, %v1662_v62  ;;  %v2442_v14 = vmax.f32 %v2428_v54, %v2432_v59 }
 0x153   :  { %v2900_v4 = vld [vmem:[#allocation2 + $0x47d] ss:$2 sm:$0xff]  ;;  %v2902_v5 = vld [vmem:[#allocation2 + $0x48d] ss:$2 sm:$0x3f]  ;;  %v1989_v6 = vmax.f32 %v1671_v61, 0.0 }
 0x154   :  { %v2905_v10 = vmax.f32 %v2896_v63, %v2900_v4  ;;  %v2906_v11 = vmax.f32 %v2898_v0, %v2902_v5  ;;  %v2436_v12 = vld [vmem:[#allocation2 + $0x17c] ss:$2 sm:$0x3f]  ;;  %v2440_v13 = vld [vmem:[#allocation2 + $0x17d] ss:$2 sm:$0x3f] }
 0x155   :  { %2183 = vst.msk [vmem:[#allocation2 + $0x4c0] sm:$0xff] %vm2030_vm3, %v1986_v1  ;;  %v2444_v15 = vmax.f32 %v2436_v12, %v2440_v13  ;;  %2186 = vst.msk [vmem:[#allocation2 + $0x4d8] sm:$0xff] %vm2030_vm3, %v1989_v6  ;;  %v1887_v18 = vmax.f32 %v1263_v2, 0.0  ;;  %v3678_v19 = vpop.f32.mrb[56].mxu0  ;;  %v3778_v20 = vpop.f32.mrb[56].mxu1  ;;  %v1987_v22 = vmax.f32 %v1663_v7, 0.0 }
 0x156   :  { %3377 = vst.msk [vmem:[%s4970_s3 + $0x30] sm:$0xf] %vm2256_vm5, %v3475_v3  ;;  %v2907_v16 = vmax.f32 %v2903_v9, %v2905_v10  ;;  %v2908_v17 = vmax.f32 %v2904_v39, %v2906_v11  ;;  %v1284_v23 = vadd.f32 %v4579_v8, %v3678_v19  ;;  %v1275_v24 = vpop.f32.mrb[57].mxu0  ;;  %v1675_v25 = vpop.f32.mrb[57].mxu1  ;;  %v2921_v28 = vld [vmem:[#allocation2 + $0x498] ss:$2 sm:$0xff]  ;;  %v1684_v30 = vadd.f32 %v4579_v8, %v3778_v20 }
 0x157   :  { %v2446_v21 = vmax.f32 %v2442_v14, %v2444_v15  ;;  %v2925_v29 = vld [vmem:[#allocation2 + $0x499] ss:$2 sm:$0xff]  ;;  %2084 = vst.msk [vmem:[#allocation2 + $0x1a8] sm:$0xff] %vm2030_vm3, %v1887_v18  ;;  %v1276_v31 = vadd.f32 %v4579_v8, %v1275_v24  ;;  %v2459_v33 = vld [vmem:[#allocation2 + $0x188] ss:$2 sm:$0xff]  ;;  %2184 = vst.msk [vmem:[#allocation2 + $0x4c8] sm:$0xff] %vm2030_vm3, %v1987_v22  ;;  %v1676_v37 = vadd.f32 %v4579_v8, %v1675_v25 }
 0x158   :  { %v3503_v26 = vpack.c.bf16 %v2907_v16, %v2907_v16  ;;  %v3504_v27 = vpack.c.bf16 %v2908_v17, %v2908_v17  ;;  %v2463_v34 = vld [vmem:[#allocation2 + $0x189] ss:$2 sm:$0xff]  ;;  %v2461_v35 = vld [vmem:[#allocation2 + $0x198] ss:$2 sm:$0x3f]  ;;  %v1892_v46 = vmax.f32 %v1284_v23, 0.0  ;;  %v2936_v48 = vmax.f32 %v2921_v28, %v2925_v29 }
 0x159   :  { %v3476_v32 = vpack.c.bf16 %v2446_v21, %v2446_v21  ;;  %v2465_v36 = vld [vmem:[#allocation2 + $0x199] ss:$2 sm:$0x3f]  ;;  %v2923_v38 = vld [vmem:[#allocation2 + $0x4a8] ss:$2 sm:$0x3f]  ;;  %v2474_v56 = vmax.f32 %v2459_v33, %v2463_v34 }
 0x15a   :  { %3433 = vst.msk [vmem:[%s4970_s3 + $0xa0] sm:$0xf] %vm2256_vm5, %v3503_v26  ;;  %v2475_v40 = vmax.f32 %v2461_v35, %v2465_v36  ;;  %v2469_v41 = vld [vmem:[#allocation2 + $0x1b4] ss:$2 sm:$0x3f]  ;;  %v1992_v47 = vmax.f32 %v1684_v30, 0.0 }
 0x15b   :  { %3434 = vst.msk [vmem:[%s4970_s3 + $0xa4] sm:$0x7] %vm2258_vm4, %v3504_v27  ;;  %v2473_v42 = vld [vmem:[#allocation2 + $0x1b5] ss:$2 sm:$0x3f]  ;;  %v1890_v51 = vmax.f32 %v1276_v31, 0.0 }
 0x15c   :  { %3378 = vst.msk [vmem:[%s4970_s3 + $0x34] sm:$0x7] %vm2258_vm4, %v3476_v32  ;;  %v2929_v43 = vld [vmem:[#allocation2 + $0x4b4] ss:$2 sm:$0xff]  ;;  %v2933_v44 = vld [vmem:[#allocation2 + $0x4b5] ss:$2 sm:$0xff]  ;;  %v2477_v45 = vmax.f32 %v2469_v41, %v2473_v42 }
 0x15d   :  { %v2927_v49 = vld [vmem:[#allocation2 + $0x4a9] ss:$2 sm:$0x3f]  ;;  %v2938_v50 = vmax.f32 %v2929_v43, %v2933_v44  ;;  %v1990_v52 = vmax.f32 %v1676_v37, 0.0  ;;  %2089 = vst.msk [vmem:[#allocation2 + $0x1d0] sm:$0xff] %vm2030_vm3, %v1892_v46  ;;  %2189 = vst.msk [vmem:[#allocation2 + $0x4f0] sm:$0xff] %vm2030_vm3, %v1992_v47 }
 0x15e   :  { %v2479_v53 = vmax.f32 %v2475_v40, %v2477_v45  ;;  %v3679_v54 = vpop.f32.mrb[58].mxu0  ;;  %v3779_v55 = vpop.f32.mrb[58].mxu1  ;;  %2087 = vst.msk [vmem:[#allocation2 + $0x1c0] sm:$0xff] %vm2030_vm3, %v1890_v51  ;;  %v2937_v62 = vmax.f32 %v2923_v38, %v2927_v49  ;;  %v2467_v0 = vld [vmem:[#allocation2 + $0x1a4] ss:$2 sm:$0xff] }
 0x15f   :  { %v2940_v57 = vmax.f32 %v2936_v48, %v2938_v50  ;;  %2187 = vst.msk [vmem:[#allocation2 + $0x4e0] sm:$0xff] %vm2030_vm3, %v1990_v52  ;;  %v1287_v58 = vadd.f32 %v4579_v8, %v3679_v54  ;;  %v1687_v59 = vadd.f32 %v4579_v8, %v3779_v55  ;;  %v1278_v60 = vpop.f32.mrb[59].mxu0  ;;  %v1678_v61 = vpop.f32.mrb[59].mxu1  ;;  %v2471_v1 = vld [vmem:[#allocation2 + $0x1a5] ss:$2 sm:$0xff] }
 0x160   :  { %v3478_v63 = vpack.c.bf16 %v2479_v53, %v2479_v53  ;;  %v1279_v2 = vadd.f32 %v4579_v8, %v1278_v60  ;;  %v1679_v3 = vadd.f32 %v4579_v8, %v1678_v61  ;;  %v3682_v4 = vpop.f32.mrb[60].mxu0  ;;  %v3782_v5 = vpop.f32.mrb[60].mxu1  ;;  %v2476_v7 = vmax.f32 %v2467_v0, %v2471_v1  ;;  %v2931_v39 = vld [vmem:[#allocation2 + $0x4c4] ss:$2 sm:$0x3f] }
 0x161   :  { %v3505_v6 = vpack.c.bf16 %v2940_v57, %v2940_v57  ;;  %v2935_v9 = vld [vmem:[#allocation2 + $0x4c5] ss:$2 sm:$0x3f]  ;;  %v1300_v10 = vadd.f32 %v4579_v8, %v3682_v4  ;;  %v1700_v11 = vadd.f32 %v4579_v8, %v3782_v5  ;;  %v1893_v13 = vmax.f32 %v1287_v58, 0.0  ;;  %v1291_v16 = vpop.f32.mrb[61].mxu0  ;;  %v1691_v17 = vpop.f32.mrb[61].mxu1 }
 0x162   :  { %3382 = vst.msk [vmem:[%s4970_s3 + $0x3c] sm:$0x7] %vm2258_vm4, %v3478_v63  ;;  %v2939_v12 = vmax.f32 %v2931_v39, %v2935_v9  ;;  %v1993_v14 = vmax.f32 %v1687_v59, 0.0  ;;  %v1891_v15 = vmax.f32 %v1279_v2, 0.0  ;;  %v2478_v18 = vmax.f32 %v2474_v56, %v2476_v7  ;;  %v3683_v22 = vpop.f32.mrb[62].mxu0  ;;  %v3783_v23 = vpop.f32.mrb[62].mxu1 }
 0x163   :  { %3437 = vst.msk [vmem:[%s4970_s3 + $0xa8] sm:$0xf] %vm2256_vm5, %v3505_v6  ;;  %v1991_v19 = vmax.f32 %v1679_v3, 0.0  ;;  %v1896_v20 = vmax.f32 %v1300_v10, 0.0  ;;  %v1996_v21 = vmax.f32 %v1700_v11, 0.0  ;;  %v1292_v25 = vadd.f32 %v4579_v8, %v1291_v16  ;;  %v1294_v28 = vpop.f32.mrb[63].mxu0 }
 0x164   :  { %v2941_v24 = vmax.f32 %v2937_v62, %v2939_v12  ;;  %2090 = vst.msk [vmem:[#allocation2 + $0x1d8] sm:$0xff] %vm2030_vm3, %v1893_v13  ;;  %2190 = vst.msk [vmem:[#allocation2 + $0x4f8] sm:$0xff] %vm2030_vm3, %v1993_v14  ;;  %v1692_v26 = vadd.f32 %v4579_v8, %v1691_v17  ;;  %v1303_v27 = vadd.f32 %v4579_v8, %v3683_v22  ;;  %v1694_v29 = vpop.f32.mrb[63].mxu1  ;;  %v3686_v34 = vpop.f32.mrb[64].mxu0  ;;  %v2954_v63 = vld [vmem:[#allocation2 + $0x4d0] ss:$2 sm:$0xff] }
 0x165   :  { %2088 = vst.msk [vmem:[#allocation2 + $0x1c8] sm:$0xff] %vm2030_vm3, %v1891_v15  ;;  %v3477_v30 = vpack.c.bf16 %v2478_v18, %v2478_v18  ;;  %2188 = vst.msk [vmem:[#allocation2 + $0x4e8] sm:$0xff] %vm2030_vm3, %v1991_v19  ;;  %v1295_v31 = vadd.f32 %v4579_v8, %v1294_v28  ;;  %v1703_v32 = vadd.f32 %v4579_v8, %v3783_v23  ;;  %v3786_v35 = vpop.f32.mrb[64].mxu1  ;;  %v1894_v37 = vmax.f32 %v1292_v25, 0.0  ;;  %v1307_v41 = vpop.f32.mrb[65].mxu0 }
 0x166   :  { %2093 = vst.msk [vmem:[#allocation2 + $0x1f0] sm:$0xff] %vm2030_vm3, %v1896_v20  ;;  %2193 = vst.msk [vmem:[#allocation2 + $0x510] sm:$0xff] %vm2030_vm3, %v1996_v21  ;;  %v1695_v33 = vadd.f32 %v4579_v8, %v1694_v29  ;;  %v3506_v36 = vpack.c.bf16 %v2941_v24, %v2941_v24  ;;  %v1994_v38 = vmax.f32 %v1692_v26, 0.0  ;;  %v1897_v40 = vmax.f32 %v1303_v27, 0.0  ;;  %v1707_v42 = vpop.f32.mrb[65].mxu1  ;;  %v3687_v47 = vpop.f32.mrb[66].mxu0 }
 0x167   :  { %3381 = vst.msk [vmem:[%s4970_s3 + $0x38] sm:$0xf] %vm2256_vm5, %v3477_v30  ;;  %v1895_v43 = vmax.f32 %v1295_v31, 0.0  ;;  %v1997_v44 = vmax.f32 %v1703_v32, 0.0  ;;  %v1316_v46 = vadd.f32 %v4579_v8, %v3686_v34  ;;  %v3787_v48 = vpop.f32.mrb[66].mxu1  ;;  %v1716_v49 = vadd.f32 %v4579_v8, %v3786_v35  ;;  %v1310_v53 = vpop.f32.mrb[67].mxu0 }
 0x168   :  { %v1995_v45 = vmax.f32 %v1695_v33, 0.0  ;;  %3438 = vst.msk [vmem:[%s4970_s3 + $0xac] sm:$0x7] %vm2258_vm4, %v3506_v36  ;;  %v1308_v50 = vadd.f32 %v4579_v8, %v1307_v41  ;;  %v1708_v51 = vadd.f32 %v4579_v8, %v1707_v42  ;;  %v1319_v52 = vadd.f32 %v4579_v8, %v3687_v47  ;;  %v1710_v54 = vpop.f32.mrb[67].mxu1  ;;  %v2958_v0 = vld [vmem:[#allocation2 + $0x4d1] ss:$2 sm:$0xff] }
 0x169   :  { %2091 = vst.msk [vmem:[#allocation2 + $0x1e0] sm:$0xff] %vm2030_vm3, %v1894_v37  ;;  %2191 = vst.msk [vmem:[#allocation2 + $0x500] sm:$0xff] %vm2030_vm3, %v1994_v38  ;;  %v1900_v55 = vmax.f32 %v1316_v46, 0.0  ;;  %v1719_v56 = vadd.f32 %v4579_v8, %v3787_v48  ;;  %v1311_v57 = vadd.f32 %v4579_v8, %v1310_v53  ;;  %v1711_v58 = vadd.f32 %v4579_v8, %v1710_v54  ;;  %v3690_v13 = vpop.f32.mrb[68].mxu0  ;;  %v3790_v34 = vpop.f32.mrb[68].mxu1 }
 0x16a   :  { %2094 = vst.msk [vmem:[#allocation2 + $0x1f8] sm:$0xff] %vm2030_vm3, %v1897_v40  ;;  %2092 = vst.msk [vmem:[#allocation2 + $0x1e8] sm:$0xff] %vm2030_vm3, %v1895_v43  ;;  %v2000_v59 = vmax.f32 %v1716_v49, 0.0  ;;  %v1898_v60 = vmax.f32 %v1308_v50, 0.0  ;;  %v1998_v61 = vmax.f32 %v1708_v51, 0.0  ;;  %v1901_v62 = vmax.f32 %v1319_v52, 0.0 }
 0x16b   :  { %2194 = vst.msk [vmem:[#allocation2 + $0x518] sm:$0xff] %vm2030_vm3, %v1997_v44  ;;  %2192 = vst.msk [vmem:[#allocation2 + $0x508] sm:$0xff] %vm2030_vm3, %v1995_v45  ;;  %v2494_v1 = vld [vmem:[#allocation2 + $0x1d0] ss:$2 sm:$0x3f]  ;;  %v2001_v10 = vmax.f32 %v1719_v56, 0.0  ;;  %v2969_v14 = vmax.f32 %v2954_v63, %v2958_v0  ;;  %v1332_v18 = vadd.f32 %v4579_v8, %v3690_v13  ;;  %v1732_v49 = vadd.f32 %v4579_v8, %v3790_v34 }
 0x16c   :  { %2097 = vst.msk [vmem:[#allocation2 + $0x210] sm:$0xff] %vm2030_vm3, %v1900_v55  ;;  %v2498_v2 = vld [vmem:[#allocation2 + $0x1d1] ss:$2 sm:$0x3f]  ;;  %v2962_v3 = vld [vmem:[#allocation2 + $0x4ec] ss:$2 sm:$0xff] }
 0x16d   :  { %2197 = vst.msk [vmem:[#allocation2 + $0x530] sm:$0xff] %vm2030_vm3, %v2000_v59  ;;  %2095 = vst.msk [vmem:[#allocation2 + $0x200] sm:$0xff] %vm2030_vm3, %v1898_v60  ;;  %v2492_v4 = vld [vmem:[#allocation2 + $0x1c0] ss:$2 sm:$0xff]  ;;  %v2496_v5 = vld [vmem:[#allocation2 + $0x1c1] ss:$2 sm:$0xff]  ;;  %v2508_v23 = vmax.f32 %v2494_v1, %v2498_v2 }
 0x16e   :  { %2195 = vst.msk [vmem:[#allocation2 + $0x520] sm:$0xff] %vm2030_vm3, %v1998_v61  ;;  %2098 = vst.msk [vmem:[#allocation2 + $0x218] sm:$0xff] %vm2030_vm3, %v1901_v62  ;;  %v2956_v6 = vld [vmem:[#allocation2 + $0x4e0] ss:$2 sm:$0x3f]  ;;  %v1899_v11 = vmax.f32 %v1311_v57, 0.0  ;;  %v2507_v29 = vmax.f32 %v2492_v4, %v2496_v5 }
 0x16f   :  { %v2960_v7 = vld [vmem:[#allocation2 + $0x4e1] ss:$2 sm:$0x3f]  ;;  %v2966_v39 = vld [vmem:[#allocation2 + $0x4ed] ss:$2 sm:$0xff]  ;;  %v1999_v12 = vmax.f32 %v1711_v58, 0.0 }
 0x170   :  { %v2970_v9 = vmax.f32 %v2956_v6, %v2960_v7  ;;  %v2971_v15 = vmax.f32 %v2962_v3, %v2966_v39  ;;  %v2964_v16 = vld [vmem:[#allocation2 + $0x4fc] ss:$2 sm:$0x3f]  ;;  %v2968_v17 = vld [vmem:[#allocation2 + $0x4fd] ss:$2 sm:$0x3f] }
 0x171   :  { %v2972_v19 = vmax.f32 %v2964_v16, %v2968_v17  ;;  %v2500_v20 = vld [vmem:[#allocation2 + $0x1dc] ss:$2 sm:$0xff]  ;;  %v2502_v21 = vld [vmem:[#allocation2 + $0x1ec] ss:$2 sm:$0x3f]  ;;  %2198 = vst.msk [vmem:[#allocation2 + $0x538] sm:$0xff] %vm2030_vm3, %v2001_v10 }
 0x172   :  { %2096 = vst.msk [vmem:[#allocation2 + $0x208] sm:$0xff] %vm2030_vm3, %v1899_v11  ;;  %2196 = vst.msk [vmem:[#allocation2 + $0x528] sm:$0xff] %vm2030_vm3, %v1999_v12  ;;  %v1323_v22 = vpop.f32.mrb[69].mxu0  ;;  %v2973_v24 = vmax.f32 %v2969_v14, %v2971_v15  ;;  %v2504_v25 = vld [vmem:[#allocation2 + $0x1dd] ss:$2 sm:$0xff]  ;;  %v1904_v27 = vmax.f32 %v1332_v18, 0.0 }
 0x173   :  { %v2506_v26 = vld [vmem:[#allocation2 + $0x1ed] ss:$2 sm:$0x3f]  ;;  %v1324_v28 = vadd.f32 %v4579_v8, %v1323_v22  ;;  %v2974_v30 = vmax.f32 %v2970_v9, %v2972_v19  ;;  %v2509_v31 = vmax.f32 %v2500_v20, %v2504_v25  ;;  %v3691_v33 = vpop.f32.mrb[70].mxu0  ;;  %v2987_v43 = vld [vmem:[#allocation2 + $0x508] ss:$2 sm:$0xff] }
 0x174   :  { %v2510_v32 = vmax.f32 %v2502_v21, %v2506_v26  ;;  %v3507_v35 = vpack.c.bf16 %v2973_v24, %v2973_v24  ;;  %2101 = vst.msk [vmem:[#allocation2 + $0x230] sm:$0xff] %vm2030_vm3, %v1904_v27  ;;  %v1335_v37 = vadd.f32 %v4579_v8, %v3691_v33  ;;  %v1326_v38 = vpop.f32.mrb[71].mxu0  ;;  %v2991_v46 = vld [vmem:[#allocation2 + $0x509] ss:$2 sm:$0xff]  ;;  %v1723_v50 = vpop.f32.mrb[69].mxu1  ;;  %v2004_v7 = vmax.f32 %v1732_v49, 0.0 }
 0x175   :  { %v1902_v36 = vmax.f32 %v1324_v28, 0.0  ;;  %v3508_v40 = vpack.c.bf16 %v2974_v30, %v2974_v30  ;;  %v2511_v41 = vmax.f32 %v2507_v29, %v2509_v31  ;;  %v2989_v44 = vld [vmem:[#allocation2 + $0x518] ss:$2 sm:$0x3f]  ;;  %v1327_v48 = vadd.f32 %v4579_v8, %v1326_v38  ;;  %v3694_v51 = vpop.f32.mrb[72].mxu0  ;;  %v3791_v58 = vpop.f32.mrb[70].mxu1 }
 0x176   :  { %v2512_v42 = vmax.f32 %v2508_v23, %v2510_v32  ;;  %v2993_v45 = vld [vmem:[#allocation2 + $0x519] ss:$2 sm:$0x3f]  ;;  %3441 = vst.msk [vmem:[%s4970_s3 + $0xb0] sm:$0xf] %vm2256_vm5, %v3507_v35  ;;  %v1905_v47 = vmax.f32 %v1335_v37, 0.0  ;;  %v1724_v57 = vadd.f32 %v4579_v8, %v1723_v50  ;;  %v1735_v62 = vadd.f32 %v4579_v8, %v3791_v58 }
 0x177   :  { %2099 = vst.msk [vmem:[#allocation2 + $0x220] sm:$0xff] %vm2030_vm3, %v1902_v36  ;;  %v3479_v52 = vpack.c.bf16 %v2511_v41, %v2511_v41  ;;  %v2525_v54 = vld [vmem:[#allocation2 + $0x1f8] ss:$2 sm:$0xff]  ;;  %v2529_v55 = vld [vmem:[#allocation2 + $0x1f9] ss:$2 sm:$0xff]  ;;  %v3003_v56 = vmax.f32 %v2989_v44, %v2993_v45  ;;  %v1339_v59 = vpop.f32.mrb[73].mxu0  ;;  %v1348_v63 = vadd.f32 %v4579_v8, %v3694_v51  ;;  %v3002_v2 = vmax.f32 %v2987_v43, %v2991_v46 }
 0x178   :  { %3442 = vst.msk [vmem:[%s4970_s3 + $0xb4] sm:$0x7] %vm2258_vm4, %v3508_v40  ;;  %v3480_v53 = vpack.c.bf16 %v2512_v42, %v2512_v42  ;;  %v2997_v60 = vld [vmem:[#allocation2 + $0x534] ss:$2 sm:$0x3f]  ;;  %v1340_v0 = vadd.f32 %v4579_v8, %v1339_v59  ;;  %v2540_v3 = vmax.f32 %v2525_v54, %v2529_v55  ;;  %v1903_v6 = vmax.f32 %v1327_v48, 0.0 }
 0x179   :  { %v3001_v61 = vld [vmem:[#allocation2 + $0x535] ss:$2 sm:$0x3f]  ;;  %2102 = vst.msk [vmem:[#allocation2 + $0x238] sm:$0xff] %vm2030_vm3, %v1905_v47  ;;  %v2995_v4 = vld [vmem:[#allocation2 + $0x524] ss:$2 sm:$0xff] }
 0x17a   :  { %3385 = vst.msk [vmem:[%s4970_s3 + $0x40] sm:$0xf] %vm2256_vm5, %v3479_v52  ;;  %v3005_v1 = vmax.f32 %v2997_v60, %v3001_v61  ;;  %v2999_v5 = vld [vmem:[#allocation2 + $0x525] ss:$2 sm:$0xff]  ;;  %v2002_v10 = vmax.f32 %v1724_v57, 0.0  ;;  %v2005_v11 = vmax.f32 %v1735_v62, 0.0 }
 0x17b   :  { %3386 = vst.msk [vmem:[%s4970_s3 + $0x44] sm:$0x7] %vm2258_vm4, %v3480_v53  ;;  %v3004_v9 = vmax.f32 %v2995_v4, %v2999_v5  ;;  %v1726_v12 = vpop.f32.mrb[71].mxu1  ;;  %v3695_v13 = vpop.f32.mrb[74].mxu0  ;;  %v1908_v15 = vmax.f32 %v1348_v63, 0.0  ;;  %v1906_v17 = vmax.f32 %v1340_v0, 0.0 }
 0x17c   :  { %v3007_v39 = vmax.f32 %v3003_v56, %v3005_v1  ;;  %2100 = vst.msk [vmem:[#allocation2 + $0x228] sm:$0xff] %vm2030_vm3, %v1903_v6  ;;  %2201 = vst.msk [vmem:[#allocation2 + $0x550] sm:$0xff] %vm2030_vm3, %v2004_v7  ;;  %v1727_v14 = vadd.f32 %v4579_v8, %v1726_v12  ;;  %v3794_v16 = vpop.f32.mrb[72].mxu1  ;;  %v1351_v18 = vadd.f32 %v4579_v8, %v3695_v13  ;;  %v1342_v19 = vpop.f32.mrb[75].mxu0 }
 0x17d   :  { %v3006_v21 = vmax.f32 %v3002_v2, %v3004_v9  ;;  %2199 = vst.msk [vmem:[#allocation2 + $0x540] sm:$0xff] %vm2030_vm3, %v2002_v10  ;;  %2202 = vst.msk [vmem:[#allocation2 + $0x558] sm:$0xff] %vm2030_vm3, %v2005_v11  ;;  %v1748_v24 = vadd.f32 %v4579_v8, %v3794_v16  ;;  %v1739_v25 = vpop.f32.mrb[73].mxu1  ;;  %v1343_v26 = vadd.f32 %v4579_v8, %v1342_v19  ;;  %v3698_v27 = vpop.f32.mrb[76].mxu0 }
 0x17e   :  { %v3510_v20 = vpack.c.bf16 %v3007_v39, %v3007_v39  ;;  %v2533_v22 = vld [vmem:[#allocation2 + $0x214] ss:$2 sm:$0xff]  ;;  %v2537_v23 = vld [vmem:[#allocation2 + $0x215] ss:$2 sm:$0xff]  ;;  %v2003_v29 = vmax.f32 %v1727_v14, 0.0  ;;  %2105 = vst.msk [vmem:[#allocation2 + $0x250] sm:$0xff] %vm2030_vm3, %v1908_v15  ;;  %v1740_v30 = vadd.f32 %v4579_v8, %v1739_v25  ;;  %v1364_v43 = vadd.f32 %v4579_v8, %v3698_v27 }
 0x17f   :  { %v2542_v28 = vmax.f32 %v2533_v22, %v2537_v23  ;;  %2103 = vst.msk [vmem:[#allocation2 + $0x240] sm:$0xff] %vm2030_vm3, %v1906_v17  ;;  %v1909_v31 = vmax.f32 %v1351_v18, 0.0  ;;  %v3795_v32 = vpop.f32.mrb[74].mxu1  ;;  %v1355_v33 = vpop.f32.mrb[77].mxu0  ;;  %v3509_v34 = vpack.c.bf16 %v3006_v21, %v3006_v21  ;;  %v2008_v35 = vmax.f32 %v1748_v24, 0.0 }
 0x180   :  { %3446 = vst.msk [vmem:[%s4970_s3 + $0xbc] sm:$0x7] %vm2258_vm4, %v3510_v20  ;;  %v1751_v36 = vadd.f32 %v4579_v8, %v3795_v32  ;;  %v1907_v37 = vmax.f32 %v1343_v26, 0.0  ;;  %v2527_v38 = vld [vmem:[#allocation2 + $0x208] ss:$2 sm:$0x3f]  ;;  %v1356_v49 = vadd.f32 %v4579_v8, %v1355_v33 }
 0x181   :  { %v2544_v40 = vmax.f32 %v2540_v3, %v2542_v28  ;;  %2200 = vst.msk [vmem:[#allocation2 + $0x548] sm:$0xff] %vm2030_vm3, %v2003_v29  ;;  %v2006_v41 = vmax.f32 %v1740_v30, 0.0  ;;  %2106 = vst.msk [vmem:[#allocation2 + $0x258] sm:$0xff] %vm2030_vm3, %v1909_v31  ;;  %v1742_v42 = vpop.f32.mrb[75].mxu1  ;;  %v3699_v44 = vpop.f32.mrb[78].mxu0  ;;  %v1912_v53 = vmax.f32 %v1364_v43, 0.0 }
 0x182   :  { %v2531_v45 = vld [vmem:[#allocation2 + $0x209] ss:$2 sm:$0x3f]  ;;  %3445 = vst.msk [vmem:[%s4970_s3 + $0xb8] sm:$0xf] %vm2256_vm5, %v3509_v34  ;;  %v2009_v46 = vmax.f32 %v1751_v36, 0.0  ;;  %v1743_v47 = vadd.f32 %v4579_v8, %v1742_v42  ;;  %v1367_v50 = vadd.f32 %v4579_v8, %v3699_v44 }
 0x183   :  { %2205 = vst.msk [vmem:[#allocation2 + $0x570] sm:$0xff] %vm2030_vm3, %v2008_v35  ;;  %2104 = vst.msk [vmem:[#allocation2 + $0x248] sm:$0xff] %vm2030_vm3, %v1907_v37  ;;  %v3798_v48 = vpop.f32.mrb[76].mxu1  ;;  %v1358_v51 = vpop.f32.mrb[79].mxu0  ;;  %v3481_v52 = vpack.c.bf16 %v2544_v40, %v2544_v40  ;;  %v2541_v60 = vmax.f32 %v2527_v38, %v2531_v45  ;;  %v2558_v61 = vld [vmem:[#allocation2 + $0x230] ss:$2 sm:$0xff] }
 0x184   :  { %2203 = vst.msk [vmem:[#allocation2 + $0x560] sm:$0xff] %vm2030_vm3, %v2006_v41  ;;  %v1764_v54 = vadd.f32 %v4579_v8, %v3798_v48  ;;  %v1755_v55 = vpop.f32.mrb[77].mxu1  ;;  %v1359_v56 = vadd.f32 %v4579_v8, %v1358_v51  ;;  %v2535_v57 = vld [vmem:[#allocation2 + $0x224] ss:$2 sm:$0x3f]  ;;  %2206 = vst.msk [vmem:[#allocation2 + $0x578] sm:$0xff] %vm2030_vm3, %v2009_v46 }
 0x185   :  { %v2539_v58 = vld [vmem:[#allocation2 + $0x225] ss:$2 sm:$0x3f]  ;;  %v1756_v59 = vadd.f32 %v4579_v8, %v1755_v55  ;;  %3389 = vst.msk [vmem:[%s4970_s3 + $0x48] sm:$0xf] %vm2256_vm5, %v3481_v52  ;;  %v2007_v0 = vmax.f32 %v1743_v47, 0.0 }
 0x186   :  { %v2562_v62 = vld [vmem:[#allocation2 + $0x231] ss:$2 sm:$0xff]  ;;  %v2543_v63 = vmax.f32 %v2535_v57, %v2539_v58  ;;  %2109 = vst.msk [vmem:[#allocation2 + $0x270] sm:$0xff] %vm2030_vm3, %v1912_v53  ;;  %v2012_v1 = vmax.f32 %v1764_v54, 0.0  ;;  %v1910_v2 = vmax.f32 %v1356_v49, 0.0  ;;  %v3799_v3 = vpop.f32.mrb[78].mxu1 }
 0x187   :  { %v3702_v4 = vpop.f32.mrb[80].mxu0  ;;  %v2010_v6 = vmax.f32 %v1756_v59, 0.0  ;;  %v1913_v7 = vmax.f32 %v1367_v50, 0.0  ;;  %v1911_v39 = vmax.f32 %v1359_v56, 0.0  ;;  %v1758_v9 = vpop.f32.mrb[79].mxu1  ;;  %2204 = vst.msk [vmem:[#allocation2 + $0x568] sm:$0xff] %vm2030_vm3, %v2007_v0  ;;  %v1767_v11 = vadd.f32 %v4579_v8, %v3799_v3 }
 0x188   :  { %v2545_v5 = vmax.f32 %v2541_v60, %v2543_v63  ;;  %v1371_v10 = vpop.f32.mrb[81].mxu0  ;;  %2209 = vst.msk [vmem:[#allocation2 + $0x590] sm:$0xff] %vm2030_vm3, %v2012_v1  ;;  %2107 = vst.msk [vmem:[#allocation2 + $0x260] sm:$0xff] %vm2030_vm3, %v1910_v2  ;;  %v1759_v12 = vadd.f32 %v4579_v8, %v1758_v9  ;;  %v1380_v13 = vadd.f32 %v4579_v8, %v3702_v4  ;;  %v3802_v14 = vpop.f32.mrb[80].mxu1  ;;  %v3020_v33 = vld [vmem:[#allocation2 + $0x540] ss:$2 sm:$0xff] }
 0x189   :  { %v1372_v15 = vadd.f32 %v4579_v8, %v1371_v10  ;;  %v3703_v16 = vpop.f32.mrb[82].mxu0  ;;  %2207 = vst.msk [vmem:[#allocation2 + $0x580] sm:$0xff] %vm2030_vm3, %v2010_v6  ;;  %2110 = vst.msk [vmem:[#allocation2 + $0x278] sm:$0xff] %vm2030_vm3, %v1913_v7  ;;  %v1780_v18 = vadd.f32 %v4579_v8, %v3802_v14  ;;  %v2573_v20 = vmax.f32 %v2558_v61, %v2562_v62  ;;  %v2013_v23 = vmax.f32 %v1767_v11, 0.0  ;;  %v1771_v29 = vpop.f32.mrb[81].mxu1 }
 0x18a   :  { %v3482_v17 = vpack.c.bf16 %v2545_v5, %v2545_v5  ;;  %2108 = vst.msk [vmem:[#allocation2 + $0x268] sm:$0xff] %vm2030_vm3, %v1911_v39  ;;  %v1383_v19 = vadd.f32 %v4579_v8, %v3703_v16  ;;  %v2566_v21 = vld [vmem:[#allocation2 + $0x24c] ss:$2 sm:$0xff]  ;;  %v2570_v22 = vld [vmem:[#allocation2 + $0x24d] ss:$2 sm:$0xff]  ;;  %v2011_v24 = vmax.f32 %v1759_v12, 0.0  ;;  %v1772_v34 = vadd.f32 %v4579_v8, %v1771_v29 }
 0x18b   :  { %v2575_v25 = vmax.f32 %v2566_v21, %v2570_v22  ;;  %v1916_v26 = vmax.f32 %v1380_v13, 0.0  ;;  %v2016_v27 = vmax.f32 %v1780_v18, 0.0  ;;  %v1914_v28 = vmax.f32 %v1372_v15, 0.0  ;;  %v1374_v30 = vpop.f32.mrb[83].mxu0  ;;  %2210 = vst.msk [vmem:[#allocation2 + $0x598] sm:$0xff] %vm2030_vm3, %v2013_v23  ;;  %v3803_v36 = vpop.f32.mrb[82].mxu1 }
 0x18c   :  { %3390 = vst.msk [vmem:[%s4970_s3 + $0x4c] sm:$0x7] %vm2258_vm4, %v3482_v17  ;;  %v3022_v31 = vld [vmem:[#allocation2 + $0x550] ss:$2 sm:$0x3f]  ;;  %v1917_v35 = vmax.f32 %v1383_v19, 0.0  ;;  %v1375_v37 = vadd.f32 %v4579_v8, %v1374_v30 }
 0x18d   :  { %v3026_v32 = vld [vmem:[#allocation2 + $0x551] ss:$2 sm:$0x3f]  ;;  %2208 = vst.msk [vmem:[#allocation2 + $0x588] sm:$0xff] %vm2030_vm3, %v2011_v24  ;;  %v2577_v41 = vmax.f32 %v2573_v20, %v2575_v25  ;;  %2113 = vst.msk [vmem:[#allocation2 + $0x290] sm:$0xff] %vm2030_vm3, %v1916_v26  ;;  %v1774_v44 = vpop.f32.mrb[83].mxu1 }
 0x18e   :  { %v2560_v38 = vld [vmem:[#allocation2 + $0x240] ss:$2 sm:$0x3f]  ;;  %v2564_v40 = vld [vmem:[#allocation2 + $0x241] ss:$2 sm:$0x3f]  ;;  %v3036_v59 = vmax.f32 %v3022_v31, %v3026_v32 }
 0x18f   :  { %2213 = vst.msk [vmem:[#allocation2 + $0x5b0] sm:$0xff] %vm2030_vm3, %v2016_v27  ;;  %2111 = vst.msk [vmem:[#allocation2 + $0x280] sm:$0xff] %vm2030_vm3, %v1914_v28  ;;  %v4834_v42 = vld [vmem:[%s4969_s2] ss:$0 sm:$0xff]  ;;  %v3706_v45 = vpop.f32.mrb[84].mxu0  ;;  %v2014_v8 = vmax.f32 %v1772_v34, 0.0  ;;  %v3483_v51 = vpack.c.bf16 %v2577_v41, %v2577_v41  ;;  %v2574_v1 = vmax.f32 %v2560_v38, %v2564_v40 }
 0x190   :  { %v1783_v43 = vadd.f32 %v4834_v42, %v3803_v36  ;;  %v3024_v46 = vld [vmem:[#allocation2 + $0x541] ss:$2 sm:$0xff]  ;;  %2114 = vst.msk [vmem:[#allocation2 + $0x298] sm:$0xff] %vm2030_vm3, %v1917_v35  ;;  %v1915_v47 = vmax.f32 %v1375_v37, 0.0  ;;  %v1775_v48 = vadd.f32 %v4834_v42, %v1774_v44  ;;  %v3806_v49 = vpop.f32.mrb[84].mxu1  ;;  %v1387_v50 = vpop.f32.mrb[85].mxu0  ;;  %v1396_v55 = vadd.f32 %v4834_v42, %v3706_v45 }
 0x191   :  { %v3028_v52 = vld [vmem:[#allocation2 + $0x55c] ss:$2 sm:$0xff]  ;;  %v3030_v53 = vld [vmem:[#allocation2 + $0x56c] ss:$2 sm:$0x3f]  ;;  %2211 = vst.msk [vmem:[#allocation2 + $0x5a0] sm:$0xff] %vm2030_vm3, %v2014_v8  ;;  %v3035_v60 = vmax.f32 %v3020_v33, %v3024_v46  ;;  %v1796_v3 = vadd.f32 %v4834_v42, %v3806_v49  ;;  %v1388_v4 = vadd.f32 %v4834_v42, %v1387_v50 }
 0x192   :  { %v2017_v54 = vmax.f32 %v1783_v43, 0.0  ;;  %v3032_v56 = vld [vmem:[#allocation2 + $0x55d] ss:$2 sm:$0xff]  ;;  %v3034_v57 = vld [vmem:[#allocation2 + $0x56d] ss:$2 sm:$0x3f] }
 0x193   :  { %2112 = vst.msk [vmem:[#allocation2 + $0x288] sm:$0xff] %vm2030_vm3, %v1915_v47  ;;  %v2015_v58 = vmax.f32 %v1775_v48, 0.0  ;;  %v3037_v61 = vmax.f32 %v3028_v52, %v3032_v56  ;;  %v3038_v62 = vmax.f32 %v3030_v53, %v3034_v57  ;;  %v2568_v63 = vld [vmem:[#allocation2 + $0x25c] ss:$2 sm:$0x3f]  ;;  %v1920_v9 = vmax.f32 %v1396_v55, 0.0 }
 0x194   :  { %3393 = vst.msk [vmem:[%s4970_s3 + $0x50] sm:$0xf] %vm2256_vm5, %v3483_v51  ;;  %v2572_v0 = vld [vmem:[#allocation2 + $0x25d] ss:$2 sm:$0x3f]  ;;  %v2020_v23 = vmax.f32 %v1796_v3, 0.0 }
 0x195   :  { %2214 = vst.msk [vmem:[#allocation2 + $0x5b8] sm:$0xff] %vm2030_vm3, %v2017_v54  ;;  %v2576_v2 = vmax.f32 %v2568_v63, %v2572_v0  ;;  %2212 = vst.msk [vmem:[#allocation2 + $0x5a8] sm:$0xff] %vm2030_vm3, %v2015_v58  ;;  %v3039_v5 = vmax.f32 %v3035_v60, %v3037_v61  ;;  %v3040_v6 = vmax.f32 %v3036_v59, %v3038_v62  ;;  %v3053_v7 = vld [vmem:[#allocation2 + $0x578] ss:$2 sm:$0xff]  ;;  %v3057_v39 = vld [vmem:[#allocation2 + $0x579] ss:$2 sm:$0xff] }
 0x196   :  { %v2591_v11 = vld [vmem:[#allocation2 + $0x268] ss:$2 sm:$0xff]  ;;  %v2595_v12 = vld [vmem:[#allocation2 + $0x269] ss:$2 sm:$0xff]  ;;  %2117 = vst.msk [vmem:[#allocation2 + $0x2b0] sm:$0xff] %vm2030_vm3, %v1920_v9  ;;  %v1918_v24 = vmax.f32 %v1388_v4, 0.0  ;;  %v3068_v31 = vmax.f32 %v3053_v7, %v3057_v39 }
 0x197   :  { %v2578_v10 = vmax.f32 %v2574_v1, %v2576_v2  ;;  %v2593_v13 = vld [vmem:[#allocation2 + $0x278] ss:$2 sm:$0x3f]  ;;  %v3511_v14 = vpack.c.bf16 %v3039_v5, %v3039_v5  ;;  %v3512_v15 = vpack.c.bf16 %v3040_v6, %v3040_v6  ;;  %v3055_v16 = vld [vmem:[#allocation2 + $0x588] ss:$2 sm:$0x3f]  ;;  %v2606_v34 = vmax.f32 %v2591_v11, %v2595_v12 }
 0x198   :  { %v3059_v17 = vld [vmem:[#allocation2 + $0x589] ss:$2 sm:$0x3f]  ;;  %v2597_v18 = vld [vmem:[#allocation2 + $0x279] ss:$2 sm:$0x3f] }
 0x199   :  { %v2601_v19 = vld [vmem:[#allocation2 + $0x294] ss:$2 sm:$0x3f]  ;;  %v3484_v20 = vpack.c.bf16 %v2578_v10, %v2578_v10  ;;  %v2607_v21 = vmax.f32 %v2593_v13, %v2597_v18  ;;  %v2605_v22 = vld [vmem:[#allocation2 + $0x295] ss:$2 sm:$0x3f]  ;;  %v3069_v40 = vmax.f32 %v3055_v16, %v3059_v17 }
 0x19a   :  { %v1787_v25 = vpop.f32.mrb[85].mxu1  ;;  %3449 = vst.msk [vmem:[%s4970_s3 + $0xc0] sm:$0xf] %vm2256_vm5, %v3511_v14  ;;  %v3061_v26 = vld [vmem:[#allocation2 + $0x594] ss:$2 sm:$0xff]  ;;  %v2609_v28 = vmax.f32 %v2601_v19, %v2605_v22  ;;  %v3707_v45 = vpop.f32.mrb[86].mxu0 }
 0x19b   :  { %3450 = vst.msk [vmem:[%s4970_s3 + $0xc4] sm:$0x7] %vm2258_vm4, %v3512_v15  ;;  %v3065_v27 = vld [vmem:[#allocation2 + $0x595] ss:$2 sm:$0xff]  ;;  %v2599_v29 = vld [vmem:[#allocation2 + $0x284] ss:$2 sm:$0xff]  ;;  %v1788_v30 = vadd.f32 %v4834_v42, %v1787_v25  ;;  %v1399_v48 = vadd.f32 %v4834_v42, %v3707_v45 }
 0x19c   :  { %3394 = vst.msk [vmem:[%s4970_s3 + $0x54] sm:$0x7] %vm2258_vm4, %v3484_v20  ;;  %v3070_v32 = vmax.f32 %v3061_v26, %v3065_v27  ;;  %v2603_v33 = vld [vmem:[#allocation2 + $0x285] ss:$2 sm:$0xff]  ;;  %v2611_v35 = vmax.f32 %v2607_v21, %v2609_v28  ;;  %v3807_v46 = vpop.f32.mrb[86].mxu1  ;;  %v1390_v50 = vpop.f32.mrb[87].mxu0 }
 0x19d   :  { %2217 = vst.msk [vmem:[#allocation2 + $0x5d0] sm:$0xff] %vm2030_vm3, %v2020_v23  ;;  %2115 = vst.msk [vmem:[#allocation2 + $0x2a0] sm:$0xff] %vm2030_vm3, %v1918_v24  ;;  %v2608_v36 = vmax.f32 %v2599_v29, %v2603_v33  ;;  %v3063_v37 = vld [vmem:[#allocation2 + $0x5a4] ss:$2 sm:$0x3f]  ;;  %v2018_v44 = vmax.f32 %v1788_v30, 0.0  ;;  %v1799_v49 = vadd.f32 %v4834_v42, %v3807_v46  ;;  %v1391_v54 = vadd.f32 %v4834_v42, %v1390_v50 }
 0x19e   :  { %v3067_v38 = vld [vmem:[#allocation2 + $0x5a5] ss:$2 sm:$0x3f]  ;;  %v3072_v41 = vmax.f32 %v3068_v31, %v3070_v32  ;;  %v3486_v8 = vpack.c.bf16 %v2611_v35, %v2611_v35  ;;  %v1790_v51 = vpop.f32.mrb[87].mxu1  ;;  %v3710_v56 = vpop.f32.mrb[88].mxu0  ;;  %v1921_v59 = vmax.f32 %v1399_v48, 0.0 }
 0x19f   :  { %v3071_v43 = vmax.f32 %v3063_v37, %v3067_v38  ;;  %v2610_v47 = vmax.f32 %v2606_v34, %v2608_v36  ;;  %2215 = vst.msk [vmem:[#allocation2 + $0x5c0] sm:$0xff] %vm2030_vm3, %v2018_v44  ;;  %v1791_v55 = vadd.f32 %v4834_v42, %v1790_v51  ;;  %v3810_v57 = vpop.f32.mrb[88].mxu1  ;;  %v2021_v60 = vmax.f32 %v1799_v49, 0.0  ;;  %v1403_v62 = vpop.f32.mrb[89].mxu0  ;;  %v3086_v46 = vld [vmem:[#allocation2 + $0x5b0] ss:$2 sm:$0xff] }
 0x1a0   :  { %v3513_v52 = vpack.c.bf16 %v3072_v41, %v3072_v41  ;;  %3398 = vst.msk [vmem:[%s4970_s3 + $0x5c] sm:$0x7] %vm2258_vm4, %v3486_v8  ;;  %v1412_v61 = vadd.f32 %v4834_v42, %v3710_v56  ;;  %v1803_v63 = vpop.f32.mrb[89].mxu1  ;;  %v1919_v1 = vmax.f32 %v1391_v54, 0.0  ;;  %v1812_v3 = vadd.f32 %v4834_v42, %v3810_v57  ;;  %v3711_v4 = vpop.f32.mrb[90].mxu0 }
 0x1a1   :  { %v3073_v53 = vmax.f32 %v3069_v40, %v3071_v43  ;;  %v3485_v58 = vpack.c.bf16 %v2610_v47, %v2610_v47  ;;  %v2019_v2 = vmax.f32 %v1791_v55, 0.0  ;;  %v3811_v5 = vpop.f32.mrb[90].mxu1  ;;  %2118 = vst.msk [vmem:[#allocation2 + $0x2b8] sm:$0xff] %vm2030_vm3, %v1921_v59  ;;  %2218 = vst.msk [vmem:[#allocation2 + $0x5d8] sm:$0xff] %vm2030_vm3, %v2021_v60  ;;  %v1404_v7 = vadd.f32 %v4834_v42, %v1403_v62  ;;  %v1406_v10 = vpop.f32.mrb[91].mxu0 }
 0x1a2   :  { %3453 = vst.msk [vmem:[%s4970_s3 + $0xc8] sm:$0xf] %vm2256_vm5, %v3513_v52  ;;  %v1924_v6 = vmax.f32 %v1412_v61, 0.0  ;;  %v1804_v39 = vadd.f32 %v4834_v42, %v1803_v63  ;;  %v1415_v9 = vadd.f32 %v4834_v42, %v3711_v4  ;;  %v1806_v11 = vpop.f32.mrb[91].mxu1  ;;  %v2024_v12 = vmax.f32 %v1812_v3, 0.0  ;;  %v3714_v16 = vpop.f32.mrb[92].mxu0 }
 0x1a3   :  { %v3514_v0 = vpack.c.bf16 %v3073_v53, %v3073_v53  ;;  %3397 = vst.msk [vmem:[%s4970_s3 + $0x58] sm:$0xf] %vm2256_vm5, %v3485_v58  ;;  %v1407_v13 = vadd.f32 %v4834_v42, %v1406_v10  ;;  %v1815_v14 = vadd.f32 %v4834_v42, %v3811_v5  ;;  %v1807_v15 = vadd.f32 %v4834_v42, %v1806_v11  ;;  %v3814_v17 = vpop.f32.mrb[92].mxu1  ;;  %v1419_v22 = vpop.f32.mrb[93].mxu0  ;;  %v3090_v8 = vld [vmem:[#allocation2 + $0x5b1] ss:$2 sm:$0xff] }
 0x1a4   :  { %2116 = vst.msk [vmem:[#allocation2 + $0x2a8] sm:$0xff] %vm2030_vm3, %v1919_v1  ;;  %2216 = vst.msk [vmem:[#allocation2 + $0x5c8] sm:$0xff] %vm2030_vm3, %v2019_v2  ;;  %v1922_v18 = vmax.f32 %v1404_v7, 0.0  ;;  %v2022_v19 = vmax.f32 %v1804_v39, 0.0  ;;  %v1925_v20 = vmax.f32 %v1415_v9, 0.0  ;;  %v1428_v21 = vadd.f32 %v4834_v42, %v3714_v16  ;;  %v1819_v23 = vpop.f32.mrb[93].mxu1 }
 0x1a5   :  { %3454 = vst.msk [vmem:[%s4970_s3 + $0xcc] sm:$0x7] %vm2258_vm4, %v3514_v0  ;;  %v1923_v24 = vmax.f32 %v1407_v13, 0.0  ;;  %v2025_v25 = vmax.f32 %v1815_v14, 0.0  ;;  %v2023_v26 = vmax.f32 %v1807_v15, 0.0  ;;  %v1828_v27 = vadd.f32 %v4834_v42, %v3814_v17  ;;  %v3715_v28 = vpop.f32.mrb[94].mxu0 }
 0x1a6   :  { %2121 = vst.msk [vmem:[#allocation2 + $0x2d0] sm:$0xff] %vm2030_vm3, %v1924_v6  ;;  %2221 = vst.msk [vmem:[#allocation2 + $0x5f0] sm:$0xff] %vm2030_vm3, %v2024_v12  ;;  %v3815_v29 = vpop.f32.mrb[94].mxu1  ;;  %v1928_v30 = vmax.f32 %v1428_v21, 0.0  ;;  %v1420_v31 = vadd.f32 %v4834_v42, %v1419_v22  ;;  %v1820_v32 = vadd.f32 %v4834_v42, %v1819_v23  ;;  %v1431_v33 = vadd.f32 %v4834_v42, %v3715_v28  ;;  %v1422_v34 = vpop.f32.mrb[95].mxu0 }
 0x1a7   :  { %2119 = vst.msk [vmem:[#allocation2 + $0x2c0] sm:$0xff] %vm2030_vm3, %v1922_v18  ;;  %2219 = vst.msk [vmem:[#allocation2 + $0x5e0] sm:$0xff] %vm2030_vm3, %v2022_v19  ;;  %v1822_v35 = vpop.f32.mrb[95].mxu1  ;;  %v2028_v36 = vmax.f32 %v1828_v27, 0.0  ;;  %v1831_v37 = vadd.f32 %v4834_v42, %v3815_v29  ;;  %v1423_v38 = vadd.f32 %v4834_v42, %v1422_v34  ;;  %v3718_v45 = vpop.f32.mrb[96].mxu0  ;;  %v3101_v61 = vmax.f32 %v3086_v46, %v3090_v8 }
 0x1a8   :  { %2122 = vst.msk [vmem:[#allocation2 + $0x2d8] sm:$0xff] %vm2030_vm3, %v1925_v20  ;;  %2120 = vst.msk [vmem:[#allocation2 + $0x2c8] sm:$0xff] %vm2030_vm3, %v1923_v24  ;;  %v1926_v40 = vmax.f32 %v1420_v31, 0.0  ;;  %v2026_v41 = vmax.f32 %v1820_v32, 0.0  ;;  %v1929_v43 = vmax.f32 %v1431_v33, 0.0  ;;  %v1823_v44 = vadd.f32 %v4834_v42, %v1822_v35  ;;  %v1435_v60 = vpop.f32.mrb[97].mxu0 }
 0x1a9   :  { %2222 = vst.msk [vmem:[#allocation2 + $0x5f8] sm:$0xff] %vm2030_vm3, %v2025_v25  ;;  %2220 = vst.msk [vmem:[#allocation2 + $0x5e8] sm:$0xff] %vm2030_vm3, %v2023_v26  ;;  %v2626_v47 = vld [vmem:[#allocation2 + $0x2b0] ss:$2 sm:$0x3f]  ;;  %v1444_v50 = vadd.f32 %v4834_v42, %v3718_v45  ;;  %v2029_v57 = vmax.f32 %v1831_v37, 0.0  ;;  %v1436_v1 = vadd.f32 %v4834_v42, %v1435_v60 }
 0x1aa   :  { %2125 = vst.msk [vmem:[#allocation2 + $0x2f0] sm:$0xff] %vm2030_vm3, %v1928_v30  ;;  %2225 = vst.msk [vmem:[#allocation2 + $0x610] sm:$0xff] %vm2030_vm3, %v2028_v36  ;;  %v2630_v48 = vld [vmem:[#allocation2 + $0x2b1] ss:$2 sm:$0x3f]  ;;  %v1927_v58 = vmax.f32 %v1423_v38, 0.0 }
 0x1ab   :  { %v3094_v49 = vld [vmem:[#allocation2 + $0x5cc] ss:$2 sm:$0xff]  ;;  %2123 = vst.msk [vmem:[#allocation2 + $0x2e0] sm:$0xff] %vm2030_vm3, %v1926_v40  ;;  %2223 = vst.msk [vmem:[#allocation2 + $0x600] sm:$0xff] %vm2030_vm3, %v2026_v41  ;;  %v2628_v52 = vld [vmem:[#allocation2 + $0x2a1] ss:$2 sm:$0xff]  ;;  %v2640_v6 = vmax.f32 %v2626_v47, %v2630_v48 }
 0x1ac   :  { %2126 = vst.msk [vmem:[#allocation2 + $0x2f8] sm:$0xff] %vm2030_vm3, %v1929_v43  ;;  %v2624_v51 = vld [vmem:[#allocation2 + $0x2a0] ss:$2 sm:$0xff]  ;;  %v3092_v54 = vld [vmem:[#allocation2 + $0x5c1] ss:$2 sm:$0x3f] }
 0x1ad   :  { %v3088_v53 = vld [vmem:[#allocation2 + $0x5c0] ss:$2 sm:$0x3f]  ;;  %v3098_v55 = vld [vmem:[#allocation2 + $0x5cd] ss:$2 sm:$0xff]  ;;  %v2027_v59 = vmax.f32 %v1823_v44, 0.0  ;;  %v2639_v11 = vmax.f32 %v2624_v51, %v2628_v52 }
 0x1ae   :  { %v3102_v56 = vmax.f32 %v3088_v53, %v3092_v54  ;;  %v3103_v62 = vmax.f32 %v3094_v49, %v3098_v55  ;;  %v3096_v63 = vld [vmem:[#allocation2 + $0x5dc] ss:$2 sm:$0x3f]  ;;  %v3100_v0 = vld [vmem:[#allocation2 + $0x5dd] ss:$2 sm:$0x3f] }
 0x1af   :  { %v3104_v2 = vmax.f32 %v3096_v63, %v3100_v0  ;;  %v2632_v3 = vld [vmem:[#allocation2 + $0x2bc] ss:$2 sm:$0xff]  ;;  %v2634_v4 = vld [vmem:[#allocation2 + $0x2cc] ss:$2 sm:$0x3f]  ;;  %2226 = vst.msk [vmem:[#allocation2 + $0x618] sm:$0xff] %vm2030_vm3, %v2029_v57 }
 0x1b0   :  { %2124 = vst.msk [vmem:[#allocation2 + $0x2e8] sm:$0xff] %vm2030_vm3, %v1927_v58  ;;  %2224 = vst.msk [vmem:[#allocation2 + $0x608] sm:$0xff] %vm2030_vm3, %v2027_v59  ;;  %v1932_v5 = vmax.f32 %v1444_v50, 0.0  ;;  %v3105_v7 = vmax.f32 %v3101_v61, %v3103_v62  ;;  %v2636_v39 = vld [vmem:[#allocation2 + $0x2bd] ss:$2 sm:$0xff]  ;;  %v1930_v10 = vmax.f32 %v1436_v1, 0.0 }
 0x1b1   :  { %v2638_v9 = vld [vmem:[#allocation2 + $0x2cd] ss:$2 sm:$0x3f]  ;;  %v3106_v12 = vmax.f32 %v3102_v56, %v3104_v2  ;;  %v2641_v13 = vmax.f32 %v2632_v3, %v2636_v39  ;;  %v3719_v15 = vpop.f32.mrb[98].mxu0  ;;  %v3119_v28 = vld [vmem:[#allocation2 + $0x5e8] ss:$2 sm:$0xff] }
 0x1b2   :  { %v2642_v14 = vmax.f32 %v2634_v4, %v2638_v9  ;;  %2129 = vst.msk [vmem:[#allocation2 + $0x310] sm:$0xff] %vm2030_vm3, %v1932_v5  ;;  %v3515_v16 = vpack.c.bf16 %v3105_v7, %v3105_v7  ;;  %2127 = vst.msk [vmem:[#allocation2 + $0x300] sm:$0xff] %vm2030_vm3, %v1930_v10  ;;  %v1447_v17 = vadd.f32 %v4834_v42, %v3719_v15  ;;  %v1438_v18 = vpop.f32.mrb[99].mxu0  ;;  %v3121_v22 = vld [vmem:[#allocation2 + $0x5f8] ss:$2 sm:$0x3f] }
 0x1b3   :  { %v3516_v19 = vpack.c.bf16 %v3106_v12, %v3106_v12  ;;  %v2643_v20 = vmax.f32 %v2639_v11, %v2641_v13  ;;  %v3125_v23 = vld [vmem:[#allocation2 + $0x5f9] ss:$2 sm:$0x3f]  ;;  %v1439_v25 = vadd.f32 %v4834_v42, %v1438_v18  ;;  %v3123_v29 = vld [vmem:[#allocation2 + $0x5e9] ss:$2 sm:$0xff] }
 0x1b4   :  { %v2644_v21 = vmax.f32 %v2640_v6, %v2642_v14  ;;  %3457 = vst.msk [vmem:[%s4970_s3 + $0xd0] sm:$0xf] %vm2256_vm5, %v3515_v16  ;;  %v1933_v24 = vmax.f32 %v1447_v17, 0.0  ;;  %v3135_v30 = vmax.f32 %v3121_v22, %v3125_v23  ;;  %v2657_v42 = vld [vmem:[#allocation2 + $0x2d8] ss:$2 sm:$0xff]  ;;  %v3134_v38 = vmax.f32 %v3119_v28, %v3123_v29 }
 0x1b5   :  { %3458 = vst.msk [vmem:[%s4970_s3 + $0xd4] sm:$0x7] %vm2258_vm4, %v3516_v19  ;;  %v3487_v26 = vpack.c.bf16 %v2643_v20, %v2643_v20  ;;  %v2661_v33 = vld [vmem:[#allocation2 + $0x2d9] ss:$2 sm:$0xff]  ;;  %v1931_v37 = vmax.f32 %v1439_v25, 0.0 }
 0x1b6   :  { %v3488_v27 = vpack.c.bf16 %v2644_v21, %v2644_v21  ;;  %v3129_v31 = vld [vmem:[#allocation2 + $0x614] ss:$2 sm:$0x3f]  ;;  %v3133_v32 = vld [vmem:[#allocation2 + $0x615] ss:$2 sm:$0x3f]  ;;  %v2672_v45 = vmax.f32 %v2657_v42, %v2661_v33 }
 0x1b7   :  { %2130 = vst.msk [vmem:[#allocation2 + $0x318] sm:$0xff] %vm2030_vm3, %v1933_v24  ;;  %v3137_v34 = vmax.f32 %v3129_v31, %v3133_v32  ;;  %v3127_v35 = vld [vmem:[#allocation2 + $0x604] ss:$2 sm:$0xff]  ;;  %v3131_v36 = vld [vmem:[#allocation2 + $0x605] ss:$2 sm:$0xff]  ;;  %2128 = vst.msk [vmem:[#allocation2 + $0x308] sm:$0xff] %vm2030_vm3, %v1931_v37 }
 0x1b8   :  { %3401 = vst.msk [vmem:[%s4970_s3 + $0x60] sm:$0xf] %vm2256_vm5, %v3487_v26  ;;  %v3136_v41 = vmax.f32 %v3127_v35, %v3131_v36  ;;  %v2698_v8 = vld [vmem:[#allocation2 + $0x32c] ss:$2 sm:$0xff]  ;;  %v2702_v47 = vld [vmem:[#allocation2 + $0x32d] ss:$2 sm:$0xff] }
 0x1b9   :  { %3402 = vst.msk [vmem:[%s4970_s3 + $0x64] sm:$0x7] %vm2258_vm4, %v3488_v27  ;;  %v3139_v40 = vmax.f32 %v3135_v30, %v3137_v34  ;;  %v2665_v43 = vld [vmem:[#allocation2 + $0x2f4] ss:$2 sm:$0xff]  ;;  %v2669_v44 = vld [vmem:[#allocation2 + $0x2f5] ss:$2 sm:$0xff]  ;;  %v2707_v54 = vmax.f32 %v2698_v8, %v2702_v47 }
 0x1ba   :  { %v2674_v46 = vmax.f32 %v2665_v43, %v2669_v44  ;;  %v3138_v49 = vmax.f32 %v3134_v38, %v3136_v41  ;;  %v2659_v57 = vld [vmem:[#allocation2 + $0x2e8] ss:$2 sm:$0x3f]  ;;  %v2663_v58 = vld [vmem:[#allocation2 + $0x2e9] ss:$2 sm:$0x3f] }
 0x1bb   :  { %v3518_v48 = vpack.c.bf16 %v3139_v40, %v3139_v40  ;;  %v2673_v62 = vmax.f32 %v2659_v57, %v2663_v58 }
 0x1bc   :  { %v2676_v50 = vmax.f32 %v2672_v45, %v2674_v46  ;;  %v3517_v51 = vpack.c.bf16 %v3138_v49, %v3138_v49 }
 0x1bd   :  { %3462 = vst.msk [vmem:[%s4970_s3 + $0xdc] sm:$0x7] %vm2258_vm4, %v3518_v48 }
 0x1be   :  { %v2690_v52 = vld [vmem:[#allocation2 + $0x310] ss:$2 sm:$0xff]  ;;  %v2694_v53 = vld [vmem:[#allocation2 + $0x311] ss:$2 sm:$0xff]  ;;  %v3489_v55 = vpack.c.bf16 %v2676_v50, %v2676_v50  ;;  %3461 = vst.msk [vmem:[%s4970_s3 + $0xd8] sm:$0xf] %vm2256_vm5, %v3517_v51 }
 0x1bf   :  { %v2705_v56 = vmax.f32 %v2690_v52, %v2694_v53  ;;  %v2667_v60 = vld [vmem:[#allocation2 + $0x304] ss:$2 sm:$0x3f]  ;;  %v2671_v61 = vld [vmem:[#allocation2 + $0x305] ss:$2 sm:$0x3f] }
 0x1c0   :  { %3405 = vst.msk [vmem:[%s4970_s3 + $0x68] sm:$0xf] %vm2256_vm5, %v3489_v55  ;;  %v2675_v0 = vmax.f32 %v2667_v60, %v2671_v61 }
 0x1c1   :  { %v2709_v59 = vmax.f32 %v2705_v56, %v2707_v54 }
 0x1c2   :  { %v2677_v1 = vmax.f32 %v2673_v62, %v2675_v0 }
 0x1c3   :  { %v3491_v63 = vpack.c.bf16 %v2709_v59, %v2709_v59 }
 0x1c4   :  { %v3490_v2 = vpack.c.bf16 %v2677_v1, %v2677_v1 }
 0x1c5   :  { %3409 = vst.msk [vmem:[%s4970_s3 + $0x70] sm:$0xf] %vm2256_vm5, %v3491_v63 }
 0x1c6   :  { %3406 = vst.msk [vmem:[%s4970_s3 + $0x6c] sm:$0x7] %vm2258_vm4, %v3490_v2 }

// kernel: dnet_forward.5
= control target key start
LH: loop header
LB: loop body
LE: loop exit
PB: predicated region body
PF: predicated region fallthrough
CT: control target
= control target key end

     0   :  { %v433_v27 = vlaneseq  ;;  %v3195_v35 = vmov 1966171168   ;;  %s3921_s0 = inlined_call_operand.vmem [shape: bf16[2,3136], index: 0, kind: input, shape index: {}]   ;;  %s3922_s1 = inlined_call_operand.vmem [shape: bf16[3136,128], index: 1, kind: input, shape index: {}]   ;;  %s3923_s2 = inlined_call_operand.vmem [shape: f32[1,128], index: 2, kind: input, shape index: {}]   ;;  %s3924_s3 = inlined_call_operand.vmem [shape: bf16[128,128], index: 3, kind: input, shape index: {}]   ;;  %s3925_s4 = inlined_call_operand.vmem [shape: f32[1,128], index: 4, kind: input, shape index: {}]   ;;  %s3926_s5 = inlined_call_operand.hbm [shape: f32[2,128], index: 5, kind: output, shape index: {}]  }
   0x1   :  { %v2964_v0 = vld [vmem:[%s3922_s1 + $0x40] sm:$0xff]   ;;  %v2968_v4 = vld [vmem:[%s3922_s1 + $0x48] sm:$0xff]   ;;  %v2972_v8 = vld [vmem:[%s3922_s1 + $0x50] sm:$0xff]   ;;  %v431_v36 = vunpack.c.l.s4 %v3195_v35 }
   0x2   :  { %v2965_v1 = vld [vmem:[%s3922_s1] sm:$0xff]   ;;  %2650 = vmatprep.subr.bf16.mxu0 %v2964_v0  ;;  %v2969_v5 = vld [vmem:[%s3922_s1 + $0x8] sm:$0xff]   ;;  %v2973_v9 = vld [vmem:[%s3922_s1 + $0x10] sm:$0xff]   ;;  %v434_v32 = vshrl.u32 %v433_v27, 7 }
   0x3   :  { %v2966_v2 = vld [vmem:[%s3922_s1 + $0xc0] sm:$0xff]   ;;  %2651 = vmatpush3.bf16.msra.mxu0 %v2965_v1  ;;  %v2970_v6 = vld [vmem:[%s3922_s1 + $0xc8] sm:$0xff]   ;;  %v2974_v10 = vld [vmem:[%s3922_s1 + $0xd0] sm:$0xff]   ;;  %v432_v39 = vunpack.c.0.s8 %v431_v36 }
   0x4   :  { %v2967_v3 = vld [vmem:[%s3922_s1 + $0x80] sm:$0xff]   ;;  %2672 = vmatprep.subr.bf16.mxu1 %v2966_v2  ;;  %2652 = vmatprep.subr.bf16.mxu0 %v2968_v4  ;;  %v2971_v7 = vld [vmem:[%s3922_s1 + $0x88] sm:$0xff]   ;;  %v2975_v11 = vld [vmem:[%s3922_s1 + $0x90] sm:$0xff]  }
   0x5   :  { %2673 = vmatpush3.bf16.msra.mxu1 %v2967_v3  ;;  %v2976_v12 = vld [vmem:[%s3922_s1 + $0x58] sm:$0xff]   ;;  %v2980_v16 = vld [vmem:[%s3922_s1 + $0x60] sm:$0xff]   ;;  %v2984_v20 = vld [vmem:[%s3922_s1 + $0x68] sm:$0xff]   ;;  %v3334_v41 = vsub.s32 %v432_v39, %v434_v32 }
   0x6   :  { %2674 = vmatprep.subr.bf16.mxu1 %v2970_v6  ;;  %v2977_v13 = vld [vmem:[%s3922_s1 + $0x18] sm:$0xff]   ;;  %v2981_v17 = vld [vmem:[%s3922_s1 + $0x20] sm:$0xff]   ;;  %v2985_v21 = vld [vmem:[%s3922_s1 + $0x28] sm:$0xff]  }
   0x7   :  { %2653 = vmatpush3.bf16.msra.mxu0 %v2969_v5  ;;  %v2978_v14 = vld [vmem:[%s3922_s1 + $0xd8] sm:$0xff]   ;;  %v2982_v18 = vld [vmem:[%s3922_s1 + $0xe0] sm:$0xff]   ;;  %v2986_v22 = vld [vmem:[%s3922_s1 + $0xe8] sm:$0xff]  }
   0x8   :  { %2654 = vmatprep.subr.bf16.mxu0 %v2972_v8  ;;  %v2979_v15 = vld [vmem:[%s3922_s1 + $0x98] sm:$0xff]   ;;  %v2983_v19 = vld [vmem:[%s3922_s1 + $0xa0] sm:$0xff]   ;;  %v2987_v23 = vld [vmem:[%s3922_s1 + $0xa8] sm:$0xff]  }
   0x9   :  { %2675 = vmatpush3.bf16.msra.mxu1 %v2971_v7  ;;  %v2988_v24 = vld [vmem:[%s3922_s1 + $0x70] sm:$0xff]   ;;  %v2992_v29 = vld [vmem:[%s3922_s1 + $0x78] sm:$0xff]   ;;  %v22_v33 = vld [vmem:[%s3921_s0] sm:$0xff] }
   0xa   :  { %2676 = vmatprep.subr.bf16.mxu1 %v2974_v10  ;;  %v2989_v25 = vld [vmem:[%s3922_s1 + $0x30] sm:$0xff]   ;;  %v2993_v30 = vld [vmem:[%s3922_s1 + $0x38] sm:$0xff]   ;;  %v2997_v37 = vld [vmem:[%s3922_s1 + $0x140] sm:$0xff]   ;;  %v429_v38 = vcombine.high %v22_v33, %v22_v33  ;;  %v436_v42 = vrot.slane %v22_v33, %v3334_v41 }
   0xb   :  { %2655 = vmatpush3.bf16.msra.mxu0 %v2973_v9  ;;  %v2990_v26 = vld [vmem:[%s3922_s1 + $0xf0] sm:$0xff]   ;;  %v2994_v31 = vld [vmem:[%s3922_s1 + $0xf8] sm:$0xff]   ;;  %v2999_v40 = vld [vmem:[%s3922_s1 + $0x1c0] sm:$0xff]  }
   0xc   :  { %2656 = vmatprep.subr.bf16.mxu0 %v2976_v12  ;;  %v2991_v28 = vld [vmem:[%s3922_s1 + $0xb0] sm:$0xff]   ;;  %v2996_v34 = vld [vmem:[%s3922_s1 + $0xb8] sm:$0xff]   ;;  %v3338_v43 = vrot.slane %v429_v38, %v3334_v41  ;;  %v444_v44 = vcombine.high %v436_v42, %v436_v42  ;;  %v452_v45 = vrot.slane %v436_v42, %v3334_v41  ;;  %v2998_v48 = vld [vmem:[%s3922_s1 + $0x100] sm:$0xff]  }
   0xd   :  { %2677 = vmatpush3.bf16.msra.mxu1 %v2975_v11  ;;  %v3001_v51 = vld [vmem:[%s3922_s1 + $0x148] sm:$0xff]   ;;  %v3000_v53 = vld [vmem:[%s3922_s1 + $0x180] sm:$0xff]   ;;  %v3005_v57 = vld [vmem:[%s3922_s1 + $0x150] sm:$0xff]  }
   0xe   :  { %2678 = vmatprep.subr.bf16.mxu1 %v2978_v14  ;;  %v445_v46 = vcombine.high %v3338_v43, %v3338_v43  ;;  %v466_v47 = vrot.slane %v444_v44, %v3334_v41  ;;  %v474_v50 = vcombine.high %v452_v45, %v452_v45  ;;  %v3003_v54 = vld [vmem:[%s3922_s1 + $0x1c8] sm:$0xff]   ;;  %v3007_v59 = vld [vmem:[%s3922_s1 + $0x1d0] sm:$0xff]   ;;  %v3009_v61 = vld [vmem:[%s3922_s1 + $0x158] sm:$0xff]  }
   0xf   :  { %2657 = vmatpush3.bf16.msra.mxu0 %v2977_v13  ;;  %v3002_v56 = vld [vmem:[%s3922_s1 + $0x108] sm:$0xff]   ;;  %v3006_v60 = vld [vmem:[%s3922_s1 + $0x110] sm:$0xff]   ;;  %v3011_v63 = vld [vmem:[%s3922_s1 + $0x1d8] sm:$0xff]  }
  0x10   :  { %2658 = vmatprep.subr.bf16.mxu0 %v2980_v16  ;;  %v473_v49 = vrot.slane %v445_v46, %v3334_v41  ;;  %1826 = vmatprep.mubr.bf16.mxu0 %v466_v47  ;;  %v476_v52 = vcombine.high %v466_v47, %v466_v47  ;;  %v3004_v58 = vld [vmem:[%s3922_s1 + $0x188] sm:$0xff]   ;;  %v3008_v62 = vld [vmem:[%s3922_s1 + $0x190] sm:$0xff]   ;;  %v3010_v0 = vld [vmem:[%s3922_s1 + $0x118] sm:$0xff]  }
  0x11   :  { %2679 = vmatpush3.bf16.msra.mxu1 %v2979_v15  ;;  %v3013_v1 = vld [vmem:[%s3922_s1 + $0x160] sm:$0xff]   ;;  %v3012_v2 = vld [vmem:[%s3922_s1 + $0x198] sm:$0xff]   ;;  %v3017_v5 = vld [vmem:[%s3922_s1 + $0x168] sm:$0xff]  }
  0x12   :  { %2680 = vmatprep.subr.bf16.mxu1 %v2982_v18  ;;  %v477_v55 = vcombine.high %v473_v49, %v473_v49  ;;  %1866 = vmatprep.mubr.bf16.mxu1 %v476_v52  ;;  %v3015_v3 = vld [vmem:[%s3922_s1 + $0x1e0] sm:$0xff]   ;;  %v3019_v7 = vld [vmem:[%s3922_s1 + $0x1e8] sm:$0xff]   ;;  %v3021_v9 = vld [vmem:[%s3922_s1 + $0x170] sm:$0xff]  }
  0x13   :  { %2659 = vmatpush3.bf16.msra.mxu0 %v2981_v17  ;;  %v3014_v4 = vld [vmem:[%s3922_s1 + $0x120] sm:$0xff]   ;;  %v3018_v8 = vld [vmem:[%s3922_s1 + $0x128] sm:$0xff]   ;;  %v3023_v11 = vld [vmem:[%s3922_s1 + $0x1f0] sm:$0xff]   ;;  %v459_v17 = vrot.slane %v3338_v43, %v3334_v41 }
  0x14   :  { %2660 = vmatprep.subr.bf16.mxu0 %v2984_v20  ;;  %v3016_v6 = vld [vmem:[%s3922_s1 + $0x1a0] sm:$0xff]   ;;  %v3020_v10 = vld [vmem:[%s3922_s1 + $0x1a8] sm:$0xff]   ;;  %v3022_v12 = vld [vmem:[%s3922_s1 + $0x130] sm:$0xff]  }
  0x15   :  { %2681 = vmatpush3.bf16.msra.mxu1 %v2983_v19  ;;  %v3025_v13 = vld [vmem:[%s3922_s1 + $0x178] sm:$0xff]   ;;  %v3024_v14 = vld [vmem:[%s3922_s1 + $0x1b0] sm:$0xff]   ;;  %v3029_v18 = vld [vmem:[%s3922_s1 + $0x240] sm:$0xff]  }
  0x16   :  { %2682 = vmatprep.subr.bf16.mxu1 %v2986_v22  ;;  %v3027_v15 = vld [vmem:[%s3922_s1 + $0x1f8] sm:$0xff]   ;;  %v3031_v20 = vld [vmem:[%s3922_s1 + $0x2c0] sm:$0xff]   ;;  %v475_v22 = vcombine.high %v459_v17, %v459_v17  ;;  %v3037_v27 = vld [vmem:[%s3922_s1 + $0x250] sm:$0xff]  }
  0x17   :  { %2661 = vmatpush3.bf16.msra.mxu0 %v2985_v21  ;;  %v3026_v16 = vld [vmem:[%s3922_s1 + $0x138] sm:$0xff]   ;;  %v3030_v21 = vld [vmem:[%s3922_s1 + $0x200] sm:$0xff]   ;;  %v3040_v32 = vld [vmem:[%s3922_s1 + $0x290] sm:$0xff]  }
  0x18   :  { %2662 = vmatprep.subr.bf16.mxu0 %v2988_v24  ;;  %v3028_v19 = vld [vmem:[%s3922_s1 + $0x1b8] sm:$0xff]   ;;  %v3032_v24 = vld [vmem:[%s3922_s1 + $0x280] sm:$0xff]   ;;  %v3049_v39 = vld [vmem:[%s3922_s1 + $0x268] sm:$0xff]  }
  0x19   :  { %2683 = vmatpush3.bf16.msra.mxu1 %v2987_v23  ;;  %v3033_v23 = vld [vmem:[%s3922_s1 + $0x248] sm:$0xff]   ;;  %v3043_v33 = vld [vmem:[%s3922_s1 + $0x2d8] sm:$0xff]   ;;  %v3045_v35 = vld [vmem:[%s3922_s1 + $0x260] sm:$0xff]  }
  0x1a   :  { %2684 = vmatprep.subr.bf16.mxu1 %v2990_v26  ;;  %v3034_v26 = vld [vmem:[%s3922_s1 + $0x208] sm:$0xff]   ;;  %v3044_v36 = vld [vmem:[%s3922_s1 + $0x298] sm:$0xff]   ;;  %v3046_v38 = vld [vmem:[%s3922_s1 + $0x220] sm:$0xff]  }
  0x1b   :  { %2663 = vmatpush3.bf16.msra.mxu0 %v2989_v25  ;;  %v3035_v25 = vld [vmem:[%s3922_s1 + $0x2c8] sm:$0xff]   ;;  %v3053_v44 = vld [vmem:[%s3922_s1 + $0x270] sm:$0xff]  }
  0x1c   :  { %2664 = vmatprep.subr.bf16.mxu0 %v2992_v29  ;;  %v3039_v29 = vld [vmem:[%s3922_s1 + $0x2d0] sm:$0xff]   ;;  %v3051_v42 = vld [vmem:[%s3922_s1 + $0x2e8] sm:$0xff]  }
  0x1d   :  { %2685 = vmatpush3.bf16.msra.mxu1 %v2991_v28  ;;  %v3036_v28 = vld [vmem:[%s3922_s1 + $0x288] sm:$0xff]  }
  0x1e   :  { %2686 = vmatprep.subr.bf16.mxu1 %v2994_v31  ;;  %v3041_v31 = vld [vmem:[%s3922_s1 + $0x258] sm:$0xff]   ;;  %v3050_v43 = vld [vmem:[%s3922_s1 + $0x228] sm:$0xff]  }
  0x1f   :  { %2665 = vmatpush3.bf16.msra.mxu0 %v2993_v30  ;;  %v3038_v30 = vld [vmem:[%s3922_s1 + $0x210] sm:$0xff]   ;;  %v3052_v46 = vld [vmem:[%s3922_s1 + $0x2a8] sm:$0xff]  }
  0x20   :  { %2694 = vmatprep.subr.bf16.mxu0 %v2997_v37  ;;  %v3047_v37 = vld [vmem:[%s3922_s1 + $0x2e0] sm:$0xff]  }
  0x21   :  { %2687 = vmatpush3.bf16.msra.mxu1 %v2996_v34  ;;  %v3042_v34 = vld [vmem:[%s3922_s1 + $0x218] sm:$0xff]  }
  0x22   :  { %2716 = vmatprep.subr.bf16.mxu1 %v2999_v40  ;;  %1827 = vmatmul.mubr.bf16.vlgmr.msra.gmra.mrb[0].mxu0 %v452_v45  ;;  %v3048_v40 = vld [vmem:[%s3922_s1 + $0x2a0] sm:$0xff]   ;;  %v23_v45 = vld [vmem:[%s3921_s0 + $0x8] sm:$0xff] }
  0x23   :  { %2695 = vmatpush3.bf16.msra.mxu0 %v2998_v48  ;;  %1906 = vmatprep.mubr.bf16.mxu0 %v473_v49  ;;  %v485_v47 = vrot.slane %v23_v45, %v3334_v41  ;;  %v478_v48 = vcombine.high %v23_v45, %v23_v45  ;;  %v3055_v49 = vld [vmem:[%s3922_s1 + $0x2f0] sm:$0xff]  }
  0x24   :  { %1867 = vmatmul.mubr.bf16.vlgmr.msra.gmra.mrb[0].mxu1 %v474_v50  ;;  %2696 = vmatprep.subr.bf16.mxu0 %v3001_v51  ;;  %v3054_v50 = vld [vmem:[%s3922_s1 + $0x230] sm:$0xff]  }
  0x25   :  { %2717 = vmatpush3.bf16.msra.mxu1 %v3000_v53  ;;  %1946 = vmatprep.mubr.bf16.mxu1 %v477_v55  ;;  %v493_v51 = vcombine.high %v485_v47, %v485_v47  ;;  %v3523_v52 = vrot.slane %v478_v48, %v3334_v41  ;;  %v3057_v53 = vld [vmem:[%s3922_s1 + $0x278] sm:$0xff]   ;;  %v3104_v45 = vld [vmem:[%s3922_s1 + $0x4d0] sm:$0xff]  }
  0x26   :  { %2718 = vmatprep.subr.bf16.mxu1 %v3003_v54  ;;  %v3056_v54 = vld [vmem:[%s3922_s1 + $0x2b0] sm:$0xff]  }
  0x27   :  { %2697 = vmatpush3.bf16.msra.mxu0 %v3002_v56  ;;  %v515_v55 = vrot.slane %v493_v51, %v3334_v41  ;;  %v494_v56 = vcombine.high %v3523_v52, %v3523_v52  ;;  %v3105_v48 = vld [vmem:[%s3922_s1 + $0x490] sm:$0xff]   ;;  %v3110_v51 = vld [vmem:[%s3922_s1 + $0x460] sm:$0xff]  }
  0x28   :  { %2698 = vmatprep.subr.bf16.mxu0 %v3005_v57  ;;  %v3059_v57 = vld [vmem:[%s3922_s1 + $0x2f8] sm:$0xff]  }
  0x29   :  { %2719 = vmatpush3.bf16.msra.mxu1 %v3004_v58  ;;  %v3058_v58 = vld [vmem:[%s3922_s1 + $0x238] sm:$0xff]  }
  0x2a   :  { %2720 = vmatprep.subr.bf16.mxu1 %v3007_v59  ;;  %v525_v59 = vcombine.high %v515_v55, %v515_v55 }
  0x2b   :  { %2699 = vmatpush3.bf16.msra.mxu0 %v3006_v60  ;;  %v501_v60 = vrot.slane %v485_v47, %v3334_v41  ;;  %v3106_v47 = vld [vmem:[%s3922_s1 + $0x458] sm:$0xff]  }
  0x2c   :  { %2700 = vmatprep.subr.bf16.mxu0 %v3009_v61  ;;  %v3061_v61 = vld [vmem:[%s3922_s1 + $0x340] sm:$0xff]  }
  0x2d   :  { %2721 = vmatpush3.bf16.msra.mxu1 %v3008_v62  ;;  %v3060_v62 = vld [vmem:[%s3922_s1 + $0x2b8] sm:$0xff]  }
  0x2e   :  { %2722 = vmatprep.subr.bf16.mxu1 %v3011_v63  ;;  %v522_v63 = vrot.slane %v494_v56, %v3334_v41  ;;  %v3113_v56 = vld [vmem:[%s3922_s1 + $0x4a0] sm:$0xff]  }
  0x2f   :  { %2701 = vmatpush3.bf16.msra.mxu0 %v3010_v0  ;;  %v3063_v0 = vld [vmem:[%s3922_s1 + $0x3c0] sm:$0xff]  }
  0x30   :  { %2702 = vmatprep.subr.bf16.mxu0 %v3013_v1  ;;  %v3062_v1 = vld [vmem:[%s3922_s1 + $0x300] sm:$0xff]  }
  0x31   :  { %2723 = vmatpush3.bf16.msra.mxu1 %v3012_v2  ;;  %v523_v2 = vcombine.high %v501_v60, %v501_v60 }
  0x32   :  { %2724 = vmatprep.subr.bf16.mxu1 %v3015_v3  ;;  %v3065_v3 = vld [vmem:[%s3922_s1 + $0x348] sm:$0xff]  }
  0x33   :  { %2703 = vmatpush3.bf16.msra.mxu0 %v3014_v4  ;;  %v3064_v4 = vld [vmem:[%s3922_s1 + $0x380] sm:$0xff]  }
  0x34   :  { %2704 = vmatprep.subr.bf16.mxu0 %v3017_v5  ;;  %v526_v5 = vcombine.high %v522_v63, %v522_v63 }
  0x35   :  { %2725 = vmatpush3.bf16.msra.mxu1 %v3016_v6  ;;  %v3067_v6 = vld [vmem:[%s3922_s1 + $0x3c8] sm:$0xff]  }
  0x36   :  { %2726 = vmatprep.subr.bf16.mxu1 %v3019_v7  ;;  %v3066_v7 = vld [vmem:[%s3922_s1 + $0x308] sm:$0xff]  }
  0x37   :  { %2705 = vmatpush3.bf16.msra.mxu0 %v3018_v8  ;;  %v3069_v8 = vld [vmem:[%s3922_s1 + $0x350] sm:$0xff]  }
  0x38   :  { %2706 = vmatprep.subr.bf16.mxu0 %v3021_v9  ;;  %v3068_v9 = vld [vmem:[%s3922_s1 + $0x388] sm:$0xff]  }
  0x39   :  { %2727 = vmatpush3.bf16.msra.mxu1 %v3020_v10  ;;  %v3071_v10 = vld [vmem:[%s3922_s1 + $0x3d0] sm:$0xff]  }
  0x3a   :  { %2728 = vmatprep.subr.bf16.mxu1 %v3023_v11  ;;  %v3070_v11 = vld [vmem:[%s3922_s1 + $0x310] sm:$0xff]  }
  0x3b   :  { %2707 = vmatpush3.bf16.msra.mxu0 %v3022_v12  ;;  %v3073_v12 = vld [vmem:[%s3922_s1 + $0x358] sm:$0xff]  }
  0x3c   :  { %2708 = vmatprep.subr.bf16.mxu0 %v3025_v13  ;;  %v3072_v13 = vld [vmem:[%s3922_s1 + $0x390] sm:$0xff]  }
  0x3d   :  { %2729 = vmatpush3.bf16.msra.mxu1 %v3024_v14  ;;  %v3075_v14 = vld [vmem:[%s3922_s1 + $0x3d8] sm:$0xff]  }
  0x3e   :  { %2730 = vmatprep.subr.bf16.mxu1 %v3027_v15  ;;  %v3074_v15 = vld [vmem:[%s3922_s1 + $0x318] sm:$0xff]  }
  0x3f   :  { %2709 = vmatpush3.bf16.msra.mxu0 %v3026_v16  ;;  %v3077_v16 = vld [vmem:[%s3922_s1 + $0x360] sm:$0xff]  }
  0x40   :  { %2738 = vmatprep.subr.bf16.mxu0 %v3029_v18  ;;  %v3079_v18 = vld [vmem:[%s3922_s1 + $0x3e0] sm:$0xff]  }
  0x41   :  { %2731 = vmatpush3.bf16.msra.mxu1 %v3028_v19  ;;  %v3078_v19 = vld [vmem:[%s3922_s1 + $0x320] sm:$0xff]  }
  0x42   :  { %1907 = vmatmul.mubr.bf16.vlgmr.msra.gmra.mrb[4].mxu0 %v459_v17  ;;  %2760 = vmatprep.subr.bf16.mxu1 %v3031_v20  ;;  %v3076_v17 = vld [vmem:[%s3922_s1 + $0x398] sm:$0xff]   ;;  %v3081_v20 = vld [vmem:[%s3922_s1 + $0x368] sm:$0xff]  }
  0x43   :  { %2739 = vmatpush3.bf16.msra.mxu0 %v3030_v21  ;;  %1986 = vmatprep.mubr.bf16.mxu0 %v515_v55  ;;  %v3080_v21 = vld [vmem:[%s3922_s1 + $0x3a0] sm:$0xff]   ;;  %v3114_v55 = vld [vmem:[%s3922_s1 + $0x468] sm:$0xff]  }
  0x44   :  { %1947 = vmatmul.mubr.bf16.vlgmr.msra.gmra.mrb[4].mxu1 %v475_v22  ;;  %2740 = vmatprep.subr.bf16.mxu0 %v3033_v23  ;;  %v3083_v22 = vld [vmem:[%s3922_s1 + $0x3e8] sm:$0xff]  }
  0x45   :  { %2761 = vmatpush3.bf16.msra.mxu1 %v3032_v24  ;;  %2026 = vmatprep.mubr.bf16.mxu1 %v525_v59  ;;  %v3082_v23 = vld [vmem:[%s3922_s1 + $0x328] sm:$0xff]   ;;  %v3085_v24 = vld [vmem:[%s3922_s1 + $0x370] sm:$0xff]  }
  0x46   :  { %2762 = vmatprep.subr.bf16.mxu1 %v3035_v25  ;;  %v3084_v25 = vld [vmem:[%s3922_s1 + $0x3a8] sm:$0xff]   ;;  %v3118_v59 = vld [vmem:[%s3922_s1 + $0x470] sm:$0xff]  }
  0x47   :  { %2741 = vmatpush3.bf16.msra.mxu0 %v3034_v26  ;;  %v3087_v26 = vld [vmem:[%s3922_s1 + $0x3f0] sm:$0xff]  }
  0x48   :  { %2742 = vmatprep.subr.bf16.mxu0 %v3037_v27  ;;  %v3086_v27 = vld [vmem:[%s3922_s1 + $0x330] sm:$0xff]  }
  0x49   :  { %2763 = vmatpush3.bf16.msra.mxu1 %v3036_v28  ;;  %v3089_v28 = vld [vmem:[%s3922_s1 + $0x378] sm:$0xff]  }
  0x4a   :  { %2764 = vmatprep.subr.bf16.mxu1 %v3039_v29  ;;  %v3088_v29 = vld [vmem:[%s3922_s1 + $0x3b0] sm:$0xff]  }
  0x4b   :  { %2743 = vmatpush3.bf16.msra.mxu0 %v3038_v30  ;;  %v3091_v30 = vld [vmem:[%s3922_s1 + $0x3f8] sm:$0xff]  }
  0x4c   :  { %2744 = vmatprep.subr.bf16.mxu0 %v3041_v31  ;;  %v3090_v31 = vld [vmem:[%s3922_s1 + $0x338] sm:$0xff]  }
  0x4d   :  { %2765 = vmatpush3.bf16.msra.mxu1 %v3040_v32  ;;  %v508_v32 = vrot.slane %v3523_v52, %v3334_v41  ;;  %v3109_v52 = vld [vmem:[%s3922_s1 + $0x498] sm:$0xff]  }
  0x4e   :  { %2766 = vmatprep.subr.bf16.mxu1 %v3043_v33  ;;  %v3094_v33 = vld [vmem:[%s3922_s1 + $0x440] sm:$0xff]  }
  0x4f   :  { %2745 = vmatpush3.bf16.msra.mxu0 %v3042_v34  ;;  %v3093_v34 = vld [vmem:[%s3922_s1 + $0x3b8] sm:$0xff]  }
  0x50   :  { %2746 = vmatprep.subr.bf16.mxu0 %v3045_v35  ;;  %v3096_v35 = vld [vmem:[%s3922_s1 + $0x4c0] sm:$0xff]  }
  0x51   :  { %2767 = vmatpush3.bf16.msra.mxu1 %v3044_v36  ;;  %v3095_v36 = vld [vmem:[%s3922_s1 + $0x400] sm:$0xff]  }
  0x52   :  { %2768 = vmatprep.subr.bf16.mxu1 %v3047_v37  ;;  %v524_v37 = vcombine.high %v508_v32, %v508_v32 }
  0x53   :  { %2747 = vmatpush3.bf16.msra.mxu0 %v3046_v38  ;;  %v3098_v38 = vld [vmem:[%s3922_s1 + $0x448] sm:$0xff]  }
  0x54   :  { %2748 = vmatprep.subr.bf16.mxu0 %v3049_v39  ;;  %v3097_v39 = vld [vmem:[%s3922_s1 + $0x480] sm:$0xff]  }
  0x55   :  { %2769 = vmatpush3.bf16.msra.mxu1 %v3048_v40  ;;  %v3100_v40 = vld [vmem:[%s3922_s1 + $0x4c8] sm:$0xff]  }
  0x56   :  { %2770 = vmatprep.subr.bf16.mxu1 %v3051_v42  ;;  %v3099_v42 = vld [vmem:[%s3922_s1 + $0x408] sm:$0xff]  }
  0x57   :  { %2749 = vmatpush3.bf16.msra.mxu0 %v3050_v43  ;;  %v3102_v43 = vld [vmem:[%s3922_s1 + $0x450] sm:$0xff]  }
  0x58   :  { %2750 = vmatprep.subr.bf16.mxu0 %v3053_v44  ;;  %v3101_v44 = vld [vmem:[%s3922_s1 + $0x488] sm:$0xff]  }
  0x59   :  { %2771 = vmatpush3.bf16.msra.mxu1 %v3052_v46  ;;  %v3103_v46 = vld [vmem:[%s3922_s1 + $0x410] sm:$0xff]  }
  0x5a   :  { %2772 = vmatprep.subr.bf16.mxu1 %v3055_v49  ;;  %v3108_v49 = vld [vmem:[%s3922_s1 + $0x4d8] sm:$0xff]  }
  0x5b   :  { %2751 = vmatpush3.bf16.msra.mxu0 %v3054_v50  ;;  %v3107_v50 = vld [vmem:[%s3922_s1 + $0x418] sm:$0xff]  }
  0x5c   :  { %2752 = vmatprep.subr.bf16.mxu0 %v3057_v53  ;;  %v3112_v53 = vld [vmem:[%s3922_s1 + $0x4e0] sm:$0xff]  }
  0x5d   :  { %2773 = vmatpush3.bf16.msra.mxu1 %v3056_v54  ;;  %v3111_v54 = vld [vmem:[%s3922_s1 + $0x420] sm:$0xff]  }
  0x5e   :  { %2774 = vmatprep.subr.bf16.mxu1 %v3059_v57  ;;  %v3116_v57 = vld [vmem:[%s3922_s1 + $0x4e8] sm:$0xff]  }
  0x5f   :  { %2753 = vmatpush3.bf16.msra.mxu0 %v3058_v58  ;;  %v3115_v58 = vld [vmem:[%s3922_s1 + $0x428] sm:$0xff]  }
  0x60   :  { %2782 = vmatprep.subr.bf16.mxu0 %v3061_v61  ;;  %v3117_v61 = vld [vmem:[%s3922_s1 + $0x4a8] sm:$0xff]  }
  0x61   :  { %2775 = vmatpush3.bf16.msra.mxu1 %v3060_v62 }
  0x62   :  { %1987 = vmatmul.mubr.bf16.vlgmr.msra.gmra.mrb[8].mxu0 %v501_v60  ;;  %2804 = vmatprep.subr.bf16.mxu1 %v3063_v0  ;;  %v24_v60 = vld [vmem:[%s3921_s0 + $0x10] sm:$0xff] }
  0x63   :  { %2783 = vmatpush3.bf16.msra.mxu0 %v3062_v1  ;;  %2066 = vmatprep.mubr.bf16.mxu0 %v522_v63  ;;  %v534_v62 = vrot.slane %v24_v60, %v3334_v41  ;;  %v527_v63 = vcombine.high %v24_v60, %v24_v60  ;;  %v3120_v0 = vld [vmem:[%s3922_s1 + $0x4f0] sm:$0xff]  }
  0x64   :  { %2027 = vmatmul.mubr.bf16.vlgmr.msra.gmra.mrb[8].mxu1 %v523_v2  ;;  %2784 = vmatprep.subr.bf16.mxu0 %v3065_v3  ;;  %v3119_v1 = vld [vmem:[%s3922_s1 + $0x430] sm:$0xff]  }
  0x65   :  { %2805 = vmatpush3.bf16.msra.mxu1 %v3064_v4  ;;  %2106 = vmatprep.mubr.bf16.mxu1 %v526_v5  ;;  %v542_v2 = vcombine.high %v534_v62, %v534_v62  ;;  %v3729_v3 = vrot.slane %v527_v63, %v3334_v41  ;;  %v3122_v4 = vld [vmem:[%s3922_s1 + $0x478] sm:$0xff]   ;;  %v3121_v5 = vld [vmem:[%s3922_s1 + $0x4b0] sm:$0xff]  }
  0x66   :  { %2806 = vmatprep.subr.bf16.mxu1 %v3067_v6 }
  0x67   :  { %2785 = vmatpush3.bf16.msra.mxu0 %v3066_v7  ;;  %v564_v6 = vrot.slane %v542_v2, %v3334_v41  ;;  %v543_v7 = vcombine.high %v3729_v3, %v3729_v3 }
  0x68   :  { %2786 = vmatprep.subr.bf16.mxu0 %v3069_v8  ;;  %v3124_v8 = vld [vmem:[%s3922_s1 + $0x4f8] sm:$0xff]  }
  0x69   :  { %2807 = vmatpush3.bf16.msra.mxu1 %v3068_v9  ;;  %v3123_v9 = vld [vmem:[%s3922_s1 + $0x438] sm:$0xff]  }
  0x6a   :  { %2808 = vmatprep.subr.bf16.mxu1 %v3071_v10  ;;  %v574_v10 = vcombine.high %v564_v6, %v564_v6 }
  0x6b   :  { %2787 = vmatpush3.bf16.msra.mxu0 %v3070_v11  ;;  %v550_v11 = vrot.slane %v534_v62, %v3334_v41 }
  0x6c   :  { %2788 = vmatprep.subr.bf16.mxu0 %v3073_v12  ;;  %v3126_v12 = vld [vmem:[%s3922_s1 + $0x540] sm:$0xff]  }
  0x6d   :  { %2809 = vmatpush3.bf16.msra.mxu1 %v3072_v13  ;;  %v3125_v13 = vld [vmem:[%s3922_s1 + $0x4b8] sm:$0xff]  }
  0x6e   :  { %2810 = vmatprep.subr.bf16.mxu1 %v3075_v14  ;;  %v571_v14 = vrot.slane %v543_v7, %v3334_v41 }
  0x6f   :  { %2789 = vmatpush3.bf16.msra.mxu0 %v3074_v15  ;;  %v3128_v15 = vld [vmem:[%s3922_s1 + $0x5c0] sm:$0xff]  }
  0x70   :  { %2790 = vmatprep.subr.bf16.mxu0 %v3077_v16  ;;  %v3127_v16 = vld [vmem:[%s3922_s1 + $0x500] sm:$0xff]  }
  0x71   :  { %2811 = vmatpush3.bf16.msra.mxu1 %v3076_v17  ;;  %v572_v17 = vcombine.high %v550_v11, %v550_v11 }
  0x72   :  { %2812 = vmatprep.subr.bf16.mxu1 %v3079_v18  ;;  %v3130_v18 = vld [vmem:[%s3922_s1 + $0x548] sm:$0xff]  }
  0x73   :  { %2791 = vmatpush3.bf16.msra.mxu0 %v3078_v19  ;;  %v3129_v19 = vld [vmem:[%s3922_s1 + $0x580] sm:$0xff]  }
  0x74   :  { %2792 = vmatprep.subr.bf16.mxu0 %v3081_v20  ;;  %v575_v20 = vcombine.high %v571_v14, %v571_v14 }
  0x75   :  { %2813 = vmatpush3.bf16.msra.mxu1 %v3080_v21  ;;  %v3132_v21 = vld [vmem:[%s3922_s1 + $0x5c8] sm:$0xff]  }
  0x76   :  { %2814 = vmatprep.subr.bf16.mxu1 %v3083_v22  ;;  %v3131_v22 = vld [vmem:[%s3922_s1 + $0x508] sm:$0xff]  }
  0x77   :  { %2793 = vmatpush3.bf16.msra.mxu0 %v3082_v23  ;;  %v3134_v23 = vld [vmem:[%s3922_s1 + $0x550] sm:$0xff]  }
  0x78   :  { %2794 = vmatprep.subr.bf16.mxu0 %v3085_v24  ;;  %v3133_v24 = vld [vmem:[%s3922_s1 + $0x588] sm:$0xff]  }
  0x79   :  { %2815 = vmatpush3.bf16.msra.mxu1 %v3084_v25  ;;  %v3136_v25 = vld [vmem:[%s3922_s1 + $0x5d0] sm:$0xff]  }
  0x7a   :  { %2816 = vmatprep.subr.bf16.mxu1 %v3087_v26  ;;  %v3135_v26 = vld [vmem:[%s3922_s1 + $0x510] sm:$0xff]  }
  0x7b   :  { %2795 = vmatpush3.bf16.msra.mxu0 %v3086_v27  ;;  %v3138_v27 = vld [vmem:[%s3922_s1 + $0x558] sm:$0xff]  }
  0x7c   :  { %2796 = vmatprep.subr.bf16.mxu0 %v3089_v28  ;;  %v3137_v28 = vld [vmem:[%s3922_s1 + $0x590] sm:$0xff]  }
  0x7d   :  { %2817 = vmatpush3.bf16.msra.mxu1 %v3088_v29  ;;  %v3140_v29 = vld [vmem:[%s3922_s1 + $0x5d8] sm:$0xff]  }
  0x7e   :  { %2818 = vmatprep.subr.bf16.mxu1 %v3091_v30  ;;  %v3139_v30 = vld [vmem:[%s3922_s1 + $0x518] sm:$0xff]  }
  0x7f   :  { %2797 = vmatpush3.bf16.msra.mxu0 %v3090_v31  ;;  %v3142_v31 = vld [vmem:[%s3922_s1 + $0x560] sm:$0xff]  }
  0x80   :  { %2826 = vmatprep.subr.bf16.mxu0 %v3094_v33  ;;  %v3144_v33 = vld [vmem:[%s3922_s1 + $0x5e0] sm:$0xff]  }
  0x81   :  { %2819 = vmatpush3.bf16.msra.mxu1 %v3093_v34  ;;  %v3143_v34 = vld [vmem:[%s3922_s1 + $0x520] sm:$0xff]  }
  0x82   :  { %2067 = vmatmul.mubr.bf16.vlgmr.msra.gmra.mrb[12].mxu0 %v508_v32  ;;  %2848 = vmatprep.subr.bf16.mxu1 %v3096_v35  ;;  %v3141_v32 = vld [vmem:[%s3922_s1 + $0x598] sm:$0xff]   ;;  %v3146_v35 = vld [vmem:[%s3922_s1 + $0x568] sm:$0xff]  }
  0x83   :  { %2827 = vmatpush3.bf16.msra.mxu0 %v3095_v36  ;;  %2146 = vmatprep.mubr.bf16.mxu0 %v564_v6  ;;  %v3145_v36 = vld [vmem:[%s3922_s1 + $0x5a0] sm:$0xff]  }
  0x84   :  { %2107 = vmatmul.mubr.bf16.vlgmr.msra.gmra.mrb[12].mxu1 %v524_v37  ;;  %2828 = vmatprep.subr.bf16.mxu0 %v3098_v38  ;;  %v3148_v37 = vld [vmem:[%s3922_s1 + $0x5e8] sm:$0xff]  }
  0x85   :  { %2849 = vmatpush3.bf16.msra.mxu1 %v3097_v39  ;;  %2186 = vmatprep.mubr.bf16.mxu1 %v574_v10  ;;  %v3147_v38 = vld [vmem:[%s3922_s1 + $0x528] sm:$0xff]   ;;  %v3150_v39 = vld [vmem:[%s3922_s1 + $0x570] sm:$0xff]  }
  0x86   :  { %2850 = vmatprep.subr.bf16.mxu1 %v3100_v40  ;;  %v3149_v40 = vld [vmem:[%s3922_s1 + $0x5a8] sm:$0xff]  }
  0x87   :  { %2829 = vmatpush3.bf16.msra.mxu0 %v3099_v42  ;;  %v3152_v42 = vld [vmem:[%s3922_s1 + $0x5f0] sm:$0xff]  }
  0x88   :  { %2830 = vmatprep.subr.bf16.mxu0 %v3102_v43  ;;  %v3151_v43 = vld [vmem:[%s3922_s1 + $0x530] sm:$0xff]  }
  0x89   :  { %2851 = vmatpush3.bf16.msra.mxu1 %v3101_v44  ;;  %v3154_v44 = vld [vmem:[%s3922_s1 + $0x578] sm:$0xff]  }
  0x8a   :  { %2852 = vmatprep.subr.bf16.mxu1 %v3104_v45  ;;  %v3153_v45 = vld [vmem:[%s3922_s1 + $0x5b0] sm:$0xff]  }
  0x8b   :  { %2831 = vmatpush3.bf16.msra.mxu0 %v3103_v46  ;;  %v3155_v46 = vld [vmem:[%s3922_s1 + $0x538] sm:$0xff]  }
  0x8c   :  { %2832 = vmatprep.subr.bf16.mxu0 %v3106_v47  ;;  %v3156_v47 = vld [vmem:[%s3922_s1 + $0x5f8] sm:$0xff]  }
  0x8d   :  { %2853 = vmatpush3.bf16.msra.mxu1 %v3105_v48  ;;  %v3158_v48 = vld [vmem:[%s3922_s1 + $0x5b8] sm:$0xff]  }
  0x8e   :  { %2854 = vmatprep.subr.bf16.mxu1 %v3108_v49  ;;  %v557_v49 = vrot.slane %v3729_v3, %v3334_v41 }
  0x8f   :  { %2833 = vmatpush3.bf16.msra.mxu0 %v3107_v50  ;;  %v3159_v50 = vld [vmem:[%s3922_s1 + $0x600] sm:$0xff]  }
  0x90   :  { %2834 = vmatprep.subr.bf16.mxu0 %v3110_v51  ;;  %v3196_v51 = vmov 0.0  }
  0x91   :  { %2855 = vmatpush3.bf16.msra.mxu1 %v3109_v52  ;;  %v573_v52 = vcombine.high %v557_v49, %v557_v49 }
  0x92   :  { %2856 = vmatprep.subr.bf16.mxu1 %v3112_v53 }
  0x93   :  { %2835 = vmatpush3.bf16.msra.mxu0 %v3111_v54 }
  0x94   :  { %2836 = vmatprep.subr.bf16.mxu0 %v3114_v55 }
  0x95   :  { %2857 = vmatpush3.bf16.msra.mxu1 %v3113_v56 }
  0x96   :  { %2858 = vmatprep.subr.bf16.mxu1 %v3116_v57 }
  0x97   :  { %2837 = vmatpush3.bf16.msra.mxu0 %v3115_v58 }
  0x98   :  { %2838 = vmatprep.subr.bf16.mxu0 %v3118_v59 }
  0x99   :  { %2859 = vmatpush3.bf16.msra.mxu1 %v3117_v61 }
  0x9a   :  { %2860 = vmatprep.subr.bf16.mxu1 %v3120_v0 }
  0x9b   :  { %2839 = vmatpush3.bf16.msra.mxu0 %v3119_v1 }
  0x9c   :  { %2840 = vmatprep.subr.bf16.mxu0 %v3122_v4 }
  0x9d   :  { %2861 = vmatpush3.bf16.msra.mxu1 %v3121_v5 }
  0x9e   :  { %2862 = vmatprep.subr.bf16.mxu1 %v3124_v8 }
  0x9f   :  { %2841 = vmatpush3.bf16.msra.mxu0 %v3123_v9 }
  0xa0   :  { %2870 = vmatprep.subr.bf16.mxu0 %v3126_v12 }
  0xa1   :  { %2863 = vmatpush3.bf16.msra.mxu1 %v3125_v13 }
  0xa2   :  { %2147 = vmatmul.mubr.bf16.vlgmr.msra.gmra.mrb[16].mxu0 %v550_v11  ;;  %2892 = vmatprep.subr.bf16.mxu1 %v3128_v15 }
  0xa3   :  { %2871 = vmatpush3.bf16.msra.mxu0 %v3127_v16  ;;  %2226 = vmatprep.mubr.bf16.mxu0 %v571_v14 }
  0xa4   :  { %2187 = vmatmul.mubr.bf16.vlgmr.msra.gmra.mrb[16].mxu1 %v572_v17  ;;  %2872 = vmatprep.subr.bf16.mxu0 %v3130_v18 }
  0xa5   :  { %2893 = vmatpush3.bf16.msra.mxu1 %v3129_v19  ;;  %2266 = vmatprep.mubr.bf16.mxu1 %v575_v20 }
  0xa6   :  { %2894 = vmatprep.subr.bf16.mxu1 %v3132_v21 }
  0xa7   :  { %2873 = vmatpush3.bf16.msra.mxu0 %v3131_v22 }
  0xa8   :  { %2874 = vmatprep.subr.bf16.mxu0 %v3134_v23 }
  0xa9   :  { %2895 = vmatpush3.bf16.msra.mxu1 %v3133_v24 }
  0xaa   :  { %2896 = vmatprep.subr.bf16.mxu1 %v3136_v25 }
  0xab   :  { %2875 = vmatpush3.bf16.msra.mxu0 %v3135_v26 }
  0xac   :  { %2876 = vmatprep.subr.bf16.mxu0 %v3138_v27 }
  0xad   :  { %2897 = vmatpush3.bf16.msra.mxu1 %v3137_v28 }
  0xae   :  { %2898 = vmatprep.subr.bf16.mxu1 %v3140_v29 }
  0xaf   :  { %2877 = vmatpush3.bf16.msra.mxu0 %v3139_v30 }
  0xb0   :  { %2878 = vmatprep.subr.bf16.mxu0 %v3142_v31 }
  0xb1   :  { %2899 = vmatpush3.bf16.msra.mxu1 %v3141_v32 }
  0xb2   :  { %2900 = vmatprep.subr.bf16.mxu1 %v3144_v33 }
  0xb3   :  { %2879 = vmatpush3.bf16.msra.mxu0 %v3143_v34 }
  0xb4   :  { %2880 = vmatprep.subr.bf16.mxu0 %v3146_v35 }
  0xb5   :  { %2901 = vmatpush3.bf16.msra.mxu1 %v3145_v36 }
  0xb6   :  { %2902 = vmatprep.subr.bf16.mxu1 %v3148_v37 }
  0xb7   :  { %2881 = vmatpush3.bf16.msra.mxu0 %v3147_v38 }
  0xb8   :  { %2882 = vmatprep.subr.bf16.mxu0 %v3150_v39 }
  0xb9   :  { %2903 = vmatpush3.bf16.msra.mxu1 %v3149_v40 }
  0xba   :  { %2904 = vmatprep.subr.bf16.mxu1 %v3152_v42 }
  0xbb   :  { %2883 = vmatpush3.bf16.msra.mxu0 %v3151_v43 }
  0xbc   :  { %2884 = vmatprep.subr.bf16.mxu0 %v3154_v44 }
  0xbd   :  { %2905 = vmatpush3.bf16.msra.mxu1 %v3153_v45 }
  0xbe   :  { %2906 = vmatprep.subr.bf16.mxu1 %v3156_v47 }
  0xbf   :  { %2885 = vmatpush3.bf16.msra.mxu0 %v3155_v46 }
  0xc0   :  { %2928 = vmatprep.subr.bf16.mxu0 %v3196_v51 }
  0xc1   :  { %10 = vsyncpa [#allocation3], 0  ;;  %2907 = vmatpush3.bf16.msra.mxu1 %v3158_v48  ;;  %v3160_v53 = vld [vmem:[%s3922_s1 + $0x608] sm:$0xff]   ;;  %vm3197_vm0 = vmmov 0   ;;  %v3161_v54 = vld [vmem:[%s3922_s1 + $0x610] sm:$0xff]   ;;  %vm1790_vm1 = vcmask 523264  }
  0xc2   :  { %2227 = vmatmul.mubr.bf16.vlgmr.msra.gmra.mrb[20].mxu0 %v557_v49  ;;  %2940 = vmatprep.subr.bf16.mxu1 %v3196_v51  ;;  %v3162_v55 = vld [vmem:[%s3922_s1 + $0x618] sm:$0xff]   ;;  %v2442_v59 = vld [vmem:[%s3923_s2] ss:$0 sm:$0xff]  ;;  %v3164_v7 = vld [vmem:[%s3924_s3 + $0x8] sm:$0xff]   ;;  %s3198_s9 = smov [#allocation2]  }
  0xc3   :  { %2929 = vmatpush3.bf16.msra.mxu0 %v3159_v50  ;;  %2936 = vmatprep.mubr.msk.bf16.mxu0 %vm3197_vm0, %v3196_v51  ;;  %v2443_v56 = vld.sshfl [vmem:[%s3921_s0 + $0x18] sm:$0x1 pattern:$0x75316420]  ;;  %v3165_v8 = vld [vmem:[%s3924_s3 + $0x10] sm:$0xff]   ;;  %v3167_v20 = vld [vmem:[%s3924_s3 + $0x20] sm:$0xff]  }
  0xc4   :  { %2267 = vmatmul.mubr.bf16.vlgmr.msra.gmra.mrb[20].mxu1 %v573_v52  ;;  %2930 = vmatprep.subr.bf16.mxu0 %v3196_v51  ;;  %v589_v57 = vrot.slane %v2443_v56, %v3334_v41  ;;  %v3163_v41 = vld [vmem:[%s3924_s3] sm:$0xff]   ;;  %v3166_v14 = vld [vmem:[%s3924_s3 + $0x18] sm:$0xff]   ;;  %v3168_v23 = vld [vmem:[%s3924_s3 + $0x28] sm:$0xff]   ;;  %s2434_s10 = sshll.u32 %s3198_s9, 4  ;;  %s2435_s10 = int_to_ptr.vmem [resolvable:$true] %s2434_s10 }
  0xc5   :  { %2956 = vmatprep.mubr.msk.bf16.mxu1 %vm3197_vm0, %v3196_v51  ;;  %2941 = vmatpush3.bf16.msra.mxu1 %v3163_v41  ;;  %v3169_v24 = vld [vmem:[%s3924_s3 + $0x30] sm:$0xff]   ;;  %v3170_v25 = vld [vmem:[%s3924_s3 + $0x38] sm:$0xff]   ;;  %s3171_s11 = scalar_lea.vmem %s2435_s10, 32  ;;  %p3176_p1 = scmp.lt.s32.totalorder %s2435_s10, %s2435_s10 }
  0xc6   :  { %2942 = vmatprep.subr.bf16.mxu1 %v3196_v51  ;;  %p3172_p0 = scmp.ne.s32.totalorder %s2435_s10, %s3171_s11  ;;  %p3177_p2 = scmp.lt.s32.totalorder %s3171_s11, %s3171_s11 }
  0xc7   :  { %2931 = vmatpush3.bf16.msra.mxu0 %v3160_v53 }
  0xc8   :  { %2932 = vmatprep.subr.bf16.mxu0 %v3196_v51  ;;  %p3178_p3 = por %p3177_p2, %p3176_p1 }
  0xc9   :  { %2943 = vmatpush3.bf16.msra.mxu1 %v3164_v7 }
  0xca   :  { %2944 = vmatprep.subr.bf16.mxu1 %v3196_v51  ;;  %p3179_p4 = pnand %p3178_p3, %p3172_p0 }
  0xcb   :  { %2933 = vmatpush3.bf16.msra.mxu0 %v3161_v54 }
  0xcc   :  { %2934 = vmatprep.subr.bf16.mxu0 %v3196_v51 }
  0xcd   :  { %2945 = vmatpush3.bf16.msra.mxu1 %v3165_v8 }
  0xce   :  { %2946 = vmatprep.subr.bf16.mxu1 %v3196_v51 }
  0xcf   :  { %2935 = vmatpush3.bf16.msra.mxu0 %v3162_v55 }
  0xd1   :  { %2947 = vmatpush3.bf16.msra.mxu1 %v3166_v14 }
  0xd2   :  { %2937 = vmatmul.mubr.msk.bf16.vlgmr.msra.gmra.mrb[24].mxu0 %vm1790_vm1, %v589_v57  ;;  %2948 = vmatprep.subr.bf16.mxu1 %v3196_v51 }
  0xd5   :  { %2949 = vmatpush3.bf16.msra.mxu1 %v3167_v20 }
  0xd6   :  { %2950 = vmatprep.subr.bf16.mxu1 %v3196_v51 }
  0xd9   :  { %2951 = vmatpush3.bf16.msra.mxu1 %v3168_v23 }
  0xda   :  { %2952 = vmatprep.subr.bf16.mxu1 %v3196_v51 }
  0xdd   :  { %2953 = vmatpush3.bf16.msra.mxu1 %v3169_v24 }
  0xde   :  { %2954 = vmatprep.subr.bf16.mxu1 %v3196_v51 }
  0xe1   :  { %2955 = vmatpush3.bf16.msra.mxu1 %v3170_v25 }
  0xf5   :  { %v2666_v58 = vpop.f32.mrb[0].mxu0 }
  0xf6   :  { %v2667_v60 = vpop.f32.mrb[1].mxu0 }
  0xf7   :  { %v2668_v61 = vadd.f32 %v2667_v60, %v2666_v58  ;;  %v2669_v62 = vpop.f32.mrb[2].mxu0  ;;  %v2688_v63 = vpop.f32.mrb[0].mxu1 }
  0xf8   :  { %v2670_v0 = vpop.f32.mrb[3].mxu0  ;;  %v2689_v1 = vpop.f32.mrb[1].mxu1 }
  0xf9   :  { %v1829_v2 = vadd.f32 %v2668_v61, %v2442_v59  ;;  %v2690_v3 = vadd.f32 %v2689_v1, %v2688_v63  ;;  %v2691_v4 = vpop.f32.mrb[2].mxu1 }
  0xfa   :  { %v2692_v5 = vpop.f32.mrb[3].mxu1 }
  0xfb   :  { %v1869_v6 = vadd.f32 %v2690_v3, %v1829_v2 }
 0x115   :  { %v2710_v9 = vpop.f32.mrb[4].mxu0 }
 0x116   :  { %v2711_v10 = vpop.f32.mrb[5].mxu0 }
 0x117   :  { %v2712_v11 = vadd.f32 %v2711_v10, %v2710_v9  ;;  %v2713_v12 = vpop.f32.mrb[6].mxu0  ;;  %v2732_v13 = vpop.f32.mrb[4].mxu1 }
 0x118   :  { %v2714_v15 = vpop.f32.mrb[7].mxu0  ;;  %v2733_v16 = vpop.f32.mrb[5].mxu1 }
 0x119   :  { %v1909_v17 = vadd.f32 %v2712_v11, %v1869_v6  ;;  %v2734_v18 = vadd.f32 %v2733_v16, %v2732_v13  ;;  %v2735_v19 = vpop.f32.mrb[6].mxu1 }
 0x11a   :  { %v2736_v21 = vpop.f32.mrb[7].mxu1 }
 0x11b   :  { %v1949_v22 = vadd.f32 %v2734_v18, %v1909_v17  ;;  %v2641_v17 = vld [vmem:[%s3925_s4] ss:$0 sm:$0xff] }
 0x135   :  { %v2754_v26 = vpop.f32.mrb[8].mxu0 }
 0x136   :  { %v2755_v27 = vpop.f32.mrb[9].mxu0 }
 0x137   :  { %v2756_v28 = vadd.f32 %v2755_v27, %v2754_v26  ;;  %v2757_v29 = vpop.f32.mrb[10].mxu0  ;;  %v2776_v30 = vpop.f32.mrb[8].mxu1 }
 0x138   :  { %v2758_v31 = vpop.f32.mrb[11].mxu0  ;;  %v2777_v32 = vpop.f32.mrb[9].mxu1 }
 0x139   :  { %v1989_v33 = vadd.f32 %v2756_v28, %v1949_v22  ;;  %v2778_v34 = vadd.f32 %v2777_v32, %v2776_v30  ;;  %v2779_v35 = vpop.f32.mrb[10].mxu1 }
 0x13a   :  { %v2780_v36 = vpop.f32.mrb[11].mxu1 }
 0x13b   :  { %v2029_v37 = vadd.f32 %v2778_v34, %v1989_v33 }
 0x155   :  { %v2798_v38 = vpop.f32.mrb[12].mxu0 }
 0x156   :  { %v2799_v39 = vpop.f32.mrb[13].mxu0 }
 0x157   :  { %v2800_v40 = vadd.f32 %v2799_v39, %v2798_v38  ;;  %v2801_v42 = vpop.f32.mrb[14].mxu0  ;;  %v2820_v43 = vpop.f32.mrb[12].mxu1 }
 0x158   :  { %v2802_v44 = vpop.f32.mrb[15].mxu0  ;;  %v2821_v45 = vpop.f32.mrb[13].mxu1 }
 0x159   :  { %v2069_v46 = vadd.f32 %v2800_v40, %v2029_v37  ;;  %v2822_v47 = vadd.f32 %v2821_v45, %v2820_v43  ;;  %v2823_v48 = vpop.f32.mrb[14].mxu1 }
 0x15a   :  { %v2824_v49 = vpop.f32.mrb[15].mxu1 }
 0x15b   :  { %v2109_v50 = vadd.f32 %v2822_v47, %v2069_v46 }
 0x175   :  { %v2842_v51 = vpop.f32.mrb[16].mxu0 }
 0x176   :  { %v2843_v52 = vpop.f32.mrb[17].mxu0 }
 0x177   :  { %v2844_v53 = vadd.f32 %v2843_v52, %v2842_v51  ;;  %v2845_v54 = vpop.f32.mrb[18].mxu0  ;;  %v2864_v55 = vpop.f32.mrb[16].mxu1 }
 0x178   :  { %v2846_v56 = vpop.f32.mrb[19].mxu0  ;;  %v2865_v57 = vpop.f32.mrb[17].mxu1 }
 0x179   :  { %v2149_v58 = vadd.f32 %v2844_v53, %v2109_v50  ;;  %v2866_v59 = vadd.f32 %v2865_v57, %v2864_v55  ;;  %v2867_v60 = vpop.f32.mrb[18].mxu1 }
 0x17a   :  { %v2868_v61 = vpop.f32.mrb[19].mxu1 }
 0x17b   :  { %v2189_v62 = vadd.f32 %v2866_v59, %v2149_v58 }
 0x195   :  { %v2886_v63 = vpop.f32.mrb[20].mxu0 }
 0x196   :  { %v2887_v0 = vpop.f32.mrb[21].mxu0 }
 0x197   :  { %v2888_v1 = vadd.f32 %v2887_v0, %v2886_v63  ;;  %v2889_v2 = vpop.f32.mrb[22].mxu0  ;;  %v2908_v3 = vpop.f32.mrb[20].mxu1 }
 0x198   :  { %v2890_v4 = vpop.f32.mrb[23].mxu0  ;;  %v2909_v5 = vpop.f32.mrb[21].mxu1 }
 0x199   :  { %v2229_v6 = vadd.f32 %v2888_v1, %v2189_v62  ;;  %v2910_v41 = vadd.f32 %v2909_v5, %v2908_v3  ;;  %v2911_v7 = vpop.f32.mrb[22].mxu1 }
 0x19a   :  { %v2912_v8 = vpop.f32.mrb[23].mxu1 }
 0x19b   :  { %v2269_v9 = vadd.f32 %v2910_v41, %v2229_v6 }
 0x1a5   :  { %v2308_v10 = vpop.f32.mrb[24].mxu0 }
 0x1a6   :  { %v2309_v11 = vadd.f32 %v2308_v10, %v2269_v9  ;;  %v2938_v12 = vpop.f32.mrb[25].mxu0 }
 0x1a7   :  { %v2311_v13 = vpop.f32.mrb[26].mxu0 }
 0x1a8   :  { %v2314_v14 = vmax.f32 %v2309_v11, 0.0  ;;  %v2939_v15 = vpop.f32.mrb[27].mxu0 }
 0x1aa   :  { %v2315_v16 = vpack.c.bf16 %v2314_v14, %v2314_v14 }
 0x1ac   :  { %2957 = vmatmul.mubr.bf16.vlgmr.msra.gmra.mrb[24].mxu1 %v2315_v16 }
 0x27f   :  { %v2421_v18 = vpop.f32.mrb[24].mxu1 }
 0x280   :  { %v2422_v19 = vadd.f32 %v2641_v17, %v2421_v18  ;;  %v2958_v20 = vpop.f32.mrb[25].mxu1 }
 0x281   :  { %v2424_v21 = vpop.f32.mrb[26].mxu1 }
 0x282   :  { %2427 = vst [vmem:[#allocation2] sm:$0x3] %v2422_v19  ;;  %v2959_v22 = vpop.f32.mrb[27].mxu1 }
 0x283   :  { %3182 = shalt.err (!%p3179_p4)
}
 0x284   :  { %s3183_s4 = scalar_lea.hbm %s3926_s5, 32 }
 0x285   :  { %p3184_p5 = scmp.ne.s32.totalorder %s3926_s5, %s3183_s4  ;;  %p3187_p6 = scmp.lt.u32.totalorder %s3183_s4, %s3926_s5 }
 0x287   :  { %p3189_p7 = pnand %p3187_p6, %p3184_p5 }
 0x289   :  { %3192 = shalt.err (!%p3189_p7)
}
 0x28a   :  { %2437 = dma.vmem_to_hbm [thread:$0]  %s2435_s10, 32, %s3926_s5, [#allocation3]  }
 0x28b   :  { %3193 = dma.done.wait [#allocation3], 32  }
 0x28c   :  { %3194 = vsyncadd [#allocation3], 4294967264 }
 0x28d   :  { %2441 = vsyncpa [#allocation3], 1 }

// kernel: dnet_forward.4
= control target key start
LH: loop header
LB: loop body
LE: loop exit
PB: predicated region body
PF: predicated region fallthrough
CT: control target
= control target key end

     0   :  { %vm125_vm0 = vsmask.f32 7424  ;;  %vm254_vm1 = vcmask 261120   ;;  %vm635_vm2 = vcmask 1046528   ;;  %vm3039_vm3 = vcmask 523264   ;;  %s10075_s1 = inlined_call_operand.vmem [shape: bf16[288,64], index: 1, kind: input, shape index: {}]   ;;  %s10076_s0 = inlined_call_operand.vmem [shape: bf16[576,32], index: 0, kind: input, shape index: {}]   ;;  %s10077_s2 = inlined_call_operand.vmem [shape: f32[1,64], index: 2, kind: input, shape index: {}]   ;;  %s10078_s3 = inlined_call_operand.vmem [shape: bf16[14,7,64], index: 3, kind: output, shape index: {}]  }
   0x1   :  { %v8098_v0 = vld [vmem:[%s10075_s1 + $0x10] sm:$0xff]   ;;  %v8100_v2 = vld [vmem:[%s10075_s1 + $0x18] sm:$0xff]   ;;  %v15_v4 = vld [vmem:[%s10076_s0] sm:$0xf]  ;;  %vm3079_vm4 = vcmask 519168  }
   0x2   :  { %v8099_v1 = vld [vmem:[%s10075_s1 + $0x10] sm:$0xff]   ;;  %7074 = vmatprep.subr.bf16.mxu0 %v8098_v0  ;;  %v8101_v3 = vld [vmem:[%s10075_s1 + $0x18] sm:$0xff]   ;;  %v8324_v5 = vld [vmem:[%s10076_s0 + $0x4] sm:$0xf]  ;;  %vm3080_vm5 = vsmask.f32 3328 }
   0x3   :  { %7362 = vmatprep.subr.bf16.mxu1 %v8099_v1  ;;  %7075 = vmatpush3.bf16.msra.mxu0 %v8098_v0  ;;  %v8327_v6 = vcombine.low %v15_v4, %v8324_v5  ;;  %v8332_v7 = vld [vmem:[%s10076_s0 + $0x8] sm:$0xff]   ;;  %v3181_v8 = vld [vmem:[%s10076_s0 + $0x90] sm:$0xf]  ;;  %v8340_v9 = vld [vmem:[%s10076_s0 + $0x94] sm:$0xf] }
   0x4   :  { %7363 = vmatpush3.bf16.msra.mxu1 %v8099_v1  ;;  %7076 = vmatprep.subr.bf16.mxu0 %v8100_v2  ;;  %v134_v12 = vshll.u32 %v8332_v7, 16  ;;  %v138_v13 = vshrl.u32 %v8332_v7, 16  ;;  %v8349_v14 = vld [vmem:[%s10076_s0 + $0x98] sm:$0xff]   ;;  %v8354_v15 = vld [vmem:[%s10076_s0 + $0x10] sm:$0xff]   ;;  %v8357_v16 = vcombine.low %v3181_v8, %v8340_v9  ;;  %v8107_v24 = vld [vmem:[%s10075_s1] sm:$0xff]  }
   0x5   :  { %7364 = vmatprep.subr.bf16.mxu1 %v8101_v3  ;;  %v127_v10 = vshrl.u32 %v8327_v6, 16  ;;  %v129_v11 = vshll.u32 %v8327_v6, 16  ;;  %v3299_v19 = vshll.u32 %v8349_v14, 16  ;;  %v3303_v20 = vshrl.u32 %v8349_v14, 16  ;;  %v8370_v28 = vld [vmem:[%s10076_s0 + $0xa0] sm:$0xff]   ;;  %v8375_v31 = vld [vmem:[%s10076_s0 + $0x18] sm:$0xff]   ;;  %vm9865_vm6 = vmand %vm3079_vm4, %vm3080_vm5 }
   0x6   :  { %v136_v18 = vrot.slane %v134_v12, 1  ;;  %v3292_v21 = vshrl.u32 %v8357_v16, 16  ;;  %v3294_v22 = vshll.u32 %v8357_v16, 16  ;;  %v142_v23 = vshll.u32 %v8354_v15, 16  ;;  %v8383_v36 = vld [vmem:[%s10076_s0 + $0xa8] sm:$0xff]   ;;  %v8391_v41 = vld [vmem:[%s10076_s0 + $0x20] sm:$0xff]  }
   0x7   :  { %7077 = vmatpush3.bf16.msra.mxu0 %v8100_v2  ;;  %v131_v17 = vrot.slane %v129_v11, 1  ;;  %v3301_v27 = vrot.slane %v3299_v19, 1  ;;  %v146_v32 = vshrl.u32 %v8354_v15, 16  ;;  %v3307_v35 = vshll.u32 %v8370_v28, 16  ;;  %v8402_v49 = vld [vmem:[%s10076_s0 + $0xb0] sm:$0xff]   ;;  %v8113_v54 = vld [vmem:[%s10075_s1] sm:$0xff]  }
   0x8   :  { %7365 = vmatpush3.bf16.msra.mxu1 %v8101_v3  ;;  %v140_v26 = vor.u32 %v138_v13, %v136_v18  ;;  %v3296_v29 = vrot.slane %v3294_v22, 1  ;;  %v144_v30 = vrot.slane %v142_v23, 1  ;;  %7106 = vmatprep.subr.bf16.mxu0 %v8107_v24  ;;  %v150_v40 = vshll.u32 %v8375_v31, 16  ;;  %v8418_v61 = vld [vmem:[%s10076_s0 + $0x28] sm:$0xff]   ;;  %v8426_v1 = vld [vmem:[%s10076_s0 + $0xb8] sm:$0xff]   ;;  %v8432_v3 = vld [vmem:[%s10076_s0 + $0x30] sm:$0xff]  }
   0x9   :  { %v132_v25 = vor.u32 %v131_v17, %v127_v10  ;;  %v3305_v34 = vor.u32 %v3303_v20, %v3301_v27  ;;  %v3309_v42 = vrot.slane %v3307_v35, 1  ;;  %v3311_v43 = vshrl.u32 %v8370_v28, 16  ;;  %7394 = vmatprep.subr.bf16.mxu1 %v8113_v54  ;;  %v8441_v17 = vld [vmem:[%s10076_s0 + $0xc0] sm:$0xff]  }
   0xa   :  { %v3297_v37 = vor.u32 %v3296_v29, %v3292_v21  ;;  %v145_v38 = vsel %vm125_vm0, %v140_v26, %v144_v30  ;;  %v148_v39 = vor.u32 %v146_v32, %v144_v30  ;;  %v3315_v44 = vshll.u32 %v8383_v36, 16  ;;  %v8458_v30 = vld [vmem:[%s10076_s0 + $0xc8] sm:$0xff]  }
   0xb   :  { %v137_v33 = vsel %vm125_vm0, %v132_v25, %v136_v18  ;;  %v154_v45 = vshrl.u32 %v8375_v31, 16  ;;  %v152_v47 = vrot.slane %v150_v40, 1  ;;  %v158_v48 = vshll.u32 %v8391_v41, 16  ;;  %v8446_v18 = vld [vmem:[%s10076_s0 + $0x38] sm:$0xff]  }
   0xc   :  { %7078 = vmatprep.mubr.msk.bf16.mxu0 %vm254_vm1, %v137_v33  ;;  %v3302_v46 = vsel %vm125_vm0, %v3297_v37, %v3301_v27  ;;  %v3319_v50 = vshrl.u32 %v8383_v36, 16  ;;  %v3310_v51 = vsel %vm125_vm0, %v3305_v34, %v3309_v42  ;;  %v3313_v52 = vor.u32 %v3311_v43, %v3309_v42  ;;  %v8464_v33 = vld [vmem:[%s10076_s0 + $0x40] sm:$0xff]   ;;  %v8122_v43 = vld [vmem:[%s10075_s1 + $0x8] sm:$0xff]  }
   0xd   :  { %7079 = vmatmul.mubr.msk.bf16.vlgmr.msra.gmra.mrb[0].mxu0 %vm254_vm1, %v145_v38  ;;  %7366 = vmatprep.mubr.msk.bf16.mxu1 %vm254_vm1, %v3302_v46  ;;  %v3317_v53 = vrot.slane %v3315_v44, 1  ;;  %v153_v55 = vsel %vm125_vm0, %v148_v39, %v152_v47  ;;  %v156_v56 = vor.u32 %v154_v45, %v152_v47  ;;  %v160_v57 = vrot.slane %v158_v48, 1  ;;  %v8472_v38 = vld [vmem:[%s10076_s0 + $0xd0] sm:$0xff]  }
   0xe   :  { %7107 = vmatpush3.bf16.msra.mxu0 %v8107_v24  ;;  %7367 = vmatmul.mubr.msk.bf16.vlgmr.msra.gmra.mrb[0].mxu1 %vm254_vm1, %v3310_v51  ;;  %v3323_v58 = vshll.u32 %v8402_v49, 16  ;;  %v162_v62 = vshrl.u32 %v8391_v41, 16  ;;  %v3327_v2 = vshrl.u32 %v8402_v49, 16  ;;  %v166_v8 = vshll.u32 %v8418_v61, 16 }
   0xf   :  { %7082 = vmatprep.mubr.msk.bf16.mxu0 %vm254_vm1, %v153_v55  ;;  %v3318_v59 = vsel %vm125_vm0, %v3313_v52, %v3317_v53  ;;  %v3321_v60 = vor.u32 %v3319_v50, %v3317_v53  ;;  %v161_v63 = vsel %vm125_vm0, %v156_v56, %v160_v57  ;;  %7395 = vmatpush3.bf16.msra.mxu1 %v8113_v54  ;;  %v170_v10 = vshrl.u32 %v8418_v61, 16  ;;  %v8488_v53 = vld [vmem:[%s10076_s0 + $0x48] sm:$0xff]   ;;  %v8494_v55 = vld [vmem:[%s10076_s0 + $0xd8] sm:$0xff]  }
  0x10   :  { %7370 = vmatprep.mubr.msk.bf16.mxu1 %vm254_vm1, %v3318_v59  ;;  %v3325_v0 = vrot.slane %v3323_v58, 1  ;;  %v164_v4 = vor.u32 %v162_v62, %v160_v57  ;;  %v3331_v12 = vshll.u32 %v8426_v1, 16  ;;  %v174_v13 = vshll.u32 %v8432_v3, 16  ;;  %7108 = vmatprep.subr.bf16.mxu0 %v8122_v43 }
  0x11   :  { %v168_v20 = vrot.slane %v166_v8, 1  ;;  %v3335_v21 = vshrl.u32 %v8426_v1, 16  ;;  %v3339_v24 = vshll.u32 %v8441_v17, 16  ;;  %v178_v25 = vshrl.u32 %v8432_v3, 16 }
  0x12   :  { %v3329_v11 = vor.u32 %v3327_v2, %v3325_v0  ;;  %v3326_v19 = vsel %vm125_vm0, %v3321_v60, %v3325_v0  ;;  %v3333_v22 = vrot.slane %v3331_v12, 1  ;;  %v176_v23 = vrot.slane %v174_v13, 1  ;;  %7109 = vmatpush3.bf16.msra.mxu0 %v8122_v43  ;;  %v8506_v2 = vld [vmem:[%s10076_s0 + $0x50] sm:$0xff]  }
  0x13   :  { %v169_v26 = vsel %vm125_vm0, %v164_v4, %v168_v20  ;;  %v172_v27 = vor.u32 %v170_v10, %v168_v20  ;;  %v182_v29 = vshll.u32 %v8446_v18, 16  ;;  %v3343_v32 = vshrl.u32 %v8441_v17, 16 }
  0x14   :  { %v3334_v34 = vsel %vm125_vm0, %v3329_v11, %v3333_v22  ;;  %v3341_v35 = vrot.slane %v3339_v24, 1  ;;  %v180_v37 = vor.u32 %v178_v25, %v176_v23  ;;  %v3337_v39 = vor.u32 %v3335_v21, %v3333_v22  ;;  %v8513_v11 = vld [vmem:[%s10076_s0 + $0xe0] sm:$0xff]  }
  0x15   :  { %7083 = vmatmul.mubr.msk.bf16.gmra.mrb[4].mxu0 %vm254_vm1, %v161_v63  ;;  %v184_v40 = vrot.slane %v182_v29, 1  ;;  %v3347_v42 = vshll.u32 %v8458_v30, 16  ;;  %v177_v44 = vsel %vm125_vm0, %v172_v27, %v176_v23  ;;  %v186_v46 = vshrl.u32 %v8446_v18, 16  ;;  %v8524_v23 = vld [vmem:[%s10076_s0 + $0x58] sm:$0xff]  }
  0x16   :  { %7371 = vmatmul.mubr.msk.bf16.gmra.mrb[4].mxu1 %vm254_vm1, %v3326_v19  ;;  %7086 = vmatprep.mubr.msk.bf16.mxu0 %vm254_vm1, %v169_v26  ;;  %v3345_v45 = vor.u32 %v3343_v32, %v3341_v35  ;;  %v190_v47 = vshll.u32 %v8464_v33, 16  ;;  %v3351_v51 = vshrl.u32 %v8458_v30, 16  ;;  %v3355_v52 = vshll.u32 %v8472_v38, 16  ;;  %v8127_v19 = vld [vmem:[%s10075_s1 + $0x8] sm:$0xff]  }
  0x17   :  { %7374 = vmatprep.mubr.msk.bf16.mxu1 %vm254_vm1, %v3334_v34  ;;  %v185_v48 = vsel %vm125_vm0, %v180_v37, %v184_v40  ;;  %v3349_v50 = vrot.slane %v3347_v42, 1  ;;  %v194_v54 = vshrl.u32 %v8464_v33, 16  ;;  %v3342_v56 = vsel %vm125_vm0, %v3337_v39, %v3341_v35  ;;  %7396 = vmatprep.subr.bf16.mxu1 %v8127_v19  ;;  %v8531_v26 = vld [vmem:[%s10076_s0 + $0xe8] sm:$0xff]   ;;  %v8541_v39 = vld [vmem:[%s10076_s0 + $0x60] sm:$0xff]  }
  0x18   :  { %v192_v57 = vrot.slane %v190_v47, 1  ;;  %v3359_v58 = vshrl.u32 %v8472_v38, 16  ;;  %v188_v60 = vor.u32 %v186_v46, %v184_v40  ;;  %v198_v62 = vshll.u32 %v8488_v53, 16  ;;  %7397 = vmatpush3.bf16.msra.mxu1 %v8127_v19 }
  0x19   :  { %v3350_v59 = vsel %vm125_vm0, %v3345_v45, %v3349_v50  ;;  %v3363_v63 = vshll.u32 %v8494_v55, 16  ;;  %v3357_v4 = vrot.slane %v3355_v52, 1  ;;  %v202_v10 = vshrl.u32 %v8488_v53, 16 }
  0x1a   :  { %v196_v0 = vor.u32 %v194_v54, %v192_v57  ;;  %v200_v8 = vrot.slane %v198_v62, 1  ;;  %v3353_v12 = vor.u32 %v3351_v51, %v3349_v50  ;;  %v206_v13 = vshll.u32 %v8506_v2, 16  ;;  %v8564_v54 = vld [vmem:[%s10075_s1 + $0x20] sm:$0xff]  }
  0x1b   :  { %v193_v20 = vsel %vm125_vm0, %v188_v60, %v192_v57  ;;  %v3361_v21 = vor.u32 %v3359_v58, %v3357_v4  ;;  %v3365_v22 = vrot.slane %v3363_v63, 1  ;;  %v210_v25 = vshrl.u32 %v8506_v2, 16  ;;  %v8571_v60 = vld [vmem:[%s10076_s0 + $0xf8] sm:$0xff]   ;;  %7138 = vmatprep.subr.bf16.mxu0 %v8564_v54 }
  0x1c   :  { %v201_v24 = vsel %vm125_vm0, %v196_v0, %v200_v8  ;;  %v3371_v27 = vshll.u32 %v8513_v11, 16  ;;  %v214_v29 = vshll.u32 %v8524_v23, 16  ;;  %v3358_v32 = vsel %vm125_vm0, %v3353_v12, %v3357_v4 }
  0x1d   :  { %7087 = vmatmul.mubr.msk.bf16.gmra.mrb[8].mxu0 %vm254_vm1, %v177_v44  ;;  %v204_v34 = vor.u32 %v202_v10, %v200_v8  ;;  %v208_v35 = vrot.slane %v206_v13, 1  ;;  %v3367_v37 = vshrl.u32 %v8494_v55, 16  ;;  %v3366_v40 = vsel %vm125_vm0, %v3361_v21, %v3365_v22  ;;  %v8550_v44 = vld [vmem:[%s10076_s0 + $0x68] sm:$0xff]   ;;  %v8581_v8 = vld [vmem:[%s10076_s0 + $0x70] ss:$0 sps:$4 sm:$0x11]  }
  0x1e   :  { %7090 = vmatprep.mubr.msk.bf16.mxu0 %vm254_vm1, %v185_v48  ;;  %7375 = vmatmul.mubr.msk.bf16.gmra.mrb[8].mxu1 %vm254_vm1, %v3342_v56  ;;  %v3375_v42 = vshrl.u32 %v8513_v11, 16  ;;  %v3379_v43 = vshll.u32 %v8531_v26, 16  ;;  %v216_v46 = vrot.slane %v214_v29, 1  ;;  %v3373_v47 = vrot.slane %v3371_v27, 1  ;;  %v8556_v48 = vld [vmem:[%s10076_s0 + $0xf0] sm:$0xff]   ;;  %v8137_v10 = vld [vmem:[%s10075_s1 + $0x20] sm:$0xff]  }
  0x1f   :  { %7378 = vmatprep.mubr.msk.bf16.mxu1 %vm254_vm1, %v3350_v59  ;;  %v212_v45 = vor.u32 %v210_v25, %v208_v35  ;;  %v209_v50 = vsel %vm125_vm0, %v204_v34, %v208_v35  ;;  %v3369_v51 = vor.u32 %v3367_v37, %v3365_v22  ;;  %v222_v52 = vshll.u32 %v8541_v39, 16  ;;  %7426 = vmatprep.subr.bf16.mxu1 %v8137_v10  ;;  %v8602_v37 = vld [vmem:[%s10076_s0 + $0x100] ss:$0 sps:$4 sm:$0x11]  }
  0x20   :  { %v3377_v56 = vor.u32 %v3375_v42, %v3373_v47  ;;  %v3381_v57 = vrot.slane %v3379_v43, 1  ;;  %v218_v58 = vshrl.u32 %v8524_v23, 16  ;;  %v230_v59 = vshll.u32 %v8550_v44, 16 }
  0x21   :  { %v217_v62 = vsel %vm125_vm0, %v212_v45, %v216_v46  ;;  %v226_v63 = vshrl.u32 %v8541_v39, 16  ;;  %v3383_v0 = vshrl.u32 %v8531_v26, 16  ;;  %v3387_v4 = vshll.u32 %v8556_v48, 16 }
  0x22   :  { %v3374_v12 = vsel %vm125_vm0, %v3369_v51, %v3373_v47  ;;  %v224_v13 = vrot.slane %v222_v52, 1  ;;  %v3391_v19 = vshrl.u32 %v8556_v48, 16  ;;  %v220_v21 = vor.u32 %v218_v58, %v216_v46 }
  0x23   :  { %v232_v22 = vrot.slane %v230_v59, 1  ;;  %v3389_v27 = vrot.slane %v3387_v4, 1  ;;  %v234_v29 = vshrl.u32 %v8550_v44, 16  ;;  %v637_v34 = vrot.slane %v8332_v7, 1 }
  0x24   :  { %v228_v25 = vor.u32 %v226_v63, %v224_v13  ;;  %v3385_v35 = vor.u32 %v3383_v0, %v3381_v57  ;;  %v639_v42 = vrot.slane %v8354_v15, 1  ;;  %v225_v43 = vsel %vm125_vm0, %v220_v21, %v224_v13 }
  0x25   :  { %7091 = vmatmul.mubr.msk.bf16.gmra.mrb[12].mxu0 %vm254_vm1, %v193_v20  ;;  %v3382_v20 = vsel %vm125_vm0, %v3377_v56, %v3381_v57  ;;  %v3393_v45 = vor.u32 %v3391_v19, %v3389_v27  ;;  %v238_v47 = vshll.u32 %v8581_v8, 16  ;;  %v3399_v56 = vshrl.u32 %v8571_v60, 16  ;;  %v8138_v19 = vld [vmem:[%s10075_s1 + $0x28] sm:$0xff]  }
  0x26   :  { %7094 = vmatprep.mubr.msk.bf16.mxu0 %vm254_vm1, %v201_v24  ;;  %7379 = vmatmul.mubr.msk.bf16.gmra.mrb[12].mxu1 %vm254_vm1, %v3358_v32  ;;  %v3395_v24 = vshll.u32 %v8571_v60, 16  ;;  %v627_v32 = vld [vmem:[%s10076_s0] sm:$0xe]  ;;  %v8612_v52 = vsel %vm635_vm2, %v637_v34, %v639_v42  ;;  %v3403_v57 = vshll.u32 %v8602_v37, 16  ;;  %v3800_v21 = vrot.slane %v8349_v14, 1 }
  0x27   :  { %7382 = vmatprep.mubr.msk.bf16.mxu1 %vm254_vm1, %v3366_v40  ;;  %v6365_v40 = vcombine.low %v627_v32, %v8324_v5  ;;  %v3390_v5 = vsel %vm125_vm0, %v3385_v35, %v3389_v27  ;;  %v240_v63 = vrot.slane %v238_v47, 1  ;;  %v8144_v27 = vld [vmem:[%s10075_s1 + $0x38] sm:$0xff]   ;;  %v8726_v32 = vld [vmem:[%s10075_s1 + $0x40] sm:$0xff]  }
  0x28   :  { %v3397_v46 = vrot.slane %v3395_v24, 1  ;;  %v3405_v4 = vrot.slane %v3403_v57, 1  ;;  %v3802_v24 = vrot.slane %v8370_v28, 1  ;;  %v8735_v35 = vld [vmem:[%s10075_s1 + $0x40] sm:$0xff]  }
  0x29   :  { %v636_v51 = vrot.slane %v6365_v40, 1 }
  0x2a   :  { %v3398_v59 = vsel %vm125_vm0, %v3393_v45, %v3397_v46  ;;  %v3401_v0 = vor.u32 %v3399_v56, %v3397_v46  ;;  %v3810_v45 = vrot.slane %v8441_v17, 1  ;;  %v3812_v46 = vrot.slane %v8458_v30, 1 }
  0x2b   :  { %v638_v58 = vsel %vm635_vm2, %v636_v51, %v637_v34  ;;  %v3806_v34 = vrot.slane %v8402_v49, 1  ;;  %v651_v51 = vrot.slane %v8464_v33, 1 }
  0x2c   :  { %v3406_v13 = vsel %vm125_vm0, %v3401_v0, %v3405_v4  ;;  %v661_v0 = vrot.slane %v8550_v44, 1 }
  0x2d   :  { %7095 = vmatmul.mubr.msk.bf16.gmra.mrb[16].mxu0 %vm254_vm1, %v209_v50  ;;  %v233_v50 = vsel %vm125_vm0, %v228_v25, %v232_v22  ;;  %v3804_v25 = vrot.slane %v8383_v36, 1 }
  0x2e   :  { %7098 = vmatprep.mubr.msk.bf16.mxu0 %vm254_vm1, %v217_v62  ;;  %7383 = vmatmul.mubr.msk.bf16.gmra.mrb[16].mxu1 %vm254_vm1, %v3374_v12  ;;  %v236_v62 = vor.u32 %v234_v29, %v232_v22  ;;  %v645_v29 = vrot.slane %v8418_v61, 1 }
  0x2f   :  { %7386 = vmatprep.mubr.msk.bf16.mxu1 %vm254_vm1, %v3382_v20  ;;  %v8139_v20 = vld [vmem:[%s10075_s1 + $0x28] sm:$0xff]  }
  0x30   :  { %v241_v12 = vsel %vm125_vm0, %v236_v62, %v240_v63 }
  0x35   :  { %7099 = vmatmul.mubr.msk.bf16.gmra.mrb[20].mxu0 %vm254_vm1, %v225_v43  ;;  %v649_v43 = vrot.slane %v8446_v18, 1 }
  0x36   :  { %7102 = vmatprep.mubr.msk.bf16.mxu0 %vm254_vm1, %v233_v50  ;;  %7387 = vmatmul.mubr.msk.bf16.gmra.mrb[20].mxu1 %vm254_vm1, %v3390_v5 }
  0x37   :  { %7390 = vmatprep.mubr.msk.bf16.mxu1 %vm254_vm1, %v3398_v59  ;;  %v652_v5 = vsel %vm635_vm2, %v649_v43, %v651_v51  ;;  %v3820_v59 = vrot.slane %v8531_v26, 1 }
  0x3d   :  { %7103 = vmatmul.mubr.msk.bf16.gmra.mrb[24].mxu0 %vm254_vm1, %v241_v12 }
  0x3e   :  { %7110 = vmatprep.mubr.msk.bf16.mxu0 %vm254_vm1, %v8327_v6  ;;  %7391 = vmatmul.mubr.msk.bf16.gmra.mrb[24].mxu1 %vm254_vm1, %v3406_v13  ;;  %v8142_v6 = vld [vmem:[%s10075_s1 + $0x30] sm:$0xff]  }
  0x3f   :  { %7398 = vmatprep.mubr.msk.bf16.mxu1 %vm254_vm1, %v8357_v16  ;;  %v3791_v16 = vld [vmem:[%s10076_s0 + $0x90] sm:$0xe] }
  0x45   :  { %7111 = vmatmul.mubr.msk.bf16.vlgmr.msra.gmra.mrb[0].mxu0 %vm254_vm1, %v8332_v7  ;;  %v8143_v7 = vld [vmem:[%s10075_s1 + $0x30] sm:$0xff]  }
  0x46   :  { %7139 = vmatpush3.bf16.msra.mxu0 %v8564_v54  ;;  %7114 = vmatprep.mubr.msk.bf16.mxu0 %vm254_vm1, %v8354_v15  ;;  %v6598_v54 = vcombine.low %v3791_v16, %v8340_v9  ;;  %v641_v9 = vrot.slane %v8375_v31, 1  ;;  %v8145_v15 = vld [vmem:[%s10075_s1 + $0x38] sm:$0xff]   ;;  %v8150_v16 = vld [vmem:[%s10076_s0 + $0xa0] sm:$0xff]  }
  0x47   :  { %7140 = vmatprep.subr.bf16.mxu0 %v8138_v19  ;;  %7399 = vmatmul.mubr.msk.bf16.vlgmr.msra.gmra.mrb[0].mxu1 %vm254_vm1, %v8349_v14 }
  0x48   :  { %7402 = vmatprep.mubr.msk.bf16.mxu1 %vm254_vm1, %v8370_v28  ;;  %7427 = vmatpush3.bf16.msra.mxu1 %v8137_v10  ;;  %v3799_v10 = vrot.slane %v6598_v54, 1  ;;  %v642_v14 = vsel %vm635_vm2, %v639_v42, %v641_v9  ;;  %v3805_v28 = vsel %vm635_vm2, %v3802_v24, %v3804_v25  ;;  %v647_v42 = vrot.slane %v8432_v3, 1  ;;  %v8152_v54 = vld [vmem:[%s10076_s0 + $0xa8] sm:$0xff]  }
  0x49   :  { %7428 = vmatprep.subr.bf16.mxu1 %v8139_v20 }
  0x4a   :  { %7141 = vmatpush3.bf16.msra.mxu0 %v8138_v19  ;;  %v3801_v22 = vsel %vm635_vm2, %v3799_v10, %v3800_v21  ;;  %v648_v47 = vsel %vm635_vm2, %v645_v29, %v647_v42  ;;  %v650_v50 = vsel %vm635_vm2, %v647_v42, %v649_v43  ;;  %v8169_v10 = vld [vmem:[%s10075_s1 + $0x48] sm:$0xff]   ;;  %v8914_v42 = vld [vmem:[%s10076_s0 + $0x9c] sm:$0xf]  ;;  %v8168_v43 = vld [vmem:[%s10076_s0 + $0xe0] sm:$0xff]  }
  0x4b   :  { %7170 = vmatprep.subr.bf16.mxu0 %v8142_v6 }
  0x4c   :  { %7429 = vmatpush3.bf16.msra.mxu1 %v8139_v20  ;;  %v8147_v20 = vld [vmem:[%s10076_s0 + $0x98] sm:$0xff]  }
  0x4d   :  { %7115 = vmatmul.mubr.msk.bf16.gmra.mrb[4].mxu0 %vm254_vm1, %v8375_v31  ;;  %7458 = vmatprep.subr.bf16.mxu1 %v8143_v7  ;;  %v3803_v31 = vsel %vm635_vm2, %v3800_v21, %v3802_v24  ;;  %v8831_v21 = vld [vmem:[%s10075_s1 + $0x50] sm:$0xff]  }
  0x4e   :  { %7118 = vmatprep.mubr.msk.bf16.mxu0 %vm254_vm1, %v8391_v41  ;;  %v8847_v24 = vld [vmem:[%s10075_s1 + $0x50] sm:$0xff]  }
  0x4f   :  { %7403 = vmatmul.mubr.msk.bf16.gmra.mrb[4].mxu1 %vm254_vm1, %v8383_v36  ;;  %v643_v36 = vrot.slane %v8391_v41, 1  ;;  %v3808_v41 = vrot.slane %v8426_v1, 1 }
  0x50   :  { %7406 = vmatprep.mubr.msk.bf16.mxu1 %vm254_vm1, %v8402_v49  ;;  %v3807_v49 = vsel %vm635_vm2, %v3804_v25, %v3806_v34  ;;  %v8154_v25 = vld [vmem:[%s10076_s0 + $0xb0] sm:$0xff]  }
  0x51   :  { %v646_v40 = vsel %vm635_vm2, %v643_v36, %v645_v29  ;;  %v8165_v29 = vld [vmem:[%s10076_s0 + $0x48] sm:$0xff]  }
  0x55   :  { %7119 = vmatmul.mubr.msk.bf16.gmra.mrb[8].mxu0 %vm254_vm1, %v8418_v61  ;;  %v644_v61 = vsel %vm635_vm2, %v641_v9, %v643_v36  ;;  %v8156_v9 = vld [vmem:[%s10076_s0 + $0x28] sm:$0xff]  }
  0x56   :  { %7122 = vmatprep.mubr.msk.bf16.mxu0 %vm254_vm1, %v8432_v3  ;;  %v3811_v3 = vsel %vm635_vm2, %v3808_v41, %v3810_v45  ;;  %v8161_v36 = vld [vmem:[%s10076_s0 + $0xc8] sm:$0xff]  }
  0x57   :  { %7407 = vmatmul.mubr.msk.bf16.gmra.mrb[8].mxu1 %vm254_vm1, %v8426_v1  ;;  %v3809_v1 = vsel %vm635_vm2, %v3806_v34, %v3808_v41  ;;  %v8166_v34 = vld [vmem:[%s10076_s0 + $0xd8] sm:$0xff]   ;;  %v1221_v41 = vld [vmem:[%s10076_s0 + $0x8] sm:$0xf] }
  0x58   :  { %7410 = vmatprep.mubr.msk.bf16.mxu1 %vm254_vm1, %v8441_v17  ;;  %v3814_v17 = vrot.slane %v8472_v38, 1 }
  0x5a   :  { %v3815_v57 = vsel %vm635_vm2, %v3812_v46, %v3814_v17 }
  0x5d   :  { %7123 = vmatmul.mubr.msk.bf16.gmra.mrb[12].mxu0 %vm254_vm1, %v8446_v18  ;;  %v3813_v18 = vsel %vm635_vm2, %v3810_v45, %v3812_v46  ;;  %v8171_v45 = vld [vmem:[%s10076_s0 + $0xe8] sm:$0xff]  }
  0x5e   :  { %7126 = vmatprep.mubr.msk.bf16.mxu0 %vm254_vm1, %v8464_v33 }
  0x5f   :  { %7411 = vmatmul.mubr.msk.bf16.gmra.mrb[12].mxu1 %vm254_vm1, %v8458_v30  ;;  %v3816_v30 = vrot.slane %v8494_v55, 1 }
  0x60   :  { %7414 = vmatprep.mubr.msk.bf16.mxu1 %vm254_vm1, %v8472_v38  ;;  %v3818_v38 = vrot.slane %v8513_v11, 1 }
  0x61   :  { %v3817_v33 = vsel %vm635_vm2, %v3814_v17, %v3816_v30 }
  0x62   :  { %v3819_v63 = vsel %vm635_vm2, %v3816_v30, %v3818_v38 }
  0x65   :  { %7127 = vmatmul.mubr.msk.bf16.gmra.mrb[16].mxu0 %vm254_vm1, %v8488_v53 }
  0x66   :  { %7130 = vmatprep.mubr.msk.bf16.mxu0 %vm254_vm1, %v8506_v2 }
  0x67   :  { %7415 = vmatmul.mubr.msk.bf16.gmra.mrb[16].mxu1 %vm254_vm1, %v8494_v55 }
  0x68   :  { %7418 = vmatprep.mubr.msk.bf16.mxu1 %vm254_vm1, %v8513_v11  ;;  %v3822_v11 = vrot.slane %v8556_v48, 1 }
  0x6a   :  { %v3823_v13 = vsel %vm635_vm2, %v3820_v59, %v3822_v11 }
  0x6d   :  { %7131 = vmatmul.mubr.msk.bf16.gmra.mrb[20].mxu0 %vm254_vm1, %v8524_v23 }
  0x6e   :  { %7134 = vmatprep.mubr.msk.bf16.mxu0 %vm254_vm1, %v8541_v39 }
  0x6f   :  { %7419 = vmatmul.mubr.msk.bf16.gmra.mrb[20].mxu1 %vm254_vm1, %v8531_v26  ;;  %v3824_v26 = vrot.slane %v8571_v60, 1 }
  0x70   :  { %7422 = vmatprep.mubr.msk.bf16.mxu1 %vm254_vm1, %v8556_v48  ;;  %v3826_v48 = vrot.slane %v8602_v37, 1  ;;  %v8148_v37 = vld [vmem:[%s10076_s0 + $0x10] sm:$0xff]  }
  0x75   :  { %7135 = vmatmul.mubr.msk.bf16.gmra.mrb[24].mxu0 %vm254_vm1, %v8550_v44  ;;  %v3825_v44 = vsel %vm635_vm2, %v3822_v11, %v3824_v26 }
  0x76   :  { %7142 = vmatprep.mubr.msk.bf16.mxu0 %vm254_vm1, %v638_v58  ;;  %v657_v58 = vrot.slane %v8524_v23, 1  ;;  %v659_v23 = vrot.slane %v8541_v39, 1  ;;  %v663_v39 = vrot.slane %v8581_v8, 1  ;;  %v3827_v8 = vsel %vm635_vm2, %v3824_v26, %v3826_v48 }
  0x77   :  { %7423 = vmatmul.mubr.msk.bf16.gmra.mrb[24].mxu1 %vm254_vm1, %v8571_v60  ;;  %v8146_v60 = vld [vmem:[%s10076_s0 + $0x8] sm:$0xff]  }
  0x78   :  { %7430 = vmatprep.mubr.msk.bf16.mxu1 %vm254_vm1, %v3801_v22  ;;  %v660_v4 = vsel %vm635_vm2, %v657_v58, %v659_v23  ;;  %v662_v12 = vsel %vm635_vm2, %v659_v23, %v661_v0  ;;  %v664_v19 = vsel %vm635_vm2, %v661_v0, %v663_v39  ;;  %v8153_v22 = vld [vmem:[%s10076_s0 + $0x20] sm:$0xff]  }
  0x7d   :  { %7143 = vmatmul.mubr.msk.bf16.vlgmr.msra.gmra.mrb[0].mxu0 %vm254_vm1, %v8612_v52  ;;  %v653_v52 = vrot.slane %v8488_v53, 1  ;;  %v655_v53 = vrot.slane %v8506_v2, 1  ;;  %v3821_v2 = vsel %vm635_vm2, %v3818_v38, %v3820_v59 }
  0x7e   :  { %7171 = vmatpush3.bf16.msra.mxu0 %v8142_v6  ;;  %7146 = vmatprep.mubr.msk.bf16.mxu0 %vm254_vm1, %v642_v14  ;;  %v8151_v6 = vld [vmem:[%s10076_s0 + $0x18] sm:$0xff]  }
  0x7f   :  { %7172 = vmatprep.subr.bf16.mxu0 %v8144_v27  ;;  %7431 = vmatmul.mubr.msk.bf16.vlgmr.msra.gmra.mrb[0].mxu1 %vm254_vm1, %v3803_v31  ;;  %v654_v56 = vsel %vm635_vm2, %v651_v51, %v653_v52  ;;  %v656_v55 = vsel %vm635_vm2, %v653_v52, %v655_v53  ;;  %v658_v62 = vsel %vm635_vm2, %v655_v53, %v657_v58  ;;  %v8157_v14 = vld [vmem:[%s10076_s0 + $0xb8] sm:$0xff]   ;;  %v8941_v51 = vld [vmem:[%s10076_s0 + $0xa0] sm:$0xff]  }
  0x80   :  { %7434 = vmatprep.mubr.msk.bf16.mxu1 %vm254_vm1, %v3805_v28  ;;  %7459 = vmatpush3.bf16.msra.mxu1 %v8143_v7  ;;  %v8164_v7 = vld [vmem:[%s10075_s1 + $0x48] sm:$0xff]   ;;  %v8160_v31 = vld [vmem:[%s10076_s0 + $0x38] sm:$0xff]   ;;  %v8159_v28 = vld [vmem:[%s10076_s0 + $0xc0] sm:$0xff]   ;;  %v4498_v38 = vshll.u32 %v8941_v51, 16 }
  0x81   :  { %7460 = vmatprep.subr.bf16.mxu1 %v8145_v15 }
  0x82   :  { %7173 = vmatpush3.bf16.msra.mxu0 %v8144_v27  ;;  %v8158_v27 = vld [vmem:[%s10076_s0 + $0x30] sm:$0xff]   ;;  %v4500_v26 = vrot.slane %v4498_v38, 1 }
  0x83   :  { %7202 = vmatprep.subr.bf16.mxu0 %v8726_v32 }
  0x84   :  { %7461 = vmatpush3.bf16.msra.mxu1 %v8145_v15  ;;  %v8162_v15 = vld [vmem:[%s10076_s0 + $0x40] sm:$0xff]  }
  0x85   :  { %7147 = vmatmul.mubr.msk.bf16.gmra.mrb[4].mxu0 %vm254_vm1, %v644_v61  ;;  %7490 = vmatprep.subr.bf16.mxu1 %v8735_v35  ;;  %v8167_v61 = vld [vmem:[%s10076_s0 + $0x50] sm:$0xff]  }
  0x86   :  { %7150 = vmatprep.mubr.msk.bf16.mxu0 %vm254_vm1, %v646_v40  ;;  %v8170_v40 = vld [vmem:[%s10076_s0 + $0x58] sm:$0xff]  }
  0x87   :  { %7435 = vmatmul.mubr.msk.bf16.gmra.mrb[4].mxu1 %vm254_vm1, %v3807_v49 }
  0x88   :  { %7438 = vmatprep.mubr.msk.bf16.mxu1 %vm254_vm1, %v3809_v1  ;;  %v4384_v1 = vld [vmem:[%s10076_s0 + $0x98] sm:$0xf] }
  0x89   :  { %v6645_v46 = vcombine.low %v4384_v1, %v8914_v42 }
  0x8b   :  { %v4493_v52 = vshll.u32 %v6645_v46, 16  ;;  %v4491_v53 = vshrl.u32 %v6645_v46, 16 }
  0x8d   :  { %7151 = vmatmul.mubr.msk.bf16.gmra.mrb[8].mxu0 %vm254_vm1, %v648_v47  ;;  %v8928_v47 = vld [vmem:[%s10076_s0 + $0x10] sm:$0xff]   ;;  %v4495_v58 = vrot.slane %v4493_v52, 1 }
  0x8e   :  { %7154 = vmatprep.mubr.msk.bf16.mxu0 %vm254_vm1, %v650_v50  ;;  %v1339_v0 = vshrl.u32 %v8928_v47, 16 }
  0x8f   :  { %7439 = vmatmul.mubr.msk.bf16.gmra.mrb[8].mxu1 %vm254_vm1, %v3811_v3  ;;  %v8172_v3 = vld [vmem:[%s10076_s0 + $0x60] sm:$0xff]   ;;  %v4496_v11 = vor.u32 %v4495_v58, %v4491_v53 }
  0x90   :  { %7442 = vmatprep.mubr.msk.bf16.mxu1 %vm254_vm1, %v3813_v18  ;;  %v8174_v18 = vld [vmem:[%s10076_s0 + $0x68] sm:$0xff]  }
  0x95   :  { %7155 = vmatmul.mubr.msk.bf16.gmra.mrb[12].mxu0 %vm254_vm1, %v652_v5  ;;  %v1335_v5 = vshll.u32 %v8928_v47, 16 }
  0x96   :  { %7158 = vmatprep.mubr.msk.bf16.mxu0 %vm254_vm1, %v654_v56  ;;  %v8173_v56 = vld [vmem:[%s10076_s0 + $0xf0] sm:$0xff]  }
  0x97   :  { %7443 = vmatmul.mubr.msk.bf16.gmra.mrb[12].mxu1 %vm254_vm1, %v3815_v57  ;;  %v8175_v57 = vld [vmem:[%s10076_s0 + $0xf8] sm:$0xff]   ;;  %v1337_v59 = vrot.slane %v1335_v5, 1 }
  0x98   :  { %7446 = vmatprep.mubr.msk.bf16.mxu1 %vm254_vm1, %v3817_v33  ;;  %v8954_v33 = vld [vmem:[%s10076_s0 + $0x18] sm:$0xff]  }
  0x99   :  { %v1343_v23 = vshll.u32 %v8954_v33, 16 }
  0x9d   :  { %7159 = vmatmul.mubr.msk.bf16.gmra.mrb[16].mxu0 %vm254_vm1, %v656_v55 }
  0x9e   :  { %7162 = vmatprep.mubr.msk.bf16.mxu0 %vm254_vm1, %v658_v62  ;;  %v8961_v62 = vld [vmem:[%s10076_s0 + $0x20] sm:$0xff]  }
  0x9f   :  { %7447 = vmatmul.mubr.msk.bf16.gmra.mrb[16].mxu1 %vm254_vm1, %v3819_v63  ;;  %v8967_v63 = vld [vmem:[%s10076_s0 + $0xa8] sm:$0xff]   ;;  %v1351_v39 = vshll.u32 %v8961_v62, 16 }
  0xa0   :  { %7450 = vmatprep.mubr.msk.bf16.mxu1 %vm254_vm1, %v3821_v2  ;;  %v8176_v2 = vld [vmem:[%s10076_s0 + $0x70] sm:$0xff]   ;;  %v4506_v48 = vshll.u32 %v8967_v63, 16 }
  0xa5   :  { %7163 = vmatmul.mubr.msk.bf16.gmra.mrb[20].mxu0 %vm254_vm1, %v660_v4  ;;  %v8978_v4 = vld [vmem:[%s10076_s0 + $0xb0] sm:$0xff]  }
  0xa6   :  { %7166 = vmatprep.mubr.msk.bf16.mxu0 %vm254_vm1, %v662_v12  ;;  %v4518_v1 = vshrl.u32 %v8978_v4, 16 }
  0xa7   :  { %7451 = vmatmul.mubr.msk.bf16.gmra.mrb[20].mxu1 %vm254_vm1, %v3823_v13  ;;  %v1347_v13 = vshrl.u32 %v8954_v33, 16 }
  0xa8   :  { %7454 = vmatprep.mubr.msk.bf16.mxu1 %vm254_vm1, %v3825_v44  ;;  %v8177_v44 = vld [vmem:[%s10076_s0 + $0x100] sm:$0xff]  }
  0xad   :  { %7167 = vmatmul.mubr.msk.bf16.gmra.mrb[24].mxu0 %vm254_vm1, %v664_v19  ;;  %v1345_v19 = vrot.slane %v1343_v23, 1  ;;  %v9070_v23 = vld [vmem:[%s10075_s1 + $0x60] sm:$0xff]  }
  0xae   :  { %7174 = vmatprep.mubr.msk.bf16.mxu0 %vm254_vm1, %v8146_v60  ;;  %v4502_v60 = vshrl.u32 %v8941_v51, 16 }
  0xaf   :  { %7455 = vmatmul.mubr.msk.bf16.gmra.mrb[24].mxu1 %vm254_vm1, %v3827_v8  ;;  %v8992_v8 = vld [vmem:[%s10076_s0 + $0x28] sm:$0xff]  }
  0xb0   :  { %7462 = vmatprep.mubr.msk.bf16.mxu1 %vm254_vm1, %v8147_v20  ;;  %v1341_v20 = vor.u32 %v1339_v0, %v1337_v59 }
  0xb5   :  { %7175 = vmatmul.mubr.msk.bf16.vlgmr.msra.gmra.mrb[0].mxu0 %vm254_vm1, %v8148_v37  ;;  %v4501_v37 = vsel %vm125_vm0, %v4496_v11, %v4500_v26 }
  0xb6   :  { %7203 = vmatpush3.bf16.msra.mxu0 %v8726_v32  ;;  %7178 = vmatprep.mubr.msk.bf16.mxu0 %vm254_vm1, %v8151_v6  ;;  %v8163_v32 = vld [vmem:[%s10076_s0 + $0xd0] sm:$0xff]   ;;  %v4510_v6 = vshrl.u32 %v8967_v63, 16 }
  0xb7   :  { %7204 = vmatprep.subr.bf16.mxu0 %v8164_v7  ;;  %7463 = vmatmul.mubr.msk.bf16.vlgmr.msra.gmra.mrb[0].mxu1 %vm254_vm1, %v8150_v16  ;;  %v1349_v16 = vor.u32 %v1347_v13, %v1345_v19 }
  0xb8   :  { %7466 = vmatprep.mubr.msk.bf16.mxu1 %vm254_vm1, %v8152_v54  ;;  %7491 = vmatpush3.bf16.msra.mxu1 %v8735_v35  ;;  %v8898_v35 = vld [vmem:[%s10076_s0 + $0xc] sm:$0xf]  ;;  %v1353_v54 = vrot.slane %v1351_v39, 1 }
  0xb9   :  { %7492 = vmatprep.subr.bf16.mxu1 %v8169_v10  ;;  %v6412_v49 = vcombine.low %v1221_v41, %v8898_v35  ;;  %v8198_v41 = vld [vmem:[%s10075_s1 + $0x58] sm:$0xff]  }
  0xba   :  { %7205 = vmatpush3.bf16.msra.mxu0 %v8164_v7  ;;  %v4514_v7 = vshll.u32 %v8978_v4, 16 }
  0xbb   :  { %7234 = vmatprep.subr.bf16.mxu0 %v8831_v21  ;;  %v1330_v50 = vshll.u32 %v6412_v49, 16  ;;  %v1328_v17 = vshrl.u32 %v6412_v49, 16 }
  0xbc   :  { %7493 = vmatpush3.bf16.msra.mxu1 %v8169_v10  ;;  %v9001_v10 = vld [vmem:[%s10076_s0 + $0x30] sm:$0xff]  }
  0xbd   :  { %7179 = vmatmul.mubr.msk.bf16.gmra.mrb[4].mxu0 %vm254_vm1, %v8153_v22  ;;  %7522 = vmatprep.subr.bf16.mxu1 %v8847_v24  ;;  %v1332_v30 = vrot.slane %v1330_v50, 1  ;;  %v4508_v22 = vrot.slane %v4506_v48, 1 }
  0xbe   :  { %7182 = vmatprep.mubr.msk.bf16.mxu0 %vm254_vm1, %v8156_v9  ;;  %v9007_v9 = vld [vmem:[%s10076_s0 + $0xb8] sm:$0xff]  }
  0xbf   :  { %7467 = vmatmul.mubr.msk.bf16.gmra.mrb[4].mxu1 %vm254_vm1, %v8154_v25  ;;  %v1333_v55 = vor.u32 %v1332_v30, %v1328_v17  ;;  %v4504_v25 = vor.u32 %v4502_v60, %v4500_v26  ;;  %v4526_v50 = vshrl.u32 %v9007_v9, 16  ;;  %v9044_v30 = vld [vmem:[%s10076_s0 + $0x40] sm:$0xff]  }
  0xc0   :  { %7470 = vmatprep.mubr.msk.bf16.mxu1 %vm254_vm1, %v8157_v14  ;;  %v1359_v14 = vshll.u32 %v8992_v8, 16  ;;  %v1383_v11 = vshll.u32 %v9044_v30, 16 }
  0xc1   :  { %v1338_v12 = vsel %vm125_vm0, %v1333_v55, %v1337_v59  ;;  %v1371_v59 = vshrl.u32 %v9001_v10, 16 }
  0xc2   :  { %v1361_v49 = vrot.slane %v1359_v14, 1 }
  0xc5   :  { %7183 = vmatmul.mubr.msk.bf16.gmra.mrb[8].mxu0 %vm254_vm1, %v8158_v27  ;;  %v1346_v27 = vsel %vm125_vm0, %v1341_v20, %v1345_v19 }
  0xc6   :  { %7186 = vmatprep.mubr.msk.bf16.mxu0 %vm254_vm1, %v8160_v31  ;;  %v4512_v31 = vor.u32 %v4510_v6, %v4508_v22  ;;  %v1385_v6 = vrot.slane %v1383_v11, 1 }
  0xc7   :  { %7471 = vmatmul.mubr.msk.bf16.gmra.mrb[8].mxu1 %vm254_vm1, %v8159_v28  ;;  %v4516_v28 = vrot.slane %v4514_v7, 1  ;;  %v9093_v7 = vld [vmem:[%s10076_s0 + $0x50] sm:$0xff]  }
  0xc8   :  { %7474 = vmatprep.mubr.msk.bf16.mxu1 %vm254_vm1, %v8161_v36  ;;  %v1355_v36 = vshrl.u32 %v8961_v62, 16 }
  0xca   :  { %v1357_v46 = vor.u32 %v1355_v36, %v1353_v54  ;;  %v9108_v36 = vld [vmem:[%s10076_s0 + $0xe0] sm:$0xff]  }
  0xcc   :  { %v1362_v58 = vsel %vm125_vm0, %v1357_v46, %v1361_v49 }
  0xcd   :  { %7187 = vmatmul.mubr.msk.bf16.gmra.mrb[12].mxu0 %vm254_vm1, %v8162_v15  ;;  %v9016_v15 = vld [vmem:[%s10076_s0 + $0xc0] sm:$0xff]  }
  0xce   :  { %7190 = vmatprep.mubr.msk.bf16.mxu0 %vm254_vm1, %v8165_v29  ;;  %v1354_v29 = vsel %vm125_vm0, %v1349_v16, %v1353_v54  ;;  %v4534_v39 = vshrl.u32 %v9016_v15, 16  ;;  %v9099_v54 = vld [vmem:[%s10076_s0 + $0xd8] sm:$0xff]  }
  0xcf   :  { %7475 = vmatmul.mubr.msk.bf16.gmra.mrb[12].mxu1 %vm254_vm1, %v8163_v32  ;;  %v1363_v32 = vshrl.u32 %v8992_v8, 16 }
  0xd0   :  { %7478 = vmatprep.mubr.msk.bf16.mxu1 %vm254_vm1, %v8166_v34  ;;  %v1367_v34 = vshll.u32 %v9001_v10, 16 }
  0xd1   :  { %v1365_v52 = vor.u32 %v1363_v32, %v1361_v49 }
  0xd2   :  { %v1369_v17 = vrot.slane %v1367_v34, 1  ;;  %v1399_v34 = vshll.u32 %v9093_v7, 16 }
  0xd4   :  { %v1373_v60 = vor.u32 %v1371_v59, %v1369_v17 }
  0xd5   :  { %7191 = vmatmul.mubr.msk.bf16.gmra.mrb[16].mxu0 %vm254_vm1, %v8167_v61  ;;  %v4522_v61 = vshll.u32 %v9007_v9, 16 }
  0xd6   :  { %7194 = vmatprep.mubr.msk.bf16.mxu0 %vm254_vm1, %v8170_v40  ;;  %v4509_v40 = vsel %vm125_vm0, %v4504_v25, %v4508_v22 }
  0xd7   :  { %7479 = vmatmul.mubr.msk.bf16.gmra.mrb[16].mxu1 %vm254_vm1, %v8168_v43  ;;  %v9031_v43 = vld [vmem:[%s10076_s0 + $0x38] sm:$0xff]   ;;  %v4524_v5 = vrot.slane %v4522_v61, 1 }
  0xd8   :  { %7482 = vmatprep.mubr.msk.bf16.mxu1 %vm254_vm1, %v8171_v45  ;;  %v4517_v45 = vsel %vm125_vm0, %v4512_v31, %v4516_v28  ;;  %v1375_v53 = vshll.u32 %v9031_v43, 16  ;;  %v1379_v0 = vshrl.u32 %v9031_v43, 16 }
  0xd9   :  { %v4528_v38 = vor.u32 %v4526_v50, %v4524_v5  ;;  %v4558_v50 = vshrl.u32 %v9099_v54, 16 }
  0xda   :  { %v1377_v13 = vrot.slane %v1375_v53, 1 }
  0xdc   :  { %v1378_v14 = vsel %vm125_vm0, %v1373_v60, %v1377_v13  ;;  %v4566_v60 = vshrl.u32 %v9108_v36, 16 }
  0xdd   :  { %7195 = vmatmul.mubr.msk.bf16.gmra.mrb[20].mxu0 %vm254_vm1, %v8172_v3  ;;  %v4530_v3 = vshll.u32 %v9016_v15, 16 }
  0xde   :  { %7198 = vmatprep.mubr.msk.bf16.mxu0 %vm254_vm1, %v8174_v18  ;;  %v8203_v18 = vld [vmem:[%s10075_s1 + $0x58] sm:$0xff]  }
  0xdf   :  { %7483 = vmatmul.mubr.msk.bf16.gmra.mrb[20].mxu1 %vm254_vm1, %v8173_v56  ;;  %v9055_v56 = vld [vmem:[%s10076_s0 + $0xc8] sm:$0xff]   ;;  %v4532_v55 = vrot.slane %v4530_v3, 1  ;;  %v4562_v3 = vshll.u32 %v9108_v36, 16 }
  0xe0   :  { %7486 = vmatprep.mubr.msk.bf16.mxu1 %vm254_vm1, %v8175_v57  ;;  %v4520_v57 = vor.u32 %v4518_v1, %v4516_v28  ;;  %v4538_v26 = vshll.u32 %v9055_v56, 16  ;;  %v4542_v19 = vshrl.u32 %v9055_v56, 16  ;;  %v1387_v28 = vshrl.u32 %v9044_v30, 16  ;;  %v9120_v1 = vld [vmem:[%s10076_s0 + $0x58] sm:$0xff]  }
  0xe1   :  { %v4533_v48 = vsel %vm125_vm0, %v4528_v38, %v4532_v55  ;;  %v4536_v22 = vor.u32 %v4534_v39, %v4532_v55  ;;  %v4564_v59 = vrot.slane %v4562_v3, 1 }
  0xe2   :  { %v4540_v16 = vrot.slane %v4538_v26, 1  ;;  %v1389_v46 = vor.u32 %v1387_v28, %v1385_v6  ;;  %v1411_v26 = vshrl.u32 %v9120_v1, 16 }
  0xe3   :  { %v4568_v28 = vor.u32 %v4566_v60, %v4564_v59 }
  0xe4   :  { %v4541_v61 = vsel %vm125_vm0, %v4536_v22, %v4540_v16 }
  0xe5   :  { %7199 = vmatmul.mubr.msk.bf16.gmra.mrb[24].mxu0 %vm254_vm1, %v8176_v2  ;;  %v9065_v2 = vld [vmem:[%s10076_s0 + $0xd0] sm:$0xff]  }
  0xe6   :  { %7206 = vmatprep.mubr.msk.bf16.mxu0 %vm254_vm1, %v1338_v12  ;;  %v4525_v12 = vsel %vm125_vm0, %v4520_v57, %v4524_v5  ;;  %v4546_v20 = vshll.u32 %v9065_v2, 16  ;;  %v4550_v49 = vshrl.u32 %v9065_v2, 16  ;;  %v9135_v57 = vld [vmem:[%s10076_s0 + $0xe8] sm:$0xff]  }
  0xe7   :  { %7487 = vmatmul.mubr.msk.bf16.gmra.mrb[24].mxu1 %vm254_vm1, %v8177_v44  ;;  %v9083_v44 = vld [vmem:[%s10076_s0 + $0x48] sm:$0xff]  }
  0xe8   :  { %7494 = vmatprep.mubr.msk.bf16.mxu1 %vm254_vm1, %v4501_v37  ;;  %v1381_v37 = vor.u32 %v1379_v0, %v1377_v13  ;;  %v1391_v25 = vshll.u32 %v9083_v44, 16  ;;  %v4548_v31 = vrot.slane %v4546_v20, 1  ;;  %v1395_v32 = vshrl.u32 %v9083_v44, 16  ;;  %v9144_v0 = vld [vmem:[%s10076_s0 + $0xf0] sm:$0xff]  }
  0xe9   :  { %v4570_v13 = vshll.u32 %v9135_v57, 16 }
  0xea   :  { %v4552_v53 = vor.u32 %v4550_v49, %v4548_v31 }
  0xed   :  { %7207 = vmatmul.mubr.msk.bf16.vlgmr.msra.gmra.mrb[0].mxu0 %vm254_vm1, %v1346_v27  ;;  %v4544_v27 = vor.u32 %v4542_v19, %v4540_v16  ;;  %v9156_v19 = vld [vmem:[%s10076_s0 + $0x68] sm:$0xff]   ;;  %v4578_v16 = vshll.u32 %v9144_v0, 16 }
  0xee   :  { %7235 = vmatpush3.bf16.msra.mxu0 %v8831_v21  ;;  %7210 = vmatprep.mubr.msk.bf16.mxu0 %vm254_vm1, %v1354_v29  ;;  %v9049_v21 = vld [vmem:[%s10075_s1 + $0x60] sm:$0xff]   ;;  %v1386_v29 = vsel %vm125_vm0, %v1381_v37, %v1385_v6  ;;  %v4574_v6 = vshrl.u32 %v9135_v57, 16 }
  0xef   :  { %7236 = vmatprep.subr.bf16.mxu0 %v8198_v41  ;;  %7495 = vmatmul.mubr.msk.bf16.vlgmr.msra.gmra.mrb[0].mxu1 %vm254_vm1, %v4509_v40  ;;  %v1393_v40 = vrot.slane %v1391_v25, 1 }
  0xf0   :  { %7498 = vmatprep.mubr.msk.bf16.mxu1 %vm254_vm1, %v4517_v45  ;;  %7523 = vmatpush3.bf16.msra.mxu1 %v8847_v24  ;;  %v1370_v24 = vsel %vm125_vm0, %v1365_v52, %v1369_v17  ;;  %v4549_v45 = vsel %vm125_vm0, %v4544_v27, %v4548_v31  ;;  %v1401_v52 = vrot.slane %v1399_v34, 1  ;;  %v9129_v17 = vld [vmem:[%s10076_s0 + $0x60] sm:$0xff]   ;;  %v4572_v27 = vrot.slane %v4570_v13, 1  ;;  %v9171_v31 = vld [vmem:[%s10076_s0 + $0xf8] sm:$0xff]  }
  0xf1   :  { %7524 = vmatprep.subr.bf16.mxu1 %v8203_v18  ;;  %v1394_v38 = vsel %vm125_vm0, %v1389_v46, %v1393_v40 }
  0xf2   :  { %7237 = vmatpush3.bf16.msra.mxu0 %v8198_v41  ;;  %v4554_v41 = vshll.u32 %v9099_v54, 16  ;;  %v4573_v3 = vsel %vm125_vm0, %v4568_v28, %v4572_v27 }
  0xf3   :  { %7266 = vmatprep.subr.bf16.mxu0 %v9049_v21 }
  0xf4   :  { %7525 = vmatpush3.bf16.msra.mxu1 %v8203_v18  ;;  %v1397_v18 = vor.u32 %v1395_v32, %v1393_v40  ;;  %v4556_v5 = vrot.slane %v4554_v41, 1  ;;  %v1423_v32 = vshll.u32 %v9156_v19, 16  ;;  %v4576_v41 = vor.u32 %v4574_v6, %v4572_v27  ;;  %v9180_v40 = vld [vmem:[%s10076_s0 + $0x100] sm:$0xff]  }
  0xf5   :  { %7211 = vmatmul.mubr.msk.bf16.gmra.mrb[4].mxu0 %vm254_vm1, %v1362_v58  ;;  %7554 = vmatprep.subr.bf16.mxu1 %v9070_v23  ;;  %v1407_v58 = vshll.u32 %v9120_v1, 16  ;;  %v4598_v27 = vshrl.u32 %v9180_v40, 16 }
  0xf6   :  { %7214 = vmatprep.mubr.msk.bf16.mxu0 %vm254_vm1, %v1370_v24  ;;  %v4560_v55 = vor.u32 %v4558_v50, %v4556_v5  ;;  %v1403_v24 = vshrl.u32 %v9093_v7, 16  ;;  %v1402_v11 = vsel %vm125_vm0, %v1397_v18, %v1401_v52  ;;  %v4557_v39 = vsel %vm125_vm0, %v4552_v53, %v4556_v5 }
  0xf7   :  { %7499 = vmatmul.mubr.msk.bf16.gmra.mrb[4].mxu1 %vm254_vm1, %v4525_v12  ;;  %v1415_v12 = vshll.u32 %v9129_v17, 16  ;;  %v4586_v50 = vshll.u32 %v9171_v31, 16  ;;  %v4582_v5 = vshrl.u32 %v9144_v0, 16 }
  0xf8   :  { %7502 = vmatprep.mubr.msk.bf16.mxu1 %vm254_vm1, %v4533_v48  ;;  %v1409_v48 = vrot.slane %v1407_v58, 1  ;;  %v4565_v20 = vsel %vm125_vm0, %v4560_v55, %v4564_v59  ;;  %v1405_v37 = vor.u32 %v1403_v24, %v1401_v52  ;;  %v1425_v52 = vrot.slane %v1423_v32, 1  ;;  %v9196_v55 = vld [vmem:[%s10076_s0 + $0x78] ss:$0 sps:$4 sm:$0x11]  }
  0xf9   :  { %v1417_v25 = vrot.slane %v1415_v12, 1  ;;  %v4590_v58 = vshrl.u32 %v9171_v31, 16 }
  0xfa   :  { %v1413_v22 = vor.u32 %v1411_v26, %v1409_v48  ;;  %v1410_v34 = vsel %vm125_vm0, %v1405_v37, %v1409_v48  ;;  %v1670_v26 = vld [vmem:[%s10076_s0 + $0x8] sm:$0xe]  ;;  %v1439_v37 = vshll.u32 %v9196_v55, 16 }
  0xfc   :  { %v1418_v49 = vsel %vm125_vm0, %v1413_v22, %v1417_v25  ;;  %v4833_v22 = vld [vmem:[%s10076_s0 + $0x98] sm:$0xe] }
  0xfd   :  { %7215 = vmatmul.mubr.msk.bf16.gmra.mrb[8].mxu0 %vm254_vm1, %v1378_v14  ;;  %v9165_v14 = vld [vmem:[%s10076_s0 + $0x70] sm:$0xff]  }
  0xfe   :  { %7218 = vmatprep.mubr.msk.bf16.mxu0 %vm254_vm1, %v1386_v29  ;;  %v1419_v29 = vshrl.u32 %v9129_v17, 16  ;;  %v1431_v46 = vshll.u32 %v9165_v14, 16 }
  0xff   :  { %7503 = vmatmul.mubr.msk.bf16.gmra.mrb[8].mxu1 %vm254_vm1, %v4541_v61  ;;  %v4580_v61 = vrot.slane %v4578_v16, 1  ;;  %v6443_v16 = vcombine.low %v1670_v26, %v8898_v35  ;;  %v6676_v35 = vcombine.low %v4833_v22, %v8914_v42  ;;  %v4850_v26 = vrot.slane %v9016_v15, 1 }
 0x100   :  { %7506 = vmatprep.mubr.msk.bf16.mxu1 %vm254_vm1, %v4549_v45  ;;  %v1427_v45 = vshrl.u32 %v9156_v19, 16  ;;  %v1421_v18 = vor.u32 %v1419_v29, %v1417_v25  ;;  %v1433_v24 = vrot.slane %v1431_v46, 1  ;;  %v4858_v22 = vrot.slane %v9108_v36, 1 }
 0x101   :  { %v4581_v53 = vsel %vm125_vm0, %v4576_v41, %v4580_v61  ;;  %v4584_v13 = vor.u32 %v4582_v5, %v4580_v61  ;;  %v1678_v41 = vrot.slane %v6443_v16, 1  ;;  %v1679_v61 = vrot.slane %v8928_v47, 1 }
 0x102   :  { %v1429_v59 = vor.u32 %v1427_v45, %v1425_v52  ;;  %v1426_v12 = vsel %vm125_vm0, %v1421_v18, %v1425_v52  ;;  %v1681_v52 = vrot.slane %v8954_v33, 1  ;;  %v1683_v5 = vrot.slane %v8961_v62, 1 }
 0x103   :  { %v1680_v18 = vsel %vm635_vm2, %v1678_v41, %v1679_v61  ;;  %v1695_v16 = vrot.slane %v9093_v7, 1  ;;  %v1697_v7 = vrot.slane %v9120_v1, 1  ;;  %v4866_v41 = vrot.slane %v9180_v40, 1 }
 0x104   :  { %v1434_v6 = vsel %vm125_vm0, %v1429_v59, %v1433_v24  ;;  %v8216_v59 = vld [vmem:[%s10075_s1 + $0x68] sm:$0xff]  }
 0x105   :  { %7219 = vmatmul.mubr.msk.bf16.gmra.mrb[12].mxu0 %vm254_vm1, %v1394_v38  ;;  %v4594_v38 = vshll.u32 %v9180_v40, 16  ;;  %v1698_v36 = vsel %vm635_vm2, %v1695_v16, %v1697_v7 }
 0x106   :  { %7222 = vmatprep.mubr.msk.bf16.mxu0 %vm254_vm1, %v1402_v11  ;;  %v4588_v11 = vrot.slane %v4586_v50, 1  ;;  %v4841_v50 = vrot.slane %v6676_v35, 1  ;;  %v1703_v35 = vrot.slane %v9165_v14, 1 }
 0x107   :  { %7507 = vmatmul.mubr.msk.bf16.gmra.mrb[12].mxu1 %vm254_vm1, %v4557_v39  ;;  %v9207_v39 = vld [vmem:[%s10076_s0 + $0x108] ss:$0 sps:$4 sm:$0x11]   ;;  %v4596_v60 = vrot.slane %v4594_v38, 1  ;;  %v1684_v38 = vsel %vm635_vm2, %v1681_v52, %v1683_v5 }
 0x108   :  { %7510 = vmatprep.mubr.msk.bf16.mxu1 %vm254_vm1, %v4565_v20  ;;  %v4592_v48 = vor.u32 %v4590_v58, %v4588_v11  ;;  %v1435_v20 = vshrl.u32 %v9165_v14, 16  ;;  %v4589_v25 = vsel %vm125_vm0, %v4584_v13, %v4588_v11  ;;  %v4602_v28 = vshll.u32 %v9207_v39, 16  ;;  %v9257_v11 = vld [vmem:[%s10075_s1 + $0x70] sm:$0xff]  }
 0x109   :  { %v4846_v58 = vrot.slane %v8978_v4, 1  ;;  %v8217_v4 = vld [vmem:[%s10075_s1 + $0x68] sm:$0xff]   ;;  %v1691_v13 = vrot.slane %v9044_v30, 1  ;;  %v1705_v14 = vrot.slane %v9196_v55, 1  ;;  %v8219_v55 = vld [vmem:[%s10076_s0 + $0xa0] sm:$0xff]  }
 0x10a   :  { %v4597_v29 = vsel %vm125_vm0, %v4592_v48, %v4596_v60  ;;  %v1437_v32 = vor.u32 %v1435_v20, %v1433_v24  ;;  %v4604_v45 = vrot.slane %v4602_v28, 1  ;;  %v1687_v24 = vrot.slane %v9001_v10, 1  ;;  %v9268_v10 = vld [vmem:[%s10075_s1 + $0x70] sm:$0xff]  }
 0x10b   :  { %v4852_v48 = vrot.slane %v9055_v56, 1  ;;  %v4854_v20 = vrot.slane %v9065_v2, 1  ;;  %v4856_v56 = vrot.slane %v9099_v54, 1  ;;  %v1699_v28 = vrot.slane %v9129_v17, 1 }
 0x10c   :  { %v4860_v54 = vrot.slane %v9135_v57, 1  ;;  %v1701_v17 = vrot.slane %v9156_v19, 1  ;;  %v4864_v57 = vrot.slane %v9171_v31, 1  ;;  %v4868_v31 = vrot.slane %v9207_v39, 1  ;;  %v8220_v39 = vld [vmem:[%s10076_s0 + $0x18] sm:$0xff]  }
 0x10d   :  { %7223 = vmatmul.mubr.msk.bf16.gmra.mrb[16].mxu0 %vm254_vm1, %v1410_v34  ;;  %v1441_v34 = vrot.slane %v1439_v37, 1  ;;  %v4855_v30 = vsel %vm635_vm2, %v4852_v48, %v4854_v20  ;;  %v1706_v40 = vsel %vm635_vm2, %v1703_v35, %v1705_v14  ;;  %v8249_v14 = vld [vmem:[%s10076_s0 + $0x108] sm:$0xff]  }
 0x10e   :  { %7226 = vmatprep.mubr.msk.bf16.mxu0 %vm254_vm1, %v1418_v49  ;;  %v4600_v49 = vor.u32 %v4598_v27, %v4596_v60  ;;  %v4857_v27 = vsel %vm635_vm2, %v4854_v20, %v4856_v56  ;;  %v4867_v19 = vsel %vm635_vm2, %v4864_v57, %v4866_v41  ;;  %v9460_v20 = vld [vmem:[%s10076_s0 + $0x18] sm:$0xff]  }
 0x10f   :  { %7511 = vmatmul.mubr.msk.bf16.gmra.mrb[16].mxu1 %vm254_vm1, %v4573_v3  ;;  %v1442_v46 = vsel %vm125_vm0, %v1437_v32, %v1441_v34  ;;  %v4842_v3 = vrot.slane %v8941_v51, 1  ;;  %v4844_v51 = vrot.slane %v8967_v63, 1  ;;  %v1685_v63 = vrot.slane %v8992_v8, 1 }
 0x110   :  { %7514 = vmatprep.mubr.msk.bf16.mxu1 %vm254_vm1, %v4581_v53  ;;  %v4605_v42 = vsel %vm125_vm0, %v4600_v49, %v4604_v45  ;;  %v1682_v53 = vsel %vm635_vm2, %v1679_v61, %v1681_v52  ;;  %v1700_v32 = vsel %vm635_vm2, %v1697_v7, %v1699_v28  ;;  %v4861_v34 = vsel %vm635_vm2, %v4858_v22, %v4860_v54  ;;  %v8218_v45 = vld [vmem:[%s10076_s0 + $0x10] sm:$0xff]   ;;  %v9365_v52 = vld [vmem:[%s10075_s1 + $0x80] sm:$0xff]  }
 0x111   :  { %v4843_v47 = vsel %vm635_vm2, %v4841_v50, %v4842_v3  ;;  %v4845_v33 = vsel %vm635_vm2, %v4842_v3, %v4844_v51  ;;  %v4847_v62 = vsel %vm635_vm2, %v4844_v51, %v4846_v58  ;;  %v1686_v8 = vsel %vm635_vm2, %v1683_v5, %v1685_v63  ;;  %v8223_v50 = vld [vmem:[%s10076_s0 + $0x20] sm:$0xff]   ;;  %v8236_v3 = vld [vmem:[%s10075_s1 + $0x78] sm:$0xff]   ;;  %v8225_v5 = vld [vmem:[%s10076_s0 + $0x28] sm:$0xff]  }
 0x112   :  { %v1704_v61 = vsel %vm635_vm2, %v1701_v17, %v1703_v35  ;;  %v8228_v51 = vld [vmem:[%s10076_s0 + $0x30] sm:$0xff]   ;;  %v2381_v35 = vshrl.u32 %v9460_v20, 16 }
 0x115   :  { %7227 = vmatmul.mubr.msk.bf16.gmra.mrb[20].mxu0 %vm254_vm1, %v1426_v12  ;;  %v1688_v12 = vsel %vm635_vm2, %v1685_v63, %v1687_v24  ;;  %v8233_v63 = vld [vmem:[%s10076_s0 + $0xd0] sm:$0xff]  }
 0x116   :  { %7230 = vmatprep.mubr.msk.bf16.mxu0 %vm254_vm1, %v1434_v6  ;;  %v1693_v6 = vrot.slane %v9083_v44, 1  ;;  %v4859_v44 = vsel %vm635_vm2, %v4856_v56, %v4858_v22  ;;  %v2377_v22 = vshll.u32 %v9460_v20, 16 }
 0x117   :  { %7515 = vmatmul.mubr.msk.bf16.gmra.mrb[20].mxu1 %vm254_vm1, %v4589_v25 }
 0x118   :  { %7518 = vmatprep.mubr.msk.bf16.mxu1 %vm254_vm1, %v4597_v29  ;;  %v1694_v2 = vsel %vm635_vm2, %v1691_v13, %v1693_v6  ;;  %v1696_v25 = vsel %vm635_vm2, %v1693_v6, %v1695_v16  ;;  %v4862_v29 = vrot.slane %v9144_v0, 1  ;;  %v1702_v0 = vsel %vm635_vm2, %v1699_v28, %v1701_v17  ;;  %v9473_v6 = vld [vmem:[%s10076_s0 + $0xa8] sm:$0xff]  }
 0x11a   :  { %v4863_v1 = vsel %vm635_vm2, %v4860_v54, %v4862_v29  ;;  %v4865_v49 = vsel %vm635_vm2, %v4862_v29, %v4864_v57  ;;  %v5540_v54 = vshll.u32 %v9473_v6, 16  ;;  %v2379_v29 = vrot.slane %v2377_v22, 1  ;;  %v9582_v22 = vld [vmem:[%s10076_s0 + $0xd0] sm:$0xff]  }
 0x11d   :  { %7231 = vmatmul.mubr.msk.bf16.gmra.mrb[24].mxu0 %vm254_vm1, %v1442_v46  ;;  %v4869_v46 = vsel %vm635_vm2, %v4866_v41, %v4868_v31  ;;  %v9510_v41 = vld [vmem:[%s10076_s0 + $0xb8] sm:$0xff]  }
 0x11e   :  { %7238 = vmatprep.mubr.msk.bf16.mxu0 %vm254_vm1, %v1680_v18  ;;  %v8222_v18 = vld [vmem:[%s10076_s0 + $0xa8] sm:$0xff]  }
 0x11f   :  { %7519 = vmatmul.mubr.msk.bf16.gmra.mrb[24].mxu1 %vm254_vm1, %v4605_v42  ;;  %v8224_v42 = vld [vmem:[%s10076_s0 + $0xb0] sm:$0xff]  }
 0x120   :  { %7526 = vmatprep.mubr.msk.bf16.mxu1 %vm254_vm1, %v4843_v47  ;;  %v8241_v47 = vld [vmem:[%s10075_s1 + $0x78] sm:$0xff]  }
 0x125   :  { %7239 = vmatmul.mubr.msk.bf16.vlgmr.msra.gmra.mrb[0].mxu0 %vm254_vm1, %v1682_v53  ;;  %v9379_v53 = vld [vmem:[%s10075_s1 + $0x80] sm:$0xff]  }
 0x126   :  { %7267 = vmatpush3.bf16.msra.mxu0 %v9049_v21  ;;  %7242 = vmatprep.mubr.msk.bf16.mxu0 %vm254_vm1, %v1684_v38  ;;  %v4848_v21 = vrot.slane %v9007_v9, 1  ;;  %v8229_v38 = vld [vmem:[%s10076_s0 + $0xc0] sm:$0xff]  }
 0x127   :  { %7268 = vmatprep.subr.bf16.mxu0 %v8216_v59  ;;  %7527 = vmatmul.mubr.msk.bf16.vlgmr.msra.gmra.mrb[0].mxu1 %vm254_vm1, %v4845_v33  ;;  %v8232_v33 = vld [vmem:[%s10076_s0 + $0x40] sm:$0xff]  }
 0x128   :  { %7530 = vmatprep.mubr.msk.bf16.mxu1 %vm254_vm1, %v4847_v62  ;;  %7555 = vmatpush3.bf16.msra.mxu1 %v9070_v23  ;;  %v4849_v9 = vsel %vm635_vm2, %v4846_v58, %v4848_v21  ;;  %v4851_v15 = vsel %vm635_vm2, %v4848_v21, %v4850_v26  ;;  %v1689_v23 = vrot.slane %v9031_v43, 1  ;;  %v4853_v43 = vsel %vm635_vm2, %v4850_v26, %v4852_v48  ;;  %v8226_v58 = vld [vmem:[%s10076_s0 + $0xb8] sm:$0xff]   ;;  %v8231_v62 = vld [vmem:[%s10076_s0 + $0xc8] sm:$0xff]   ;;  %v8238_v21 = vld [vmem:[%s10076_s0 + $0xe0] sm:$0xff]  }
 0x129   :  { %7556 = vmatprep.subr.bf16.mxu1 %v8217_v4  ;;  %v9430_v26 = vld [vmem:[%s10076_s0 + $0x14] sm:$0xf] }
 0x12a   :  { %7269 = vmatpush3.bf16.msra.mxu0 %v8216_v59  ;;  %v1690_v60 = vsel %vm635_vm2, %v1687_v24, %v1689_v23  ;;  %v1692_v37 = vsel %vm635_vm2, %v1689_v23, %v1691_v13  ;;  %v8230_v59 = vld [vmem:[%s10076_s0 + $0x38] sm:$0xff]   ;;  %v8237_v24 = vld [vmem:[%s10076_s0 + $0x50] sm:$0xff]   ;;  %v9446_v23 = vld [vmem:[%s10076_s0 + $0xa4] sm:$0xf] }
 0x12b   :  { %7298 = vmatprep.subr.bf16.mxu0 %v9257_v11  ;;  %v8240_v13 = vld [vmem:[%s10076_s0 + $0xe8] sm:$0xff]   ;;  %v8243_v48 = vld [vmem:[%s10076_s0 + $0xf0] sm:$0xff]  }
 0x12c   :  { %7557 = vmatpush3.bf16.msra.mxu1 %v8217_v4  ;;  %v8234_v4 = vld [vmem:[%s10076_s0 + $0x48] sm:$0xff]  }
 0x12d   :  { %7243 = vmatmul.mubr.msk.bf16.gmra.mrb[4].mxu0 %vm254_vm1, %v1686_v8  ;;  %7586 = vmatprep.subr.bf16.mxu1 %v9268_v10  ;;  %v2263_v8 = vld [vmem:[%s10076_s0 + $0x10] sm:$0xf] }
 0x12e   :  { %7246 = vmatprep.mubr.msk.bf16.mxu0 %vm254_vm1, %v1688_v12  ;;  %v8242_v12 = vld [vmem:[%s10076_s0 + $0x60] sm:$0xff]  }
 0x12f   :  { %7531 = vmatmul.mubr.msk.bf16.gmra.mrb[4].mxu1 %vm254_vm1, %v4849_v9  ;;  %v6490_v9 = vcombine.low %v2263_v8, %v9430_v26  ;;  %v8270_v8 = vld [vmem:[%s10075_s1 + $0x88] sm:$0xff]  }
 0x130   :  { %7534 = vmatprep.mubr.msk.bf16.mxu1 %vm254_vm1, %v4851_v15  ;;  %v5426_v15 = vld [vmem:[%s10076_s0 + $0xa0] sm:$0xf] }
 0x131   :  { %v2370_v56 = vshrl.u32 %v6490_v9, 16 }
 0x135   :  { %7247 = vmatmul.mubr.msk.bf16.gmra.mrb[8].mxu0 %vm254_vm1, %v1690_v60  ;;  %v6723_v60 = vcombine.low %v5426_v15, %v9446_v23  ;;  %v5560_v15 = vshrl.u32 %v9510_v41, 16 }
 0x136   :  { %7250 = vmatprep.mubr.msk.bf16.mxu0 %vm254_vm1, %v1692_v37  ;;  %v2372_v37 = vshll.u32 %v6490_v9, 16 }
 0x137   :  { %7535 = vmatmul.mubr.msk.bf16.gmra.mrb[8].mxu1 %vm254_vm1, %v4853_v43  ;;  %v8244_v43 = vld [vmem:[%s10076_s0 + $0x68] sm:$0xff]   ;;  %v5535_v16 = vshll.u32 %v6723_v60, 16  ;;  %v5533_v7 = vshrl.u32 %v6723_v60, 16 }
 0x138   :  { %7538 = vmatprep.mubr.msk.bf16.mxu1 %vm254_vm1, %v4855_v30  ;;  %v8246_v30 = vld [vmem:[%s10076_s0 + $0x70] sm:$0xff]  }
 0x139   :  { %v5537_v28 = vrot.slane %v5535_v16, 1 }
 0x13b   :  { %v5538_v57 = vor.u32 %v5537_v28, %v5533_v7 }
 0x13d   :  { %7251 = vmatmul.mubr.msk.bf16.gmra.mrb[12].mxu0 %vm254_vm1, %v1694_v2  ;;  %v2374_v2 = vrot.slane %v2372_v37, 1 }
 0x13e   :  { %7254 = vmatprep.mubr.msk.bf16.mxu0 %vm254_vm1, %v1696_v25  ;;  %v8245_v25 = vld [vmem:[%s10076_s0 + $0xf8] sm:$0xff]  }
 0x13f   :  { %7539 = vmatmul.mubr.msk.bf16.gmra.mrb[12].mxu1 %vm254_vm1, %v4857_v27  ;;  %v8247_v27 = vld [vmem:[%s10076_s0 + $0x100] sm:$0xff]  }
 0x140   :  { %7542 = vmatprep.mubr.msk.bf16.mxu1 %vm254_vm1, %v4859_v44  ;;  %v9486_v44 = vld [vmem:[%s10076_s0 + $0x20] sm:$0xff]  }
 0x141   :  { %v2385_v17 = vshll.u32 %v9486_v44, 16 }
 0x145   :  { %7255 = vmatmul.mubr.msk.bf16.gmra.mrb[16].mxu0 %vm254_vm1, %v1698_v36  ;;  %v2375_v36 = vor.u32 %v2374_v2, %v2370_v56  ;;  %v9576_v2 = vld [vmem:[%s10076_s0 + $0x48] sm:$0xff]  }
 0x146   :  { %7258 = vmatprep.mubr.msk.bf16.mxu0 %vm254_vm1, %v1700_v32  ;;  %v9493_v32 = vld [vmem:[%s10076_s0 + $0x28] sm:$0xff]  }
 0x147   :  { %7543 = vmatmul.mubr.msk.bf16.gmra.mrb[16].mxu1 %vm254_vm1, %v4861_v34  ;;  %v9499_v34 = vld [vmem:[%s10076_s0 + $0xb0] sm:$0xff]  }
 0x148   :  { %7546 = vmatprep.mubr.msk.bf16.mxu1 %vm254_vm1, %v4863_v1  ;;  %v8248_v1 = vld [vmem:[%s10076_s0 + $0x78] sm:$0xff]   ;;  %v5548_v31 = vshll.u32 %v9499_v34, 16 }
 0x14d   :  { %7259 = vmatmul.mubr.msk.bf16.gmra.mrb[20].mxu0 %vm254_vm1, %v1702_v0  ;;  %v5542_v0 = vrot.slane %v5540_v54, 1 }
 0x14e   :  { %7262 = vmatprep.mubr.msk.bf16.mxu0 %vm254_vm1, %v1704_v61  ;;  %v2380_v61 = vsel %vm125_vm0, %v2375_v36, %v2379_v29 }
 0x14f   :  { %7547 = vmatmul.mubr.msk.bf16.gmra.mrb[20].mxu1 %vm254_vm1, %v4865_v49  ;;  %v2389_v49 = vshrl.u32 %v9486_v44, 16 }
 0x150   :  { %7550 = vmatprep.mubr.msk.bf16.mxu1 %vm254_vm1, %v4867_v19  ;;  %v2393_v19 = vshll.u32 %v9493_v32, 16 }
 0x155   :  { %7263 = vmatmul.mubr.msk.bf16.gmra.mrb[24].mxu0 %vm254_vm1, %v1706_v40  ;;  %v5544_v40 = vshrl.u32 %v9473_v6, 16 }
 0x156   :  { %7270 = vmatprep.mubr.msk.bf16.mxu0 %vm254_vm1, %v8218_v45  ;;  %v2387_v45 = vrot.slane %v2385_v17, 1 }
 0x157   :  { %7551 = vmatmul.mubr.msk.bf16.gmra.mrb[24].mxu1 %vm254_vm1, %v4869_v46  ;;  %v9524_v46 = vld [vmem:[%s10076_s0 + $0x30] sm:$0xff]  }
 0x158   :  { %7558 = vmatprep.mubr.msk.bf16.mxu1 %vm254_vm1, %v8219_v55  ;;  %v2383_v55 = vor.u32 %v2381_v35, %v2379_v29  ;;  %v9592_v29 = vld [vmem:[%s10076_s0 + $0xd8] sm:$0xff]   ;;  %v5580_v35 = vshll.u32 %v9582_v22, 16 }
 0x15d   :  { %7271 = vmatmul.mubr.msk.bf16.vlgmr.msra.gmra.mrb[0].mxu0 %vm254_vm1, %v8220_v39  ;;  %v5543_v39 = vsel %vm125_vm0, %v5538_v57, %v5542_v0 }
 0x15e   :  { %7299 = vmatpush3.bf16.msra.mxu0 %v9257_v11  ;;  %7274 = vmatprep.mubr.msk.bf16.mxu0 %vm254_vm1, %v8223_v50  ;;  %v8235_v11 = vld [vmem:[%s10076_s0 + $0xd8] sm:$0xff]   ;;  %v5552_v50 = vshrl.u32 %v9499_v34, 16 }
 0x15f   :  { %7300 = vmatprep.subr.bf16.mxu0 %v8236_v3  ;;  %7559 = vmatmul.mubr.msk.bf16.vlgmr.msra.gmra.mrb[0].mxu1 %vm254_vm1, %v8222_v18  ;;  %v2391_v18 = vor.u32 %v2389_v49, %v2387_v45  ;;  %v9604_v49 = vld [vmem:[%s10076_s0 + $0x50] sm:$0xff]  }
 0x160   :  { %7562 = vmatprep.mubr.msk.bf16.mxu1 %vm254_vm1, %v8224_v42  ;;  %7587 = vmatpush3.bf16.msra.mxu1 %v9268_v10  ;;  %v8239_v10 = vld [vmem:[%s10076_s0 + $0x58] sm:$0xff]   ;;  %v2395_v42 = vrot.slane %v2393_v19, 1 }
 0x161   :  { %7588 = vmatprep.subr.bf16.mxu1 %v8241_v47 }
 0x162   :  { %7301 = vmatpush3.bf16.msra.mxu0 %v8236_v3  ;;  %v5556_v3 = vshll.u32 %v9510_v41, 16 }
 0x163   :  { %7330 = vmatprep.subr.bf16.mxu0 %v9365_v52 }
 0x164   :  { %7589 = vmatpush3.bf16.msra.mxu1 %v8241_v47  ;;  %v9533_v47 = vld [vmem:[%s10076_s0 + $0x38] sm:$0xff]  }
 0x165   :  { %7275 = vmatmul.mubr.msk.bf16.gmra.mrb[4].mxu0 %vm254_vm1, %v8225_v5  ;;  %7618 = vmatprep.subr.bf16.mxu1 %v9379_v53  ;;  %v5550_v5 = vrot.slane %v5548_v31, 1  ;;  %v2413_v36 = vshrl.u32 %v9533_v47, 16  ;;  %v5584_v31 = vshrl.u32 %v9582_v22, 16 }
 0x166   :  { %7278 = vmatprep.mubr.msk.bf16.mxu0 %vm254_vm1, %v8228_v51  ;;  %v9539_v51 = vld [vmem:[%s10076_s0 + $0xc0] sm:$0xff]  }
 0x167   :  { %7563 = vmatmul.mubr.msk.bf16.gmra.mrb[4].mxu1 %vm254_vm1, %v8226_v58  ;;  %v5546_v58 = vor.u32 %v5544_v40, %v5542_v0  ;;  %v5568_v37 = vshrl.u32 %v9539_v51, 16  ;;  %v5588_v40 = vshll.u32 %v9592_v29, 16 }
 0x168   :  { %7566 = vmatprep.mubr.msk.bf16.mxu1 %vm254_vm1, %v8229_v38  ;;  %v2401_v38 = vshll.u32 %v9524_v46, 16 }
 0x16a   :  { %v2403_v9 = vrot.slane %v2401_v38, 1  ;;  %v5590_v38 = vrot.slane %v5588_v40, 1 }
 0x16d   :  { %7279 = vmatmul.mubr.msk.bf16.gmra.mrb[8].mxu0 %vm254_vm1, %v8230_v59  ;;  %v2388_v59 = vsel %vm125_vm0, %v2383_v55, %v2387_v45 }
 0x16e   :  { %7282 = vmatprep.mubr.msk.bf16.mxu0 %vm254_vm1, %v8232_v33  ;;  %v5554_v33 = vor.u32 %v5552_v50, %v5550_v5  ;;  %v5582_v50 = vrot.slane %v5580_v35, 1 }
 0x16f   :  { %7567 = vmatmul.mubr.msk.bf16.gmra.mrb[8].mxu1 %vm254_vm1, %v8231_v62  ;;  %v5558_v62 = vrot.slane %v5556_v3, 1  ;;  %v9619_v3 = vld [vmem:[%s10076_s0 + $0xe0] sm:$0xff]  }
 0x170   :  { %7570 = vmatprep.mubr.msk.bf16.mxu1 %vm254_vm1, %v8233_v63  ;;  %v2397_v63 = vshrl.u32 %v9493_v32, 16 }
 0x172   :  { %v2399_v60 = vor.u32 %v2397_v63, %v2395_v42  ;;  %v2437_v63 = vshrl.u32 %v9604_v49, 16 }
 0x174   :  { %v2404_v7 = vsel %vm125_vm0, %v2399_v60, %v2403_v9 }
 0x175   :  { %7283 = vmatmul.mubr.msk.bf16.gmra.mrb[12].mxu0 %vm254_vm1, %v8234_v4  ;;  %v9548_v4 = vld [vmem:[%s10076_s0 + $0xc8] sm:$0xff]  }
 0x176   :  { %7286 = vmatprep.mubr.msk.bf16.mxu0 %vm254_vm1, %v8237_v24  ;;  %v2396_v24 = vsel %vm125_vm0, %v2391_v18, %v2395_v42  ;;  %v2433_v42 = vshll.u32 %v9604_v49, 16 }
 0x177   :  { %7571 = vmatmul.mubr.msk.bf16.gmra.mrb[12].mxu1 %vm254_vm1, %v8235_v11  ;;  %v2405_v11 = vshrl.u32 %v9524_v46, 16 }
 0x178   :  { %7574 = vmatprep.mubr.msk.bf16.mxu1 %vm254_vm1, %v8238_v21  ;;  %v2409_v21 = vshll.u32 %v9533_v47, 16 }
 0x179   :  { %v2407_v16 = vor.u32 %v2405_v11, %v2403_v9  ;;  %v5596_v11 = vshll.u32 %v9619_v3, 16 }
 0x17a   :  { %v2411_v56 = vrot.slane %v2409_v21, 1 }
 0x17d   :  { %7287 = vmatmul.mubr.msk.bf16.gmra.mrb[16].mxu0 %vm254_vm1, %v8239_v10  ;;  %v5564_v10 = vshll.u32 %v9539_v51, 16 }
 0x17e   :  { %7290 = vmatprep.mubr.msk.bf16.mxu0 %vm254_vm1, %v8242_v12  ;;  %v5551_v12 = vsel %vm125_vm0, %v5546_v58, %v5550_v5  ;;  %v5586_v58 = vor.u32 %v5584_v31, %v5582_v50 }
 0x17f   :  { %7575 = vmatmul.mubr.msk.bf16.gmra.mrb[16].mxu1 %vm254_vm1, %v8240_v13  ;;  %v9563_v13 = vld [vmem:[%s10076_s0 + $0x40] sm:$0xff]  }
 0x180   :  { %7578 = vmatprep.mubr.msk.bf16.mxu1 %vm254_vm1, %v8243_v48  ;;  %v5559_v48 = vsel %vm125_vm0, %v5554_v33, %v5558_v62  ;;  %v2421_v17 = vshrl.u32 %v9563_v13, 16  ;;  %v9628_v33 = vld [vmem:[%s10076_s0 + $0xe8] sm:$0xff]   ;;  %v5591_v9 = vsel %vm125_vm0, %v5586_v58, %v5590_v38 }
 0x181   :  { %v5604_v60 = vshll.u32 %v9628_v33, 16 }
 0x185   :  { %7291 = vmatmul.mubr.msk.bf16.gmra.mrb[20].mxu0 %vm254_vm1, %v8244_v43  ;;  %v5572_v43 = vshll.u32 %v9548_v4, 16 }
 0x186   :  { %7294 = vmatprep.mubr.msk.bf16.mxu0 %vm254_vm1, %v8246_v30  ;;  %v8275_v30 = vld [vmem:[%s10075_s1 + $0x88] sm:$0xff]  }
 0x187   :  { %7579 = vmatmul.mubr.msk.bf16.gmra.mrb[20].mxu1 %vm254_vm1, %v8245_v25  ;;  %v5562_v25 = vor.u32 %v5560_v15, %v5558_v62  ;;  %v5574_v54 = vrot.slane %v5572_v43, 1 }
 0x188   :  { %7582 = vmatprep.mubr.msk.bf16.mxu1 %vm254_vm1, %v8247_v27  ;;  %v2417_v27 = vshll.u32 %v9563_v13, 16 }
 0x18a   :  { %v2419_v0 = vrot.slane %v2417_v27, 1 }
 0x18c   :  { %v2423_v45 = vor.u32 %v2421_v17, %v2419_v0 }
 0x18d   :  { %7295 = vmatmul.mubr.msk.bf16.gmra.mrb[24].mxu0 %vm254_vm1, %v8248_v1  ;;  %v2412_v1 = vsel %vm125_vm0, %v2407_v16, %v2411_v56  ;;  %v5598_v16 = vrot.slane %v5596_v11, 1  ;;  %v9700_v11 = vld [vmem:[%s10076_s0 + $0x108] sm:$0xff]  }
 0x18e   :  { %7302 = vmatprep.mubr.msk.bf16.mxu0 %vm254_vm1, %v2380_v61  ;;  %v5576_v61 = vshrl.u32 %v9548_v4, 16 }
 0x18f   :  { %7583 = vmatmul.mubr.msk.bf16.gmra.mrb[24].mxu1 %vm254_vm1, %v8249_v14  ;;  %v2415_v14 = vor.u32 %v2413_v36, %v2411_v56  ;;  %v9655_v56 = vld [vmem:[%s10076_s0 + $0xf0] sm:$0xff]   ;;  %v9664_v36 = vld [vmem:[%s10076_s0 + $0xf8] sm:$0xff]  }
 0x190   :  { %7590 = vmatprep.mubr.msk.bf16.mxu1 %vm254_vm1, %v5543_v39  ;;  %v9613_v39 = vld [vmem:[%s10076_s0 + $0x58] sm:$0xff]   ;;  %v5578_v18 = vor.u32 %v5576_v61, %v5574_v54  ;;  %v5612_v35 = vshll.u32 %v9655_v56, 16  ;;  %v5608_v61 = vshrl.u32 %v9628_v33, 16  ;;  %v5616_v40 = vshrl.u32 %v9655_v56, 16 }
 0x191   :  { %v2420_v5 = vsel %vm125_vm0, %v2415_v14, %v2419_v0 }
 0x192   :  { %v5583_v21 = vsel %vm125_vm0, %v5578_v18, %v5582_v50  ;;  %v9685_v18 = vld [vmem:[%s10076_s0 + $0x78] sm:$0xff]  }
 0x195   :  { %7303 = vmatmul.mubr.msk.bf16.vlgmr.msra.gmra.mrb[0].mxu0 %vm254_vm1, %v2388_v59  ;;  %v2429_v59 = vshrl.u32 %v9576_v2, 16 }
 0x196   :  { %7331 = vmatpush3.bf16.msra.mxu0 %v9365_v52  ;;  %7306 = vmatprep.mubr.msk.bf16.mxu0 %vm254_vm1, %v2396_v24  ;;  %v5566_v52 = vrot.slane %v5564_v10, 1  ;;  %v2441_v24 = vshll.u32 %v9613_v39, 16  ;;  %v5592_v10 = vshrl.u32 %v9592_v29, 16 }
 0x197   :  { %7332 = vmatprep.subr.bf16.mxu0 %v8270_v8  ;;  %7591 = vmatmul.mubr.msk.bf16.vlgmr.msra.gmra.mrb[0].mxu1 %vm254_vm1, %v5551_v12  ;;  %v9640_v12 = vld [vmem:[%s10076_s0 + $0x60] sm:$0xff]  }
 0x198   :  { %7594 = vmatprep.mubr.msk.bf16.mxu1 %vm254_vm1, %v5559_v48  ;;  %7619 = vmatpush3.bf16.msra.mxu1 %v9379_v53  ;;  %v5570_v28 = vor.u32 %v5568_v37, %v5566_v52  ;;  %v2425_v53 = vshll.u32 %v9576_v2, 16  ;;  %v5567_v57 = vsel %vm125_vm0, %v5562_v25, %v5566_v52  ;;  %v5600_v48 = vshrl.u32 %v9619_v3, 16 }
 0x199   :  { %7620 = vmatprep.subr.bf16.mxu1 %v8275_v30  ;;  %v2443_v43 = vrot.slane %v2441_v24, 1  ;;  %v5594_v52 = vor.u32 %v5592_v10, %v5590_v38  ;;  %v2449_v25 = vshll.u32 %v9640_v12, 16  ;;  %v2453_v17 = vshrl.u32 %v9640_v12, 16 }
 0x19a   :  { %7333 = vmatpush3.bf16.msra.mxu0 %v8270_v8  ;;  %v5575_v19 = vsel %vm125_vm0, %v5570_v28, %v5574_v54  ;;  %v2427_v55 = vrot.slane %v2425_v53, 1  ;;  %v2435_v8 = vrot.slane %v2433_v42, 1  ;;  %v5606_v28 = vrot.slane %v5604_v60, 1 }
 0x19b   :  { %v2445_v54 = vshrl.u32 %v9613_v39, 16  ;;  %v2451_v0 = vrot.slane %v2449_v25, 1  ;;  %v5614_v42 = vrot.slane %v5612_v35, 1  ;;  %v2473_v10 = vshll.u32 %v9685_v18, 16 }
 0x19c   :  { %7621 = vmatpush3.bf16.msra.mxu1 %v8275_v30  ;;  %v2428_v62 = vsel %vm125_vm0, %v2423_v45, %v2427_v55  ;;  %v2431_v15 = vor.u32 %v2429_v59, %v2427_v55  ;;  %v2439_v37 = vor.u32 %v2437_v63, %v2435_v8  ;;  %v9649_v30 = vld [vmem:[%s10076_s0 + $0x68] sm:$0xff]   ;;  %v5620_v45 = vshll.u32 %v9664_v36, 16  ;;  %v9716_v25 = vld [vmem:[%s10076_s0 + $0x80] ss:$0 sps:$4 sm:$0x11]  }
 0x19d   :  { %7307 = vmatmul.mubr.msk.bf16.gmra.mrb[4].mxu0 %vm254_vm1, %v2404_v7  ;;  %v5602_v7 = vor.u32 %v5600_v48, %v5598_v16  ;;  %v2457_v53 = vshll.u32 %v9649_v30, 16  ;;  %v2447_v31 = vor.u32 %v2445_v54, %v2443_v43  ;;  %v2455_v55 = vor.u32 %v2453_v17, %v2451_v0  ;;  %v2712_v54 = vld [vmem:[%s10076_s0 + $0x10] sm:$0xe] }
 0x19e   :  { %7310 = vmatprep.mubr.msk.bf16.mxu0 %vm254_vm1, %v2412_v1  ;;  %v2436_v27 = vsel %vm125_vm0, %v2431_v15, %v2435_v8  ;;  %v2444_v1 = vsel %vm125_vm0, %v2439_v37, %v2443_v43  ;;  %v5610_v58 = vor.u32 %v5608_v61, %v5606_v28  ;;  %v2461_v38 = vshrl.u32 %v9649_v30, 16 }
 0x19f   :  { %7595 = vmatmul.mubr.msk.bf16.gmra.mrb[4].mxu1 %vm254_vm1, %v5567_v57  ;;  %v5599_v57 = vsel %vm125_vm0, %v5594_v52, %v5598_v16  ;;  %v5607_v14 = vsel %vm125_vm0, %v5602_v7, %v5606_v28  ;;  %v2459_v50 = vrot.slane %v2457_v53, 1  ;;  %v5618_v63 = vor.u32 %v5616_v40, %v5614_v42  ;;  %v9727_v53 = vld [vmem:[%s10076_s0 + $0x110] ss:$0 sps:$4 sm:$0x11]   ;;  %v5875_v40 = vld [vmem:[%s10076_s0 + $0xa0] sm:$0xe] }
 0x1a0   :  { %7598 = vmatprep.mubr.msk.bf16.mxu1 %vm254_vm1, %v5575_v19  ;;  %v9676_v19 = vld [vmem:[%s10076_s0 + $0x70] sm:$0xff]   ;;  %v5622_v24 = vrot.slane %v5620_v45, 1  ;;  %v5615_v15 = vsel %vm125_vm0, %v5610_v58, %v5614_v42  ;;  %v5624_v37 = vshrl.u32 %v9664_v36, 16  ;;  %v5636_v52 = vshll.u32 %v9700_v11, 16 }
 0x1a1   :  { %v2465_v59 = vshll.u32 %v9676_v19, 16  ;;  %v2469_v8 = vshrl.u32 %v9676_v19, 16  ;;  %v2463_v48 = vor.u32 %v2461_v38, %v2459_v50  ;;  %v2475_v7 = vrot.slane %v2473_v10, 1 }
 0x1a2   :  { %v5623_v43 = vsel %vm125_vm0, %v5618_v63, %v5622_v24  ;;  %v5626_v17 = vor.u32 %v5624_v37, %v5622_v24  ;;  %v2481_v61 = vshll.u32 %v9716_v25, 16  ;;  %v5884_v10 = vrot.slane %v9473_v6, 1 }
 0x1a3   :  { %v2467_v60 = vrot.slane %v2465_v59, 1  ;;  %v5886_v6 = vrot.slane %v9499_v34, 1  ;;  %v5888_v37 = vrot.slane %v9510_v41, 1  ;;  %v5890_v34 = vrot.slane %v9539_v51, 1 }
 0x1a4   :  { %v2483_v38 = vrot.slane %v2481_v61, 1  ;;  %v5894_v51 = vrot.slane %v9582_v22, 1  ;;  %v5898_v22 = vrot.slane %v9619_v3, 1  ;;  %v5902_v3 = vrot.slane %v9655_v56, 1 }
 0x1a5   :  { %7311 = vmatmul.mubr.msk.bf16.gmra.mrb[8].mxu0 %vm254_vm1, %v2420_v5  ;;  %v9691_v5 = vld [vmem:[%s10076_s0 + $0x100] sm:$0xff]  }
 0x1a6   :  { %7314 = vmatprep.mubr.msk.bf16.mxu0 %vm254_vm1, %v2428_v62  ;;  %v2452_v62 = vsel %vm125_vm0, %v2447_v31, %v2451_v0  ;;  %v5632_v16 = vshrl.u32 %v9691_v5, 16  ;;  %v2477_v0 = vshrl.u32 %v9685_v18, 16  ;;  %v6521_v31 = vcombine.low %v2712_v54, %v9430_v26 }
 0x1a7   :  { %7599 = vmatmul.mubr.msk.bf16.gmra.mrb[8].mxu1 %vm254_vm1, %v5583_v21  ;;  %v2460_v21 = vsel %vm125_vm0, %v2455_v55, %v2459_v50  ;;  %v5640_v55 = vshrl.u32 %v9700_v11, 16  ;;  %v5644_v50 = vshll.u32 %v9727_v53, 16  ;;  %v6754_v26 = vcombine.low %v5875_v40, %v9446_v23 }
 0x1a8   :  { %7602 = vmatprep.mubr.msk.bf16.mxu1 %vm254_vm1, %v5591_v9  ;;  %v5628_v9 = vshll.u32 %v9691_v5, 16  ;;  %v2479_v58 = vor.u32 %v2477_v0, %v2475_v7  ;;  %v2720_v59 = vrot.slane %v6521_v31, 1  ;;  %v2733_v54 = vrot.slane %v9576_v2, 1 }
 0x1a9   :  { %v5646_v24 = vrot.slane %v5644_v50, 1  ;;  %v2735_v2 = vrot.slane %v9604_v49, 1  ;;  %v5900_v0 = vrot.slane %v9628_v33, 1  ;;  %v2741_v31 = vrot.slane %v9649_v30, 1 }
 0x1aa   :  { %v5630_v28 = vrot.slane %v5628_v9, 1  ;;  %v5904_v40 = vrot.slane %v9664_v36, 1  ;;  %v2743_v30 = vrot.slane %v9676_v19, 1  ;;  %v2745_v50 = vrot.slane %v9685_v18, 1 }
 0x1ab   :  { %v5901_v49 = vsel %vm635_vm2, %v5898_v22, %v5900_v0  ;;  %v5906_v56 = vrot.slane %v9691_v5, 1  ;;  %v2747_v18 = vrot.slane %v9716_v25, 1  ;;  %v5910_v5 = vrot.slane %v9727_v53, 1 }
 0x1ac   :  { %v5634_v35 = vor.u32 %v5632_v16, %v5630_v28  ;;  %v5631_v45 = vsel %vm125_vm0, %v5626_v17, %v5630_v28  ;;  %v5887_v16 = vsel %vm635_vm2, %v5884_v10, %v5886_v6  ;;  %v5891_v28 = vsel %vm635_vm2, %v5888_v37, %v5890_v34 }
 0x1ad   :  { %7315 = vmatmul.mubr.msk.bf16.gmra.mrb[12].mxu0 %vm254_vm1, %v2436_v27  ;;  %v2471_v27 = vor.u32 %v2469_v8, %v2467_v60  ;;  %v5883_v8 = vrot.slane %v6754_v26, 1  ;;  %v2744_v36 = vsel %vm635_vm2, %v2741_v31, %v2743_v30 }
 0x1ae   :  { %7318 = vmatprep.mubr.msk.bf16.mxu0 %vm254_vm1, %v2444_v1  ;;  %v2468_v1 = vsel %vm125_vm0, %v2463_v48, %v2467_v60  ;;  %v2725_v48 = vrot.slane %v9493_v32, 1  ;;  %v2727_v32 = vrot.slane %v9524_v46, 1 }
 0x1af   :  { %7603 = vmatmul.mubr.msk.bf16.gmra.mrb[12].mxu1 %vm254_vm1, %v5599_v57  ;;  %v5638_v57 = vrot.slane %v5636_v52, 1  ;;  %v2729_v52 = vrot.slane %v9533_v47, 1  ;;  %v2731_v47 = vrot.slane %v9563_v13, 1 }
 0x1b0   :  { %7606 = vmatprep.mubr.msk.bf16.mxu1 %vm254_vm1, %v5607_v14  ;;  %v2476_v14 = vsel %vm125_vm0, %v2471_v27, %v2475_v7  ;;  %v2728_v41 = vsel %vm635_vm2, %v2725_v48, %v2727_v32  ;;  %v5892_v27 = vrot.slane %v9548_v4, 1 }
 0x1b1   :  { %v5639_v42 = vsel %vm125_vm0, %v5634_v35, %v5638_v57  ;;  %v5642_v63 = vor.u32 %v5640_v55, %v5638_v57  ;;  %v2730_v7 = vsel %vm635_vm2, %v2727_v32, %v2729_v52  ;;  %v2732_v4 = vsel %vm635_vm2, %v2729_v52, %v2731_v47 }
 0x1b2   :  { %v5893_v46 = vsel %vm635_vm2, %v5890_v34, %v5892_v27  ;;  %v2734_v17 = vsel %vm635_vm2, %v2731_v47, %v2733_v54  ;;  %v5895_v35 = vsel %vm635_vm2, %v5892_v27, %v5894_v51  ;;  %v2737_v57 = vrot.slane %v9613_v39, 1 }
 0x1b3   :  { %v5647_v23 = vsel %vm125_vm0, %v5642_v63, %v5646_v24  ;;  %v2739_v39 = vrot.slane %v9640_v12, 1  ;;  %v5903_v55 = vsel %vm635_vm2, %v5900_v0, %v5902_v3  ;;  %v5905_v12 = vsel %vm635_vm2, %v5902_v3, %v5904_v40 }
 0x1b4   :  { %v2738_v61 = vsel %vm635_vm2, %v2735_v2, %v2737_v57 }
 0x1b5   :  { %7319 = vmatmul.mubr.msk.bf16.gmra.mrb[16].mxu0 %vm254_vm1, %v2452_v62  ;;  %v2721_v62 = vrot.slane %v9460_v20, 1  ;;  %v5885_v20 = vsel %vm635_vm2, %v5883_v8, %v5884_v10  ;;  %v2740_v33 = vsel %vm635_vm2, %v2737_v57, %v2739_v39 }
 0x1b6   :  { %7322 = vmatprep.mubr.msk.bf16.mxu0 %vm254_vm1, %v2460_v21  ;;  %v2484_v21 = vsel %vm125_vm0, %v2479_v58, %v2483_v38  ;;  %v2746_v58 = vsel %vm635_vm2, %v2743_v30, %v2745_v50  ;;  %v5907_v38 = vsel %vm635_vm2, %v5904_v40, %v5906_v56 }
 0x1b7   :  { %7607 = vmatmul.mubr.msk.bf16.gmra.mrb[16].mxu1 %vm254_vm1, %v5615_v15  ;;  %v2722_v9 = vsel %vm635_vm2, %v2720_v59, %v2721_v62  ;;  %v2723_v15 = vrot.slane %v9486_v44, 1  ;;  %v5889_v44 = vsel %vm635_vm2, %v5886_v6, %v5888_v37  ;;  %v9836_v59 = vld [vmem:[%s10077_s2] ss:$0 sm:$0xff] }
 0x1b8   :  { %7610 = vmatprep.mubr.msk.bf16.mxu1 %vm254_vm1, %v5623_v43 }
 0x1b9   :  { %v2724_v60 = vsel %vm635_vm2, %v2721_v62, %v2723_v15  ;;  %v2726_v43 = vsel %vm635_vm2, %v2723_v15, %v2725_v48 }
 0x1bd   :  { %7323 = vmatmul.mubr.msk.bf16.gmra.mrb[20].mxu0 %vm254_vm1, %v2468_v1  ;;  %v5896_v1 = vrot.slane %v9592_v29, 1  ;;  %v2736_v29 = vsel %vm635_vm2, %v2733_v54, %v2735_v2 }
 0x1be   :  { %7326 = vmatprep.mubr.msk.bf16.mxu0 %vm254_vm1, %v2476_v14 }
 0x1bf   :  { %7611 = vmatmul.mubr.msk.bf16.gmra.mrb[20].mxu1 %vm254_vm1, %v5631_v45  ;;  %v5897_v13 = vsel %vm635_vm2, %v5894_v51, %v5896_v1  ;;  %v5899_v14 = vsel %vm635_vm2, %v5896_v1, %v5898_v22  ;;  %v2742_v45 = vsel %vm635_vm2, %v2739_v39, %v2741_v31 }
 0x1c0   :  { %7614 = vmatprep.mubr.msk.bf16.mxu1 %vm254_vm1, %v5639_v42  ;;  %v5908_v42 = vrot.slane %v9700_v11, 1  ;;  %v2748_v11 = vsel %vm635_vm2, %v2745_v50, %v2747_v18 }
 0x1c2   :  { %v5909_v19 = vsel %vm635_vm2, %v5906_v56, %v5908_v42  ;;  %v5911_v26 = vsel %vm635_vm2, %v5908_v42, %v5910_v5  ;;  %v3082_v42 = vld [vmem:[%s10078_s3] sm:$0xf] }
 0x1c5   :  { %7327 = vmatmul.mubr.msk.bf16.gmra.mrb[24].mxu0 %vm254_vm1, %v2484_v21 }
 0x1c6   :  { %7334 = vmatprep.mubr.msk.bf16.mxu0 %vm254_vm1, %v2722_v9 }
 0x1c7   :  { %7615 = vmatmul.mubr.msk.bf16.gmra.mrb[24].mxu1 %vm254_vm1, %v5647_v23 }
 0x1c8   :  { %7622 = vmatprep.mubr.msk.bf16.mxu1 %vm254_vm1, %v5885_v20 }
 0x1cd   :  { %7335 = vmatmul.mubr.msk.bf16.vlgmr.msra.gmra.mrb[0].mxu0 %vm254_vm1, %v2724_v60 }
 0x1ce   :  { %7338 = vmatprep.mubr.msk.bf16.mxu0 %vm254_vm1, %v2726_v43 }
 0x1cf   :  { %7623 = vmatmul.mubr.msk.bf16.vlgmr.msra.gmra.mrb[0].mxu1 %vm254_vm1, %v5887_v16 }
 0x1d0   :  { %7626 = vmatprep.mubr.msk.bf16.mxu1 %vm254_vm1, %v5889_v44 }
 0x1d5   :  { %7339 = vmatmul.mubr.msk.bf16.gmra.mrb[4].mxu0 %vm254_vm1, %v2728_v41 }
 0x1d6   :  { %7342 = vmatprep.mubr.msk.bf16.mxu0 %vm254_vm1, %v2730_v7 }
 0x1d7   :  { %7627 = vmatmul.mubr.msk.bf16.gmra.mrb[4].mxu1 %vm254_vm1, %v5891_v28 }
 0x1d8   :  { %7630 = vmatprep.mubr.msk.bf16.mxu1 %vm254_vm1, %v5893_v46 }
 0x1dd   :  { %7343 = vmatmul.mubr.msk.bf16.gmra.mrb[8].mxu0 %vm254_vm1, %v2732_v4 }
 0x1de   :  { %7346 = vmatprep.mubr.msk.bf16.mxu0 %vm254_vm1, %v2734_v17 }
 0x1df   :  { %7631 = vmatmul.mubr.msk.bf16.gmra.mrb[8].mxu1 %vm254_vm1, %v5895_v35 }
 0x1e0   :  { %7634 = vmatprep.mubr.msk.bf16.mxu1 %vm254_vm1, %v5897_v13 }
 0x1e5   :  { %7347 = vmatmul.mubr.msk.bf16.gmra.mrb[12].mxu0 %vm254_vm1, %v2736_v29 }
 0x1e6   :  { %7350 = vmatprep.mubr.msk.bf16.mxu0 %vm254_vm1, %v2738_v61 }
 0x1e7   :  { %7635 = vmatmul.mubr.msk.bf16.gmra.mrb[12].mxu1 %vm254_vm1, %v5899_v14 }
 0x1e8   :  { %7638 = vmatprep.mubr.msk.bf16.mxu1 %vm254_vm1, %v5901_v49 }
 0x1ed   :  { %7351 = vmatmul.mubr.msk.bf16.gmra.mrb[16].mxu0 %vm254_vm1, %v2740_v33 }
 0x1ee   :  { %7354 = vmatprep.mubr.msk.bf16.mxu0 %vm254_vm1, %v2742_v45 }
 0x1ef   :  { %7639 = vmatmul.mubr.msk.bf16.gmra.mrb[16].mxu1 %vm254_vm1, %v5903_v55 }
 0x1f0   :  { %7642 = vmatprep.mubr.msk.bf16.mxu1 %vm254_vm1, %v5905_v12 }
 0x1f5   :  { %7355 = vmatmul.mubr.msk.bf16.gmra.mrb[20].mxu0 %vm254_vm1, %v2744_v36 }
 0x1f6   :  { %7358 = vmatprep.mubr.msk.bf16.mxu0 %vm254_vm1, %v2746_v58 }
 0x1f7   :  { %7643 = vmatmul.mubr.msk.bf16.gmra.mrb[20].mxu1 %vm254_vm1, %v5907_v38 }
 0x1f8   :  { %7646 = vmatprep.mubr.msk.bf16.mxu1 %vm254_vm1, %v5909_v19 }
 0x1fd   :  { %7359 = vmatmul.mubr.msk.bf16.gmra.mrb[24].mxu0 %vm254_vm1, %v2748_v11 }
 0x1ff   :  { %7647 = vmatmul.mubr.msk.bf16.gmra.mrb[24].mxu1 %vm254_vm1, %v5911_v26 }
 0x2a0   :  { %v7336_v25 = vpop.f32.mrb[0].mxu0 }
 0x2a1   :  { %v2985_v62 = vadd.f32 %v7336_v25, %v9836_v59  ;;  %v2837_v63 = vpop.f32.mrb[1].mxu0 }
 0x2a2   :  { %v2983_v53 = vadd.f32 %v9836_v59, %v2837_v63  ;;  %v7337_v24 = vpop.f32.mrb[2].mxu0  ;;  %v7624_v8 = vpop.f32.mrb[0].mxu1 }
 0x2a3   :  { %v3013_v21 = vmax.f32 %v2985_v62, 0.0  ;;  %v2986_v10 = vadd.f32 %v7337_v24, %v9836_v59  ;;  %v2840_v9 = vpop.f32.mrb[3].mxu0  ;;  %v6000_v20 = vpop.f32.mrb[1].mxu1  ;;  %v6148_v43 = vadd.f32 %v7624_v8, %v9836_v59 }
 0x2a4   :  { %v3011_v23 = vmax.f32 %v2983_v53, 0.0  ;;  %v2984_v15 = vadd.f32 %v9836_v59, %v2840_v9  ;;  %v7625_v6 = vpop.f32.mrb[2].mxu1  ;;  %v6146_v16 = vadd.f32 %v9836_v59, %v6000_v20 }
 0x2a5   :  { %3042 = vst.msk [vmem:[#allocation2 + $0x10] sm:$0xff] %vm3039_vm3, %v3013_v21  ;;  %v3014_v48 = vmax.f32 %v2986_v10, 0.0  ;;  %v6003_v37 = vpop.f32.mrb[3].mxu1  ;;  %v6149_v32 = vadd.f32 %v7625_v6, %v9836_v59  ;;  %v6176_v51 = vmax.f32 %v6148_v43, 0.0 }
 0x2a6   :  { %3040 = vst.msk [vmem:[#allocation2] sm:$0xff] %vm3039_vm3, %v3011_v23  ;;  %v3012_v60 = vmax.f32 %v2984_v15, 0.0  ;;  %v6147_v52 = vadd.f32 %v9836_v59, %v6003_v37  ;;  %v6174_v4 = vmax.f32 %v6146_v16, 0.0 }
 0x2a7   :  { %3043 = vst.msk [vmem:[#allocation2 + $0x18] sm:$0xff] %vm3039_vm3, %v3014_v48  ;;  %v6177_v35 = vmax.f32 %v6149_v32, 0.0 }
 0x2a8   :  { %3041 = vst.msk [vmem:[#allocation2 + $0x8] sm:$0xff] %vm3039_vm3, %v3012_v60  ;;  %v7340_v44 = vpop.f32.mrb[4].mxu0  ;;  %v6175_v13 = vmax.f32 %v6147_v52, 0.0 }
 0x2a9   :  { %v2989_v34 = vadd.f32 %v7340_v44, %v9836_v59  ;;  %v2853_v41 = vpop.f32.mrb[5].mxu0 }
 0x2aa   :  { %v2987_v27 = vadd.f32 %v9836_v59, %v2853_v41  ;;  %v7341_v7 = vpop.f32.mrb[6].mxu0  ;;  %v7628_v46 = vpop.f32.mrb[4].mxu1 }
 0x2ab   :  { %v3017_v28 = vmax.f32 %v2989_v34, 0.0  ;;  %v2990_v47 = vadd.f32 %v7341_v7, %v9836_v59  ;;  %v2856_v54 = vpop.f32.mrb[7].mxu0  ;;  %v6016_v17 = vpop.f32.mrb[5].mxu1  ;;  %v6152_v33 = vadd.f32 %v7628_v46, %v9836_v59 }
 0x2ac   :  { %v3015_v1 = vmax.f32 %v2987_v27, 0.0  ;;  %v7629_v57 = vpop.f32.mrb[6].mxu1  ;;  %v2988_v22 = vadd.f32 %v9836_v59, %v2856_v54  ;;  %v6150_v11 = vadd.f32 %v9836_v59, %v6016_v17 }
 0x2ad   :  { %3046 = vst.msk [vmem:[#allocation2 + $0x30] sm:$0xff] %vm3039_vm3, %v3017_v28  ;;  %v3018_v2 = vmax.f32 %v2990_v47, 0.0  ;;  %v6019_v31 = vpop.f32.mrb[7].mxu1  ;;  %v6153_v40 = vadd.f32 %v7629_v57, %v9836_v59  ;;  %v6180_v62 = vmax.f32 %v6152_v33, 0.0  ;;  %v6772_v47 = vld [vmem:[%s10078_s3 + $0x1c] sm:$0xf] }
 0x2ae   :  { %v3072_v29 = vld [vmem:[#allocation2 + $0x10] ss:$2 sm:$0x7f]  ;;  %v3074_v0 = vld [vmem:[#allocation2 + $0x11] ss:$2 sm:$0x7f]  ;;  %v6151_v53 = vadd.f32 %v9836_v59, %v6019_v31 }
 0x2af   :  { %3044 = vst.msk [vmem:[#allocation2 + $0x20] sm:$0xff] %vm3039_vm3, %v3015_v1  ;;  %v3076_v61 = vmax.f32 %v3072_v29, %v3074_v0  ;;  %6204 = vst.msk [vmem:[#allocation2 + $0x10] sm:$0xff] %vm3039_vm3, %v6176_v51  ;;  %v3068_v14 = vld [vmem:[#allocation2] ss:$2 sm:$0x7f]  ;;  %v3016_v45 = vmax.f32 %v2988_v22, 0.0 }
 0x2b0   :  { %6205 = vst.msk [vmem:[#allocation2 + $0x18] sm:$0xff] %vm3039_vm3, %v6177_v35  ;;  %v3070_v49 = vld [vmem:[#allocation2 + $0x1] ss:$2 sm:$0x7f]  ;;  %3047 = vst.msk [vmem:[#allocation2 + $0x38] sm:$0xff] %vm3039_vm3, %v3018_v2  ;;  %v7344_v3 = vpop.f32.mrb[8].mxu0 }
 0x2b1   :  { %v3075_v39 = vmax.f32 %v3068_v14, %v3070_v49  ;;  %6202 = vst.msk [vmem:[#allocation2] sm:$0xff] %vm3039_vm3, %v6174_v4  ;;  %6203 = vst.msk [vmem:[#allocation2 + $0x8] sm:$0xff] %vm3039_vm3, %v6175_v13  ;;  %v2993_v55 = vadd.f32 %v7344_v3, %v9836_v59  ;;  %v2869_v12 = vpop.f32.mrb[9].mxu0  ;;  %v6181_v63 = vmax.f32 %v6153_v40, 0.0  ;;  %v6178_v44 = vmax.f32 %v6150_v11, 0.0 }
 0x2b2   :  { %v2991_v50 = vadd.f32 %v9836_v59, %v2869_v12  ;;  %v7345_v56 = vpop.f32.mrb[10].mxu0  ;;  %3045 = vst.msk [vmem:[#allocation2 + $0x28] sm:$0xff] %vm3039_vm3, %v3016_v45  ;;  %v7632_v38 = vpop.f32.mrb[8].mxu1  ;;  %v6179_v52 = vmax.f32 %v6151_v53, 0.0 }
 0x2b3   :  { %v3077_v30 = vmax.f32 %v3075_v39, %v3076_v61  ;;  %v3021_v58 = vmax.f32 %v2993_v55, 0.0  ;;  %v2994_v19 = vadd.f32 %v7345_v56, %v9836_v59  ;;  %v2872_v18 = vpop.f32.mrb[11].mxu0  ;;  %v6032_v25 = vpop.f32.mrb[9].mxu1  ;;  %v6156_v43 = vadd.f32 %v7632_v38, %v9836_v59  ;;  %v6539_v61 = vld [vmem:[%s10078_s3 + $0x4] sm:$0xf] }
 0x2b4   :  { %v3019_v26 = vmax.f32 %v2991_v50, 0.0  ;;  %v7633_v21 = vpop.f32.mrb[10].mxu1  ;;  %v2992_v48 = vadd.f32 %v9836_v59, %v2872_v18  ;;  %v6154_v51 = vadd.f32 %v9836_v59, %v6032_v25 }
 0x2b5   :  { %v3078_v5 = vpack.c.bf16 %v3077_v30, %v3077_v30  ;;  %3050 = vst.msk [vmem:[#allocation2 + $0x50] sm:$0xff] %vm3039_vm3, %v3021_v58  ;;  %v3022_v24 = vmax.f32 %v2994_v19, 0.0  ;;  %v6157_v16 = vadd.f32 %v7633_v21, %v9836_v59  ;;  %v6035_v34 = vpop.f32.mrb[11].mxu1  ;;  %v6184_v13 = vmax.f32 %v6156_v43, 0.0 }
 0x2b6   :  { %3048 = vst.msk [vmem:[#allocation2 + $0x40] sm:$0xff] %vm3039_vm3, %v3019_v26  ;;  %v3020_v4 = vmax.f32 %v2992_v48, 0.0  ;;  %v6155_v14 = vadd.f32 %v9836_v59, %v6035_v34  ;;  %v6182_v12 = vmax.f32 %v6154_v51, 0.0  ;;  %v6541_v34 = vld [vmem:[%s10078_s3 + $0x8] sm:$0xf] }
 0x2b7   :  { %v6232_v8 = vld [vmem:[#allocation2 + $0x10] ss:$2 sm:$0x7f]  ;;  %v6233_v10 = vld [vmem:[#allocation2 + $0x11] ss:$2 sm:$0x7f]  ;;  %v3083_v9 = vsel %vm9865_vm6, %v3078_v5, %v3082_v42 }
 0x2b8   :  { %v6235_v23 = vmax.f32 %v6232_v8, %v6233_v10  ;;  %3084 = vst [vmem:[%s10078_s3] sm:$0xf] %v3083_v9  ;;  %v6230_v20 = vld [vmem:[#allocation2] ss:$2 sm:$0x7f]  ;;  %3051 = vst.msk [vmem:[#allocation2 + $0x58] sm:$0xff] %vm3039_vm3, %v3022_v24  ;;  %v7348_v41 = vpop.f32.mrb[12].mxu0 }
 0x2b9   :  { %v6231_v15 = vld [vmem:[#allocation2 + $0x1] ss:$2 sm:$0x7f]  ;;  %v3090_v60 = vld [vmem:[#allocation2 + $0x30] ss:$2 sm:$0x7f]  ;;  %v2997_v46 = vadd.f32 %v7348_v41, %v9836_v59 }
 0x2ba   :  { %v6234_v6 = vmax.f32 %v6230_v20, %v6231_v15  ;;  %v3092_v37 = vld [vmem:[#allocation2 + $0x31] ss:$2 sm:$0x7f]  ;;  %v3086_v7 = vld [vmem:[#allocation2 + $0x20] ss:$2 sm:$0x7f] }
 0x2bb   :  { %v3094_v32 = vmax.f32 %v3090_v60, %v3092_v37  ;;  %6208 = vst.msk [vmem:[#allocation2 + $0x30] sm:$0xff] %vm3039_vm3, %v6180_v62  ;;  %6209 = vst.msk [vmem:[#allocation2 + $0x38] sm:$0xff] %vm3039_vm3, %v6181_v63  ;;  %v3088_v28 = vld [vmem:[#allocation2 + $0x21] ss:$2 sm:$0x7f]  ;;  %v7636_v1 = vpop.f32.mrb[12].mxu1 }
 0x2bc   :  { %v6236_v27 = vmax.f32 %v6234_v6, %v6235_v23  ;;  %v3093_v54 = vmax.f32 %v3086_v7, %v3088_v28  ;;  %6206 = vst.msk [vmem:[#allocation2 + $0x20] sm:$0xff] %vm3039_vm3, %v6178_v44  ;;  %6207 = vst.msk [vmem:[#allocation2 + $0x28] sm:$0xff] %vm3039_vm3, %v6179_v52  ;;  %v2885_v17 = vpop.f32.mrb[13].mxu0  ;;  %v6185_v2 = vmax.f32 %v6157_v16, 0.0  ;;  %v3025_v57 = vmax.f32 %v2997_v46, 0.0  ;;  %v6048_v22 = vpop.f32.mrb[13].mxu1 }
 0x2bd   :  { %v7349_v29 = vpop.f32.mrb[14].mxu0  ;;  %3049 = vst.msk [vmem:[#allocation2 + $0x48] sm:$0xff] %vm3039_vm3, %v3020_v4  ;;  %v2995_v49 = vadd.f32 %v9836_v59, %v2885_v17  ;;  %v7637_v31 = vpop.f32.mrb[14].mxu1  ;;  %v6183_v18 = vmax.f32 %v6155_v14, 0.0  ;;  %v6160_v24 = vadd.f32 %v7636_v1, %v9836_v59  ;;  %v9922_v20 = vadd.f32 %v9836_v59, %v6048_v22  ;;  %v6774_v60 = vld [vmem:[%s10078_s3 + $0x20] sm:$0xf] }
 0x2be   :  { %v6237_v35 = vpack.c.bf16 %v6236_v27, %v6236_v27  ;;  %v3095_v0 = vmax.f32 %v3093_v54, %v3094_v32  ;;  %v2998_v39 = vadd.f32 %v7349_v29, %v9836_v59  ;;  %v2888_v3 = vpop.f32.mrb[15].mxu0  ;;  %3054 = vst.msk [vmem:[#allocation2 + $0x70] sm:$0xff] %vm3039_vm3, %v3025_v57  ;;  %v6051_v56 = vpop.f32.mrb[15].mxu1  ;;  %v6161_v15 = vadd.f32 %v7637_v31, %v9836_v59 }
 0x2bf   :  { %v3106_v40 = vld [vmem:[#allocation2 + $0x50] ss:$2 sm:$0x7f]  ;;  %v3108_v45 = vld [vmem:[#allocation2 + $0x51] ss:$2 sm:$0x7f]  ;;  %v2996_v50 = vadd.f32 %v9836_v59, %v2888_v3  ;;  %v6159_v43 = vadd.f32 %v9836_v59, %v6051_v56 }
 0x2c0   :  { %v6240_v33 = vsel %vm9865_vm6, %v6237_v35, %v6772_v47  ;;  %v3096_v55 = vpack.c.bf16 %v3095_v0, %v3095_v0  ;;  %6212 = vst.msk [vmem:[#allocation2 + $0x50] sm:$0xff] %vm3039_vm3, %v6184_v13  ;;  %6213 = vst.msk [vmem:[#allocation2 + $0x58] sm:$0xff] %vm3039_vm3, %v6185_v2  ;;  %v3023_v30 = vmax.f32 %v2995_v49, 0.0  ;;  %v3026_v5 = vmax.f32 %v2998_v39, 0.0  ;;  %v7352_v11 = vpop.f32.mrb[16].mxu0 }
 0x2c1   :  { %6773 = vst [vmem:[%s10078_s3 + $0x1c] sm:$0xf] %v6240_v33  ;;  %v3001_v62 = vadd.f32 %v7352_v11, %v9836_v59  ;;  %v3110_v53 = vmax.f32 %v3106_v40, %v3108_v45  ;;  %v3024_v21 = vmax.f32 %v2996_v50, 0.0  ;;  %v2901_v10 = vpop.f32.mrb[17].mxu0  ;;  %v6188_v46 = vmax.f32 %v6160_v24, 0.0 }
 0x2c2   :  { %v6244_v42 = vld [vmem:[#allocation2 + $0x30] ss:$2 sm:$0x7f]  ;;  %v6245_v58 = vld [vmem:[#allocation2 + $0x31] ss:$2 sm:$0x7f]  ;;  %v3099_v19 = vsel %vm9865_vm6, %v3096_v55, %v6539_v61  ;;  %v2999_v48 = vadd.f32 %v9836_v59, %v2901_v10 }
 0x2c3   :  { %v6247_v38 = vmax.f32 %v6244_v42, %v6245_v58  ;;  %3052 = vst.msk [vmem:[#allocation2 + $0x60] sm:$0xff] %vm3039_vm3, %v3023_v30  ;;  %6540 = vst [vmem:[%s10078_s3 + $0x4] sm:$0xf] %v3099_v19  ;;  %v6242_v26 = vld [vmem:[#allocation2 + $0x20] ss:$2 sm:$0x7f] }
 0x2c4   :  { %v6243_v25 = vld [vmem:[#allocation2 + $0x21] ss:$2 sm:$0x7f]  ;;  %3055 = vst.msk [vmem:[#allocation2 + $0x78] sm:$0xff] %vm3039_vm3, %v3026_v5  ;;  %v7640_v8 = vpop.f32.mrb[16].mxu1  ;;  %3053 = vst.msk [vmem:[#allocation2 + $0x68] sm:$0xff] %vm3039_vm3, %v3024_v21 }
 0x2c5   :  { %v6246_v63 = vmax.f32 %v6242_v26, %v6243_v25  ;;  %v3102_v9 = vld [vmem:[#allocation2 + $0x40] ss:$2 sm:$0x7f]  ;;  %v3104_v23 = vld [vmem:[#allocation2 + $0x41] ss:$2 sm:$0x7f]  ;;  %v6164_v49 = vadd.f32 %v7640_v8, %v9836_v59 }
 0x2c6   :  { %v3109_v37 = vmax.f32 %v3102_v9, %v3104_v23  ;;  %6210 = vst.msk [vmem:[#allocation2 + $0x40] sm:$0xff] %vm3039_vm3, %v6182_v12  ;;  %6211 = vst.msk [vmem:[#allocation2 + $0x48] sm:$0xff] %vm3039_vm3, %v6183_v18  ;;  %v3029_v16 = vmax.f32 %v3001_v62, 0.0  ;;  %v6064_v44 = vpop.f32.mrb[17].mxu1  ;;  %v7353_v32 = vpop.f32.mrb[18].mxu0  ;;  %v6186_v51 = vmax.f32 %v9922_v20, 0.0 }
 0x2c7   :  { %v6248_v6 = vmax.f32 %v6246_v63, %v6247_v38  ;;  %v6256_v52 = vld [vmem:[#allocation2 + $0x50] ss:$2 sm:$0x7f]  ;;  %v3002_v41 = vadd.f32 %v7353_v32, %v9836_v59  ;;  %v6257_v7 = vld [vmem:[#allocation2 + $0x51] ss:$2 sm:$0x7f]  ;;  %v6162_v56 = vadd.f32 %v9836_v59, %v6064_v44 }
 0x2c8   :  { %v3111_v28 = vmax.f32 %v3109_v37, %v3110_v53  ;;  %3058 = vst.msk [vmem:[#allocation2 + $0x90] sm:$0xff] %vm3039_vm3, %v3029_v16  ;;  %v7641_v47 = vpop.f32.mrb[18].mxu1  ;;  %v2904_v54 = vpop.f32.mrb[19].mxu0  ;;  %v6189_v4 = vmax.f32 %v6161_v15, 0.0  ;;  %v3027_v1 = vmax.f32 %v2999_v48, 0.0  ;;  %v6187_v22 = vmax.f32 %v6159_v43, 0.0 }
 0x2c9   :  { %v6249_v27 = vpack.c.bf16 %v6248_v6, %v6248_v6  ;;  %v3030_v17 = vmax.f32 %v3002_v41, 0.0  ;;  %v6067_v35 = vpop.f32.mrb[19].mxu1  ;;  %v7356_v13 = vpop.f32.mrb[20].mxu0  ;;  %v3000_v29 = vadd.f32 %v9836_v59, %v2904_v54  ;;  %v6259_v31 = vmax.f32 %v6256_v52, %v6257_v7  ;;  %v6776_v5 = vld [vmem:[%s10078_s3 + $0x24] sm:$0xf] }
 0x2ca   :  { %v3112_v57 = vpack.c.bf16 %v3111_v28, %v3111_v28  ;;  %v2917_v0 = vpop.f32.mrb[21].mxu0  ;;  %3056 = vst.msk [vmem:[#allocation2 + $0x80] sm:$0xff] %vm3039_vm3, %v3027_v1  ;;  %v3005_v39 = vadd.f32 %v7356_v13, %v9836_v59  ;;  %v7644_v40 = vpop.f32.mrb[20].mxu1  ;;  %v6165_v42 = vadd.f32 %v7641_v47, %v9836_v59  ;;  %v6543_v53 = vld [vmem:[%s10078_s3 + $0xc] sm:$0xf]  ;;  %v6163_v24 = vadd.f32 %v9836_v59, %v6067_v35 }
 0x2cb   :  { %v6252_v2 = vsel %vm9865_vm6, %v6249_v27, %v6774_v60  ;;  %v3122_v61 = vld [vmem:[#allocation2 + $0x70] ss:$2 sm:$0x7f]  ;;  %v3124_v14 = vld [vmem:[#allocation2 + $0x71] ss:$2 sm:$0x7f]  ;;  %v3003_v45 = vadd.f32 %v9836_v59, %v2917_v0  ;;  %v6168_v52 = vadd.f32 %v7644_v40, %v9836_v59 }
 0x2cc   :  { %6775 = vst [vmem:[%s10078_s3 + $0x20] sm:$0xf] %v6252_v2  ;;  %3059 = vst.msk [vmem:[#allocation2 + $0x98] sm:$0xff] %vm3039_vm3, %v3030_v17  ;;  %v3115_v3 = vsel %vm9865_vm6, %v3112_v57, %v6541_v34  ;;  %v3028_v33 = vmax.f32 %v3000_v29, 0.0  ;;  %v7357_v55 = vpop.f32.mrb[22].mxu0  ;;  %v3126_v50 = vmax.f32 %v3122_v61, %v3124_v14  ;;  %v3033_v26 = vmax.f32 %v3005_v39, 0.0 }
 0x2cd   :  { %6216 = vst.msk [vmem:[#allocation2 + $0x70] sm:$0xff] %vm3039_vm3, %v6188_v46  ;;  %6217 = vst.msk [vmem:[#allocation2 + $0x78] sm:$0xff] %vm3039_vm3, %v6189_v4  ;;  %v6254_v12 = vld [vmem:[#allocation2 + $0x40] ss:$2 sm:$0x7f]  ;;  %v3006_v58 = vadd.f32 %v7357_v55, %v9836_v59  ;;  %v9966_v25 = vpop.f32.mrb[21].mxu1 }
 0x2ce   :  { %6542 = vst [vmem:[%s10078_s3 + $0x8] sm:$0xf] %v3115_v3  ;;  %v6255_v30 = vld [vmem:[#allocation2 + $0x41] ss:$2 sm:$0x7f]  ;;  %3057 = vst.msk [vmem:[#allocation2 + $0x88] sm:$0xff] %vm3039_vm3, %v3028_v33 }
 0x2cf   :  { %v6258_v38 = vmax.f32 %v6254_v12, %v6255_v30  ;;  %v3118_v19 = vld [vmem:[#allocation2 + $0x60] ss:$2 sm:$0x7f]  ;;  %v3120_v18 = vld [vmem:[#allocation2 + $0x61] ss:$2 sm:$0x7f] }
 0x2d0   :  { %v3125_v11 = vmax.f32 %v3118_v19, %v3120_v18  ;;  %6214 = vst.msk [vmem:[#allocation2 + $0x60] sm:$0xff] %vm3039_vm3, %v6186_v51  ;;  %6215 = vst.msk [vmem:[#allocation2 + $0x68] sm:$0xff] %vm3039_vm3, %v6187_v22  ;;  %v2920_v62 = vpop.f32.mrb[23].mxu0  ;;  %v3031_v21 = vmax.f32 %v3003_v45, 0.0  ;;  %v3034_v8 = vmax.f32 %v3006_v58, 0.0  ;;  %v7645_v10 = vpop.f32.mrb[22].mxu1 }
 0x2d1   :  { %v6260_v63 = vmax.f32 %v6258_v38, %v6259_v31  ;;  %v6192_v23 = vmax.f32 %v6164_v49, 0.0  ;;  %v6190_v20 = vmax.f32 %v6162_v56, 0.0  ;;  %v6193_v15 = vmax.f32 %v6165_v42, 0.0  ;;  %3062 = vst.msk [vmem:[#allocation2 + $0xb0] sm:$0xff] %vm3039_vm3, %v3033_v26  ;;  %v6083_v48 = vpop.f32.mrb[23].mxu1  ;;  %v7360_v6 = vpop.f32.mrb[24].mxu0 }
 0x2d2   :  { %v3127_v9 = vmax.f32 %v3125_v11, %v3126_v50  ;;  %3060 = vst.msk [vmem:[#allocation2 + $0xa0] sm:$0xff] %vm3039_vm3, %v3031_v21  ;;  %3063 = vst.msk [vmem:[#allocation2 + $0xb8] sm:$0xff] %vm3039_vm3, %v3034_v8  ;;  %v3004_v34 = vadd.f32 %v9836_v59, %v2920_v62  ;;  %v3009_v41 = vadd.f32 %v7360_v6, %v9836_v59  ;;  %v6191_v28 = vmax.f32 %v6163_v24, 0.0  ;;  %v7648_v47 = vpop.f32.mrb[24].mxu1  ;;  %v2933_v54 = vpop.f32.mrb[25].mxu0 }
 0x2d3   :  { %v6261_v60 = vpack.c.bf16 %v6260_v63, %v6260_v63  ;;  %v3138_v37 = vld [vmem:[#allocation2 + $0x90] ss:$2 sm:$0x7f]  ;;  %v3140_v43 = vld [vmem:[#allocation2 + $0x91] ss:$2 sm:$0x7f]  ;;  %v6169_v46 = vadd.f32 %v7645_v10, %v9836_v59  ;;  %v3007_v35 = vadd.f32 %v9836_v59, %v2933_v54  ;;  %v6166_v11 = vadd.f32 %v9836_v59, %v9966_v25 }
 0x2d4   :  { %v6268_v16 = vld [vmem:[#allocation2 + $0x70] ss:$2 sm:$0x7f]  ;;  %v6269_v44 = vld [vmem:[#allocation2 + $0x71] ss:$2 sm:$0x7f]  ;;  %v3128_v32 = vpack.c.bf16 %v3127_v9, %v3127_v9  ;;  %v3142_v7 = vmax.f32 %v3138_v37, %v3140_v43  ;;  %v6167_v26 = vadd.f32 %v9836_v59, %v6083_v48 }
 0x2d5   :  { %6220 = vst.msk [vmem:[#allocation2 + $0x90] sm:$0xff] %vm3039_vm3, %v6192_v23  ;;  %6221 = vst.msk [vmem:[#allocation2 + $0x98] sm:$0xff] %vm3039_vm3, %v6193_v15  ;;  %v6264_v27 = vsel %vm9865_vm6, %v6261_v60, %v6776_v5  ;;  %v6271_v51 = vmax.f32 %v6268_v16, %v6269_v44  ;;  %v3134_v1 = vld [vmem:[#allocation2 + $0x80] ss:$2 sm:$0x7f]  ;;  %v6196_v29 = vmax.f32 %v6168_v52, 0.0  ;;  %v6172_v23 = vadd.f32 %v7648_v47, %v9836_v59 }
 0x2d6   :  { %6777 = vst [vmem:[%s10078_s3 + $0x24] sm:$0xf] %v6264_v27  ;;  %v3131_v4 = vsel %vm9865_vm6, %v3128_v32, %v6543_v53  ;;  %v3136_v17 = vld [vmem:[#allocation2 + $0x81] ss:$2 sm:$0x7f]  ;;  %v3032_v0 = vmax.f32 %v3004_v34, 0.0 }
 0x2d7   :  { %6544 = vst [vmem:[%s10078_s3 + $0xc] sm:$0xf] %v3131_v4  ;;  %v6266_v13 = vld [vmem:[#allocation2 + $0x60] ss:$2 sm:$0x7f]  ;;  %v3141_v57 = vmax.f32 %v3134_v1, %v3136_v17  ;;  %6218 = vst.msk [vmem:[#allocation2 + $0x80] sm:$0xff] %vm3039_vm3, %v6190_v20 }
 0x2d8   :  { %v6267_v2 = vld [vmem:[#allocation2 + $0x61] ss:$2 sm:$0x7f]  ;;  %6219 = vst.msk [vmem:[#allocation2 + $0x88] sm:$0xff] %vm3039_vm3, %v6191_v28  ;;  %v3037_v61 = vmax.f32 %v3009_v41, 0.0  ;;  %v6096_v14 = vpop.f32.mrb[25].mxu1 }
 0x2d9   :  { %v6270_v22 = vmax.f32 %v6266_v13, %v6267_v2  ;;  %v7361_v49 = vpop.f32.mrb[26].mxu0  ;;  %v6778_v39 = vld [vmem:[%s10078_s3 + $0x28] sm:$0xf]  ;;  %v3143_v31 = vmax.f32 %v3141_v57, %v3142_v7  ;;  %v6545_v3 = vld [vmem:[%s10078_s3 + $0x10] sm:$0xf]  ;;  %v6197_v33 = vmax.f32 %v6169_v46, 0.0  ;;  %v10001_v45 = vadd.f32 %v9836_v59, %v6096_v14 }
 0x2da   :  { %v3035_v40 = vmax.f32 %v3007_v35, 0.0  ;;  %v7649_v55 = vpop.f32.mrb[26].mxu1  ;;  %v2936_v12 = vpop.f32.mrb[27].mxu0  ;;  %v3154_v50 = vld [vmem:[#allocation2 + $0xb0] ss:$2 sm:$0x7f]  ;;  %v3010_v42 = vadd.f32 %v7361_v49, %v9836_v59 }
 0x2db   :  { %v6272_v30 = vmax.f32 %v6270_v22, %v6271_v51  ;;  %v3156_v56 = vld [vmem:[#allocation2 + $0xb1] ss:$2 sm:$0x7f]  ;;  %3061 = vst.msk [vmem:[#allocation2 + $0xa8] sm:$0xff] %vm3039_vm3, %v3032_v0  ;;  %3066 = vst.msk [vmem:[#allocation2 + $0xd0] sm:$0xff] %vm3039_vm3, %v3037_v61  ;;  %v3008_v58 = vadd.f32 %v9836_v59, %v2936_v12  ;;  %v3144_v18 = vpack.c.bf16 %v3143_v31, %v3143_v31  ;;  %v6099_v63 = vpop.f32.mrb[27].mxu1 }
 0x2dc   :  { %v6280_v38 = vld [vmem:[#allocation2 + $0x90] ss:$2 sm:$0x7f]  ;;  %v6281_v19 = vld [vmem:[#allocation2 + $0x91] ss:$2 sm:$0x7f]  ;;  %v6171_v8 = vadd.f32 %v9836_v59, %v6099_v63  ;;  %v6173_v15 = vadd.f32 %v7649_v55, %v9836_v59  ;;  %v3158_v6 = vmax.f32 %v3154_v50, %v3156_v56 }
 0x2dd   :  { %6224 = vst.msk [vmem:[#allocation2 + $0xb0] sm:$0xff] %vm3039_vm3, %v6196_v29  ;;  %6225 = vst.msk [vmem:[#allocation2 + $0xb8] sm:$0xff] %vm3039_vm3, %v6197_v33  ;;  %v6273_v5 = vpack.c.bf16 %v6272_v30, %v6272_v30  ;;  %v3038_v62 = vmax.f32 %v3010_v42, 0.0  ;;  %v6283_v53 = vmax.f32 %v6280_v38, %v6281_v19  ;;  %v3147_v24 = vsel %vm9865_vm6, %v3144_v18, %v6545_v3  ;;  %v6780_v44 = vld [vmem:[%s10078_s3 + $0x2c] sm:$0xf] }
 0x2de   :  { %3064 = vst.msk [vmem:[#allocation2 + $0xc0] sm:$0xff] %vm3039_vm3, %v3035_v40  ;;  %v3036_v21 = vmax.f32 %v3008_v58, 0.0  ;;  %6546 = vst [vmem:[%s10078_s3 + $0x10] sm:$0xf] %v3147_v24  ;;  %v6194_v48 = vmax.f32 %v6166_v11, 0.0  ;;  %v6195_v60 = vmax.f32 %v6167_v26, 0.0 }
 0x2df   :  { %v6276_v10 = vsel %vm9865_vm6, %v6273_v5, %v6778_v39  ;;  %v6278_v9 = vld [vmem:[#allocation2 + $0x80] ss:$2 sm:$0x7f]  ;;  %v6279_v25 = vld [vmem:[#allocation2 + $0x81] ss:$2 sm:$0x7f] }
 0x2e0   :  { %3067 = vst.msk [vmem:[#allocation2 + $0xd8] sm:$0xff] %vm3039_vm3, %v3038_v62  ;;  %6779 = vst [vmem:[%s10078_s3 + $0x28] sm:$0xf] %v6276_v10  ;;  %v6282_v20 = vmax.f32 %v6278_v9, %v6279_v25  ;;  %v6200_v52 = vmax.f32 %v6172_v23, 0.0  ;;  %v6547_v59 = vld [vmem:[%s10078_s3 + $0x14] sm:$0xf] }
 0x2e1   :  { %3065 = vst.msk [vmem:[#allocation2 + $0xc8] sm:$0xff] %vm3039_vm3, %v3036_v21  ;;  %v6198_v41 = vmax.f32 %v10001_v45, 0.0  ;;  %v6201_v27 = vmax.f32 %v6173_v15, 0.0  ;;  %v6199_v7 = vmax.f32 %v6171_v8, 0.0  ;;  %v6549_v49 = vld [vmem:[%s10078_s3 + $0x18] sm:$0xf] }
 0x2e2   :  { %v6284_v37 = vmax.f32 %v6282_v20, %v6283_v53  ;;  %v3150_v43 = vld [vmem:[#allocation2 + $0xa0] ss:$2 sm:$0x7f]  ;;  %v3152_v16 = vld [vmem:[#allocation2 + $0xa1] ss:$2 sm:$0x7f] }
 0x2e3   :  { %v3157_v32 = vmax.f32 %v3150_v43, %v3152_v16  ;;  %6222 = vst.msk [vmem:[#allocation2 + $0xa0] sm:$0xff] %vm3039_vm3, %v6194_v48  ;;  %6223 = vst.msk [vmem:[#allocation2 + $0xa8] sm:$0xff] %vm3039_vm3, %v6195_v60  ;;  %v6782_v3 = vld [vmem:[%s10078_s3 + $0x30] sm:$0xf]  ;;  %v6784_v38 = vld [vmem:[%s10078_s3 + $0x34] sm:$0xf] }
 0x2e4   :  { %v6285_v34 = vpack.c.bf16 %v6284_v37, %v6284_v37  ;;  %v6292_v28 = vld [vmem:[#allocation2 + $0xb0] ss:$2 sm:$0x7f]  ;;  %v6293_v46 = vld [vmem:[#allocation2 + $0xb1] ss:$2 sm:$0x7f] }
 0x2e5   :  { %v3159_v47 = vmax.f32 %v3157_v32, %v3158_v6  ;;  %v6295_v57 = vmax.f32 %v6292_v28, %v6293_v46 }
 0x2e6   :  { %v6288_v54 = vsel %vm9865_vm6, %v6285_v34, %v6780_v44 }
 0x2e7   :  { %v3170_v51 = vld [vmem:[#allocation2 + $0xd0] ss:$2 sm:$0x7f]  ;;  %v3172_v4 = vld [vmem:[#allocation2 + $0xd1] ss:$2 sm:$0x7f]  ;;  %v3160_v1 = vpack.c.bf16 %v3159_v47, %v3159_v47 }
 0x2e8   :  { %6781 = vst [vmem:[%s10078_s3 + $0x2c] sm:$0xf] %v6288_v54  ;;  %v3174_v17 = vmax.f32 %v3170_v51, %v3172_v4  ;;  %6228 = vst.msk [vmem:[#allocation2 + $0xd0] sm:$0xff] %vm3039_vm3, %v6200_v52  ;;  %v3166_v35 = vld [vmem:[#allocation2 + $0xc0] ss:$2 sm:$0x7f] }
 0x2e9   :  { %6229 = vst.msk [vmem:[#allocation2 + $0xd8] sm:$0xff] %vm3039_vm3, %v6201_v27  ;;  %v3168_v13 = vld [vmem:[#allocation2 + $0xc1] ss:$2 sm:$0x7f]  ;;  %v3163_v22 = vsel %vm9865_vm6, %v3160_v1, %v6547_v59 }
 0x2ea   :  { %v3173_v2 = vmax.f32 %v3166_v35, %v3168_v13  ;;  %6226 = vst.msk [vmem:[#allocation2 + $0xc0] sm:$0xff] %vm3039_vm3, %v6198_v41  ;;  %6227 = vst.msk [vmem:[#allocation2 + $0xc8] sm:$0xff] %vm3039_vm3, %v6199_v7  ;;  %v6290_v29 = vld [vmem:[#allocation2 + $0xa0] ss:$2 sm:$0x7f] }
 0x2eb   :  { %6548 = vst [vmem:[%s10078_s3 + $0x14] sm:$0xf] %v3163_v22  ;;  %v6291_v0 = vld [vmem:[#allocation2 + $0xa1] ss:$2 sm:$0x7f] }
 0x2ec   :  { %v3175_v61 = vmax.f32 %v3173_v2, %v3174_v17  ;;  %v6294_v14 = vmax.f32 %v6290_v29, %v6291_v0 }
 0x2ee   :  { %v3176_v39 = vpack.c.bf16 %v3175_v61, %v3175_v61  ;;  %v6296_v31 = vmax.f32 %v6294_v14, %v6295_v57 }
 0x2f0   :  { %v6304_v33 = vld [vmem:[#allocation2 + $0xd0] ss:$2 sm:$0x7f]  ;;  %v6305_v40 = vld [vmem:[#allocation2 + $0xd1] ss:$2 sm:$0x7f]  ;;  %v3179_v45 = vsel %vm9865_vm6, %v3176_v39, %v6549_v49  ;;  %v6297_v55 = vpack.c.bf16 %v6296_v31, %v6296_v31 }
 0x2f1   :  { %v6307_v12 = vmax.f32 %v6304_v33, %v6305_v40  ;;  %6550 = vst [vmem:[%s10078_s3 + $0x18] sm:$0xf] %v3179_v45  ;;  %v6302_v30 = vld [vmem:[#allocation2 + $0xc0] ss:$2 sm:$0x7f] }
 0x2f2   :  { %v6303_v50 = vld [vmem:[#allocation2 + $0xc1] ss:$2 sm:$0x7f]  ;;  %v6300_v42 = vsel %vm9865_vm6, %v6297_v55, %v6782_v3 }
 0x2f3   :  { %v6306_v56 = vmax.f32 %v6302_v30, %v6303_v50  ;;  %6783 = vst [vmem:[%s10078_s3 + $0x30] sm:$0xf] %v6300_v42 }
 0x2f5   :  { %v6308_v58 = vmax.f32 %v6306_v56, %v6307_v12 }
 0x2f7   :  { %v6309_v19 = vpack.c.bf16 %v6308_v58, %v6308_v58 }
 0x2f9   :  { %v6312_v18 = vsel %vm9865_vm6, %v6309_v19, %v6784_v38 }
 0x2fa   :  { %6785 = vst [vmem:[%s10078_s3 + $0x34] sm:$0xf] %v6312_v18 }

</bundles_post_ra>
